<compile_context>
chip_gen: v6e
topology: v6e:2x2x1
jax: 0.10.0
libtpu: 0.0.40
codegen_flags: <defaults>
</compile_context>

<pallas_src>
import functools

import jax
import jax.numpy as jnp
from jax import lax
from jax.experimental import pallas as pl
from jax.experimental.pallas import tpu as pltpu

EPS = 1e-5
SLOPE = 0.2
LANE = 128


def _round_up(v, m):
    return ((v + m - 1) // m) * m


# -----------------------------------------------------------------------------
# Kernel 1: folded-batch conv  (patches @ W) + bias + optional LeakyReLU
# -----------------------------------------------------------------------------
def _conv_act_kernel(p_ref, w_ref, b_ref, o_ref, *, leaky):
    # p_ref: (TM, K) bf16 ; w_ref: (K, C) bf16 ; b_ref: (1, C) f32 ; o_ref: (TM, C) f32
    y = jnp.dot(p_ref[...], w_ref[...], preferred_element_type=jnp.float32)
    y = y + b_ref[...]
    if leaky:
        y = jnp.where(y > 0, y, SLOPE * y)
    o_ref[...] = y


def conv_bias_act(patches, w_kc, bias, *, leaky, tile_m=512):
    """patches (M, K) bf16 ; w_kc (K, C) bf16 ; bias (1, C) f32 -> (M, C) f32."""
    M, K = patches.shape
    C = w_kc.shape[1]
    tm = M if M <= tile_m else tile_m
    return pl.pallas_call(
        functools.partial(_conv_act_kernel, leaky=leaky),
        out_shape=jax.ShapeDtypeStruct((M, C), jnp.float32),
        grid=(pl.cdiv(M, tm),),
        in_specs=[
            pl.BlockSpec((tm, K), lambda m: (m, 0)),
            pl.BlockSpec((K, C), lambda m: (0, 0)),
            pl.BlockSpec((1, C), lambda m: (0, 0)),
        ],
        out_specs=pl.BlockSpec((tm, C), lambda m: (m, 0)),
        compiler_params=pltpu.CompilerParams(dimension_semantics=("parallel",)),
    )(patches, w_kc, bias)


# -----------------------------------------------------------------------------
# Kernel 2a: conv matmul + per-sample per-channel sum / sum-sq accumulation
# -----------------------------------------------------------------------------
def _conv_stats_kernel(p_ref, w_ref, y_ref, s_ref, *, valid_p, tile_p):
    # p_ref: (1, TP, K) bf16 ; w_ref: (K, C) bf16
    # y_ref: (1, TP, C) f32  ; s_ref: (1, 2, C) f32   (row 0 = sum, row 1 = sum of squares)
    pidx = pl.program_id(1)

    @pl.when(pidx == 0)
    def _():
        s_ref[...] = jnp.zeros_like(s_ref)

    y = jnp.dot(p_ref[0], w_ref[...], preferred_element_type=jnp.float32)  # (TP, C)
    y_ref[0] = y

    # mask rows of a partial last tile so they don't pollute the statistics
    row = lax.broadcasted_iota(jnp.int32, (tile_p, 1), 0) + pidx * tile_p
    ym = jnp.where(row < valid_p, y, 0.0)

    add = jnp.concatenate(
        [jnp.sum(ym, axis=0, keepdims=True),
         jnp.sum(ym * ym, axis=0, keepdims=True)], axis=0)                  # (2, C)
    s_ref[0] = s_ref[0] + add


# -----------------------------------------------------------------------------
# Kernel 2b: InstanceNorm (from accumulated stats) + LeakyReLU
# -----------------------------------------------------------------------------
def _norm_act_kernel(y_ref, s_ref, o_ref, *, count):
    y = y_ref[0]                                   # (TP, C) f32
    s = s_ref[0]                                   # (2, C)
    inv = 1.0 / count
    mean = s[0:1, :] * inv
    var = jnp.maximum(s[1:2, :] * inv - mean * mean, 0.0)
    z = (y - mean) * lax.rsqrt(var + EPS)
    o_ref[0] = jnp.where(z > 0, z, SLOPE * z)


def conv_instnorm_act(patches, w_kc, *, tile_p=256):
    """patches (N, P, K) bf16 ; w_kc (K, C) bf16 -> InstanceNorm+LeakyReLU, (N, P, C) f32."""
    N, P, K = patches.shape
    C = w_kc.shape[1]
    tp = P if P <= tile_p else tile_p
    grid = (N, pl.cdiv(P, tp))

    y, stats = pl.pallas_call(
        functools.partial(_conv_stats_kernel, valid_p=P, tile_p=tp),
        out_shape=(jax.ShapeDtypeStruct((N, P, C), jnp.float32),
                   jax.ShapeDtypeStruct((N, 2, C), jnp.float32)),
        grid=grid,
        in_specs=[
            pl.BlockSpec((1, tp, K), lambda n, p: (n, p, 0)),
            pl.BlockSpec((K, C), lambda n, p: (0, 0)),
        ],
        out_specs=(
            pl.BlockSpec((1, tp, C), lambda n, p: (n, p, 0)),
            pl.BlockSpec((1, 2, C), lambda n, p: (n, 0, 0)),   # resident across p
        ),
        compiler_params=pltpu.CompilerParams(
            dimension_semantics=("parallel", "arbitrary")),
    )(patches, w_kc)

    return pl.pallas_call(
        functools.partial(_norm_act_kernel, count=float(P)),
        out_shape=jax.ShapeDtypeStruct((N, P, C), jnp.float32),
        grid=grid,
        in_specs=[
            pl.BlockSpec((1, tp, C), lambda n, p: (n, p, 0)),
            pl.BlockSpec((1, 2, C), lambda n, p: (n, 0, 0)),
        ],
        out_specs=pl.BlockSpec((1, tp, C), lambda n, p: (n, p, 0)),
        compiler_params=pltpu.CompilerParams(
            dimension_semantics=("parallel", "parallel")),
    )(y, stats)


# -----------------------------------------------------------------------------
# Wrapper glue: channel-last im2col + weight reordering
# -----------------------------------------------------------------------------
def im2col_nhwc(x, k, stride, pad):
    """x (N, H, W, C) -> patches (N, Ho*Wo, k*k*C), K-index ordering (kh, kw, cin)."""
    N, H, W, C = x.shape
    xp = jnp.pad(x, ((0, 0), (pad, pad), (pad, pad), (0, 0)))
    Ho = (H + 2 * pad - k) // stride + 1
    Wo = (W + 2 * pad - k) // stride + 1
    cols = []
    for dh in range(k):
        for dw in range(k):
            cols.append(xp[:, dh:dh + (Ho - 1) * stride + 1:stride,
                              dw:dw + (Wo - 1) * stride + 1:stride, :])
    pat = jnp.stack(cols, axis=3)                      # (N, Ho, Wo, k*k, C)
    pat = pat.reshape(N, Ho * Wo, k * k * C)
    return pat, Ho, Wo


def _prep_weight(w_oihw, c_pad):
    """OIHW -> (K, C_pad) bf16 with K ordering (kh, kw, cin) matching im2col_nhwc."""
    cout, cin, kh, kw = w_oihw.shape
    w_kc = jnp.transpose(w_oihw, (2, 3, 1, 0)).reshape(kh * kw * cin, cout)
    if c_pad > cout:
        w_kc = jnp.pad(w_kc, ((0, 0), (0, c_pad - cout)))
    return w_kc.astype(jnp.bfloat16)


# -----------------------------------------------------------------------------
# Parameters (deterministic init, shapes from the module's __init__)
# -----------------------------------------------------------------------------
def init_params(key, in_channels):
    dims = [
        ("block_1", in_channels, 64),
        ("block_2", 64, 128),
        ("block_3", 128, 256),
        ("block_4", 256, 512),
        ("out_conv", 512, 1),
    ]
    params = {}
    for name, cin, cout in dims:
        key, k_w, k_b = jax.random.split(key, 3)
        w = jax.random.normal(k_w, (cout, cin, 4, 4), jnp.float32) * 0.05
        b = jax.random.normal(k_b, (cout,), jnp.float32) * 0.05
        params[name] = (w, b)
    return params


# -----------------------------------------------------------------------------
# Full forward pass
# -----------------------------------------------------------------------------
def gaugan_discriminator_forward(x, mask, params, *, tile_m=512, tile_p=256):
    N = x.shape[0]
    h = jnp.concatenate([x, mask], axis=1)                     # NCHW (module semantics)
    h = jnp.transpose(h, (0, 2, 3, 1)).astype(jnp.float32)     # NHWC from here on

    feats = []

    # --- block_1: conv + LeakyReLU (no norm); batch folded into the matmul M dim ---
    w, b = params["block_1"]
    cout = w.shape[0]
    c_pad = _round_up(cout, LANE)
    patches, Ho, Wo = im2col_nhwc(h, 4, 2, 1)
    pat = patches.reshape(N * Ho * Wo, -1).astype(jnp.bfloat16)
    w_kc = _prep_weight(w, c_pad)
    b_pad = jnp.pad(b, (0, c_pad - cout)).reshape(1, c_pad).astype(jnp.float32)
    y = conv_bias_act(pat, w_kc, b_pad, leaky=True, tile_m=tile_m)   # (N*P, 128) f32
    h = y.reshape(N, Ho, Wo, c_pad)[..., :cout]                      # drop lane padding
    feats.append(h)

    # --- block_2..4: conv (bias dropped: cancelled by InstanceNorm) + IN + LeakyReLU ---
    for name in ("block_2", "block_3", "block_4"):
        w, _unused_b = params[name]
        cout = w.shape[0]                                            # multiple of 128
        patches, Ho, Wo = im2col_nhwc(h, 4, 2, 1)
        pat = patches.astype(jnp.bfloat16)
        w_kc = _prep_weight(w, cout)
        hh = conv_instnorm_act(pat, w_kc, tile_p=tile_p)             # (N, P, C) f32
        h = hh.reshape(N, Ho, Wo, cout)
        feats.append(h)

    # --- out_conv: 4x4 stride-1 pad-1 conv, Cout=1 padded to 128 lanes ---
    w, b = params["out_conv"]
    c_pad = LANE
    patches, Ho, Wo = im2col_nhwc(h, 4, 1, 1)
    pat = patches.reshape(N * Ho * Wo, -1).astype(jnp.bfloat16)
    w_kc = _prep_weight(w, c_pad)
    b_pad = jnp.pad(b, (0, c_pad - 1)).reshape(1, c_pad).astype(jnp.float32)
    y = conv_bias_act(pat, w_kc, b_pad, leaky=False, tile_m=tile_m)
    preds = y.reshape(N, Ho, Wo, c_pad)[..., :1].transpose(0, 3, 1, 2)   # NCHW

    # flat features: match PyTorch r.view(N, -1) on NCHW tensors
    flat = jnp.concatenate(
        [f.transpose(0, 3, 1, 2).reshape(N, -1) for f in feats], axis=1)
    return preds, flat


# -----------------------------------------------------------------------------
# Pure-JAX (f32, NCHW) reference for verification
# -----------------------------------------------------------------------------
def reference_forward(x, mask, params):
    def conv(h, w, b, stride, pad):
        y = lax.conv_general_dilated(
            h, w, (stride, stride), [(pad, pad), (pad, pad)],
            dimension_numbers=("NCHW", "OIHW", "NCHW"))
        return y + b[None, :, None, None]

    def block(h, w, b, norm):
        y = conv(h, w, b, 2, 1)
        if norm:
            m = y.mean(axis=(2, 3), keepdims=True)
            v = ((y - m) ** 2).mean(axis=(2, 3), keepdims=True)
            y = (y - m) * lax.rsqrt(v + EPS)
        return jnp.where(y > 0, y, SLOPE * y)

    h = jnp.concatenate([x, mask], axis=1)
    feats = []
    for name, norm in [("block_1", False), ("block_2", True),
                       ("block_3", True), ("block_4", True)]:
        w, b = params[name]
        h = block(h, w, b, norm)
        feats.append(h)
    w, b = params["out_conv"]
    preds = conv(h, w, b, 1, 1)
    flat = jnp.concatenate([f.reshape(f.shape[0], -1) for f in feats], axis=1)
    return preds, flat


def _rel_err(a, b):
    a = a.astype(jnp.float32)
    b = b.astype(jnp.float32)
    return float(jnp.sqrt(jnp.sum((a - b) ** 2)) / (jnp.sqrt(jnp.sum(b ** 2)) + 1e-12))


if __name__ == "__main__":
    key = jax.random.PRNGKey(0)
    k_x, k_m, k_p = jax.random.split(key, 3)

    # small, but deep enough for four stride-2 blocks + the stride-1 out_conv;
    # 48x48 also exercises partial (masked) P/M tiles with the tile sizes below.
    N, C_X, C_MASK, H, W = 2, 3, 4, 48, 48
    x = jax.random.normal(k_x, (N, C_X, H, W), jnp.float32)
    mask = jax.random.normal(k_m, (N, C_MASK, H, W), jnp.float32)
    params = init_params(k_p, C_X + C_MASK)

    fwd = jax.jit(functools.partial(gaugan_discriminator_forward,
                                    tile_m=256, tile_p=128))
    preds, flat = fwd(x, mask, params)
    preds = jax.block_until_ready(preds)
    flat = jax.block_until_ready(flat)

    preds_ref, flat_ref = reference_forward(x, mask, params)
    assert preds.shape == preds_ref.shape and flat.shape == flat_ref.shape
    # kernel runs the matmuls in bf16 (f32 accumulate); compare against the f32
    # reference with tolerances sized for bf16 drift over five stacked convs.
    assert _rel_err(flat, flat_ref) < 5e-2, _rel_err(flat, flat_ref)
    assert _rel_err(preds, preds_ref) < 8e-2, _rel_err(preds, preds_ref)
    assert jnp.allclose(flat, flat_ref, atol=0.3, rtol=0.1)
    assert jnp.allclose(preds, preds_ref, atol=0.4, rtol=0.1)

    print("KERNEL_OK")
</pallas_src>

<mosaic_0001>
module attributes {stable_mosaic.version = 11 : i64} {
  func.func @_conv_act_kernel(%arg0: i32, %arg1: memref<256x112xbf16, #tpu.memory_space<vmem>>, %arg2: memref<112x128xbf16, #tpu.memory_space<vmem>>, %arg3: memref<1x128xf32, #tpu.memory_space<vmem>>, %arg4: memref<256x128xf32, #tpu.memory_space<vmem>>) attributes {dimension_semantics = [#tpu.dimension_semantics<parallel>], iteration_bounds = array<i64: 5>, scalar_prefetch = 0 : i64, scratch_operands = 0 : i64, tpu.core_type = #tpu.core_type<tc>, window_params = [{transform_indices = @transform_0, window_bounds = array<i64: 256, 112>}, {pipeline_mode = #tpu.pipeline_mode<synchronous>, transform_indices = @transform_1, window_bounds = array<i64: 112, 128>}, {pipeline_mode = #tpu.pipeline_mode<synchronous>, transform_indices = @transform_2, window_bounds = array<i64: 1, 128>}, {transform_indices = @transform_3, window_bounds = array<i64: 256, 128>}]} {
    %c0 = arith.constant 0 : index
    %c0_0 = arith.constant 0 : index
    %0 = vector.load %arg1[%c0, %c0_0] : memref<256x112xbf16, #tpu.memory_space<vmem>>, vector<256x112xbf16>
    %c0_1 = arith.constant 0 : index
    %c0_2 = arith.constant 0 : index
    %1 = vector.load %arg2[%c0_1, %c0_2] : memref<112x128xbf16, #tpu.memory_space<vmem>>, vector<112x128xbf16>
    %cst = arith.constant dense<0.000000e+00> : vector<256x128xf32>
    %2 = tpu.matmul %0, %1, %cst {dimension_numbers = #tpu.dot_dimension_numbers<[1], [0], [0], [1], [0, 0, 1, 1], [], []>} : vector<256x112xbf16>, vector<112x128xbf16>, vector<256x128xf32> -> vector<256x128xf32>
    %c0_3 = arith.constant 0 : index
    %c0_4 = arith.constant 0 : index
    %3 = vector.load %arg3[%c0_3, %c0_4] : memref<1x128xf32, #tpu.memory_space<vmem>>, vector<1x128xf32>
    %4 = vector.broadcast %3 : vector<1x128xf32> to vector<256x128xf32>
    %5 = arith.addf %2, %4 : vector<256x128xf32>
    %cst_5 = arith.constant 0.000000e+00 : f32
    %6 = vector.broadcast %cst_5 : f32 to vector<256x128xf32>
    %7 = arith.cmpf ogt, %5, %6 : vector<256x128xf32>
    %cst_6 = arith.constant 2.000000e-01 : f32
    %8 = vector.broadcast %cst_6 : f32 to vector<256x128xf32>
    %9 = arith.mulf %8, %5 : vector<256x128xf32>
    %10 = arith.select %7, %5, %9 : vector<256x128xi1>, vector<256x128xf32>
    %c0_7 = arith.constant 0 : index
    %c0_8 = arith.constant 0 : index
    %11 = vector.load %arg4[%c0_7, %c0_8] : memref<256x128xf32, #tpu.memory_space<vmem>>, vector<256x128xf32>
    tpu.vector_store %arg4[%c0_7, %c0_8], %10 {strides = array<i32>} : memref<256x128xf32, #tpu.memory_space<vmem>>, vector<256x128xf32>,
    return
  }
  func.func @transform_0(%arg0: i32) -> (i32, i32) {
    %c0_i32 = arith.constant 0 : i32
    %c0_i32_0 = arith.constant 0 : i32
    return %arg0, %c0_i32 : i32, i32
  }
  func.func @transform_1(%arg0: i32) -> (i32, i32) {
    %c0_i32 = arith.constant 0 : i32
    %c0_i32_0 = arith.constant 0 : i32
    %c0_i32_1 = arith.constant 0 : i32
    return %c0_i32, %c0_i32_0 : i32, i32
  }
  func.func @transform_2(%arg0: i32) -> (i32, i32) {
    %c0_i32 = arith.constant 0 : i32
    %c0_i32_0 = arith.constant 0 : i32
    %c0_i32_1 = arith.constant 0 : i32
    return %c0_i32, %c0_i32_0 : i32, i32
  }
  func.func @transform_3(%arg0: i32) -> (i32, i32) {
    %c0_i32 = arith.constant 0 : i32
    %c0_i32_0 = arith.constant 0 : i32
    return %arg0, %c0_i32 : i32, i32
  }
}

module attributes {stable_mosaic.version = 11 : i64} {
  func.func @_conv_stats_kernel(%arg0: i32, %arg1: i32, %arg2: memref<1x128x1024xbf16, #tpu.memory_space<vmem>>, %arg3: memref<1024x128xbf16, #tpu.memory_space<vmem>>, %arg4: memref<1x128x128xf32, #tpu.memory_space<vmem>>, %arg5: memref<1x2x128xf32, #tpu.memory_space<vmem>>) attributes {dimension_semantics = [#tpu.dimension_semantics<parallel>, #tpu.dimension_semantics<arbitrary>], iteration_bounds = array<i64: 2, 2>, scalar_prefetch = 0 : i64, scratch_operands = 0 : i64, tpu.core_type = #tpu.core_type<tc>, window_params = [{transform_indices = @transform_0, window_bounds = array<i64: 1, 128, 1024>}, {pipeline_mode = #tpu.pipeline_mode<synchronous>, transform_indices = @transform_1, window_bounds = array<i64: 1024, 128>}, {transform_indices = @transform_2, window_bounds = array<i64: 1, 128, 128>}, {transform_indices = @transform_3, window_bounds = array<i64: 1, 2, 128>}]} {
    %c0_i32 = arith.constant 0 : i32
    %0 = arith.cmpi eq, %arg1, %c0_i32 : i32
    %1 = arith.extui %0 : i1 to i32
    %c0_i32_0 = arith.constant 0 : i32
    %2 = arith.cmpi ne, %1, %c0_i32_0 : i32
    scf.if %2 {
      %cst_17 = arith.constant 0.000000e+00 : f32
      %32 = vector.broadcast %cst_17 : f32 to vector<1x2x128xf32>
      %c0_18 = arith.constant 0 : index
      %c0_19 = arith.constant 0 : index
      %c0_20 = arith.constant 0 : index
      %33 = vector.load %arg5[%c0_18, %c0_19, %c0_20] : memref<1x2x128xf32, #tpu.memory_space<vmem>>, vector<1x2x128xf32>
      tpu.vector_store %arg5[%c0_18, %c0_19, %c0_20], %32 {strides = array<i32>} : memref<1x2x128xf32, #tpu.memory_space<vmem>>, vector<1x2x128xf32>,
    } else {
    }
    %c0 = arith.constant 0 : index
    %c0_1 = arith.constant 0 : index
    %c0_2 = arith.constant 0 : index
    %3 = vector.load %arg2[%c0, %c0_1, %c0_2] : memref<1x128x1024xbf16, #tpu.memory_space<vmem>>, vector<1x128x1024xbf16>
    %4 = vector.shape_cast %3 : vector<1x128x1024xbf16> to vector<128x1024xbf16>
    %c0_3 = arith.constant 0 : index
    %c0_4 = arith.constant 0 : index
    %5 = vector.load %arg3[%c0_3, %c0_4] : memref<1024x128xbf16, #tpu.memory_space<vmem>>, vector<1024x128xbf16>
    %cst = arith.constant dense<0.000000e+00> : vector<128x128xf32>
    %6 = tpu.matmul %4, %5, %cst {dimension_numbers = #tpu.dot_dimension_numbers<[1], [0], [0], [1], [0, 0, 1, 1], [], []>} : vector<128x1024xbf16>, vector<1024x128xbf16>, vector<128x128xf32> -> vector<128x128xf32>
    %c0_5 = arith.constant 0 : index
    %c0_6 = arith.constant 0 : index
    %c0_7 = arith.constant 0 : index
    %7 = vector.load %arg4[%c0_5, %c0_6, %c0_7] : memref<1x128x128xf32, #tpu.memory_space<vmem>>, vector<1x128x128xf32>
    %8 = vector.shape_cast %7 : vector<1x128x128xf32> to vector<128x128xf32>
    %9 = vector.shape_cast %6 : vector<128x128xf32> to vector<1x128x128xf32>
    tpu.vector_store %arg4[%c0_5, %c0_6, %c0_7], %9 {strides = array<i32>} : memref<1x128x128xf32, #tpu.memory_space<vmem>>, vector<1x128x128xf32>,
    %10 = tpu.iota {dimensions = array<i32: 0>} : vector<128x1xi32>
    %c128_i32 = arith.constant 128 : i32
    %11 = arith.muli %arg1, %c128_i32 : i32
    %12 = vector.broadcast %11 : i32 to vector<128x1xi32>
    %13 = arith.addi %10, %12 : vector<128x1xi32>
    %c144_i32 = arith.constant 144 : i32
    %14 = vector.broadcast %c144_i32 : i32 to vector<128x1xi32>
    %15 = arith.cmpi slt, %13, %14 : vector<128x1xi32>
    %cst_8 = arith.constant 0.000000e+00 : f32
    %16 = vector.shape_cast %15 : vector<128x1xi1> to vector<128x1xi1>
    %17 = vector.broadcast %16 : vector<128x1xi1> to vector<128x128xi1>
    %18 = vector.broadcast %cst_8 : f32 to vector<128x128xf32>
    %19 = arith.select %17, %6, %18 : vector<128x128xi1>, vector<128x128xf32>
    %cst_9 = arith.constant dense<0.000000e+00> : vector<128xf32>
    %20 = vector.multi_reduction <add>, %19, %cst_9 [0] : vector<128x128xf32> to vector<128xf32>
    %21 = vector.shape_cast %20 : vector<128xf32> to vector<1x128xf32>
    %22 = arith.mulf %19, %19 : vector<128x128xf32>
    %cst_10 = arith.constant dense<0.000000e+00> : vector<128xf32>
    %23 = vector.multi_reduction <add>, %22, %cst_10 [0] : vector<128x128xf32> to vector<128xf32>
    %24 = vector.shape_cast %23 : vector<128xf32> to vector<1x128xf32>
    %25 = tpu.concatenate %21, %24 in 0 : vector<1x128xf32>, vector<1x128xf32> -> vector<2x128xf32>
    %c0_11 = arith.constant 0 : index
    %c0_12 = arith.constant 0 : index
    %c0_13 = arith.constant 0 : index
    %26 = vector.load %arg5[%c0_11, %c0_12, %c0_13] : memref<1x2x128xf32, #tpu.memory_space<vmem>>, vector<1x2x128xf32>
    %27 = vector.shape_cast %26 : vector<1x2x128xf32> to vector<2x128xf32>
    %28 = arith.addf %27, %25 : vector<2x128xf32>
    %c0_14 = arith.constant 0 : index
    %c0_15 = arith.constant 0 : index
    %c0_16 = arith.constant 0 : index
    %29 = vector.load %arg5[%c0_14, %c0_15, %c0_16] : memref<1x2x128xf32, #tpu.memory_space<vmem>>, vector<1x2x128xf32>
    %30 = vector.shape_cast %29 : vector<1x2x128xf32> to vector<2x128xf32>
    %31 = vector.shape_cast %28 : vector<2x128xf32> to vector<1x2x128xf32>
    tpu.vector_store %arg5[%c0_14, %c0_15, %c0_16], %31 {strides = array<i32>} : memref<1x2x128xf32, #tpu.memory_space<vmem>>, vector<1x2x128xf32>,
    return
  }
  func.func @transform_0(%arg0: i32, %arg1: i32) -> (i32, i32, i32) {
    %c0_i32 = arith.constant 0 : i32
    %c0_i32_0 = arith.constant 0 : i32
    return %arg0, %arg1, %c0_i32 : i32, i32, i32
  }
  func.func @transform_1(%arg0: i32, %arg1: i32) -> (i32, i32) {
    %c0_i32 = arith.constant 0 : i32
    %c0_i32_0 = arith.constant 0 : i32
    %c0_i32_1 = arith.constant 0 : i32
    return %c0_i32, %c0_i32_0 : i32, i32
  }
  func.func @transform_2(%arg0: i32, %arg1: i32) -> (i32, i32, i32) {
    %c0_i32 = arith.constant 0 : i32
    %c0_i32_0 = arith.constant 0 : i32
    return %arg0, %arg1, %c0_i32 : i32, i32, i32
  }
  func.func @transform_3(%arg0: i32, %arg1: i32) -> (i32, i32, i32) {
    %c0_i32 = arith.constant 0 : i32
    %c0_i32_0 = arith.constant 0 : i32
    %c0_i32_1 = arith.constant 0 : i32
    return %arg0, %c0_i32, %c0_i32_0 : i32, i32, i32
  }
}

module attributes {stable_mosaic.version = 11 : i64} {
  func.func @_norm_act_kernel(%arg0: i32, %arg1: i32, %arg2: memref<1x128x128xf32, #tpu.memory_space<vmem>>, %arg3: memref<1x2x128xf32, #tpu.memory_space<vmem>>, %arg4: memref<1x128x128xf32, #tpu.memory_space<vmem>>) attributes {dimension_semantics = [#tpu.dimension_semantics<parallel>, #tpu.dimension_semantics<parallel>], iteration_bounds = array<i64: 2, 2>, scalar_prefetch = 0 : i64, scratch_operands = 0 : i64, tpu.core_type = #tpu.core_type<tc>, window_params = [{transform_indices = @transform_0, window_bounds = array<i64: 1, 128, 128>}, {transform_indices = @transform_1, window_bounds = array<i64: 1, 2, 128>}, {transform_indices = @transform_2, window_bounds = array<i64: 1, 128, 128>}]} {
    %c0 = arith.constant 0 : index
    %c0_0 = arith.constant 0 : index
    %c0_1 = arith.constant 0 : index
    %0 = vector.load %arg2[%c0, %c0_0, %c0_1] : memref<1x128x128xf32, #tpu.memory_space<vmem>>, vector<1x128x128xf32>
    %1 = vector.shape_cast %0 : vector<1x128x128xf32> to vector<128x128xf32>
    %c0_2 = arith.constant 0 : index
    %c0_3 = arith.constant 0 : index
    %c0_4 = arith.constant 0 : index
    %2 = vector.load %arg3[%c0_2, %c0_3, %c0_4] : memref<1x2x128xf32, #tpu.memory_space<vmem>>, vector<1x2x128xf32>
    %3 = vector.shape_cast %2 : vector<1x2x128xf32> to vector<2x128xf32>
    %4 = vector.extract_strided_slice %3 {offsets = [0, 0], sizes = [1, 128], strides = [1, 1]} : vector<2x128xf32> to vector<1x128xf32>
    %cst = arith.constant 0.0069444445 : f32
    %5 = vector.broadcast %cst : f32 to vector<1x128xf32>
    %6 = arith.mulf %4, %5 : vector<1x128xf32>
    %7 = vector.extract_strided_slice %3 {offsets = [1, 0], sizes = [1, 128], strides = [1, 1]} : vector<2x128xf32> to vector<1x128xf32>
    %cst_5 = arith.constant 0.0069444445 : f32
    %8 = vector.broadcast %cst_5 : f32 to vector<1x128xf32>
    %9 = arith.mulf %7, %8 : vector<1x128xf32>
    %10 = arith.mulf %6, %6 : vector<1x128xf32>
    %11 = arith.subf %9, %10 : vector<1x128xf32>
    %cst_6 = arith.constant 0.000000e+00 : f32
    %12 = vector.broadcast %cst_6 : f32 to vector<1x128xf32>
    %13 = arith.maximumf %11, %12 : vector<1x128xf32>
    %14 = vector.broadcast %6 : vector<1x128xf32> to vector<128x128xf32>
    %15 = arith.subf %1, %14 : vector<128x128xf32>
    %cst_7 = arith.constant 9.99999974E-6 : f32
    %16 = vector.broadcast %cst_7 : f32 to vector<1x128xf32>
    %17 = arith.addf %13, %16 : vector<1x128xf32>
    %18 = math.rsqrt %17 : vector<1x128xf32>
    %19 = vector.broadcast %18 : vector<1x128xf32> to vector<128x128xf32>
    %20 = arith.mulf %15, %19 : vector<128x128xf32>
    %cst_8 = arith.constant 0.000000e+00 : f32
    %21 = vector.broadcast %cst_8 : f32 to vector<128x128xf32>
    %22 = arith.cmpf ogt, %20, %21 : vector<128x128xf32>
    %cst_9 = arith.constant 2.000000e-01 : f32
    %23 = vector.broadcast %cst_9 : f32 to vector<128x128xf32>
    %24 = arith.mulf %23, %20 : vector<128x128xf32>
    %25 = arith.select %22, %20, %24 : vector<128x128xi1>, vector<128x128xf32>
    %c0_10 = arith.constant 0 : index
    %c0_11 = arith.constant 0 : index
    %c0_12 = arith.constant 0 : index
    %26 = vector.load %arg4[%c0_10, %c0_11, %c0_12] : memref<1x128x128xf32, #tpu.memory_space<vmem>>, vector<1x128x128xf32>
    %27 = vector.shape_cast %26 : vector<1x128x128xf32> to vector<128x128xf32>
    %28 = vector.shape_cast %25 : vector<128x128xf32> to vector<1x128x128xf32>
    tpu.vector_store %arg4[%c0_10, %c0_11, %c0_12], %28 {strides = array<i32>} : memref<1x128x128xf32, #tpu.memory_space<vmem>>, vector<1x128x128xf32>,
    return
  }
  func.func @transform_0(%arg0: i32, %arg1: i32) -> (i32, i32, i32) {
    %c0_i32 = arith.constant 0 : i32
    %c0_i32_0 = arith.constant 0 : i32
    return %arg0, %arg1, %c0_i32 : i32, i32, i32
  }
  func.func @transform_1(%arg0: i32, %arg1: i32) -> (i32, i32, i32) {
    %c0_i32 = arith.constant 0 : i32
    %c0_i32_0 = arith.constant 0 : i32
    %c0_i32_1 = arith.constant 0 : i32
    return %arg0, %c0_i32, %c0_i32_0 : i32, i32, i32
  }
  func.func @transform_2(%arg0: i32, %arg1: i32) -> (i32, i32, i32) {
    %c0_i32 = arith.constant 0 : i32
    %c0_i32_0 = arith.constant 0 : i32
    return %arg0, %arg1, %c0_i32 : i32, i32, i32
  }
}

module attributes {stable_mosaic.version = 11 : i64} {
  func.func @_conv_stats_kernel(%arg0: i32, %arg1: i32, %arg2: memref<1x36x2048xbf16, #tpu.memory_space<vmem>>, %arg3: memref<2048x256xbf16, #tpu.memory_space<vmem>>, %arg4: memref<1x36x256xf32, #tpu.memory_space<vmem>>, %arg5: memref<1x2x256xf32, #tpu.memory_space<vmem>>) attributes {dimension_semantics = [#tpu.dimension_semantics<parallel>, #tpu.dimension_semantics<arbitrary>], iteration_bounds = array<i64: 2, 1>, scalar_prefetch = 0 : i64, scratch_operands = 0 : i64, tpu.core_type = #tpu.core_type<tc>, window_params = [{transform_indices = @transform_0, window_bounds = array<i64: 1, 36, 2048>}, {pipeline_mode = #tpu.pipeline_mode<synchronous>, transform_indices = @transform_1, window_bounds = array<i64: 2048, 256>}, {transform_indices = @transform_2, window_bounds = array<i64: 1, 36, 256>}, {transform_indices = @transform_3, window_bounds = array<i64: 1, 2, 256>}]} {
    %c0_i32 = arith.constant 0 : i32
    %0 = arith.cmpi eq, %arg1, %c0_i32 : i32
    %1 = arith.extui %0 : i1 to i32
    %c0_i32_0 = arith.constant 0 : i32
    %2 = arith.cmpi ne, %1, %c0_i32_0 : i32
    scf.if %2 {
      %cst_18 = arith.constant 0.000000e+00 : f32
      %32 = vector.broadcast %cst_18 : f32 to vector<1x2x256xf32>
      %c0_19 = arith.constant 0 : index
      %c0_20 = arith.constant 0 : index
      %c0_21 = arith.constant 0 : index
      %33 = vector.load %arg5[%c0_19, %c0_20, %c0_21] : memref<1x2x256xf32, #tpu.memory_space<vmem>>, vector<1x2x256xf32>
      tpu.vector_store %arg5[%c0_19, %c0_20, %c0_21], %32 {strides = array<i32>} : memref<1x2x256xf32, #tpu.memory_space<vmem>>, vector<1x2x256xf32>,
    } else {
    }
    %c0 = arith.constant 0 : index
    %c0_1 = arith.constant 0 : index
    %c0_2 = arith.constant 0 : index
    %3 = vector.load %arg2[%c0, %c0_1, %c0_2] : memref<1x36x2048xbf16, #tpu.memory_space<vmem>>, vector<1x36x2048xbf16>
    %4 = vector.shape_cast %3 : vector<1x36x2048xbf16> to vector<36x2048xbf16>
    %c0_3 = arith.constant 0 : index
    %c0_4 = arith.constant 0 : index
    %5 = vector.load %arg3[%c0_3, %c0_4] : memref<2048x256xbf16, #tpu.memory_space<vmem>>, vector<2048x256xbf16>
    %cst = arith.constant dense<0.000000e+00> : vector<36x256xf32>
    %6 = tpu.matmul %4, %5, %cst {dimension_numbers = #tpu.dot_dimension_numbers<[1], [0], [0], [1], [0, 0, 1, 1], [], []>} : vector<36x2048xbf16>, vector<2048x256xbf16>, vector<36x256xf32> -> vector<36x256xf32>
    %c0_5 = arith.constant 0 : index
    %c0_6 = arith.constant 0 : index
    %c0_7 = arith.constant 0 : index
    %7 = vector.load %arg4[%c0_5, %c0_6, %c0_7] : memref<1x36x256xf32, #tpu.memory_space<vmem>>, vector<1x36x256xf32>
    %8 = vector.shape_cast %7 : vector<1x36x256xf32> to vector<36x256xf32>
    %9 = vector.shape_cast %6 : vector<36x256xf32> to vector<1x36x256xf32>
    tpu.vector_store %arg4[%c0_5, %c0_6, %c0_7], %9 {strides = array<i32>} : memref<1x36x256xf32, #tpu.memory_space<vmem>>, vector<1x36x256xf32>,
    %10 = tpu.iota {dimensions = array<i32: 0>} : vector<36x1xi32>
    %c36_i32 = arith.constant 36 : i32
    %11 = arith.muli %arg1, %c36_i32 : i32
    %12 = vector.broadcast %11 : i32 to vector<36x1xi32>
    %13 = arith.addi %10, %12 : vector<36x1xi32>
    %c36_i32_8 = arith.constant 36 : i32
    %14 = vector.broadcast %c36_i32_8 : i32 to vector<36x1xi32>
    %15 = arith.cmpi slt, %13, %14 : vector<36x1xi32>
    %cst_9 = arith.constant 0.000000e+00 : f32
    %16 = vector.shape_cast %15 : vector<36x1xi1> to vector<36x1xi1>
    %17 = vector.broadcast %16 : vector<36x1xi1> to vector<36x256xi1>
    %18 = vector.broadcast %cst_9 : f32 to vector<36x256xf32>
    %19 = arith.select %17, %6, %18 : vector<36x256xi1>, vector<36x256xf32>
    %cst_10 = arith.constant dense<0.000000e+00> : vector<256xf32>
    %20 = vector.multi_reduction <add>, %19, %cst_10 [0] : vector<36x256xf32> to vector<256xf32>
    %21 = vector.shape_cast %20 : vector<256xf32> to vector<1x256xf32>
    %22 = arith.mulf %19, %19 : vector<36x256xf32>
    %cst_11 = arith.constant dense<0.000000e+00> : vector<256xf32>
    %23 = vector.multi_reduction <add>, %22, %cst_11 [0] : vector<36x256xf32> to vector<256xf32>
    %24 = vector.shape_cast %23 : vector<256xf32> to vector<1x256xf32>
    %25 = tpu.concatenate %21, %24 in 0 : vector<1x256xf32>, vector<1x256xf32> -> vector<2x256xf32>
    %c0_12 = arith.constant 0 : index
    %c0_13 = arith.constant 0 : index
    %c0_14 = arith.constant 0 : index
    %26 = vector.load %arg5[%c0_12, %c0_13, %c0_14] : memref<1x2x256xf32, #tpu.memory_space<vmem>>, vector<1x2x256xf32>
    %27 = vector.shape_cast %26 : vector<1x2x256xf32> to vector<2x256xf32>
    %28 = arith.addf %27, %25 : vector<2x256xf32>
    %c0_15 = arith.constant 0 : index
    %c0_16 = arith.constant 0 : index
    %c0_17 = arith.constant 0 : index
    %29 = vector.load %arg5[%c0_15, %c0_16, %c0_17] : memref<1x2x256xf32, #tpu.memory_space<vmem>>, vector<1x2x256xf32>
    %30 = vector.shape_cast %29 : vector<1x2x256xf32> to vector<2x256xf32>
    %31 = vector.shape_cast %28 : vector<2x256xf32> to vector<1x2x256xf32>
    tpu.vector_store %arg5[%c0_15, %c0_16, %c0_17], %31 {strides = array<i32>} : memref<1x2x256xf32, #tpu.memory_space<vmem>>, vector<1x2x256xf32>,
    return
  }
  func.func @transform_0(%arg0: i32, %arg1: i32) -> (i32, i32, i32) {
    %c0_i32 = arith.constant 0 : i32
    %c0_i32_0 = arith.constant 0 : i32
    return %arg0, %arg1, %c0_i32 : i32, i32, i32
  }
  func.func @transform_1(%arg0: i32, %arg1: i32) -> (i32, i32) {
    %c0_i32 = arith.constant 0 : i32
    %c0_i32_0 = arith.constant 0 : i32
    %c0_i32_1 = arith.constant 0 : i32
    return %c0_i32, %c0_i32_0 : i32, i32
  }
  func.func @transform_2(%arg0: i32, %arg1: i32) -> (i32, i32, i32) {
    %c0_i32 = arith.constant 0 : i32
    %c0_i32_0 = arith.constant 0 : i32
    return %arg0, %arg1, %c0_i32 : i32, i32, i32
  }
  func.func @transform_3(%arg0: i32, %arg1: i32) -> (i32, i32, i32) {
    %c0_i32 = arith.constant 0 : i32
    %c0_i32_0 = arith.constant 0 : i32
    %c0_i32_1 = arith.constant 0 : i32
    return %arg0, %c0_i32, %c0_i32_0 : i32, i32, i32
  }
}

module attributes {stable_mosaic.version = 11 : i64} {
  func.func @_norm_act_kernel(%arg0: i32, %arg1: i32, %arg2: memref<1x36x256xf32, #tpu.memory_space<vmem>>, %arg3: memref<1x2x256xf32, #tpu.memory_space<vmem>>, %arg4: memref<1x36x256xf32, #tpu.memory_space<vmem>>) attributes {dimension_semantics = [#tpu.dimension_semantics<parallel>, #tpu.dimension_semantics<parallel>], iteration_bounds = array<i64: 2, 1>, scalar_prefetch = 0 : i64, scratch_operands = 0 : i64, tpu.core_type = #tpu.core_type<tc>, window_params = [{transform_indices = @transform_0, window_bounds = array<i64: 1, 36, 256>}, {transform_indices = @transform_1, window_bounds = array<i64: 1, 2, 256>}, {transform_indices = @transform_2, window_bounds = array<i64: 1, 36, 256>}]} {
    %c0 = arith.constant 0 : index
    %c0_0 = arith.constant 0 : index
    %c0_1 = arith.constant 0 : index
    %0 = vector.load %arg2[%c0, %c0_0, %c0_1] : memref<1x36x256xf32, #tpu.memory_space<vmem>>, vector<1x36x256xf32>
    %1 = vector.shape_cast %0 : vector<1x36x256xf32> to vector<36x256xf32>
    %c0_2 = arith.constant 0 : index
    %c0_3 = arith.constant 0 : index
    %c0_4 = arith.constant 0 : index
    %2 = vector.load %arg3[%c0_2, %c0_3, %c0_4] : memref<1x2x256xf32, #tpu.memory_space<vmem>>, vector<1x2x256xf32>
    %3 = vector.shape_cast %2 : vector<1x2x256xf32> to vector<2x256xf32>
    %4 = vector.extract_strided_slice %3 {offsets = [0, 0], sizes = [1, 256], strides = [1, 1]} : vector<2x256xf32> to vector<1x256xf32>
    %cst = arith.constant 0.027777778 : f32
    %5 = vector.broadcast %cst : f32 to vector<1x256xf32>
    %6 = arith.mulf %4, %5 : vector<1x256xf32>
    %7 = vector.extract_strided_slice %3 {offsets = [1, 0], sizes = [1, 256], strides = [1, 1]} : vector<2x256xf32> to vector<1x256xf32>
    %cst_5 = arith.constant 0.027777778 : f32
    %8 = vector.broadcast %cst_5 : f32 to vector<1x256xf32>
    %9 = arith.mulf %7, %8 : vector<1x256xf32>
    %10 = arith.mulf %6, %6 : vector<1x256xf32>
    %11 = arith.subf %9, %10 : vector<1x256xf32>
    %cst_6 = arith.constant 0.000000e+00 : f32
    %12 = vector.broadcast %cst_6 : f32 to vector<1x256xf32>
    %13 = arith.maximumf %11, %12 : vector<1x256xf32>
    %14 = vector.broadcast %6 : vector<1x256xf32> to vector<36x256xf32>
    %15 = arith.subf %1, %14 : vector<36x256xf32>
    %cst_7 = arith.constant 9.99999974E-6 : f32
    %16 = vector.broadcast %cst_7 : f32 to vector<1x256xf32>
    %17 = arith.addf %13, %16 : vector<1x256xf32>
    %18 = math.rsqrt %17 : vector<1x256xf32>
    %19 = vector.broadcast %18 : vector<1x256xf32> to vector<36x256xf32>
    %20 = arith.mulf %15, %19 : vector<36x256xf32>
    %cst_8 = arith.constant 0.000000e+00 : f32
    %21 = vector.broadcast %cst_8 : f32 to vector<36x256xf32>
    %22 = arith.cmpf ogt, %20, %21 : vector<36x256xf32>
    %cst_9 = arith.constant 2.000000e-01 : f32
    %23 = vector.broadcast %cst_9 : f32 to vector<36x256xf32>
    %24 = arith.mulf %23, %20 : vector<36x256xf32>
    %25 = arith.select %22, %20, %24 : vector<36x256xi1>, vector<36x256xf32>
    %c0_10 = arith.constant 0 : index
    %c0_11 = arith.constant 0 : index
    %c0_12 = arith.constant 0 : index
    %26 = vector.load %arg4[%c0_10, %c0_11, %c0_12] : memref<1x36x256xf32, #tpu.memory_space<vmem>>, vector<1x36x256xf32>
    %27 = vector.shape_cast %26 : vector<1x36x256xf32> to vector<36x256xf32>
    %28 = vector.shape_cast %25 : vector<36x256xf32> to vector<1x36x256xf32>
    tpu.vector_store %arg4[%c0_10, %c0_11, %c0_12], %28 {strides = array<i32>} : memref<1x36x256xf32, #tpu.memory_space<vmem>>, vector<1x36x256xf32>,
    return
  }
  func.func @transform_0(%arg0: i32, %arg1: i32) -> (i32, i32, i32) {
    %c0_i32 = arith.constant 0 : i32
    %c0_i32_0 = arith.constant 0 : i32
    return %arg0, %arg1, %c0_i32 : i32, i32, i32
  }
  func.func @transform_1(%arg0: i32, %arg1: i32) -> (i32, i32, i32) {
    %c0_i32 = arith.constant 0 : i32
    %c0_i32_0 = arith.constant 0 : i32
    %c0_i32_1 = arith.constant 0 : i32
    return %arg0, %c0_i32, %c0_i32_0 : i32, i32, i32
  }
  func.func @transform_2(%arg0: i32, %arg1: i32) -> (i32, i32, i32) {
    %c0_i32 = arith.constant 0 : i32
    %c0_i32_0 = arith.constant 0 : i32
    return %arg0, %arg1, %c0_i32 : i32, i32, i32
  }
}

module attributes {stable_mosaic.version = 11 : i64} {
  func.func @_conv_stats_kernel(%arg0: i32, %arg1: i32, %arg2: memref<1x9x4096xbf16, #tpu.memory_space<vmem>>, %arg3: memref<4096x512xbf16, #tpu.memory_space<vmem>>, %arg4: memref<1x9x512xf32, #tpu.memory_space<vmem>>, %arg5: memref<1x2x512xf32, #tpu.memory_space<vmem>>) attributes {dimension_semantics = [#tpu.dimension_semantics<parallel>, #tpu.dimension_semantics<arbitrary>], iteration_bounds = array<i64: 2, 1>, scalar_prefetch = 0 : i64, scratch_operands = 0 : i64, tpu.core_type = #tpu.core_type<tc>, window_params = [{transform_indices = @transform_0, window_bounds = array<i64: 1, 9, 4096>}, {pipeline_mode = #tpu.pipeline_mode<synchronous>, transform_indices = @transform_1, window_bounds = array<i64: 4096, 512>}, {transform_indices = @transform_2, window_bounds = array<i64: 1, 9, 512>}, {transform_indices = @transform_3, window_bounds = array<i64: 1, 2, 512>}]} {
    %c0_i32 = arith.constant 0 : i32
    %0 = arith.cmpi eq, %arg1, %c0_i32 : i32
    %1 = arith.extui %0 : i1 to i32
    %c0_i32_0 = arith.constant 0 : i32
    %2 = arith.cmpi ne, %1, %c0_i32_0 : i32
    scf.if %2 {
      %cst_18 = arith.constant 0.000000e+00 : f32
      %32 = vector.broadcast %cst_18 : f32 to vector<1x2x512xf32>
      %c0_19 = arith.constant 0 : index
      %c0_20 = arith.constant 0 : index
      %c0_21 = arith.constant 0 : index
      %33 = vector.load %arg5[%c0_19, %c0_20, %c0_21] : memref<1x2x512xf32, #tpu.memory_space<vmem>>, vector<1x2x512xf32>
      tpu.vector_store %arg5[%c0_19, %c0_20, %c0_21], %32 {strides = array<i32>} : memref<1x2x512xf32, #tpu.memory_space<vmem>>, vector<1x2x512xf32>,
    } else {
    }
    %c0 = arith.constant 0 : index
    %c0_1 = arith.constant 0 : index
    %c0_2 = arith.constant 0 : index
    %3 = vector.load %arg2[%c0, %c0_1, %c0_2] : memref<1x9x4096xbf16, #tpu.memory_space<vmem>>, vector<1x9x4096xbf16>
    %4 = vector.shape_cast %3 : vector<1x9x4096xbf16> to vector<9x4096xbf16>
    %c0_3 = arith.constant 0 : index
    %c0_4 = arith.constant 0 : index
    %5 = vector.load %arg3[%c0_3, %c0_4] : memref<4096x512xbf16, #tpu.memory_space<vmem>>, vector<4096x512xbf16>
    %cst = arith.constant dense<0.000000e+00> : vector<9x512xf32>
    %6 = tpu.matmul %4, %5, %cst {dimension_numbers = #tpu.dot_dimension_numbers<[1], [0], [0], [1], [0, 0, 1, 1], [], []>} : vector<9x4096xbf16>, vector<4096x512xbf16>, vector<9x512xf32> -> vector<9x512xf32>
    %c0_5 = arith.constant 0 : index
    %c0_6 = arith.constant 0 : index
    %c0_7 = arith.constant 0 : index
    %7 = vector.load %arg4[%c0_5, %c0_6, %c0_7] : memref<1x9x512xf32, #tpu.memory_space<vmem>>, vector<1x9x512xf32>
    %8 = vector.shape_cast %7 : vector<1x9x512xf32> to vector<9x512xf32>
    %9 = vector.shape_cast %6 : vector<9x512xf32> to vector<1x9x512xf32>
    tpu.vector_store %arg4[%c0_5, %c0_6, %c0_7], %9 {strides = array<i32>} : memref<1x9x512xf32, #tpu.memory_space<vmem>>, vector<1x9x512xf32>,
    %10 = tpu.iota {dimensions = array<i32: 0>} : vector<9x1xi32>
    %c9_i32 = arith.constant 9 : i32
    %11 = arith.muli %arg1, %c9_i32 : i32
    %12 = vector.broadcast %11 : i32 to vector<9x1xi32>
    %13 = arith.addi %10, %12 : vector<9x1xi32>
    %c9_i32_8 = arith.constant 9 : i32
    %14 = vector.broadcast %c9_i32_8 : i32 to vector<9x1xi32>
    %15 = arith.cmpi slt, %13, %14 : vector<9x1xi32>
    %cst_9 = arith.constant 0.000000e+00 : f32
    %16 = vector.shape_cast %15 : vector<9x1xi1> to vector<9x1xi1>
    %17 = vector.broadcast %16 : vector<9x1xi1> to vector<9x512xi1>
    %18 = vector.broadcast %cst_9 : f32 to vector<9x512xf32>
    %19 = arith.select %17, %6, %18 : vector<9x512xi1>, vector<9x512xf32>
    %cst_10 = arith.constant dense<0.000000e+00> : vector<512xf32>
    %20 = vector.multi_reduction <add>, %19, %cst_10 [0] : vector<9x512xf32> to vector<512xf32>
    %21 = vector.shape_cast %20 : vector<512xf32> to vector<1x512xf32>
    %22 = arith.mulf %19, %19 : vector<9x512xf32>
    %cst_11 = arith.constant dense<0.000000e+00> : vector<512xf32>
    %23 = vector.multi_reduction <add>, %22, %cst_11 [0] : vector<9x512xf32> to vector<512xf32>
    %24 = vector.shape_cast %23 : vector<512xf32> to vector<1x512xf32>
    %25 = tpu.concatenate %21, %24 in 0 : vector<1x512xf32>, vector<1x512xf32> -> vector<2x512xf32>
    %c0_12 = arith.constant 0 : index
    %c0_13 = arith.constant 0 : index
    %c0_14 = arith.constant 0 : index
    %26 = vector.load %arg5[%c0_12, %c0_13, %c0_14] : memref<1x2x512xf32, #tpu.memory_space<vmem>>, vector<1x2x512xf32>
    %27 = vector.shape_cast %26 : vector<1x2x512xf32> to vector<2x512xf32>
    %28 = arith.addf %27, %25 : vector<2x512xf32>
    %c0_15 = arith.constant 0 : index
    %c0_16 = arith.constant 0 : index
    %c0_17 = arith.constant 0 : index
    %29 = vector.load %arg5[%c0_15, %c0_16, %c0_17] : memref<1x2x512xf32, #tpu.memory_space<vmem>>, vector<1x2x512xf32>
    %30 = vector.shape_cast %29 : vector<1x2x512xf32> to vector<2x512xf32>
    %31 = vector.shape_cast %28 : vector<2x512xf32> to vector<1x2x512xf32>
    tpu.vector_store %arg5[%c0_15, %c0_16, %c0_17], %31 {strides = array<i32>} : memref<1x2x512xf32, #tpu.memory_space<vmem>>, vector<1x2x512xf32>,
    return
  }
  func.func @transform_0(%arg0: i32, %arg1: i32) -> (i32, i32, i32) {
    %c0_i32 = arith.constant 0 : i32
    %c0_i32_0 = arith.constant 0 : i32
    return %arg0, %arg1, %c0_i32 : i32, i32, i32
  }
  func.func @transform_1(%arg0: i32, %arg1: i32) -> (i32, i32) {
    %c0_i32 = arith.constant 0 : i32
    %c0_i32_0 = arith.constant 0 : i32
    %c0_i32_1 = arith.constant 0 : i32
    return %c0_i32, %c0_i32_0 : i32, i32
  }
  func.func @transform_2(%arg0: i32, %arg1: i32) -> (i32, i32, i32) {
    %c0_i32 = arith.constant 0 : i32
    %c0_i32_0 = arith.constant 0 : i32
    return %arg0, %arg1, %c0_i32 : i32, i32, i32
  }
  func.func @transform_3(%arg0: i32, %arg1: i32) -> (i32, i32, i32) {
    %c0_i32 = arith.constant 0 : i32
    %c0_i32_0 = arith.constant 0 : i32
    %c0_i32_1 = arith.constant 0 : i32
    return %arg0, %c0_i32, %c0_i32_0 : i32, i32, i32
  }
}

module attributes {stable_mosaic.version = 11 : i64} {
  func.func @_norm_act_kernel(%arg0: i32, %arg1: i32, %arg2: memref<1x9x512xf32, #tpu.memory_space<vmem>>, %arg3: memref<1x2x512xf32, #tpu.memory_space<vmem>>, %arg4: memref<1x9x512xf32, #tpu.memory_space<vmem>>) attributes {dimension_semantics = [#tpu.dimension_semantics<parallel>, #tpu.dimension_semantics<parallel>], iteration_bounds = array<i64: 2, 1>, scalar_prefetch = 0 : i64, scratch_operands = 0 : i64, tpu.core_type = #tpu.core_type<tc>, window_params = [{transform_indices = @transform_0, window_bounds = array<i64: 1, 9, 512>}, {transform_indices = @transform_1, window_bounds = array<i64: 1, 2, 512>}, {transform_indices = @transform_2, window_bounds = array<i64: 1, 9, 512>}]} {
    %c0 = arith.constant 0 : index
    %c0_0 = arith.constant 0 : index
    %c0_1 = arith.constant 0 : index
    %0 = vector.load %arg2[%c0, %c0_0, %c0_1] : memref<1x9x512xf32, #tpu.memory_space<vmem>>, vector<1x9x512xf32>
    %1 = vector.shape_cast %0 : vector<1x9x512xf32> to vector<9x512xf32>
    %c0_2 = arith.constant 0 : index
    %c0_3 = arith.constant 0 : index
    %c0_4 = arith.constant 0 : index
    %2 = vector.load %arg3[%c0_2, %c0_3, %c0_4] : memref<1x2x512xf32, #tpu.memory_space<vmem>>, vector<1x2x512xf32>
    %3 = vector.shape_cast %2 : vector<1x2x512xf32> to vector<2x512xf32>
    %4 = vector.extract_strided_slice %3 {offsets = [0, 0], sizes = [1, 512], strides = [1, 1]} : vector<2x512xf32> to vector<1x512xf32>
    %cst = arith.constant 0.111111112 : f32
    %5 = vector.broadcast %cst : f32 to vector<1x512xf32>
    %6 = arith.mulf %4, %5 : vector<1x512xf32>
    %7 = vector.extract_strided_slice %3 {offsets = [1, 0], sizes = [1, 512], strides = [1, 1]} : vector<2x512xf32> to vector<1x512xf32>
    %cst_5 = arith.constant 0.111111112 : f32
    %8 = vector.broadcast %cst_5 : f32 to vector<1x512xf32>
    %9 = arith.mulf %7, %8 : vector<1x512xf32>
    %10 = arith.mulf %6, %6 : vector<1x512xf32>
    %11 = arith.subf %9, %10 : vector<1x512xf32>
    %cst_6 = arith.constant 0.000000e+00 : f32
    %12 = vector.broadcast %cst_6 : f32 to vector<1x512xf32>
    %13 = arith.maximumf %11, %12 : vector<1x512xf32>
    %14 = vector.broadcast %6 : vector<1x512xf32> to vector<9x512xf32>
    %15 = arith.subf %1, %14 : vector<9x512xf32>
    %cst_7 = arith.constant 9.99999974E-6 : f32
    %16 = vector.broadcast %cst_7 : f32 to vector<1x512xf32>
    %17 = arith.addf %13, %16 : vector<1x512xf32>
    %18 = math.rsqrt %17 : vector<1x512xf32>
    %19 = vector.broadcast %18 : vector<1x512xf32> to vector<9x512xf32>
    %20 = arith.mulf %15, %19 : vector<9x512xf32>
    %cst_8 = arith.constant 0.000000e+00 : f32
    %21 = vector.broadcast %cst_8 : f32 to vector<9x512xf32>
    %22 = arith.cmpf ogt, %20, %21 : vector<9x512xf32>
    %cst_9 = arith.constant 2.000000e-01 : f32
    %23 = vector.broadcast %cst_9 : f32 to vector<9x512xf32>
    %24 = arith.mulf %23, %20 : vector<9x512xf32>
    %25 = arith.select %22, %20, %24 : vector<9x512xi1>, vector<9x512xf32>
    %c0_10 = arith.constant 0 : index
    %c0_11 = arith.constant 0 : index
    %c0_12 = arith.constant 0 : index
    %26 = vector.load %arg4[%c0_10, %c0_11, %c0_12] : memref<1x9x512xf32, #tpu.memory_space<vmem>>, vector<1x9x512xf32>
    %27 = vector.shape_cast %26 : vector<1x9x512xf32> to vector<9x512xf32>
    %28 = vector.shape_cast %25 : vector<9x512xf32> to vector<1x9x512xf32>
    tpu.vector_store %arg4[%c0_10, %c0_11, %c0_12], %28 {strides = array<i32>} : memref<1x9x512xf32, #tpu.memory_space<vmem>>, vector<1x9x512xf32>,
    return
  }
  func.func @transform_0(%arg0: i32, %arg1: i32) -> (i32, i32, i32) {
    %c0_i32 = arith.constant 0 : i32
    %c0_i32_0 = arith.constant 0 : i32
    return %arg0, %arg1, %c0_i32 : i32, i32, i32
  }
  func.func @transform_1(%arg0: i32, %arg1: i32) -> (i32, i32, i32) {
    %c0_i32 = arith.constant 0 : i32
    %c0_i32_0 = arith.constant 0 : i32
    %c0_i32_1 = arith.constant 0 : i32
    return %arg0, %c0_i32, %c0_i32_0 : i32, i32, i32
  }
  func.func @transform_2(%arg0: i32, %arg1: i32) -> (i32, i32, i32) {
    %c0_i32 = arith.constant 0 : i32
    %c0_i32_0 = arith.constant 0 : i32
    return %arg0, %arg1, %c0_i32 : i32, i32, i32
  }
}

module attributes {stable_mosaic.version = 11 : i64} {
  func.func @_conv_act_kernel(%arg0: i32, %arg1: memref<8x8192xbf16, #tpu.memory_space<vmem>>, %arg2: memref<8192x128xbf16, #tpu.memory_space<vmem>>, %arg3: memref<1x128xf32, #tpu.memory_space<vmem>>, %arg4: memref<8x128xf32, #tpu.memory_space<vmem>>) attributes {dimension_semantics = [#tpu.dimension_semantics<parallel>], iteration_bounds = array<i64: 1>, scalar_prefetch = 0 : i64, scratch_operands = 0 : i64, tpu.core_type = #tpu.core_type<tc>, window_params = [{transform_indices = @transform_0, window_bounds = array<i64: 8, 8192>}, {pipeline_mode = #tpu.pipeline_mode<synchronous>, transform_indices = @transform_1, window_bounds = array<i64: 8192, 128>}, {pipeline_mode = #tpu.pipeline_mode<synchronous>, transform_indices = @transform_2, window_bounds = array<i64: 1, 128>}, {transform_indices = @transform_3, window_bounds = array<i64: 8, 128>}]} {
    %c0 = arith.constant 0 : index
    %c0_0 = arith.constant 0 : index
    %0 = vector.load %arg1[%c0, %c0_0] : memref<8x8192xbf16, #tpu.memory_space<vmem>>, vector<8x8192xbf16>
    %c0_1 = arith.constant 0 : index
    %c0_2 = arith.constant 0 : index
    %1 = vector.load %arg2[%c0_1, %c0_2] : memref<8192x128xbf16, #tpu.memory_space<vmem>>, vector<8192x128xbf16>
    %cst = arith.constant dense<0.000000e+00> : vector<8x128xf32>
    %2 = tpu.matmul %0, %1, %cst {dimension_numbers = #tpu.dot_dimension_numbers<[1], [0], [0], [1], [0, 0, 1, 1], [], []>} : vector<8x8192xbf16>, vector<8192x128xbf16>, vector<8x128xf32> -> vector<8x128xf32>
    %c0_3 = arith.constant 0 : index
    %c0_4 = arith.constant 0 : index
    %3 = vector.load %arg3[%c0_3, %c0_4] : memref<1x128xf32, #tpu.memory_space<vmem>>, vector<1x128xf32>
    %4 = vector.broadcast %3 : vector<1x128xf32> to vector<8x128xf32>
    %5 = arith.addf %2, %4 : vector<8x128xf32>
    %c0_5 = arith.constant 0 : index
    %c0_6 = arith.constant 0 : index
    %6 = vector.load %arg4[%c0_5, %c0_6] : memref<8x128xf32, #tpu.memory_space<vmem>>, vector<8x128xf32>
    tpu.vector_store %arg4[%c0_5, %c0_6], %5 {strides = array<i32>} : memref<8x128xf32, #tpu.memory_space<vmem>>, vector<8x128xf32>,
    return
  }
  func.func @transform_0(%arg0: i32) -> (i32, i32) {
    %c0_i32 = arith.constant 0 : i32
    %c0_i32_0 = arith.constant 0 : i32
    return %arg0, %c0_i32 : i32, i32
  }
  func.func @transform_1(%arg0: i32) -> (i32, i32) {
    %c0_i32 = arith.constant 0 : i32
    %c0_i32_0 = arith.constant 0 : i32
    %c0_i32_1 = arith.constant 0 : i32
    return %c0_i32, %c0_i32_0 : i32, i32
  }
  func.func @transform_2(%arg0: i32) -> (i32, i32) {
    %c0_i32 = arith.constant 0 : i32
    %c0_i32_0 = arith.constant 0 : i32
    %c0_i32_1 = arith.constant 0 : i32
    return %c0_i32, %c0_i32_0 : i32, i32
  }
  func.func @transform_3(%arg0: i32) -> (i32, i32) {
    %c0_i32 = arith.constant 0 : i32
    %c0_i32_0 = arith.constant 0 : i32
    return %arg0, %c0_i32 : i32, i32
  }
}

</mosaic_0001>

<bundles_post_ra>
// kernel: gaugan_discriminator_forward.8
= control target key start
LH: loop header
LB: loop body
LE: loop exit
PB: predicated region body
PF: predicated region fallthrough
CT: control target
= control target key end

     0   :  { %s1415_s12 = smov 0   ;;  %s1417_s13 = smov 0   ;;  %s1718_s0 = inlined_call_operand.vmem [shape: bf16[1152,112], index: 0, kind: input, shape index: {}]   ;;  %s1719_s1 = inlined_call_operand.vmem [shape: bf16[112,128], index: 1, kind: input, shape index: {}]   ;;  %s1720_s2 = inlined_call_operand.vmem [shape: f32[1,128], index: 2, kind: input, shape index: {}]   ;;  %s1721_s3 = inlined_call_operand.vmem [shape: f32[1152,128], index: 3, kind: output, shape index: {}]  }
   0x1   :  { %s1419_s14 = smov 0  }
   0x2 LB: > { %s1428_s15 = sadd.s32 4294967295, %s1361_s14   ;;  %s1430_s16 = sadd.s32 1, %s1361_s14   ;;  %s1361_s14 = sphi %s1419_s14, %s1730_s14   ;;  %s1357_s13 = sphi %s1417_s13, %s1729_s13   ;;  %s1353_s12 = sphi %s1415_s12, %s1728_s12  }
   0x3   : > { %s85_s17 = ssub.s32 %s1361_s14, %s1430_s16  ;;  %s88_s18 = sadd.s32 1, %s1357_s13 }
   0x4   : > { %p86_p0 = scmp.eq.s32.totalorder %s85_s17, 0  ;;  %p98_p1 = scmp.ne.s32.totalorder %s1357_s13, %s1353_s12 }
   0x5   : > { %p99_p2 = scmp.eq.s32.totalorder %s1428_s15, 4  ;;  %p1049_p3 = scmp.ge.s32.totalorder %s1361_s14, 1 }
   0x6   : > { %s1438_s19 = scalar_select %p86_p0, %s1357_s13, %s88_s18  }
   0x7   : > { %p1440_p4 = por %p99_p2, %p98_p1  ;;  %p146_p5 = scmp.lt.s32.totalorder %s1361_s14, 6 }
   0x9   : > { %p147_p6 = pnand %p1049_p3, %p146_p5 }
   0xa   : > { %s1448_s23 = sshll.u32 (!%p147_p6), %s1428_s15, 5  ;;  %s170_s18 = sand.u32 (!%p147_p6), 1, %s1353_s12  }
   0xb   : > { %150 = sbr.rel (%p147_p6) target bundleno = 323 (0x143), region = 32  ;;  %p178_p7 = scmp.lt.s32.totalorder (!%p147_p6), %s1448_s23, 143 }
   0xc   : > { %s1050_s24 = sshll.u32 (!%p147_p6), %s170_s18, 8 }
   0xd   : > { %s1519_s12 = scalar_lea.vmem (!%p147_p6), [#allocation2], %s1050_s24  }
  0x10   : > { %v1284_v0 = vld [vmem:[%s1719_s1 + $0x30] sm:$0xff]   ;;  %v1285_v1 = vld [vmem:[%s1719_s1 + $0x28] sm:$0xff]   ;;  %s179_s26 = scalar_select %p178_p7, %s1448_s23, 143  ;;  %v1286_v2 = vld [vmem:[%s1719_s1 + $0x20] sm:$0xff]   ;;  %vm368_vm0 = vcmask 916480  }
  0x11   : > { %1136 = vmatprep.subr.bf16.mxu0 %v1284_v0  ;;  %1182 = vmatprep.subr.bf16.mxu1 %v1284_v0  ;;  %v1287_v3 = vld [vmem:[%s1719_s1 + $0x18] sm:$0xff]   ;;  %v1288_v6 = vld [vmem:[%s1719_s1 + $0x10] sm:$0xff]   ;;  %v1289_v7 = vld [vmem:[%s1719_s1 + $0x8] sm:$0xff]   ;;  %s714_s25 = ssub.s32 (%p1440_p4), 144, %s1448_s23 }
  0x12   : > { %1137 = vmatpush3.bf16.msra.mxu0 %v1284_v0  ;;  %1189 = vmatpush3.bf16.msra.mxu1 %v1284_v0  ;;  %s1052_s29 = sshll.u32 %s179_s26, 2  ;;  %v1290_v8 = vld [vmem:[%s1719_s1] sm:$0xff]   ;;  %s1110_s26 = sshll.u32 (%p1440_p4), %s1428_s15, 8 }
  0x13   : > { %1138 = vmatprep.subr.bf16.mxu0 %v1285_v1  ;;  %1183 = vmatprep.subr.bf16.mxu1 %v1285_v1  ;;  %s1464_s7 = scalar_lea.vmem %s1718_s0, %s1052_s29  ;;  %v1511_v23 = vld [vmem:[%s1720_s2] ss:$0 sm:$0xff]  ;;  %p715_p8 = scmp.lt.s32.totalorder (%p1440_p4), %s714_s25, 32 }
  0x14   : > { %v1291_v4 = vld [vmem:[%s1464_s7] sm:$0xff]   ;;  %v1293_v9 = vld [vmem:[%s1464_s7 + $0x8] sm:$0xff]   ;;  %v1295_v11 = vld [vmem:[%s1464_s7 + $0x10] sm:$0xff]   ;;  %s1586_s29 = scalar_lea.vmem (%p1440_p4), %s1721_s3, %s1110_s26  }
  0x15   : > { %v1292_v5 = vld [vmem:[%s1464_s7 + $0x40] sm:$0xff]   ;;  %1150 = vmatprep.mubr.msk.bf16.mxu0 %vm368_vm0, %v1291_v4  ;;  %v1294_v10 = vld [vmem:[%s1464_s7 + $0x48] sm:$0xff]   ;;  %v1296_v12 = vld [vmem:[%s1464_s7 + $0x50] sm:$0xff]  }
  0x16   : > { %1139 = vmatpush3.bf16.msra.mxu0 %v1285_v1  ;;  %1190 = vmatpush3.bf16.msra.mxu1 %v1285_v1  ;;  %v1297_v13 = vld [vmem:[%s1464_s7 + $0x18] sm:$0xff]   ;;  %v1299_v15 = vld [vmem:[%s1464_s7 + $0x20] sm:$0xff]   ;;  %v1301_v17 = vld [vmem:[%s1464_s7 + $0x28] sm:$0xff]  }
  0x17   : > { %1140 = vmatprep.subr.bf16.mxu0 %v1286_v2  ;;  %1184 = vmatprep.subr.bf16.mxu1 %v1286_v2  ;;  %v1298_v14 = vld [vmem:[%s1464_s7 + $0x58] sm:$0xff]   ;;  %v1300_v16 = vld [vmem:[%s1464_s7 + $0x60] sm:$0xff]   ;;  %v1302_v18 = vld [vmem:[%s1464_s7 + $0x68] sm:$0xff]  }
  0x18   : > { %1166 = vmatprep.mubr.msk.bf16.mxu1 %vm368_vm0, %v1292_v5  ;;  %v1303_v19 = vld [vmem:[%s1464_s7 + $0x30] sm:$0xff]   ;;  %v1305_v21 = vld [vmem:[%s1464_s7 + $0x38] sm:$0xff]  }
  0x19   : > { %v1304_v20 = vld [vmem:[%s1464_s7 + $0x70] sm:$0xff]   ;;  %v1306_v22 = vld [vmem:[%s1464_s7 + $0x78] sm:$0xff]  }
  0x1a   : > { %1141 = vmatpush3.bf16.msra.mxu0 %v1286_v2  ;;  %1191 = vmatpush3.bf16.msra.mxu1 %v1286_v2 }
  0x1b   : > { %1142 = vmatprep.subr.bf16.mxu0 %v1287_v3  ;;  %1185 = vmatprep.subr.bf16.mxu1 %v1287_v3 }
  0x1e   : > { %1143 = vmatpush3.bf16.msra.mxu0 %v1287_v3  ;;  %1192 = vmatpush3.bf16.msra.mxu1 %v1287_v3 }
  0x1f   : > { %1144 = vmatprep.subr.bf16.mxu0 %v1288_v6  ;;  %1186 = vmatprep.subr.bf16.mxu1 %v1288_v6 }
  0x22   : > { %1145 = vmatpush3.bf16.msra.mxu0 %v1288_v6  ;;  %1193 = vmatpush3.bf16.msra.mxu1 %v1288_v6 }
  0x23   : > { %1146 = vmatprep.subr.bf16.mxu0 %v1289_v7  ;;  %1187 = vmatprep.subr.bf16.mxu1 %v1289_v7 }
  0x26   : > { %1147 = vmatpush3.bf16.msra.mxu0 %v1289_v7  ;;  %1194 = vmatpush3.bf16.msra.mxu1 %v1289_v7 }
  0x27   : > { %1148 = vmatprep.subr.bf16.mxu0 %v1290_v8  ;;  %1188 = vmatprep.subr.bf16.mxu1 %v1290_v8 }
  0x2a   : > { %1149 = vmatpush3.bf16.msra.mxu0 %v1290_v8  ;;  %1195 = vmatpush3.bf16.msra.mxu1 %v1290_v8 }
  0x2d   : > { %1151 = vmatmul.mubr.msk.bf16.vlgmr.msra.gmra.mxu0 %vm368_vm0, %v1293_v9  ;;  %1167 = vmatmul.mubr.msk.bf16.vlgmr.msra.gmra.mxu1 %vm368_vm0, %v1294_v10 }
  0x2e   : > { %1154 = vmatprep.mubr.msk.bf16.mxu0 %vm368_vm0, %v1295_v11  ;;  %1170 = vmatprep.mubr.msk.bf16.mxu1 %vm368_vm0, %v1296_v12 }
  0x35   : > { %1155 = vmatmul.mubr.msk.bf16.gmra.mxu0 %vm368_vm0, %v1297_v13  ;;  %1171 = vmatmul.mubr.msk.bf16.gmra.mxu1 %vm368_vm0, %v1298_v14 }
  0x36   : > { %1158 = vmatprep.mubr.msk.bf16.mxu0 %vm368_vm0, %v1299_v15  ;;  %1174 = vmatprep.mubr.msk.bf16.mxu1 %vm368_vm0, %v1300_v16 }
  0x3d   : > { %1159 = vmatmul.mubr.msk.bf16.gmra.mxu0 %vm368_vm0, %v1301_v17  ;;  %1175 = vmatmul.mubr.msk.bf16.gmra.mxu1 %vm368_vm0, %v1302_v18 }
  0x3e   : > { %1162 = vmatprep.mubr.msk.bf16.mxu0 %vm368_vm0, %v1303_v19  ;;  %1178 = vmatprep.mubr.msk.bf16.mxu1 %vm368_vm0, %v1304_v20 }
  0x45   : > { %1163 = vmatmul.mubr.msk.bf16.gmra.mxu0 %vm368_vm0, %v1305_v21  ;;  %1179 = vmatmul.mubr.msk.bf16.gmra.mxu1 %vm368_vm0, %v1306_v22 }
  0xed   : > { %v1152_v24 = vpop.f32.mrf.mxu0  ;;  %v1168_v25 = vpop.f32.mrf.mxu1 }
  0xee   : > { %v460_v26 = vadd.f32 %v1152_v24, %v1511_v23  ;;  %v524_v27 = vadd.f32 %v1168_v25, %v1511_v23 }
  0xef   : > { %v451_v28 = vpop.f32.mrf.mxu0  ;;  %v515_v29 = vpop.f32.mrf.mxu1 }
  0xf0   : > { %vm580_vm1 = vcmp.gt.f32.partialorder %v460_v26, 0.0  ;;  %v612_v30 = vmul.f32 0.2, %v460_v26  ;;  %vm596_vm2 = vcmp.gt.f32.partialorder %v524_v27, 0.0  ;;  %v628_v31 = vmul.f32 0.2, %v524_v27 }
  0xf1   : > { %v452_v32 = vadd.f32 %v1511_v23, %v451_v28  ;;  %v516_v33 = vadd.f32 %v1511_v23, %v515_v29  ;;  %v1153_v34 = vpop.f32.mrf.mxu0  ;;  %v1169_v35 = vpop.f32.mrf.mxu1 }
  0xf2   : > { %v644_v36 = vsel %vm580_vm1, %v460_v26, %v612_v30  ;;  %v660_v37 = vsel %vm596_vm2, %v524_v27, %v628_v31  ;;  %v463_v38 = vadd.f32 %v1153_v34, %v1511_v23  ;;  %v527_v39 = vadd.f32 %v1169_v35, %v1511_v23 }
  0xf3   : > { %676 = vst [vmem:[%s1519_s12 + $0x10] sm:$0xff] %v644_v36  ;;  %692 = vst [vmem:[%s1519_s12 + $0x90] sm:$0xff] %v660_v37  ;;  %vm578_vm3 = vcmp.gt.f32.partialorder %v452_v32, 0.0  ;;  %v610_v40 = vmul.f32 0.2, %v452_v32  ;;  %vm594_vm4 = vcmp.gt.f32.partialorder %v516_v33, 0.0  ;;  %v454_v42 = vpop.f32.mrf.mxu0  ;;  %v518_v43 = vpop.f32.mrf.mxu1 }
  0xf4   : > { %v626_v41 = vmul.f32 0.2, %v516_v33  ;;  %vm581_vm5 = vcmp.gt.f32.partialorder %v463_v38, 0.0  ;;  %v613_v44 = vmul.f32 0.2, %v463_v38  ;;  %vm597_vm6 = vcmp.gt.f32.partialorder %v527_v39, 0.0 }
  0xf5   : > { %v629_v45 = vmul.f32 0.2, %v527_v39  ;;  %v642_v46 = vsel %vm578_vm3, %v452_v32, %v610_v40  ;;  %v455_v48 = vadd.f32 %v1511_v23, %v454_v42  ;;  %v519_v49 = vadd.f32 %v1511_v23, %v518_v43  ;;  %v1156_v50 = vpop.f32.mrf.mxu0  ;;  %v1172_v51 = vpop.f32.mrf.mxu1 }
  0xf6   : > { %v658_v47 = vsel %vm594_vm4, %v516_v33, %v626_v41  ;;  %674 = vst [vmem:[%s1519_s12] sm:$0xff] %v642_v46  ;;  %v645_v52 = vsel %vm581_vm5, %v463_v38, %v613_v44  ;;  %v476_v54 = vadd.f32 %v1156_v50, %v1511_v23  ;;  %v540_v55 = vadd.f32 %v1172_v51, %v1511_v23 }
  0xf7   : > { %690 = vst [vmem:[%s1519_s12 + $0x80] sm:$0xff] %v658_v47  ;;  %v661_v53 = vsel %vm597_vm6, %v527_v39, %v629_v45  ;;  %677 = vst [vmem:[%s1519_s12 + $0x18] sm:$0xff] %v645_v52  ;;  %vm579_vm7 = vcmp.gt.f32.partialorder %v455_v48, 0.0  ;;  %v611_v56 = vmul.f32 0.2, %v455_v48  ;;  %vm595_vm8 = vcmp.gt.f32.partialorder %v519_v49, 0.0  ;;  %v467_v58 = vpop.f32.mrf.mxu0  ;;  %v531_v59 = vpop.f32.mrf.mxu1 }
  0xf8   : > { %693 = vst [vmem:[%s1519_s12 + $0x98] sm:$0xff] %v661_v53  ;;  %v627_v57 = vmul.f32 0.2, %v519_v49  ;;  %vm584_vm9 = vcmp.gt.f32.partialorder %v476_v54, 0.0  ;;  %v616_v60 = vmul.f32 0.2, %v476_v54  ;;  %v468_v0 = vadd.f32 %v1511_v23, %v467_v58 }
  0xf9   : > { %vm600_vm10 = vcmp.gt.f32.partialorder %v540_v55, 0.0  ;;  %v632_v61 = vmul.f32 0.2, %v540_v55  ;;  %v643_v62 = vsel %vm579_vm7, %v455_v48, %v611_v56  ;;  %v532_v1 = vadd.f32 %v1511_v23, %v531_v59  ;;  %v1157_v2 = vpop.f32.mrf.mxu0  ;;  %v1173_v3 = vpop.f32.mrf.mxu1 }
  0xfa   : > { %v659_v63 = vsel %vm595_vm8, %v519_v49, %v627_v57  ;;  %675 = vst [vmem:[%s1519_s12 + $0x8] sm:$0xff] %v643_v62  ;;  %v648_v4 = vsel %vm584_vm9, %v476_v54, %v616_v60  ;;  %v479_v6 = vadd.f32 %v1157_v2, %v1511_v23  ;;  %v543_v7 = vadd.f32 %v1173_v3, %v1511_v23 }
  0xfb   : > { %691 = vst [vmem:[%s1519_s12 + $0x88] sm:$0xff] %v659_v63  ;;  %v664_v5 = vsel %vm600_vm10, %v540_v55, %v632_v61  ;;  %680 = vst [vmem:[%s1519_s12 + $0x30] sm:$0xff] %v648_v4  ;;  %vm582_vm11 = vcmp.gt.f32.partialorder %v468_v0, 0.0  ;;  %v614_v8 = vmul.f32 0.2, %v468_v0  ;;  %vm598_vm12 = vcmp.gt.f32.partialorder %v532_v1, 0.0  ;;  %v470_v10 = vpop.f32.mrf.mxu0  ;;  %v534_v11 = vpop.f32.mrf.mxu1 }
  0xfc   : > { %696 = vst [vmem:[%s1519_s12 + $0xb0] sm:$0xff] %v664_v5  ;;  %v630_v9 = vmul.f32 0.2, %v532_v1  ;;  %vm585_vm13 = vcmp.gt.f32.partialorder %v479_v6, 0.0  ;;  %v617_v12 = vmul.f32 0.2, %v479_v6  ;;  %v471_v16 = vadd.f32 %v1511_v23, %v470_v10 }
  0xfd   : > { %vm601_vm14 = vcmp.gt.f32.partialorder %v543_v7, 0.0  ;;  %v633_v13 = vmul.f32 0.2, %v543_v7  ;;  %v646_v14 = vsel %vm582_vm11, %v468_v0, %v614_v8  ;;  %v535_v17 = vadd.f32 %v1511_v23, %v534_v11  ;;  %v1160_v18 = vpop.f32.mrf.mxu0  ;;  %v1176_v19 = vpop.f32.mrf.mxu1 }
  0xfe   : > { %v662_v15 = vsel %vm598_vm12, %v532_v1, %v630_v9  ;;  %678 = vst [vmem:[%s1519_s12 + $0x20] sm:$0xff] %v646_v14  ;;  %v649_v20 = vsel %vm585_vm13, %v479_v6, %v617_v12  ;;  %v492_v22 = vadd.f32 %v1160_v18, %v1511_v23  ;;  %v556_v24 = vadd.f32 %v1176_v19, %v1511_v23 }
  0xff   : > { %694 = vst [vmem:[%s1519_s12 + $0xa0] sm:$0xff] %v662_v15  ;;  %v665_v21 = vsel %vm601_vm14, %v543_v7, %v633_v13  ;;  %681 = vst [vmem:[%s1519_s12 + $0x38] sm:$0xff] %v649_v20  ;;  %vm583_vm15 = vcmp.gt.f32.partialorder %v471_v16, 0.0  ;;  %v615_v25 = vmul.f32 0.2, %v471_v16  ;;  %vm599_vm0 = vcmp.gt.f32.partialorder %v535_v17, 0.0  ;;  %v483_v27 = vpop.f32.mrf.mxu0  ;;  %v547_v28 = vpop.f32.mrf.mxu1 }
 0x100   : > { %697 = vst [vmem:[%s1519_s12 + $0xb8] sm:$0xff] %v665_v21  ;;  %v631_v26 = vmul.f32 0.2, %v535_v17  ;;  %vm588_vm1 = vcmp.gt.f32.partialorder %v492_v22, 0.0  ;;  %v620_v29 = vmul.f32 0.2, %v492_v22  ;;  %v484_v33 = vadd.f32 %v1511_v23, %v483_v27 }
 0x101   : > { %vm604_vm2 = vcmp.gt.f32.partialorder %v556_v24, 0.0  ;;  %v636_v30 = vmul.f32 0.2, %v556_v24  ;;  %v647_v31 = vsel %vm583_vm15, %v471_v16, %v615_v25  ;;  %v548_v34 = vadd.f32 %v1511_v23, %v547_v28  ;;  %v1161_v35 = vpop.f32.mrf.mxu0  ;;  %v1177_v36 = vpop.f32.mrf.mxu1 }
 0x102   : > { %v663_v32 = vsel %vm599_vm0, %v535_v17, %v631_v26  ;;  %679 = vst [vmem:[%s1519_s12 + $0x28] sm:$0xff] %v647_v31  ;;  %v652_v37 = vsel %vm588_vm1, %v492_v22, %v620_v29  ;;  %v495_v39 = vadd.f32 %v1161_v35, %v1511_v23  ;;  %v559_v40 = vadd.f32 %v1177_v36, %v1511_v23 }
 0x103   : > { %695 = vst [vmem:[%s1519_s12 + $0xa8] sm:$0xff] %v663_v32  ;;  %v668_v38 = vsel %vm604_vm2, %v556_v24, %v636_v30  ;;  %684 = vst [vmem:[%s1519_s12 + $0x50] sm:$0xff] %v652_v37  ;;  %vm586_vm3 = vcmp.gt.f32.partialorder %v484_v33, 0.0  ;;  %v618_v41 = vmul.f32 0.2, %v484_v33  ;;  %vm602_vm4 = vcmp.gt.f32.partialorder %v548_v34, 0.0  ;;  %v486_v43 = vpop.f32.mrf.mxu0  ;;  %v550_v44 = vpop.f32.mrf.mxu1 }
 0x104   : > { %700 = vst [vmem:[%s1519_s12 + $0xd0] sm:$0xff] %v668_v38  ;;  %v634_v42 = vmul.f32 0.2, %v548_v34  ;;  %vm589_vm5 = vcmp.gt.f32.partialorder %v495_v39, 0.0  ;;  %v621_v45 = vmul.f32 0.2, %v495_v39  ;;  %v487_v49 = vadd.f32 %v1511_v23, %v486_v43 }
 0x105   : > { %vm605_vm6 = vcmp.gt.f32.partialorder %v559_v40, 0.0  ;;  %v637_v46 = vmul.f32 0.2, %v559_v40  ;;  %v650_v47 = vsel %vm586_vm3, %v484_v33, %v618_v41  ;;  %v551_v50 = vadd.f32 %v1511_v23, %v550_v44  ;;  %v1164_v51 = vpop.f32.mrf.mxu0  ;;  %v1180_v52 = vpop.f32.mrf.mxu1 }
 0x106   : > { %v666_v48 = vsel %vm602_vm4, %v548_v34, %v634_v42  ;;  %682 = vst [vmem:[%s1519_s12 + $0x40] sm:$0xff] %v650_v47  ;;  %v653_v53 = vsel %vm589_vm5, %v495_v39, %v621_v45  ;;  %v508_v55 = vadd.f32 %v1164_v51, %v1511_v23  ;;  %v572_v56 = vadd.f32 %v1180_v52, %v1511_v23 }
 0x107   : > { %698 = vst [vmem:[%s1519_s12 + $0xc0] sm:$0xff] %v666_v48  ;;  %v669_v54 = vsel %vm605_vm6, %v559_v40, %v637_v46  ;;  %685 = vst [vmem:[%s1519_s12 + $0x58] sm:$0xff] %v653_v53  ;;  %vm587_vm7 = vcmp.gt.f32.partialorder %v487_v49, 0.0  ;;  %v619_v57 = vmul.f32 0.2, %v487_v49  ;;  %vm603_vm8 = vcmp.gt.f32.partialorder %v551_v50, 0.0  ;;  %v499_v59 = vpop.f32.mrf.mxu0  ;;  %v563_v60 = vpop.f32.mrf.mxu1 }
 0x108   : > { %701 = vst [vmem:[%s1519_s12 + $0xd8] sm:$0xff] %v669_v54  ;;  %v635_v58 = vmul.f32 0.2, %v551_v50  ;;  %vm592_vm9 = vcmp.gt.f32.partialorder %v508_v55, 0.0  ;;  %v624_v61 = vmul.f32 0.2, %v508_v55  ;;  %v500_v1 = vadd.f32 %v1511_v23, %v499_v59 }
 0x109   : > { %vm608_vm10 = vcmp.gt.f32.partialorder %v572_v56, 0.0  ;;  %v640_v62 = vmul.f32 0.2, %v572_v56  ;;  %v651_v63 = vsel %vm587_vm7, %v487_v49, %v619_v57  ;;  %v564_v2 = vadd.f32 %v1511_v23, %v563_v60  ;;  %v1165_v3 = vpop.f32.mrf.mxu0  ;;  %v1181_v4 = vpop.f32.mrf.mxu1 }
 0x10a   : > { %v667_v0 = vsel %vm603_vm8, %v551_v50, %v635_v58  ;;  %683 = vst [vmem:[%s1519_s12 + $0x48] sm:$0xff] %v651_v63  ;;  %v656_v5 = vsel %vm592_vm9, %v508_v55, %v624_v61  ;;  %v511_v7 = vadd.f32 %v1165_v3, %v1511_v23  ;;  %v575_v8 = vadd.f32 %v1181_v4, %v1511_v23 }
 0x10b   : > { %699 = vst [vmem:[%s1519_s12 + $0xc8] sm:$0xff] %v667_v0  ;;  %v672_v6 = vsel %vm608_vm10, %v572_v56, %v640_v62  ;;  %688 = vst [vmem:[%s1519_s12 + $0x70] sm:$0xff] %v656_v5  ;;  %vm590_vm11 = vcmp.gt.f32.partialorder %v500_v1, 0.0  ;;  %v622_v9 = vmul.f32 0.2, %v500_v1  ;;  %vm606_vm12 = vcmp.gt.f32.partialorder %v564_v2, 0.0  ;;  %v502_v11 = vpop.f32.mrf.mxu0  ;;  %v566_v12 = vpop.f32.mrf.mxu1 }
 0x10c   : > { %704 = vst [vmem:[%s1519_s12 + $0xf0] sm:$0xff] %v672_v6  ;;  %v638_v10 = vmul.f32 0.2, %v564_v2  ;;  %vm593_vm13 = vcmp.gt.f32.partialorder %v511_v7, 0.0  ;;  %v625_v13 = vmul.f32 0.2, %v511_v7  ;;  %v503_v17 = vadd.f32 %v1511_v23, %v502_v11 }
 0x10d   : > { %vm609_vm14 = vcmp.gt.f32.partialorder %v575_v8, 0.0  ;;  %v641_v14 = vmul.f32 0.2, %v575_v8  ;;  %v654_v15 = vsel %vm590_vm11, %v500_v1, %v622_v9  ;;  %v567_v18 = vadd.f32 %v1511_v23, %v566_v12 }
 0x10e   : > { %v670_v16 = vsel %vm606_vm12, %v564_v2, %v638_v10  ;;  %686 = vst [vmem:[%s1519_s12 + $0x60] sm:$0xff] %v654_v15  ;;  %v657_v19 = vsel %vm593_vm13, %v511_v7, %v625_v13  ;;  %vm591_vm15 = vcmp.gt.f32.partialorder %v503_v17, 0.0  ;;  %v623_v21 = vmul.f32 0.2, %v503_v17  ;;  %712 = sbr.rel (!%p1440_p4) target bundleno = 323 (0x143), region = 36 }
 0x10f   : > { %702 = vst [vmem:[%s1519_s12 + $0xe0] sm:$0xff] %v670_v16  ;;  %v673_v20 = vsel %vm609_vm14, %v575_v8, %v641_v14  ;;  %689 = vst [vmem:[%s1519_s12 + $0x78] sm:$0xff] %v657_v19  ;;  %vm607_vm0 = vcmp.gt.f32.partialorder %v567_v18, 0.0  ;;  %v639_v22 = vmul.f32 0.2, %v567_v18 }
 0x110   : > { %705 = vst [vmem:[%s1519_s12 + $0xf8] sm:$0xff] %v673_v20  ;;  %v655_v24 = vsel %vm591_vm15, %v503_v17, %v623_v21 }
 0x111   : > { %v671_v25 = vsel %vm607_vm0, %v567_v18, %v639_v22  ;;  %687 = vst [vmem:[%s1519_s12 + $0x68] sm:$0xff] %v655_v24 }
 0x112   : > { %703 = vst [vmem:[%s1519_s12 + $0xe8] sm:$0xff] %v671_v25 }
 0x113   : > { %s1732_s25 = smov (!%p715_p8, %s714_s25), 32 }
 0x114   : > { %s1095_s30 = sshll.u32 %s1732_s25, 7 }
 0x115   : > { %p1098_p9 = scmp.eq.s32.totalorder %s1095_s30, 0 }
 0x116   : > { %s1592_s4 = sshrl.u32 (!%p1098_p9), %s1732_s25, 5 }
 0x117   : > { %723 = sbr.rel (%p1098_p9) target bundleno = 323 (0x143), region = 40  ;;  %p1099_p10 = scmp.le.s32.totalorder (!%p1098_p9), %s1592_s4, 0 }
 0x11c   : > { %1002 = sbr.rel (%p1099_p10) target bundleno = 306 (0x132), region = 116  ;;  %s1723_s15 = smov (!%p1099_p10), %s1586_s29 }
 0x11d   : > { %s1724_s20 = smov (!%p1099_p10), %s1519_s12  ;;  %s1601_s23 = smov (!%p1099_p10), 0  }
 0x11e   : > { %s1603_s5 = smov (!%p1099_p10), 0  }
 0x121 LB: >> { %v848_v23 = vld [vmem:[%s1369_s20] sm:$0xff]  ;;  %v850_v26 = vld [vmem:[%s1369_s20 + $0x8] sm:$0xff]  ;;  %v852_v27 = vld [vmem:[%s1369_s20 + $0x10] sm:$0xff]  ;;  %s912_s6 = sadd.s32 1, %s1373_s23  ;;  %s842_s5 = sadd.s32 1, %s1377_s5   ;;  %s1377_s5 = sphi %s1603_s5, %s842_s5   ;;  %s1373_s23 = sphi %s1601_s23, %s1727_s23   ;;  %s1369_s20 = sphi %s1724_s20, %s1726_s20   ;;  %s1365_s15 = sphi %s1723_s15, %s1725_s15  }
 0x122   : >> { %849 = vst [vmem:[%s1365_s15] sm:$0xff] %v848_v23  ;;  %851 = vst [vmem:[%s1365_s15 + $0x8] sm:$0xff] %v850_v26  ;;  %v854_v28 = vld [vmem:[%s1369_s20 + $0x18] sm:$0xff]  ;;  %v856_v29 = vld [vmem:[%s1369_s20 + $0x20] sm:$0xff]  ;;  %p913_p11 = scmp.ge.s32.totalorder %s912_s6, %s1592_s4  ;;  %p841_p12 = scmp.ge.s32.totalorder %s842_s5, %s1592_s4 }
 0x123   : >> { %853 = vst [vmem:[%s1365_s15 + $0x10] sm:$0xff] %v852_v27  ;;  %v858_v30 = vld [vmem:[%s1369_s20 + $0x28] sm:$0xff]  ;;  %855 = vst [vmem:[%s1365_s15 + $0x18] sm:$0xff] %v854_v28  ;;  %v860_v31 = vld [vmem:[%s1369_s20 + $0x30] sm:$0xff] }
 0x124   : >> { %857 = vst [vmem:[%s1365_s15 + $0x20] sm:$0xff] %v856_v29  ;;  %859 = vst [vmem:[%s1365_s15 + $0x28] sm:$0xff] %v858_v30  ;;  %v862_v32 = vld [vmem:[%s1369_s20 + $0x38] sm:$0xff]  ;;  %v864_v33 = vld [vmem:[%s1369_s20 + $0x40] sm:$0xff]  ;;  %s1734_s6 = smov (%p913_p11, %s912_s6), 0 }
 0x125   : >> { %861 = vst [vmem:[%s1365_s15 + $0x30] sm:$0xff] %v860_v31  ;;  %863 = vst [vmem:[%s1365_s15 + $0x38] sm:$0xff] %v862_v32  ;;  %v866_v34 = vld [vmem:[%s1369_s20 + $0x48] sm:$0xff]  ;;  %v868_v35 = vld [vmem:[%s1369_s20 + $0x50] sm:$0xff]  ;;  %s1100_s7 = sshll.u32 %s1734_s6, 8  ;;  %s1727_s23 = smov %s1734_s6 }
 0x126   : >> { %865 = vst [vmem:[%s1365_s15 + $0x40] sm:$0xff] %v864_v33  ;;  %v870_v36 = vld [vmem:[%s1369_s20 + $0x58] sm:$0xff]  ;;  %867 = vst [vmem:[%s1365_s15 + $0x48] sm:$0xff] %v866_v34  ;;  %v872_v37 = vld [vmem:[%s1369_s20 + $0x60] sm:$0xff]  ;;  %s1659_s8 = scalar_lea.vmem %s1519_s12, %s1100_s7 [#allocation2]   ;;  %s918_s9 = scalar_lea.vmem %s1586_s29, %s1100_s7  }
 0x127   : >> { %869 = vst [vmem:[%s1365_s15 + $0x50] sm:$0xff] %v868_v35  ;;  %871 = vst [vmem:[%s1365_s15 + $0x58] sm:$0xff] %v870_v36  ;;  %v874_v38 = vld [vmem:[%s1369_s20 + $0x68] sm:$0xff]  ;;  %v876_v39 = vld [vmem:[%s1369_s20 + $0x70] sm:$0xff] }
 0x128   : >> { %873 = vst [vmem:[%s1365_s15 + $0x60] sm:$0xff] %v872_v37  ;;  %875 = vst [vmem:[%s1365_s15 + $0x68] sm:$0xff] %v874_v38  ;;  %v878_v40 = vld [vmem:[%s1369_s20 + $0x78] sm:$0xff]  ;;  %v880_v41 = vld [vmem:[%s1369_s20 + $0x80] sm:$0xff] }
 0x129   : >> { %877 = vst [vmem:[%s1365_s15 + $0x70] sm:$0xff] %v876_v39  ;;  %v882_v42 = vld [vmem:[%s1369_s20 + $0x88] sm:$0xff]  ;;  %879 = vst [vmem:[%s1365_s15 + $0x78] sm:$0xff] %v878_v40  ;;  %v884_v43 = vld [vmem:[%s1369_s20 + $0x90] sm:$0xff] }
 0x12a   : >> { %881 = vst [vmem:[%s1365_s15 + $0x80] sm:$0xff] %v880_v41  ;;  %883 = vst [vmem:[%s1365_s15 + $0x88] sm:$0xff] %v882_v42  ;;  %v886_v44 = vld [vmem:[%s1369_s20 + $0x98] sm:$0xff]  ;;  %v888_v45 = vld [vmem:[%s1369_s20 + $0xa0] sm:$0xff] }
 0x12b   : >> { %885 = vst [vmem:[%s1365_s15 + $0x90] sm:$0xff] %v884_v43  ;;  %887 = vst [vmem:[%s1365_s15 + $0x98] sm:$0xff] %v886_v44  ;;  %v890_v46 = vld [vmem:[%s1369_s20 + $0xa8] sm:$0xff]  ;;  %v892_v47 = vld [vmem:[%s1369_s20 + $0xb0] sm:$0xff] }
 0x12c   : >> { %889 = vst [vmem:[%s1365_s15 + $0xa0] sm:$0xff] %v888_v45  ;;  %v894_v48 = vld [vmem:[%s1369_s20 + $0xb8] sm:$0xff]  ;;  %891 = vst [vmem:[%s1365_s15 + $0xa8] sm:$0xff] %v890_v46  ;;  %v896_v49 = vld [vmem:[%s1369_s20 + $0xc0] sm:$0xff] }
 0x12d   : >> { %893 = vst [vmem:[%s1365_s15 + $0xb0] sm:$0xff] %v892_v47  ;;  %895 = vst [vmem:[%s1365_s15 + $0xb8] sm:$0xff] %v894_v48  ;;  %v898_v50 = vld [vmem:[%s1369_s20 + $0xc8] sm:$0xff]  ;;  %v900_v51 = vld [vmem:[%s1369_s20 + $0xd0] sm:$0xff]  ;;  %844 = sbr.rel (!%p841_p12) target bundleno = 289 (0x121), region = 122 }
 0x12e   : >> { %897 = vst [vmem:[%s1365_s15 + $0xc0] sm:$0xff] %v896_v49  ;;  %899 = vst [vmem:[%s1365_s15 + $0xc8] sm:$0xff] %v898_v50  ;;  %v902_v52 = vld [vmem:[%s1369_s20 + $0xd8] sm:$0xff]  ;;  %v904_v53 = vld [vmem:[%s1369_s20 + $0xe0] sm:$0xff] }
 0x12f   : >> { %901 = vst [vmem:[%s1365_s15 + $0xd0] sm:$0xff] %v900_v51  ;;  %v906_v54 = vld [vmem:[%s1369_s20 + $0xe8] sm:$0xff]  ;;  %903 = vst [vmem:[%s1365_s15 + $0xd8] sm:$0xff] %v902_v52  ;;  %v908_v55 = vld [vmem:[%s1369_s20 + $0xf0] sm:$0xff] }
 0x130   : >> { %905 = vst [vmem:[%s1365_s15 + $0xe0] sm:$0xff] %v904_v53  ;;  %907 = vst [vmem:[%s1365_s15 + $0xe8] sm:$0xff] %v906_v54  ;;  %v910_v56 = vld [vmem:[%s1369_s20 + $0xf8] sm:$0xff]  ;;  %s1726_s20 = smov %s1659_s8 }
 0x131   : >> { %909 = vst [vmem:[%s1365_s15 + $0xf0] sm:$0xff] %v908_v55  ;;  %911 = vst [vmem:[%s1365_s15 + $0xf8] sm:$0xff] %v910_v56  ;;  %s1725_s15 = smov %s918_s9 }
 0x132 PF: > { %s1700_s10 = sand.u32 31, %s1732_s25   ;;  %s1111_s11 = sshll.u32 %s1592_s4, 8 }
 0x133   : > { %s923_s14 = scalar_lea.vmem %s1519_s12, %s1111_s11 [#allocation2]   ;;  %s925_s17 = scalar_lea.vmem %s1586_s29, %s1111_s11  }
 0x134   : > { %p1105_p13 = scmp.le.s32.totalorder %s1700_s10, 0 }
 0x135   : > { %s1379_s18 = smov (!%p1105_p13), %s925_s17   ;;  %s1383_s21 = smov (!%p1105_p13), %s923_s14  }
 0x136   : > { %1016 = sbr.rel (%p1105_p13) target bundleno = 323 (0x143), region = 127  ;;  %s1387_s22 = smov (!%p1105_p13), 0  }
 0x137   : > { %s1391_s24 = smov (!%p1105_p13), 0  }
 0x13b LB: >> { %v935_v57 = vld [vmem:[%s1385_s21] sm:$0xff]  ;;  %s937_s25 = sadd.s32 1, %s1389_s22  ;;  %s929_s24 = sadd.s32 1, %s1393_s24   ;;  %s1393_s24 = sphi %s1391_s24, %s929_s24   ;;  %s1389_s22 = sphi %s1387_s22, %s1388_s22   ;;  %s1385_s21 = sphi %s1383_s21, %s942_s21   ;;  %s1381_s18 = sphi %s1379_s18, %s943_s18  }
 0x13c   : >> { %936 = vst [vmem:[%s1381_s18] sm:$0xff] %v935_v57  ;;  %p938_p0 = scmp.ge.s32.totalorder %s937_s25, %s1700_s10  ;;  %p928_p1 = scmp.ge.s32.totalorder %s929_s24, %s1700_s10 }
 0x13e   : >> { %s1736_s25 = smov (%p938_p0, %s937_s25), 0  ;;  %931 = sbr.rel (!%p928_p1) target bundleno = 315 (0x13b), region = 133 }
 0x13f   : >> { %s1106_s12 = sshll.u32 %s1736_s25, 3  ;;  %s1388_s22 = smov %s1736_s25  }
 0x140   : >> { %s942_s21 = scalar_lea.vmem %s923_s14, %s1106_s12 [#allocation2]   ;;  %s943_s18 = scalar_lea.vmem %s925_s17, %s1106_s12  }
 0x143 PF: > { %p10_p2 = scmp.ge.s32.totalorder %s1430_s16, 7   ;;  %s1728_s12 = smov %s1357_s13 }
 0x144   : > { %s1729_s13 = smov %s1438_s19  ;;  %s1730_s14 = smov %s1430_s16 }
 0x145   :  { %12 = sbr.rel (!%p10_p2) target bundleno = 2 (0x2), region = 144 }

// kernel: gaugan_discriminator_forward.9
= control target key start
LH: loop header
LB: loop body
LE: loop exit
PB: predicated region body
PF: predicated region fallthrough
CT: control target
= control target key end

     0   :  { %s2782_s12 = smov 0   ;;  %s2784_s13 = smov 0   ;;  %s3485_s0 = inlined_call_operand.vmem [shape: bf16[2,144,1024], index: 0, kind: input, shape index: {}]   ;;  %s3486_s1 = inlined_call_operand.vmem [shape: bf16[1024,128], index: 1, kind: input, shape index: {}]   ;;  %s3487_s2 = inlined_call_operand.vmem [shape: f32[2,144,128], index: 2, kind: output, shape index: {0}]   ;;  %s3488_s3 = inlined_call_operand.vmem [shape: f32[2,2,128], index: 3, kind: output, shape index: {1}]  }
   0x1   :  { %s2786_s14 = smov 0   ;;  %s2788_s15 = smov 0  }
   0x2   :  { %s2790_s16 = smov 0   ;;  %s2792_s17 = smov 0  }
   0x3   :  { %s2794_s18 = smov 0  }
   0x4 LB: > { %s23_s19 = sadd.s32 1, %s2719_s16  ;;  %s26_s20 = sadd.s32 1, %s2723_s17  ;;  %s2727_s18 = sphi %s2794_s18, %s14_s18   ;;  %s2723_s17 = sphi %s2792_s17, %s3532_s17   ;;  %s2719_s16 = sphi %s2790_s16, %s3531_s16   ;;  %s2715_s15 = sphi %s2788_s15, %s3530_s15   ;;  %s2711_s14 = sphi %s2786_s14, %s3529_s14   ;;  %s2707_s13 = sphi %s2784_s13, %s3528_s13   ;;  %s2703_s12 = sphi %s2782_s12, %s3527_s12  }
   0x5   : > { %p24_p0 = scmp.ge.s32.totalorder %s23_s19, 2  ;;  %s2039_s21 = sadd.s32 4294967295, %s2727_s18  }
   0x6   : > { %p94_p1 = scmp.ne.s32.totalorder %s2707_s13, %s2703_s12  ;;  %p95_p2 = scmp.eq.s32.totalorder %s2039_s21, 3 }
   0x7   : > { %s3534_s19 = smov (%p24_p0, %s23_s19), 0  ;;  %s3536_s20 = smov (!%p24_p0, %s26_s20), %s2723_s17 }
   0x8   : > { %s80_s22 = ssub.s32 %s2719_s16, %s3534_s19  ;;  %p28_p3 = scmp.ge.s32.totalorder %s3536_s20, 2 }
   0x9   : > { %p2043_p4 = scmp.ge.s32.totalorder %s2727_s18, 1  ;;  %p2828_p5 = por %p95_p2, %p94_p1 }
   0xa   : > { %p172_p6 = scmp.lt.s32.totalorder %s2727_s18, 5  ;;  %s3538_s20 = smov (%p28_p3, %s3536_s20), 0 }
   0xb   : > { %s79_s24 = ssub.s32 %s2723_s17, %s3538_s20  ;;  %s84_s26 = sadd.s32 1, %s2707_s13 }
   0xc   : > { %p173_p7 = pnand %p2043_p4, %p172_p6  ;;  %s81_s25 = sor.u32 %s80_s22, %s79_s24 }
   0xd   : > { %p82_p8 = scmp.eq.s32.totalorder %s81_s25, 0 }
   0xe   : > { %176 = sbr.rel (%p173_p7) target bundleno = 456 (0x1c8), region = 28 }
   0xf   : > { %s2839_s27 = scalar_select %p82_p8, %s2707_s13, %s84_s26  }
  0x13   : > { %s200_s28 = sand.u32 1, %s2703_s12   ;;  %s2843_s29 = sshll.u32 %s2711_s14, 4 }
  0x14   : > { %s2044_s30 = sshll.u32 %s200_s28, 7  ;;  %p215_p9 = scmp.lt.s32.totalorder %s2715_s15, 1 }
  0x15   : > { %p217_p10 = scmp.lt.s32.totalorder %s2843_s29, 17  ;;  %s2859_s26 = scalar_lea.vmem [#allocation2], %s2044_s30  }
  0x16   : > { %s216_s4 = scalar_select %p215_p9, %s2715_s15, 1 }
  0x17   : > { %s218_s5 = scalar_select %p217_p10, %s2843_s29, 17 }
  0x18   : > { %s2454_s6 = smul.u32 144, %s216_s4  ;;  %s2048_s7 = sshll.u32 %s216_s4, 1 }
  0x19   : > { %s2046_s8 = sshll.u32 %s218_s5, 3  ;;  %s2852_s11 = scalar_lea.vmem %s3488_s3, %s2048_s7 }
  0x1a   : > { %s221_s21 = sadd.s32 %s2454_s6, %s2046_s8  ;;  %p2049_p11 = scmp.ne.s32.totalorder %s2711_s14, 0 }
  0x1b   : > { %s2047_s22 = sshll.u32 %s221_s21, 2 }
  0x1c   : > { %s2857_s25 = scalar_lea.vmem %s3485_s0, %s2047_s22  ;;  %243 = sbr.rel (%p2049_p11) target bundleno = 35 (0x23), region = 32 }
  0x21   : > { %v2761_v0 = vmov 0.0  }
  0x22   : > { %244 = vst [vmem:[%s2852_s11] sm:$0x3] %v2761_v0 }
  0x23 PF: > { %v2577_v1 = vld [vmem:[%s3486_s1 + $0x78] sm:$0xff]   ;;  %v2581_v5 = vld [vmem:[%s3486_s1 + $0x70] sm:$0xff]   ;;  %v2585_v9 = vld [vmem:[%s3486_s1 + $0x68] sm:$0xff]   ;;  %s2455_s12 = smul.u32 (%p2828_p5), 18, %s2715_s15 }
  0x24   : > { %v2578_v2 = vld [vmem:[%s3486_s1 + $0xf8] sm:$0xff]   ;;  %2198 = vmatprep.subr.bf16.mxu0 %v2577_v1  ;;  %v2582_v6 = vld [vmem:[%s3486_s1 + $0xf0] sm:$0xff]   ;;  %v2586_v10 = vld [vmem:[%s3486_s1 + $0xe8] sm:$0xff]  }
  0x25   : > { %v2579_v3 = vld [vmem:[%s3486_s1 + $0x38] sm:$0xff]   ;;  %2262 = vmatprep.subr.bf16.mxu1 %v2578_v2  ;;  %v2583_v7 = vld [vmem:[%s3486_s1 + $0x30] sm:$0xff]   ;;  %v2587_v11 = vld [vmem:[%s3486_s1 + $0x28] sm:$0xff]   ;;  %s1725_s24 = sadd.s32 (%p2828_p5), %s2455_s12, %s2843_s29 }
  0x26   : > { %v2580_v4 = vld [vmem:[%s3486_s1 + $0xb8] sm:$0xff]   ;;  %2199 = vmatpush3.bf16.msra.mxu0 %v2579_v3  ;;  %v2584_v8 = vld [vmem:[%s3486_s1 + $0xb0] sm:$0xff]   ;;  %v2588_v12 = vld [vmem:[%s3486_s1 + $0xa8] sm:$0xff]   ;;  %s2183_s28 = sshll.u32 (%p2828_p5), %s1725_s24, 3 }
  0x27   : > { %2263 = vmatpush3.bf16.msra.mxu1 %v2580_v4  ;;  %2200 = vmatprep.subr.bf16.mxu0 %v2581_v5  ;;  %v2589_v13 = vld [vmem:[%s3486_s1 + $0x60] sm:$0xff]   ;;  %v2593_v17 = vld [vmem:[%s3486_s1 + $0x58] sm:$0xff]   ;;  %v2597_v21 = vld [vmem:[%s3486_s1 + $0x50] sm:$0xff]   ;;  %s3384_s7 = scalar_lea.vmem (%p2828_p5), %s3487_s2, %s2183_s28  }
  0x28   : > { %2264 = vmatprep.subr.bf16.mxu1 %v2582_v6  ;;  %v2590_v14 = vld [vmem:[%s3486_s1 + $0xe0] sm:$0xff]   ;;  %v2594_v18 = vld [vmem:[%s3486_s1 + $0xd8] sm:$0xff]   ;;  %v2598_v22 = vld [vmem:[%s3486_s1 + $0xd0] sm:$0xff]  }
  0x29   : > { %v2591_v15 = vld [vmem:[%s3486_s1 + $0x20] sm:$0xff]   ;;  %v2595_v19 = vld [vmem:[%s3486_s1 + $0x18] sm:$0xff]   ;;  %v2599_v23 = vld [vmem:[%s3486_s1 + $0x10] sm:$0xff]  }
  0x2a   : > { %2201 = vmatpush3.bf16.msra.mxu0 %v2583_v7  ;;  %v2592_v16 = vld [vmem:[%s3486_s1 + $0xa0] sm:$0xff]   ;;  %v2596_v20 = vld [vmem:[%s3486_s1 + $0x98] sm:$0xff]   ;;  %v2600_v24 = vld [vmem:[%s3486_s1 + $0x90] sm:$0xff]  }
  0x2b   : > { %2265 = vmatpush3.bf16.msra.mxu1 %v2584_v8  ;;  %2202 = vmatprep.subr.bf16.mxu0 %v2585_v9  ;;  %v2601_v25 = vld [vmem:[%s3486_s1 + $0x48] sm:$0xff]   ;;  %v2605_v29 = vld [vmem:[%s3486_s1 + $0x40] sm:$0xff]   ;;  %v2609_v41 = vld [vmem:[%s3486_s1 + $0x178] sm:$0xff]  }
  0x2c   : > { %2266 = vmatprep.subr.bf16.mxu1 %v2586_v10  ;;  %v2602_v26 = vld [vmem:[%s3486_s1 + $0xc8] sm:$0xff]   ;;  %v2606_v30 = vld [vmem:[%s3486_s1 + $0xc0] sm:$0xff]   ;;  %v2610_v42 = vld [vmem:[%s3486_s1 + $0x138] sm:$0xff]  }
  0x2d   : > { %v2603_v27 = vld [vmem:[%s3486_s1 + $0x8] sm:$0xff]   ;;  %v2607_v31 = vld [vmem:[%s3486_s1] sm:$0xff]   ;;  %v2611_v43 = vld [vmem:[%s3486_s1 + $0x1f8] sm:$0xff]  }
  0x2e   : > { %2203 = vmatpush3.bf16.msra.mxu0 %v2587_v11  ;;  %v2604_v28 = vld [vmem:[%s3486_s1 + $0x88] sm:$0xff]   ;;  %v2608_v32 = vld [vmem:[%s3486_s1 + $0x80] sm:$0xff]   ;;  %v2612_v44 = vld [vmem:[%s3486_s1 + $0x1b8] sm:$0xff]  }
  0x2f   : > { %2267 = vmatpush3.bf16.msra.mxu1 %v2588_v12  ;;  %2204 = vmatprep.subr.bf16.mxu0 %v2589_v13  ;;  %v245_v33 = vld [vmem:[%s2857_s25] sm:$0xff]  ;;  %v246_v35 = vld [vmem:[%s2857_s25 + $0x8] sm:$0xff]  ;;  %v2613_v51 = vld [vmem:[%s3486_s1 + $0x170] sm:$0xff]  }
  0x30   : > { %2268 = vmatprep.subr.bf16.mxu1 %v2590_v14  ;;  %v249_v34 = vld [vmem:[%s2857_s25 + $0x20] sm:$0xff]  ;;  %v250_v38 = vld [vmem:[%s2857_s25 + $0x28] sm:$0xff]  ;;  %v2614_v53 = vld [vmem:[%s3486_s1 + $0x130] sm:$0xff]  }
  0x31   : > { %v2050_v36 = vcombine.low %v245_v33, %v249_v34  ;;  %v2051_v37 = vcombine.high %v245_v33, %v249_v34  ;;  %v2052_v39 = vcombine.low %v246_v35, %v250_v38  ;;  %v2053_v40 = vcombine.high %v246_v35, %v250_v38  ;;  %v253_v45 = vld [vmem:[%s2857_s25 + $0x40] sm:$0xff]  ;;  %v254_v48 = vld [vmem:[%s2857_s25 + $0x48] sm:$0xff]  ;;  %v2615_v55 = vld [vmem:[%s3486_s1 + $0x1f0] sm:$0xff]  }
  0x32   : > { %2205 = vmatpush3.bf16.msra.mxu0 %v2591_v15  ;;  %v257_v46 = vld [vmem:[%s2857_s25 + $0x60] sm:$0xff]  ;;  %v258_v49 = vld [vmem:[%s2857_s25 + $0x68] sm:$0xff]  ;;  %v2616_v56 = vld [vmem:[%s3486_s1 + $0x1b0] sm:$0xff]  }
  0x33   : > { %2269 = vmatpush3.bf16.msra.mxu1 %v2592_v16  ;;  %2206 = vmatprep.subr.bf16.mxu0 %v2593_v17  ;;  %v2059_v47 = vcombine.high %v253_v45, %v257_v46  ;;  %v2061_v50 = vcombine.high %v254_v48, %v258_v49  ;;  %v2058_v52 = vcombine.low %v253_v45, %v257_v46  ;;  %v261_v57 = vld [vmem:[%s2857_s25 + $0x80] sm:$0xff]  ;;  %v262_v59 = vld [vmem:[%s2857_s25 + $0x88] sm:$0xff]  ;;  %v2631_v33 = vld [vmem:[%s3486_s1 + $0x1d0] sm:$0xff]  }
  0x34   : > { %2270 = vmatprep.subr.bf16.mxu1 %v2594_v18  ;;  %1173 = vmatprep.mubr.bf16.mxu0 %v2051_v37  ;;  %v2060_v54 = vcombine.low %v254_v48, %v258_v49  ;;  %v265_v58 = vld [vmem:[%s2857_s25 + $0xa0] sm:$0xff]  ;;  %v266_v60 = vld [vmem:[%s2857_s25 + $0xa8] sm:$0xff]  ;;  %v2632_v34 = vld [vmem:[%s3486_s1 + $0x190] sm:$0xff]  }
  0x35   : > { %1270 = vmatprep.mubr.bf16.mxu1 %v2053_v40  ;;  %v2067_v61 = vcombine.high %v261_v57, %v265_v58  ;;  %v2069_v62 = vcombine.high %v262_v59, %v266_v60  ;;  %v2617_v63 = vld [vmem:[%s3486_s1 + $0x168] sm:$0xff]   ;;  %v2066_v3 = vcombine.low %v261_v57, %v265_v58  ;;  %v269_v4 = vld [vmem:[%s2857_s25 + $0xc0] sm:$0xff]  ;;  %v2068_v7 = vcombine.low %v262_v59, %v266_v60 }
  0x36   : > { %2207 = vmatpush3.bf16.msra.mxu0 %v2595_v19  ;;  %v2618_v0 = vld [vmem:[%s3486_s1 + $0x128] sm:$0xff]   ;;  %v273_v5 = vld [vmem:[%s2857_s25 + $0xe0] sm:$0xff]  ;;  %v2625_v19 = vld [vmem:[%s3486_s1 + $0x158] sm:$0xff]  }
  0x37   : > { %2271 = vmatpush3.bf16.msra.mxu1 %v2596_v20  ;;  %2208 = vmatprep.subr.bf16.mxu0 %v2597_v21  ;;  %v2619_v1 = vld [vmem:[%s3486_s1 + $0x1e8] sm:$0xff]   ;;  %v2075_v8 = vcombine.high %v269_v4, %v273_v5  ;;  %v2621_v11 = vld [vmem:[%s3486_s1 + $0x160] sm:$0xff]   ;;  %v2074_v20 = vcombine.low %v269_v4, %v273_v5  ;;  %v2626_v21 = vld [vmem:[%s3486_s1 + $0x118] sm:$0xff]  }
  0x38   : > { %2272 = vmatprep.subr.bf16.mxu1 %v2598_v22  ;;  %v2620_v2 = vld [vmem:[%s3486_s1 + $0x1a8] sm:$0xff]   ;;  %v2622_v12 = vld [vmem:[%s3486_s1 + $0x120] sm:$0xff]  }
  0x39   : > { %v270_v6 = vld [vmem:[%s2857_s25 + $0xc8] sm:$0xff]  ;;  %v2623_v13 = vld [vmem:[%s3486_s1 + $0x1e0] sm:$0xff]  }
  0x3a   : > { %2209 = vmatpush3.bf16.msra.mxu0 %v2599_v23  ;;  %v274_v9 = vld [vmem:[%s2857_s25 + $0xe8] sm:$0xff]  ;;  %v2624_v14 = vld [vmem:[%s3486_s1 + $0x1a0] sm:$0xff]  }
  0x3b   : > { %2273 = vmatpush3.bf16.msra.mxu1 %v2600_v24  ;;  %2210 = vmatprep.subr.bf16.mxu0 %v2601_v25  ;;  %v2077_v10 = vcombine.high %v270_v6, %v274_v9  ;;  %v277_v15 = vld [vmem:[%s2857_s25 + $0x100] sm:$0xff]  ;;  %v278_v17 = vld [vmem:[%s2857_s25 + $0x108] sm:$0xff]  ;;  %v2076_v22 = vcombine.low %v270_v6, %v274_v9  ;;  %v2627_v24 = vld [vmem:[%s3486_s1 + $0x1d8] sm:$0xff]  }
  0x3c   : > { %2274 = vmatprep.subr.bf16.mxu1 %v2602_v26  ;;  %v281_v16 = vld [vmem:[%s2857_s25 + $0x120] sm:$0xff]  ;;  %v282_v18 = vld [vmem:[%s2857_s25 + $0x128] sm:$0xff]  ;;  %v2628_v26 = vld [vmem:[%s3486_s1 + $0x198] sm:$0xff]  }
  0x3d   : > { %v2083_v23 = vcombine.high %v277_v15, %v281_v16  ;;  %v2085_v25 = vcombine.high %v278_v17, %v282_v18  ;;  %v2082_v35 = vcombine.low %v277_v15, %v281_v16  ;;  %v2634_v40 = vld [vmem:[%s3486_s1 + $0x108] sm:$0xff]   ;;  %v2638_v49 = vld [vmem:[%s3486_s1 + $0x100] sm:$0xff]   ;;  %v256_v9 = vld [vmem:[%s2857_s25 + $0x58] sm:$0xff] }
  0x3e   : > { %2211 = vmatpush3.bf16.msra.mxu0 %v2603_v27  ;;  %v285_v27 = vld [vmem:[%s2857_s25 + $0x140] sm:$0xff]  ;;  %v294_v45 = vld [vmem:[%s2857_s25 + $0x188] sm:$0xff]  ;;  %v263_v15 = vld [vmem:[%s2857_s25 + $0x90] sm:$0xff] }
  0x3f   : > { %2275 = vmatpush3.bf16.msra.mxu1 %v2604_v28  ;;  %2212 = vmatprep.subr.bf16.mxu0 %v2605_v29  ;;  %v289_v28 = vld [vmem:[%s2857_s25 + $0x160] sm:$0xff]  ;;  %v2629_v29 = vld [vmem:[%s3486_s1 + $0x150] sm:$0xff]   ;;  %v298_v46 = vld [vmem:[%s2857_s25 + $0x1a8] sm:$0xff] }
  0x40   : > { %2276 = vmatprep.subr.bf16.mxu1 %v2606_v30  ;;  %v286_v30 = vld [vmem:[%s2857_s25 + $0x148] sm:$0xff]  ;;  %v2091_v37 = vcombine.high %v285_v27, %v289_v28  ;;  %v2090_v48 = vcombine.low %v285_v27, %v289_v28  ;;  %v2100_v60 = vcombine.low %v294_v45, %v298_v46  ;;  %v267_v16 = vld [vmem:[%s2857_s25 + $0xb0] sm:$0xff] }
  0x41   : > { %v302_v57 = vld [vmem:[%s2857_s25 + $0x1c8] sm:$0xff]  ;;  %v2070_v27 = vcombine.low %v263_v15, %v267_v16 }
  0x42   : > { %2213 = vmatpush3.bf16.msra.mxu0 %v2607_v31  ;;  %v290_v31 = vld [vmem:[%s2857_s25 + $0x168] sm:$0xff] }
  0x43   : > { %2277 = vmatpush3.bf16.msra.mxu1 %v2608_v32  ;;  %2326 = vmatprep.subr.bf16.mxu0 %v2609_v41  ;;  %v2630_v32 = vld [vmem:[%s3486_s1 + $0x110] sm:$0xff]   ;;  %v2093_v38 = vcombine.high %v286_v30, %v290_v31  ;;  %v2635_v41 = vld [vmem:[%s3486_s1 + $0x1c8] sm:$0xff]  }
  0x44   : > { %2390 = vmatprep.subr.bf16.mxu1 %v2611_v43  ;;  %v297_v43 = vld [vmem:[%s2857_s25 + $0x1a0] sm:$0xff]  ;;  %v306_v58 = vld [vmem:[%s2857_s25 + $0x1e8] sm:$0xff] }
  0x45   : > { %1174 = vmatmul.mubr.bf16.vlgmr.msra.gmra.mxu0 %v2050_v36  ;;  %v2084_v36 = vcombine.low %v278_v17, %v282_v18  ;;  %v2108_v4 = vcombine.low %v302_v57, %v306_v58  ;;  %v264_v17 = vld [vmem:[%s2857_s25 + $0x98] sm:$0xff] }
  0x46   : > { %1271 = vmatmul.mubr.bf16.vlgmr.msra.gmra.mxu1 %v2052_v39  ;;  %2327 = vmatpush3.bf16.msra.mxu0 %v2610_v42  ;;  %v2633_v39 = vld [vmem:[%s3486_s1 + $0x148] sm:$0xff]   ;;  %v293_v42 = vld [vmem:[%s2857_s25 + $0x180] sm:$0xff]  ;;  %v268_v18 = vld [vmem:[%s2857_s25 + $0xb8] sm:$0xff] }
  0x47   : > { %2391 = vmatpush3.bf16.msra.mxu1 %v2612_v44  ;;  %1181 = vmatprep.mubr.bf16.mxu0 %v2059_v47  ;;  %v2636_v44 = vld [vmem:[%s3486_s1 + $0x188] sm:$0xff]   ;;  %v2637_v47 = vld [vmem:[%s3486_s1 + $0x140] sm:$0xff]   ;;  %v2098_v59 = vcombine.low %v293_v42, %v297_v43  ;;  %v2072_v28 = vcombine.low %v264_v17, %v268_v18 }
  0x48   : > { %1278 = vmatprep.mubr.bf16.mxu1 %v2061_v50  ;;  %2328 = vmatprep.subr.bf16.mxu0 %v2613_v51  ;;  %v2092_v50 = vcombine.low %v286_v30, %v290_v31  ;;  %v2099_v51 = vcombine.high %v293_v42, %v297_v43  ;;  %v279_v31 = vld [vmem:[%s2857_s25 + $0x110] sm:$0xff]  ;;  %v292_v42 = vld [vmem:[%s2857_s25 + $0x178] sm:$0xff] }
  0x49   : > { %2392 = vmatprep.subr.bf16.mxu1 %v2615_v55  ;;  %v301_v55 = vld [vmem:[%s2857_s25 + $0x1c0] sm:$0xff] }
  0x4a   : > { %2329 = vmatpush3.bf16.msra.mxu0 %v2614_v53  ;;  %v2101_v53 = vcombine.high %v294_v45, %v298_v46 }
  0x4b   : > { %2393 = vmatpush3.bf16.msra.mxu1 %v2616_v56  ;;  %2330 = vmatprep.subr.bf16.mxu0 %v2617_v63  ;;  %v305_v56 = vld [vmem:[%s2857_s25 + $0x1e0] sm:$0xff]  ;;  %v247_v63 = vld [vmem:[%s2857_s25 + $0x10] sm:$0xff] }
  0x4c   : > { %2394 = vmatprep.subr.bf16.mxu1 %v2619_v1  ;;  %v248_v1 = vld [vmem:[%s2857_s25 + $0x18] sm:$0xff] }
  0x4d   : > { %1182 = vmatmul.mubr.bf16.gmra.mxu0 %v2058_v52  ;;  %v2639_v52 = vld [vmem:[%s3486_s1 + $0x1c0] sm:$0xff]  }
  0x4e   : > { %1279 = vmatmul.mubr.bf16.gmra.mxu1 %v2060_v54  ;;  %1189 = vmatprep.mubr.bf16.mxu0 %v2067_v61  ;;  %v2640_v54 = vld [vmem:[%s3486_s1 + $0x180] sm:$0xff]   ;;  %v2107_v61 = vcombine.high %v301_v55, %v305_v56 }
  0x4f   : > { %1286 = vmatprep.mubr.bf16.mxu1 %v2069_v62  ;;  %2331 = vmatpush3.bf16.msra.mxu0 %v2618_v0  ;;  %v2109_v62 = vcombine.high %v302_v57, %v306_v58  ;;  %v251_v0 = vld [vmem:[%s2857_s25 + $0x30] sm:$0xff]  ;;  %v304_v57 = vld [vmem:[%s2857_s25 + $0x1d8] sm:$0xff] }
  0x50   : > { %2395 = vmatpush3.bf16.msra.mxu1 %v2620_v2  ;;  %2332 = vmatprep.subr.bf16.mxu0 %v2621_v11  ;;  %v252_v2 = vld [vmem:[%s2857_s25 + $0x38] sm:$0xff]  ;;  %v2055_v5 = vcombine.high %v247_v63, %v251_v0  ;;  %v2054_v11 = vcombine.low %v247_v63, %v251_v0 }
  0x51   : > { %2396 = vmatprep.subr.bf16.mxu1 %v2623_v13  ;;  %v2057_v6 = vcombine.high %v248_v1, %v252_v2  ;;  %v308_v58 = vld [vmem:[%s2857_s25 + $0x1f8] sm:$0xff] }
  0x52   : > { %v2112_v0 = vcombine.low %v304_v57, %v308_v58 }
  0x53   : > { %2333 = vmatpush3.bf16.msra.mxu0 %v2622_v12  ;;  %v2056_v12 = vcombine.low %v248_v1, %v252_v2 }
  0x54   : > { %2397 = vmatpush3.bf16.msra.mxu1 %v2624_v14  ;;  %2334 = vmatprep.subr.bf16.mxu0 %v2625_v19 }
  0x55   : > { %1190 = vmatmul.mubr.bf16.gmra.mxu0 %v2066_v3  ;;  %2398 = vmatprep.subr.bf16.mxu1 %v2627_v24  ;;  %v2106_v3 = vcombine.low %v301_v55, %v305_v56  ;;  %v275_v24 = vld [vmem:[%s2857_s25 + $0xf0] sm:$0xff] }
  0x56   : > { %1287 = vmatmul.mubr.bf16.gmra.mxu1 %v2068_v7  ;;  %1197 = vmatprep.mubr.bf16.mxu0 %v2075_v8  ;;  %v255_v7 = vld [vmem:[%s2857_s25 + $0x50] sm:$0xff] }
  0x57   : > { %1294 = vmatprep.mubr.bf16.mxu1 %v2077_v10  ;;  %2335 = vmatpush3.bf16.msra.mxu0 %v2626_v21  ;;  %v259_v8 = vld [vmem:[%s2857_s25 + $0x70] sm:$0xff]  ;;  %v260_v10 = vld [vmem:[%s2857_s25 + $0x78] sm:$0xff]  ;;  %v2071_v21 = vcombine.high %v263_v15, %v267_v16 }
  0x58   : > { %2399 = vmatpush3.bf16.msra.mxu1 %v2628_v26  ;;  %2336 = vmatprep.subr.bf16.mxu0 %v2629_v29  ;;  %v2063_v13 = vcombine.high %v255_v7, %v259_v8  ;;  %v2065_v14 = vcombine.high %v256_v9, %v260_v10  ;;  %v2062_v19 = vcombine.low %v255_v7, %v259_v8  ;;  %v276_v26 = vld [vmem:[%s2857_s25 + $0xf8] sm:$0xff]  ;;  %v303_v55 = vld [vmem:[%s2857_s25 + $0x1d0] sm:$0xff] }
  0x59   : > { %2400 = vmatprep.subr.bf16.mxu1 %v2631_v33  ;;  %v280_v33 = vld [vmem:[%s2857_s25 + $0x118] sm:$0xff]  ;;  %v307_v56 = vld [vmem:[%s2857_s25 + $0x1f0] sm:$0xff] }
  0x5a   : > { %v2110_v63 = vcombine.low %v303_v55, %v307_v56 }
  0x5b   : > { %2337 = vmatpush3.bf16.msra.mxu0 %v2630_v32  ;;  %v283_v32 = vld [vmem:[%s2857_s25 + $0x130] sm:$0xff] }
  0x5c   : > { %2401 = vmatpush3.bf16.msra.mxu1 %v2632_v34  ;;  %2338 = vmatprep.subr.bf16.mxu0 %v2633_v39  ;;  %v284_v34 = vld [vmem:[%s2857_s25 + $0x138] sm:$0xff]  ;;  %v287_v39 = vld [vmem:[%s2857_s25 + $0x150] sm:$0xff]  ;;  %v2086_v43 = vcombine.low %v279_v31, %v283_v32 }
  0x5d   : > { %1198 = vmatmul.mubr.bf16.gmra.mxu0 %v2074_v20  ;;  %2402 = vmatprep.subr.bf16.mxu1 %v2635_v41  ;;  %v2064_v20 = vcombine.low %v256_v9, %v260_v10  ;;  %v288_v41 = vld [vmem:[%s2857_s25 + $0x158] sm:$0xff] }
  0x5e   : > { %1295 = vmatmul.mubr.bf16.gmra.mxu1 %v2076_v22  ;;  %1205 = vmatprep.mubr.bf16.mxu0 %v2083_v23  ;;  %v2073_v22 = vcombine.high %v264_v17, %v268_v18  ;;  %v271_v23 = vld [vmem:[%s2857_s25 + $0xd0] sm:$0xff]  ;;  %v2097_v46 = vcombine.high %v288_v41, %v292_v42 }
  0x5f   : > { %1302 = vmatprep.mubr.bf16.mxu1 %v2085_v25  ;;  %2339 = vmatpush3.bf16.msra.mxu0 %v2634_v40  ;;  %v272_v25 = vld [vmem:[%s2857_s25 + $0xd8] sm:$0xff]  ;;  %v2079_v29 = vcombine.high %v271_v23, %v275_v24  ;;  %v291_v40 = vld [vmem:[%s2857_s25 + $0x170] sm:$0xff] }
  0x60   : > { %2403 = vmatpush3.bf16.msra.mxu1 %v2636_v44  ;;  %2340 = vmatprep.subr.bf16.mxu0 %v2637_v47  ;;  %v2081_v30 = vcombine.high %v272_v25, %v276_v26  ;;  %v2088_v44 = vcombine.low %v280_v33, %v284_v34  ;;  %v2095_v45 = vcombine.high %v287_v39, %v291_v40  ;;  %v295_v47 = vld [vmem:[%s2857_s25 + $0x190] sm:$0xff] }
  0x61   : > { %2404 = vmatprep.subr.bf16.mxu1 %v2639_v52  ;;  %v2096_v52 = vcombine.low %v288_v41, %v292_v42 }
  0x63   : > { %2341 = vmatpush3.bf16.msra.mxu0 %v2638_v49  ;;  %v296_v49 = vld [vmem:[%s2857_s25 + $0x198] sm:$0xff] }
  0x64   : > { %2405 = vmatpush3.bf16.msra.mxu1 %v2640_v54 }
  0x65   : > { %1206 = vmatmul.mubr.bf16.gmra.mxu0 %v2082_v35  ;;  %v2078_v35 = vcombine.low %v271_v23, %v275_v24 }
  0x66   : > { %1303 = vmatmul.mubr.bf16.gmra.mxu1 %v2084_v36  ;;  %1213 = vmatprep.mubr.bf16.mxu0 %v2091_v37  ;;  %v2080_v36 = vcombine.low %v272_v25, %v276_v26  ;;  %v2087_v37 = vcombine.high %v279_v31, %v283_v32 }
  0x67   : > { %1310 = vmatprep.mubr.bf16.mxu1 %v2093_v38  ;;  %v2089_v38 = vcombine.high %v280_v33, %v284_v34 }
  0x6d   : > { %1214 = vmatmul.mubr.bf16.gmra.mxu0 %v2090_v48  ;;  %v299_v48 = vld [vmem:[%s2857_s25 + $0x1b0] sm:$0xff] }
  0x6e   : > { %1311 = vmatmul.mubr.bf16.gmra.mxu1 %v2092_v50  ;;  %1221 = vmatprep.mubr.bf16.mxu0 %v2099_v51  ;;  %v300_v50 = vld [vmem:[%s2857_s25 + $0x1b8] sm:$0xff]  ;;  %v2094_v51 = vcombine.low %v287_v39, %v291_v40  ;;  %s2178_s25 = sshll.u32 %s2711_s14, 7  ;;  %s1719_s14 = ssub.s32 (%p2828_p5), 18, %s2843_s29 }
  0x6f   : > { %1318 = vmatprep.mubr.bf16.mxu1 %v2101_v53  ;;  %v2103_v53 = vcombine.high %v295_v47, %v299_v48  ;;  %v2105_v54 = vcombine.high %v296_v49, %v300_v50  ;;  %p1720_p12 = scmp.lt.s32.totalorder (%p2828_p5), %s1719_s14, 16 }
  0x75   : > { %1222 = vmatmul.mubr.bf16.gmra.mxu0 %v2098_v59  ;;  %v2102_v59 = vcombine.low %v295_v47, %v299_v48 }
  0x76   : > { %1319 = vmatmul.mubr.bf16.gmra.mxu1 %v2100_v60  ;;  %1229 = vmatprep.mubr.bf16.mxu0 %v2107_v61  ;;  %v2104_v60 = vcombine.low %v296_v49, %v300_v50  ;;  %v2111_v61 = vcombine.high %v303_v55, %v307_v56 }
  0x77   : > { %1326 = vmatprep.mubr.bf16.mxu1 %v2109_v62  ;;  %v2113_v62 = vcombine.high %v304_v57, %v308_v58 }
  0x7d   : > { %1230 = vmatmul.mubr.bf16.gmra.mxu0 %v2106_v3 }
  0x7e   : > { %1327 = vmatmul.mubr.bf16.gmra.mxu1 %v2108_v4  ;;  %1367 = vmatprep.mubr.bf16.mxu0 %v2055_v5 }
  0x7f   : > { %1464 = vmatprep.mubr.bf16.mxu1 %v2057_v6 }
  0x85   : > { %1368 = vmatmul.mubr.bf16.vlgmr.msra.gmra.mxu0 %v2054_v11 }
  0x86   : > { %1465 = vmatmul.mubr.bf16.vlgmr.msra.gmra.mxu1 %v2056_v12  ;;  %1375 = vmatprep.mubr.bf16.mxu0 %v2063_v13 }
  0x87   : > { %1472 = vmatprep.mubr.bf16.mxu1 %v2065_v14 }
  0x8d   : > { %1376 = vmatmul.mubr.bf16.gmra.mxu0 %v2062_v19 }
  0x8e   : > { %1473 = vmatmul.mubr.bf16.gmra.mxu1 %v2064_v20  ;;  %1383 = vmatprep.mubr.bf16.mxu0 %v2071_v21 }
  0x8f   : > { %1480 = vmatprep.mubr.bf16.mxu1 %v2073_v22 }
  0x95   : > { %1384 = vmatmul.mubr.bf16.gmra.mxu0 %v2070_v27 }
  0x96   : > { %1481 = vmatmul.mubr.bf16.gmra.mxu1 %v2072_v28  ;;  %1391 = vmatprep.mubr.bf16.mxu0 %v2079_v29 }
  0x97   : > { %1488 = vmatprep.mubr.bf16.mxu1 %v2081_v30 }
  0x9d   : > { %1392 = vmatmul.mubr.bf16.gmra.mxu0 %v2078_v35 }
  0x9e   : > { %1489 = vmatmul.mubr.bf16.gmra.mxu1 %v2080_v36  ;;  %1399 = vmatprep.mubr.bf16.mxu0 %v2087_v37 }
  0x9f   : > { %1496 = vmatprep.mubr.bf16.mxu1 %v2089_v38 }
  0xa5   : > { %1400 = vmatmul.mubr.bf16.gmra.mxu0 %v2086_v43 }
  0xa6   : > { %1497 = vmatmul.mubr.bf16.gmra.mxu1 %v2088_v44  ;;  %1407 = vmatprep.mubr.bf16.mxu0 %v2095_v45 }
  0xa7   : > { %1504 = vmatprep.mubr.bf16.mxu1 %v2097_v46 }
  0xad   : > { %1408 = vmatmul.mubr.bf16.gmra.mxu0 %v2094_v51 }
  0xae   : > { %1505 = vmatmul.mubr.bf16.gmra.mxu1 %v2096_v52  ;;  %1415 = vmatprep.mubr.bf16.mxu0 %v2103_v53 }
  0xaf   : > { %1512 = vmatprep.mubr.bf16.mxu1 %v2105_v54 }
  0xb5   : > { %1416 = vmatmul.mubr.bf16.gmra.mxu0 %v2102_v59 }
  0xb6   : > { %1513 = vmatmul.mubr.bf16.gmra.mxu1 %v2104_v60  ;;  %1423 = vmatprep.mubr.bf16.mxu0 %v2111_v61 }
  0xb7   : > { %1520 = vmatprep.mubr.bf16.mxu1 %v2113_v62  ;;  %v1545_v62 = vlaneseq }
  0xbd   : > { %1424 = vmatmul.mubr.bf16.gmra.mxu0 %v2110_v63 }
  0xbe   : > { %1521 = vmatmul.mubr.bf16.gmra.mxu1 %v2112_v0 }
 0x105   : > { %v3119_v1 = vpop.f32.mrf.mxu0 }
 0x106   : > { %v3121_v2 = vpop.f32.mrf.mxu1 }
 0x107   : > { %v3123_v3 = vpop.f32.mrf.mxu0 }
 0x108   : > { %v3125_v4 = vpop.f32.mrf.mxu1 }
 0x109   : > { %v3127_v5 = vpop.f32.mrf.mxu0 }
 0x10a   : > { %v3129_v6 = vpop.f32.mrf.mxu1 }
 0x10b   : > { %v3131_v7 = vpop.f32.mrf.mxu0 }
 0x10c   : > { %v3133_v8 = vpop.f32.mrf.mxu1 }
 0x10d   : > { %v3135_v9 = vpop.f32.mrf.mxu0 }
 0x10e   : > { %v3137_v10 = vpop.f32.mrf.mxu1 }
 0x10f   : > { %v3139_v11 = vpop.f32.mrf.mxu0 }
 0x110   : > { %v3141_v12 = vpop.f32.mrf.mxu1 }
 0x111   : > { %v3143_v13 = vpop.f32.mrf.mxu0 }
 0x112   : > { %v3145_v14 = vpop.f32.mrf.mxu1 }
 0x113   : > { %v3147_v15 = vpop.f32.mrf.mxu0 }
 0x114   : > { %v3149_v16 = vpop.f32.mrf.mxu1 }
 0x115   : > { %v3151_v17 = vpop.f32.mrf.mxu0 }
 0x116   : > { %v3153_v18 = vpop.f32.mrf.mxu1 }
 0x117   : > { %v3155_v19 = vpop.f32.mrf.mxu0 }
 0x118   : > { %v3157_v20 = vpop.f32.mrf.mxu1 }
 0x119   : > { %v3159_v21 = vpop.f32.mrf.mxu0 }
 0x11a   : > { %v3161_v22 = vpop.f32.mrf.mxu1 }
 0x11b   : > { %v3163_v23 = vpop.f32.mrf.mxu0 }
 0x11c   : > { %v3165_v24 = vpop.f32.mrf.mxu1 }
 0x11d   : > { %v3167_v25 = vpop.f32.mrf.mxu0 }
 0x11e   : > { %v3169_v26 = vpop.f32.mrf.mxu1 }
 0x11f   : > { %v3171_v27 = vpop.f32.mrf.mxu0 }
 0x120   : > { %v3173_v28 = vpop.f32.mrf.mxu1 }
 0x121   : > { %v3175_v29 = vpop.f32.mrf.mxu0 }
 0x122   : > { %v3177_v30 = vpop.f32.mrf.mxu1 }
 0x123   : > { %v3179_v31 = vpop.f32.mrf.mxu0 }
 0x124   : > { %v3181_v32 = vpop.f32.mrf.mxu1 }
 0x125   : > { %v3183_v33 = vpop.f32.mrf.mxu0 }
 0x126   : > { %v3185_v34 = vpop.f32.mrf.mxu1 }
 0x127   : > { %v3187_v35 = vpop.f32.mrf.mxu0 }
 0x128   : > { %v3189_v36 = vpop.f32.mrf.mxu1 }
 0x129   : > { %v3191_v37 = vpop.f32.mrf.mxu0 }
 0x12a   : > { %v3193_v38 = vpop.f32.mrf.mxu1 }
 0x12b   : > { %v3195_v39 = vpop.f32.mrf.mxu0 }
 0x12c   : > { %v3197_v40 = vpop.f32.mrf.mxu1 }
 0x12d   : > { %v3199_v41 = vpop.f32.mrf.mxu0 }
 0x12e   : > { %v3201_v42 = vpop.f32.mrf.mxu1 }
 0x12f   : > { %v3203_v43 = vpop.f32.mrf.mxu0 }
 0x130   : > { %v3205_v44 = vpop.f32.mrf.mxu1 }
 0x131   : > { %v3207_v45 = vpop.f32.mrf.mxu0 }
 0x132   : > { %v3209_v46 = vpop.f32.mrf.mxu1 }
 0x133   : > { %v3211_v47 = vpop.f32.mrf.mxu0 }
 0x134   : > { %v3213_v48 = vpop.f32.mrf.mxu1 }
 0x135   : > { %3490 = vst [vmem:[#allocation3_spill] sm:$0xff] %v3213_v48  ;;  %v3215_v49 = vpop.f32.mrf.mxu0 }
 0x136   : > { %3491 = vst [vmem:[#allocation4_spill] sm:$0xff] %v3215_v49  ;;  %v3217_v50 = vpop.f32.mrf.mxu1 }
 0x137   : > { %3492 = vst [vmem:[#allocation5_spill] sm:$0xff] %v3217_v50  ;;  %v3219_v51 = vpop.f32.mrf.mxu0 }
 0x138   : > { %3493 = vst [vmem:[#allocation6_spill] sm:$0xff] %v3219_v51  ;;  %v3221_v52 = vpop.f32.mrf.mxu1 }
 0x139   : > { %3494 = vst [vmem:[#allocation7_spill] sm:$0xff] %v3221_v52  ;;  %v3223_v53 = vpop.f32.mrf.mxu0 }
 0x13a   : > { %3495 = vst [vmem:[#allocation8_spill] sm:$0xff] %v3223_v53  ;;  %v3225_v54 = vpop.f32.mrf.mxu1 }
 0x13b   : > { %3496 = vst [vmem:[#allocation9_spill] sm:$0xff] %v3225_v54  ;;  %v3227_v55 = vpop.f32.mrf.mxu0  ;;  %v2216_v54 = vadd.f32 %v3123_v3, %v3119_v1  ;;  %v2283_v1 = vadd.f32 %v3133_v8, %v3129_v6 }
 0x13c   : > { %3497 = vst [vmem:[#allocation10_spill] sm:$0xff] %v3227_v55  ;;  %v3229_v56 = vpop.f32.mrf.mxu1  ;;  %v3254_v55 = vstv %s2178_s25 }
 0x13d   : > { %3498 = vst [vmem:[#allocation11_spill] sm:$0xff] %v3229_v56  ;;  %v3231_v57 = vpop.f32.mrf.mxu0 }
 0x13e   : > { %3499 = vst [vmem:[#allocation12_spill] sm:$0xff] %v3231_v57  ;;  %v3233_v58 = vpop.f32.mrf.mxu1  ;;  %v2280_v57 = vadd.f32 %v3125_v4, %v3121_v2 }
 0x13f   : > { %3500 = vst [vmem:[#allocation13_spill] sm:$0xff] %v3233_v58  ;;  %v3235_v59 = vpop.f32.mrf.mxu0 }
 0x140   : > { %3501 = vst [vmem:[#allocation14_spill] sm:$0xff] %v3235_v59  ;;  %v3237_v60 = vpop.f32.mrf.mxu1  ;;  %v3252_v59 = vshrl.u32 %v1545_v62, 7  ;;  %v1273_v53 = vadd.f32 %v2280_v57, %v2216_v54  ;;  %v2222_v54 = vadd.f32 %v3139_v11, %v3135_v9 }
 0x141   : > { %3502 = vst [vmem:[#allocation15_spill] sm:$0xff] %v3237_v60  ;;  %v3239_v61 = vpop.f32.mrf.mxu0 }
 0x142   : > { %3503 = vst [vmem:[#allocation16_spill] sm:$0xff] %v3239_v61  ;;  %v3241_v63 = vpop.f32.mrf.mxu1  ;;  %v1564_v4 = vadd.s32 %v3254_v55, %v3252_v59 }
 0x143   : > { %3504 = vst [vmem:[#allocation17_spill] sm:$0xff] %v3241_v63  ;;  %v3243_v0 = vpop.f32.mrf.mxu0  ;;  %v1547_v63 = vadd.s32 8, %v3252_v59 }
 0x144   : > { %3505 = vst [vmem:[#allocation18_spill] sm:$0xff] %v3243_v0  ;;  %v3250_v56 = vpop.f32.mrf.mxu1  ;;  %v2219_v0 = vadd.f32 %v3131_v7, %v3127_v5  ;;  %v2286_v5 = vadd.f32 %v3141_v12, %v3137_v10  ;;  %vm1580_vm0 = vcmp.lt.s32.totalorder %v1564_v4, 144  ;;  %v2225_v10 = vadd.f32 %v3147_v15, %v3143_v13 }
 0x145   : > { %3506 = vst [vmem:[#allocation19_spill] sm:$0xff] %v3250_v56  ;;  %v2342_v58 = vpop.f32.mrf.mxu0  ;;  %v1548_v56 = vadd.s32 16, %v3252_v59  ;;  %v1565_v6 = vadd.s32 %v3254_v55, %v1547_v63  ;;  %v2228_v4 = vadd.f32 %v3155_v19, %v3151_v17 }
 0x146   : > { %v2406_v60 = vpop.f32.mrf.mxu1  ;;  %v1276_v8 = vadd.f32 %v2283_v1, %v2219_v0  ;;  %v1281_v11 = vadd.f32 %v2286_v5, %v2222_v54 }
 0x147   : > { %v2343_v61 = vpop.f32.mrf.mxu0  ;;  %v1566_v48 = vadd.s32 %v3254_v55, %v1548_v56  ;;  %vm1581_vm1 = vcmp.lt.s32.totalorder %v1565_v6, 144 }
 0x148   : > { %v2344_v3 = vadd.f32 %v2343_v61, %v2342_v58  ;;  %v2407_v2 = vpop.f32.mrf.mxu1 }
 0x149   : > { %v2345_v62 = vpop.f32.mrf.mxu0  ;;  %v2408_v50 = vadd.f32 %v2407_v2, %v2406_v60  ;;  %vm1582_vm2 = vcmp.lt.s32.totalorder %v1566_v48, 144 }
 0x14a   : > { %v1370_v52 = vadd.f32 %v2344_v3, %v1273_v53  ;;  %v2409_v51 = vpop.f32.mrf.mxu1  ;;  %v1549_v53 = vadd.s32 24, %v3252_v59 }
 0x14b   : > { %v2346_v7 = vpop.f32.mrf.mxu0 }
 0x14c   : > { %v1467_v57 = vadd.f32 %v2408_v50, %v1370_v52  ;;  %v2347_v58 = vadd.f32 %v2346_v7, %v2345_v62  ;;  %v2410_v61 = vpop.f32.mrf.mxu1  ;;  %v2289_v50 = vadd.f32 %v3149_v16, %v3145_v14  ;;  %v1567_v2 = vadd.s32 %v3254_v55, %v1549_v53 }
 0x14d   : > { %v2348_v49 = vpop.f32.mrf.mxu0  ;;  %v2411_v3 = vadd.f32 %v2410_v61, %v2409_v51  ;;  %v1550_v51 = vadd.s32 32, %v3252_v59  ;;  %v2292_v14 = vadd.f32 %v3157_v20, %v3153_v18  ;;  %v1551_v18 = vadd.s32 40, %v3252_v59 }
 0x14e   : > { %1529 = vst [vmem:[%s2859_s26] sm:$0xff] %v1467_v57  ;;  %v1373_v60 = vadd.f32 %v2347_v58, %v1276_v8  ;;  %v2412_v9 = vpop.f32.mrf.mxu1  ;;  %v1628_v52 = vsel %vm1580_vm0, %v1467_v57, 0.0  ;;  %v1284_v6 = vadd.f32 %v2289_v50, %v2225_v10  ;;  %vm1583_vm3 = vcmp.lt.s32.totalorder %v1567_v2, 144 }
 0x14f   : > { %v2349_v12 = vpop.f32.mrf.mxu0  ;;  %v1665_v16 = vmul.f32 %v1628_v52, %v1628_v52  ;;  %v1568_v17 = vadd.s32 %v3254_v55, %v1550_v51  ;;  %v1289_v20 = vadd.f32 %v2292_v14, %v2228_v4  ;;  %v2231_v50 = vadd.f32 %v3163_v23, %v3159_v21 }
 0x150   : > { %v1470_v63 = vadd.f32 %v2411_v3, %v1373_v60  ;;  %v2350_v0 = vadd.f32 %v2349_v12, %v2348_v49  ;;  %v2413_v56 = vpop.f32.mrf.mxu1  ;;  %v1552_v51 = vadd.s32 48, %v3252_v59  ;;  %v2234_v21 = vadd.f32 %v3171_v27, %v3167_v25 }
 0x151   : > { %v2351_v1 = vpop.f32.mrf.mxu0  ;;  %v2414_v62 = vadd.f32 %v2413_v56, %v2412_v9  ;;  %vm1584_vm4 = vcmp.lt.s32.totalorder %v1568_v17, 144  ;;  %vm1702_vm0 = vcmask 1040384  }
 0x152   : > { %1530 = vst [vmem:[%s2859_s26 + $0x8] sm:$0xff] %v1470_v63  ;;  %v1629_v13 = vsel %vm1581_vm1, %v1470_v63, 0.0  ;;  %v1378_v15 = vadd.f32 %v2350_v0, %v1281_v11  ;;  %v2415_v54 = vpop.f32.mrf.mxu1 }
 0x153   : > { %v1644_v49 = vadd.f32 %v1629_v13, %v1628_v52  ;;  %v1666_v5 = vmul.f32 %v1629_v13, %v1629_v13  ;;  %v2352_v7 = vpop.f32.mrf.mxu0  ;;  %v2295_v52 = vadd.f32 %v3165_v24, %v3161_v22  ;;  %v2298_v22 = vadd.f32 %v3173_v28, %v3169_v26 }
 0x154   : > { %v1475_v8 = vadd.f32 %v2414_v62, %v1378_v15  ;;  %v2353_v57 = vadd.f32 %v2352_v7, %v2351_v1  ;;  %v2416_v58 = vpop.f32.mrf.mxu1  ;;  %v1569_v62 = vadd.s32 %v3254_v55, %v1551_v18  ;;  %v1553_v26 = vadd.s32 56, %v3252_v59 }
 0x155   : > { %v1681_v61 = vadd.f32 %v1666_v5, %v1665_v16  ;;  %v2354_v53 = vpop.f32.mrf.mxu0  ;;  %v2417_v3 = vadd.f32 %v2416_v58, %v2415_v54  ;;  %v1292_v14 = vadd.f32 %v2295_v52, %v2231_v50  ;;  %v1297_v27 = vadd.f32 %v2298_v22, %v2234_v21 }
 0x156   : > { %1531 = vst [vmem:[%s2859_s26 + $0x10] sm:$0xff] %v1475_v8  ;;  %v1630_v19 = vsel %vm1582_vm2, %v1475_v8, 0.0  ;;  %v1381_v60 = vadd.f32 %v2353_v57, %v1284_v6  ;;  %v2418_v9 = vpop.f32.mrf.mxu1  ;;  %v1570_v8 = vadd.s32 %v3254_v55, %v1552_v51  ;;  %vm1585_vm5 = vcmp.lt.s32.totalorder %v1569_v62, 144 }
 0x157   : > { %v1645_v11 = vadd.f32 %v1644_v49, %v1630_v19  ;;  %v1667_v12 = vmul.f32 %v1630_v19, %v1630_v19  ;;  %v2355_v10 = vpop.f32.mrf.mxu0 }
 0x158   : > { %v1478_v63 = vadd.f32 %v2417_v3, %v1381_v60  ;;  %v2356_v48 = vadd.f32 %v2355_v10, %v2354_v53  ;;  %v2419_v0 = vpop.f32.mrf.mxu1  ;;  %v2237_v60 = vadd.f32 %v3179_v31, %v3175_v29  ;;  %v2301_v3 = vadd.f32 %v3181_v32, %v3177_v30 }
 0x159   : > { %v1682_v56 = vadd.f32 %v1681_v61, %v1667_v12  ;;  %v2357_v1 = vpop.f32.mrf.mxu0  ;;  %v2420_v2 = vadd.f32 %v2419_v0, %v2418_v9  ;;  %vm1586_vm6 = vcmp.lt.s32.totalorder %v1570_v8, 144  ;;  %v1554_v12 = vadd.s32 64, %v3252_v59 }
 0x15a   : > { %1532 = vst [vmem:[%s2859_s26 + $0x18] sm:$0xff] %v1478_v63  ;;  %v1631_v4 = vsel %vm1583_vm3, %v1478_v63, 0.0  ;;  %v1386_v13 = vadd.f32 %v2356_v48, %v1289_v20  ;;  %v2421_v15 = vpop.f32.mrf.mxu1  ;;  %v1571_v48 = vadd.s32 %v3254_v55, %v1553_v26  ;;  %v2240_v29 = vadd.f32 %v3187_v35, %v3183_v33 }
 0x15b   : > { %v1646_v23 = vadd.f32 %v1645_v11, %v1631_v4  ;;  %v1668_v24 = vmul.f32 %v1631_v4, %v1631_v4  ;;  %v2358_v54 = vpop.f32.mrf.mxu0  ;;  %v2304_v30 = vadd.f32 %v3189_v36, %v3185_v34  ;;  %v1555_v34 = vadd.s32 72, %v3252_v59 }
 0x15c   : > { %v1483_v16 = vadd.f32 %v2420_v2, %v1386_v13  ;;  %v2359_v49 = vadd.f32 %v2358_v54, %v2357_v1  ;;  %v2422_v5 = vpop.f32.mrf.mxu1  ;;  %vm1587_vm7 = vcmp.lt.s32.totalorder %v1571_v48, 144  ;;  %v2243_v54 = vadd.f32 %v3195_v39, %v3191_v37 }
 0x15d   : > { %v1683_v7 = vadd.f32 %v1682_v56, %v1668_v24  ;;  %v2360_v6 = vpop.f32.mrf.mxu0  ;;  %v2423_v61 = vadd.f32 %v2422_v5, %v2421_v15  ;;  %v1300_v56 = vadd.f32 %v2301_v3, %v2237_v60  ;;  %v1572_v15 = vadd.s32 %v3254_v55, %v1554_v12 }
 0x15e   : > { %1533 = vst [vmem:[%s2859_s26 + $0x20] sm:$0xff] %v1483_v16  ;;  %v1632_v57 = vsel %vm1584_vm4, %v1483_v16, 0.0  ;;  %v1389_v58 = vadd.f32 %v2359_v49, %v1292_v14  ;;  %v2424_v25 = vpop.f32.mrf.mxu1  ;;  %v1305_v35 = vadd.f32 %v2304_v30, %v2240_v29  ;;  %v2307_v14 = vadd.f32 %v3197_v40, %v3193_v38 }
 0x15f   : > { %v1647_v28 = vadd.f32 %v1646_v23, %v1632_v57  ;;  %v1669_v53 = vmul.f32 %v1632_v57, %v1632_v57  ;;  %v2361_v19 = vpop.f32.mrf.mxu0  ;;  %vm1588_vm8 = vcmp.lt.s32.totalorder %v1572_v15, 144  ;;  %v1556_v8 = vadd.s32 80, %v3252_v59  ;;  %v3511_v15 = vld [vmem:[#allocation7_spill] sm:$0xff] }
 0x160   : > { %v1486_v9 = vadd.f32 %v2423_v61, %v1389_v58  ;;  %v2362_v17 = vadd.f32 %v2361_v19, %v2360_v6  ;;  %v2425_v18 = vpop.f32.mrf.mxu1  ;;  %v1573_v26 = vadd.s32 %v3254_v55, %v1555_v34  ;;  %v2246_v37 = vadd.f32 %v3203_v43, %v3199_v41 }
 0x161   : > { %v1684_v20 = vadd.f32 %v1683_v7, %v1669_v53  ;;  %v2363_v11 = vpop.f32.mrf.mxu0  ;;  %v2426_v52 = vadd.f32 %v2425_v18, %v2424_v25  ;;  %v2310_v38 = vadd.f32 %v3205_v44, %v3201_v42  ;;  %v1557_v42 = vadd.s32 88, %v3252_v59 }
 0x162   : > { %1534 = vst [vmem:[%s2859_s26 + $0x28] sm:$0xff] %v1486_v9  ;;  %v1633_v10 = vsel %vm1585_vm5, %v1486_v9, 0.0  ;;  %v1394_v50 = vadd.f32 %v2362_v17, %v1297_v27  ;;  %v2427_v63 = vpop.f32.mrf.mxu1  ;;  %v1574_v17 = vadd.s32 %v3254_v55, %v1556_v8  ;;  %vm1589_vm9 = vcmp.lt.s32.totalorder %v1573_v26, 144  ;;  %v3513_v26 = vld [vmem:[#allocation10_spill] sm:$0xff] }
 0x163   : > { %v1648_v31 = vadd.f32 %v1647_v28, %v1633_v10  ;;  %v1670_v32 = vmul.f32 %v1633_v10, %v1633_v10  ;;  %v2364_v0 = vpop.f32.mrf.mxu0  ;;  %v1308_v28 = vadd.f32 %v2307_v14, %v2243_v54  ;;  %v1313_v43 = vadd.f32 %v2310_v38, %v2246_v37  ;;  %v3514_v38 = vld [vmem:[#allocation9_spill] sm:$0xff] }
 0x164   : > { %v1491_v1 = vadd.f32 %v2426_v52, %v1394_v50  ;;  %v2365_v51 = vadd.f32 %v2364_v0, %v2363_v11  ;;  %v2428_v4 = vpop.f32.mrf.mxu1  ;;  %v2249_v50 = vadd.f32 %v3211_v47, %v3207_v45  ;;  %v3507_v52 = vld [vmem:[#allocation3_spill] sm:$0xff]  ;;  %vm1590_vm10 = vcmp.lt.s32.totalorder %v1574_v17, 144  ;;  %v3508_v45 = vld [vmem:[#allocation4_spill] sm:$0xff]  ;;  %v3509_v47 = vld [vmem:[#allocation6_spill] sm:$0xff] }
 0x165   : > { %v1685_v13 = vadd.f32 %v1684_v20, %v1670_v32  ;;  %v2366_v2 = vpop.f32.mrf.mxu0  ;;  %v2429_v22 = vadd.f32 %v2428_v4, %v2427_v63  ;;  %v2313_v63 = vadd.f32 %v3507_v52, %v3209_v46  ;;  %v1558_v0 = vadd.s32 96, %v3252_v59  ;;  %v3510_v46 = vld [vmem:[#allocation5_spill] sm:$0xff] }
 0x166   : > { %1535 = vst [vmem:[%s2859_s26 + $0x30] sm:$0xff] %v1491_v1  ;;  %v1634_v62 = vsel %vm1586_vm6, %v1491_v1, 0.0  ;;  %v1397_v21 = vadd.f32 %v2365_v51, %v1300_v56  ;;  %v2430_v33 = vpop.f32.mrf.mxu1 }
 0x167   : > { %v1649_v36 = vadd.f32 %v1648_v31, %v1634_v62  ;;  %v1671_v23 = vmul.f32 %v1634_v62, %v1634_v62  ;;  %v2367_v24 = vpop.f32.mrf.mxu0  ;;  %v2316_v62 = vadd.f32 %v3511_v15, %v3510_v46  ;;  %v1316_v34 = vadd.f32 %v2313_v63, %v2249_v50 }
 0x168   : > { %v1494_v16 = vadd.f32 %v2429_v22, %v1397_v21  ;;  %v2368_v49 = vadd.f32 %v2367_v24, %v2366_v2  ;;  %v2431_v5 = vpop.f32.mrf.mxu1  ;;  %v2252_v2 = vadd.f32 %v3509_v47, %v3508_v45  ;;  %v1576_v14 = vadd.s32 %v3254_v55, %v1558_v0 }
 0x169   : > { %v1686_v7 = vadd.f32 %v1685_v13, %v1671_v23  ;;  %v2369_v6 = vpop.f32.mrf.mxu0  ;;  %v2432_v61 = vadd.f32 %v2431_v5, %v2430_v33  ;;  %v1575_v13 = vadd.s32 %v3254_v55, %v1557_v42  ;;  %v3517_v42 = vld [vmem:[#allocation14_spill] sm:$0xff]  ;;  %v1561_v15 = vadd.s32 120, %v3252_v59 }
 0x16a   : > { %1536 = vst [vmem:[%s2859_s26 + $0x38] sm:$0xff] %v1494_v16  ;;  %v1635_v57 = vsel %vm1587_vm7, %v1494_v16, 0.0  ;;  %v1402_v58 = vadd.f32 %v2368_v49, %v1305_v35  ;;  %v2433_v25 = vpop.f32.mrf.mxu1  ;;  %v1559_v16 = vadd.s32 104, %v3252_v59  ;;  %v1321_v8 = vadd.f32 %v2316_v62, %v2252_v2  ;;  %v3520_v62 = vld [vmem:[#allocation16_spill] sm:$0xff] }
 0x16b   : > { %v1650_v39 = vadd.f32 %v1649_v36, %v1635_v57  ;;  %v1672_v40 = vmul.f32 %v1635_v57, %v1635_v57  ;;  %v2370_v27 = vpop.f32.mrf.mxu0  ;;  %vm1591_vm11 = vcmp.lt.s32.totalorder %v1575_v13, 144  ;;  %vm1592_vm12 = vcmp.lt.s32.totalorder %v1576_v14, 144 }
 0x16c   : > { %v1499_v53 = vadd.f32 %v2432_v61, %v1402_v58  ;;  %v2371_v19 = vadd.f32 %v2370_v27, %v2369_v6  ;;  %v2434_v60 = vpop.f32.mrf.mxu1 }
 0x16d   : > { %v1687_v3 = vadd.f32 %v1686_v7, %v1672_v40  ;;  %v2372_v9 = vpop.f32.mrf.mxu0  ;;  %v2435_v11 = vadd.f32 %v2434_v60, %v2433_v25  ;;  %v3512_v25 = vld [vmem:[#allocation8_spill] sm:$0xff] }
 0x16e   : > { %1537 = vst [vmem:[%s2859_s26 + $0x40] sm:$0xff] %v1499_v53  ;;  %v1636_v18 = vsel %vm1588_vm8, %v1499_v53, 0.0  ;;  %v1405_v20 = vadd.f32 %v2371_v19, %v1308_v28  ;;  %v2436_v41 = vpop.f32.mrf.mxu1  ;;  %v2255_v37 = vadd.f32 %v3513_v26, %v3512_v25 }
 0x16f   : > { %v1651_v44 = vadd.f32 %v1650_v39, %v1636_v18  ;;  %v1673_v12 = vmul.f32 %v1636_v18, %v1636_v18  ;;  %v2373_v10 = vpop.f32.mrf.mxu0  ;;  %v3515_v39 = vld [vmem:[#allocation11_spill] sm:$0xff] }
 0x170   : > { %v1502_v48 = vadd.f32 %v2435_v11, %v1405_v20  ;;  %v2374_v29 = vadd.f32 %v2373_v10, %v2372_v9  ;;  %v2437_v30 = vpop.f32.mrf.mxu1  ;;  %v2319_v40 = vadd.f32 %v3515_v39, %v3514_v38  ;;  %v1560_v11 = vadd.s32 112, %v3252_v59 }
 0x171   : > { %v1688_v31 = vadd.f32 %v1687_v3, %v1673_v12  ;;  %v2375_v32 = vpop.f32.mrf.mxu0  ;;  %v2438_v51 = vadd.f32 %v2437_v30, %v2436_v41  ;;  %v1577_v3 = vadd.s32 %v3254_v55, %v1559_v16  ;;  %v3516_v41 = vld [vmem:[#allocation12_spill] sm:$0xff]  ;;  %v3519_v12 = vld [vmem:[#allocation15_spill] sm:$0xff] }
 0x172   : > { %1538 = vst [vmem:[%s2859_s26 + $0x48] sm:$0xff] %v1502_v48  ;;  %v1637_v56 = vsel %vm1589_vm9, %v1502_v48, 0.0  ;;  %v1410_v1 = vadd.f32 %v2374_v29, %v1313_v43  ;;  %v2439_v4 = vpop.f32.mrf.mxu1  ;;  %v2258_v43 = vadd.f32 %v3517_v42, %v3516_v41  ;;  %v1324_v48 = vadd.f32 %v2319_v40, %v2255_v37 }
 0x173   : > { %v1652_v21 = vadd.f32 %v1651_v44, %v1637_v56  ;;  %v1674_v22 = vmul.f32 %v1637_v56, %v1637_v56  ;;  %v2376_v33 = vpop.f32.mrf.mxu0  ;;  %v3518_v44 = vld [vmem:[#allocation13_spill] sm:$0xff]  ;;  %vm1593_vm13 = vcmp.lt.s32.totalorder %v1577_v3, 144  ;;  %v1578_v13 = vadd.s32 %v3254_v55, %v1560_v11 }
 0x174   : > { %v1507_v35 = vadd.f32 %v2438_v51, %v1410_v1  ;;  %v2377_v36 = vadd.f32 %v2376_v33, %v2375_v32  ;;  %v2440_v23 = vpop.f32.mrf.mxu1  ;;  %v2322_v10 = vadd.f32 %v3519_v12, %v3518_v44  ;;  %v3522_v33 = vld [vmem:[#allocation17_spill] sm:$0xff] }
 0x175   : > { %v1689_v24 = vadd.f32 %v1688_v31, %v1674_v22  ;;  %v2378_v54 = vpop.f32.mrf.mxu0  ;;  %v2441_v7 = vadd.f32 %v2440_v23, %v2439_v4  ;;  %vm1594_vm14 = vcmp.lt.s32.totalorder %v1578_v13, 144 }
 0x176   : > { %1539 = vst [vmem:[%s2859_s26 + $0x50] sm:$0xff] %v1507_v35  ;;  %v1638_v49 = vsel %vm1590_vm10, %v1507_v35, 0.0  ;;  %v1413_v5 = vadd.f32 %v2377_v36, %v1316_v34  ;;  %v2442_v6 = vpop.f32.mrf.mxu1  ;;  %v1329_v45 = vadd.f32 %v2322_v10, %v2258_v43  ;;  %v3523_v34 = vld [vmem:[#allocation19_spill] sm:$0xff] }
 0x177   : > { %v1653_v57 = vadd.f32 %v1652_v21, %v1638_v49  ;;  %v1675_v58 = vmul.f32 %v1638_v49, %v1638_v49  ;;  %v2379_v61 = vpop.f32.mrf.mxu0  ;;  %v3521_v21 = vld [vmem:[#allocation18_spill] sm:$0xff]  ;;  %v2325_v35 = vadd.f32 %v3523_v34, %v3522_v33 }
 0x178   : > { %v1510_v27 = vadd.f32 %v2441_v7, %v1413_v5  ;;  %v2380_v28 = vadd.f32 %v2379_v61, %v2378_v54  ;;  %v2443_v53 = vpop.f32.mrf.mxu1  ;;  %v2261_v22 = vadd.f32 %v3521_v21, %v3520_v62 }
 0x179   : > { %v1690_v19 = vadd.f32 %v1689_v24, %v1675_v58  ;;  %v2381_v60 = vpop.f32.mrf.mxu0  ;;  %v2444_v18 = vadd.f32 %v2443_v53, %v2442_v6 }
 0x17a   : > { %1540 = vst [vmem:[%s2859_s26 + $0x58] sm:$0xff] %v1510_v27  ;;  %v1639_v9 = vsel %vm1591_vm11, %v1510_v27, 0.0  ;;  %v1418_v17 = vadd.f32 %v2380_v28, %v1321_v8  ;;  %v2445_v20 = vpop.f32.mrf.mxu1  ;;  %v1332_v58 = vadd.f32 %v2325_v35, %v2261_v22 }
 0x17b   : > { %v1654_v50 = vadd.f32 %v1653_v57, %v1639_v9  ;;  %v1676_v52 = vmul.f32 %v1639_v9, %v1639_v9  ;;  %v2382_v63 = vpop.f32.mrf.mxu0  ;;  %v1579_v57 = vadd.s32 %v3254_v55, %v1561_v15 }
 0x17c   : > { %v1515_v29 = vadd.f32 %v2444_v18, %v1418_v17  ;;  %v2383_v30 = vadd.f32 %v2382_v63, %v2381_v60  ;;  %v2446_v31 = vpop.f32.mrf.mxu1  ;;  %v1704_v63 = vld [vmem:[%s2852_s11] sm:$0x3] }
 0x17d   : > { %v1691_v32 = vadd.f32 %v1690_v19, %v1676_v52  ;;  %v2384_v0 = vpop.f32.mrf.mxu0  ;;  %v2447_v51 = vadd.f32 %v2446_v31, %v2445_v20  ;;  %vm1595_vm15 = vcmp.lt.s32.totalorder %v1579_v57, 144 }
 0x17e   : > { %1541 = vst [vmem:[%s2859_s26 + $0x60] sm:$0xff] %v1515_v29  ;;  %v1640_v56 = vsel %vm1592_vm12, %v1515_v29, 0.0  ;;  %v1421_v1 = vadd.f32 %v2383_v30, %v1324_v48  ;;  %v2448_v4 = vpop.f32.mrf.mxu1 }
 0x17f   : > { %v1655_v47 = vadd.f32 %v1654_v50, %v1640_v56  ;;  %v1677_v2 = vmul.f32 %v1640_v56, %v1640_v56  ;;  %v2385_v46 = vpop.f32.mrf.mxu0 }
 0x180   : > { %v1518_v36 = vadd.f32 %v2447_v51, %v1421_v1  ;;  %v2386_v23 = vadd.f32 %v2385_v46, %v2384_v0  ;;  %v2449_v24 = vpop.f32.mrf.mxu1 }
 0x181   : > { %v1692_v54 = vadd.f32 %v1691_v32, %v1677_v2  ;;  %v2387_v14 = vpop.f32.mrf.mxu0  ;;  %v2450_v5 = vadd.f32 %v2449_v24, %v2448_v4 }
 0x182   : > { %1542 = vst [vmem:[%s2859_s26 + $0x68] sm:$0xff] %v1518_v36  ;;  %v1641_v16 = vsel %vm1593_vm13, %v1518_v36, 0.0  ;;  %v1426_v49 = vadd.f32 %v2386_v23, %v1329_v45  ;;  %v2451_v7 = vpop.f32.mrf.mxu1 }
 0x183   : > { %v1656_v6 = vadd.f32 %v1655_v47, %v1641_v16  ;;  %v1678_v59 = vmul.f32 %v1641_v16, %v1641_v16  ;;  %v2388_v8 = vpop.f32.mrf.mxu0 }
 0x184   : > { %v1523_v61 = vadd.f32 %v2450_v5, %v1426_v49  ;;  %v2389_v25 = vadd.f32 %v2388_v8, %v2387_v14  ;;  %v2452_v26 = vpop.f32.mrf.mxu1 }
 0x185   : > { %v1693_v37 = vadd.f32 %v1692_v54, %v1678_v59  ;;  %v2453_v40 = vadd.f32 %v2452_v26, %v2451_v7 }
 0x186   : > { %1543 = vst [vmem:[%s2859_s26 + $0x70] sm:$0xff] %v1523_v61  ;;  %v1642_v38 = vsel %vm1594_vm14, %v1523_v61, 0.0  ;;  %v1429_v39 = vadd.f32 %v2389_v25, %v1332_v58 }
 0x187   : > { %v1657_v27 = vadd.f32 %v1656_v6, %v1642_v38  ;;  %v1679_v28 = vmul.f32 %v1642_v38, %v1642_v38 }
 0x188   : > { %v1526_v53 = vadd.f32 %v2453_v40, %v1429_v39 }
 0x189   : > { %v1694_v19 = vadd.f32 %v1693_v37, %v1679_v28 }
 0x18a   : > { %1544 = vst [vmem:[%s2859_s26 + $0x78] sm:$0xff] %v1526_v53  ;;  %v1643_v60 = vsel %vm1595_vm15, %v1526_v53, 0.0 }
 0x18b   : > { %v1658_v3 = vadd.f32 %v1657_v27, %v1643_v60  ;;  %v1680_v9 = vmul.f32 %v1643_v60, %v1643_v60 }
 0x18d   : > { %v1659_v55 = vrot.slane %v1658_v3, 4  ;;  %v1695_v17 = vadd.f32 %v1694_v19, %v1680_v9 }
 0x18f   : > { %v1660_v18 = vadd.f32 %v1659_v55, %v1658_v3  ;;  %v1696_v20 = vrot.slane %v1695_v17, 4 }
 0x191   : > { %v1661_v11 = vrot.slane %v1660_v18, 2  ;;  %v1697_v41 = vadd.f32 %v1696_v20, %v1695_v17 }
 0x193   : > { %v1662_v42 = vadd.f32 %v1661_v11, %v1660_v18  ;;  %v1698_v43 = vrot.slane %v1697_v41, 2 }
 0x195   : > { %v1663_v44 = vrot.slane %v1662_v42, 1  ;;  %v1699_v12 = vadd.f32 %v1698_v43, %v1697_v41 }
 0x197   : > { %v1700_v10 = vrot.slane %v1699_v12, 1  ;;  %v1664_v50 = vadd.f32 %v1663_v44, %v1662_v42 }
 0x199   : > { %v1701_v52 = vadd.f32 %v1700_v10, %v1699_v12 }
 0x19a   : > { %1717 = sbr.rel (!%p2828_p5) target bundleno = 456 (0x1c8), region = 36 }
 0x19b   : > { %v1703_v48 = vsel %vm1702_vm0, %v1664_v50, %v1701_v52 }
 0x19c   : > { %v1705_v29 = vadd.f32 %v1704_v63, %v1703_v48 }
 0x19e   : > { %1706 = vst [vmem:[%s2852_s11] sm:$0x3] %v1705_v29 }
 0x19f   : > { %s3540_s14 = smov (!%p1720_p12, %s1719_s14), 16 }
 0x1a0   : > { %s2181_s4 = sshll.u32 %s3540_s14, 7 }
 0x1a1   : > { %p2184_p13 = scmp.eq.s32.totalorder %s2181_s4, 0 }
 0x1a2   : > { %s3387_s23 = sshrl.u32 (!%p2184_p13), %s3540_s14, 4 }
 0x1a3   : > { %1730 = sbr.rel (%p2184_p13) target bundleno = 456 (0x1c8), region = 40  ;;  %p2185_p0 = scmp.le.s32.totalorder (!%p2184_p13), %s3387_s23, 0 }
 0x1a8   : > { %1975 = sbr.rel (%p2185_p0) target bundleno = 439 (0x1b7), region = 128  ;;  %s3524_s15 = smov (!%p2185_p0), %s3384_s7 }
 0x1a9   : > { %s3525_s29 = smov (!%p2185_p0), %s2859_s26  ;;  %s3396_s11 = smov (!%p2185_p0), 0  }
 0x1aa   : > { %s3398_s8 = smov (!%p2185_p0), 0  }
 0x1ad LB: >> { %v1823_v30 = vld [vmem:[%s2735_s29] sm:$0xff]  ;;  %v1825_v31 = vld [vmem:[%s2735_s29 + $0x8] sm:$0xff]  ;;  %v1827_v32 = vld [vmem:[%s2735_s29 + $0x10] sm:$0xff]  ;;  %s1855_s30 = sadd.s32 1, %s2739_s11  ;;  %s1817_s8 = sadd.s32 1, %s2743_s8   ;;  %s2743_s8 = sphi %s3398_s8, %s1817_s8   ;;  %s2739_s11 = sphi %s3396_s11, %s3526_s11   ;;  %s2735_s29 = sphi %s3525_s29, %s1860_s29   ;;  %s2731_s15 = sphi %s3524_s15, %s1861_s15  }
 0x1ae   : >> { %1824 = vst [vmem:[%s2731_s15] sm:$0xff] %v1823_v30  ;;  %1826 = vst [vmem:[%s2731_s15 + $0x8] sm:$0xff] %v1825_v31  ;;  %v1829_v0 = vld [vmem:[%s2735_s29 + $0x18] sm:$0xff]  ;;  %v1831_v56 = vld [vmem:[%s2735_s29 + $0x20] sm:$0xff]  ;;  %p1856_p1 = scmp.ge.s32.totalorder %s1855_s30, %s3387_s23  ;;  %p1816_p2 = scmp.ge.s32.totalorder %s1817_s8, %s3387_s23 }
 0x1af   : >> { %1828 = vst [vmem:[%s2731_s15 + $0x10] sm:$0xff] %v1827_v32  ;;  %v1833_v1 = vld [vmem:[%s2735_s29 + $0x28] sm:$0xff]  ;;  %1830 = vst [vmem:[%s2731_s15 + $0x18] sm:$0xff] %v1829_v0  ;;  %v1835_v51 = vld [vmem:[%s2735_s29 + $0x30] sm:$0xff] }
 0x1b0   : >> { %1832 = vst [vmem:[%s2731_s15 + $0x20] sm:$0xff] %v1831_v56  ;;  %1834 = vst [vmem:[%s2731_s15 + $0x28] sm:$0xff] %v1833_v1  ;;  %v1837_v4 = vld [vmem:[%s2735_s29 + $0x38] sm:$0xff]  ;;  %v1839_v13 = vld [vmem:[%s2735_s29 + $0x40] sm:$0xff]  ;;  %s3542_s30 = smov (%p1856_p1, %s1855_s30), 0 }
 0x1b1   : >> { %1836 = vst [vmem:[%s2731_s15 + $0x30] sm:$0xff] %v1835_v51  ;;  %1838 = vst [vmem:[%s2731_s15 + $0x38] sm:$0xff] %v1837_v4  ;;  %v1841_v45 = vld [vmem:[%s2735_s29 + $0x48] sm:$0xff]  ;;  %v1843_v47 = vld [vmem:[%s2735_s29 + $0x50] sm:$0xff]  ;;  %s2186_s9 = sshll.u32 %s3542_s30, 7  ;;  %s3526_s11 = smov %s3542_s30 }
 0x1b2   : >> { %1840 = vst [vmem:[%s2731_s15 + $0x40] sm:$0xff] %v1839_v13  ;;  %v1845_v2 = vld [vmem:[%s2735_s29 + $0x58] sm:$0xff]  ;;  %1842 = vst [vmem:[%s2731_s15 + $0x48] sm:$0xff] %v1841_v45  ;;  %v1847_v46 = vld [vmem:[%s2735_s29 + $0x60] sm:$0xff]  ;;  %1819 = sbr.rel (!%p1816_p2) target bundleno = 429 (0x1ad), region = 134 }
 0x1b3   : >> { %1844 = vst [vmem:[%s2731_s15 + $0x50] sm:$0xff] %v1843_v47  ;;  %1846 = vst [vmem:[%s2731_s15 + $0x58] sm:$0xff] %v1845_v2  ;;  %v1849_v15 = vld [vmem:[%s2735_s29 + $0x68] sm:$0xff]  ;;  %v1851_v62 = vld [vmem:[%s2735_s29 + $0x70] sm:$0xff] }
 0x1b4   : >> { %1848 = vst [vmem:[%s2731_s15 + $0x60] sm:$0xff] %v1847_v46  ;;  %1850 = vst [vmem:[%s2731_s15 + $0x68] sm:$0xff] %v1849_v15  ;;  %v1853_v21 = vld [vmem:[%s2735_s29 + $0x78] sm:$0xff]  ;;  %s1860_s29 = scalar_lea.vmem %s2859_s26, %s2186_s9 [#allocation2]  }
 0x1b5   : >> { %1852 = vst [vmem:[%s2731_s15 + $0x70] sm:$0xff] %v1851_v62  ;;  %1854 = vst [vmem:[%s2731_s15 + $0x78] sm:$0xff] %v1853_v21  ;;  %s1861_s15 = scalar_lea.vmem %s3384_s7, %s2186_s9  }
 0x1b7 PF: > { %s3456_s10 = sand.u32 15, %s3540_s14   ;;  %s2196_s21 = sshll.u32 %s3387_s23, 7 }
 0x1b8   : > { %s1866_s22 = scalar_lea.vmem %s2859_s26, %s2196_s21 [#allocation2]   ;;  %s1868_s25 = scalar_lea.vmem %s3384_s7, %s2196_s21  }
 0x1b9   : > { %p2191_p3 = scmp.le.s32.totalorder %s3456_s10, 0 }
 0x1ba   : > { %s2745_s12 = smov (!%p2191_p3), %s1868_s25   ;;  %s2749_s24 = smov (!%p2191_p3), %s1866_s22  }
 0x1bb   : > { %1989 = sbr.rel (%p2191_p3) target bundleno = 456 (0x1c8), region = 139  ;;  %s2753_s28 = smov (!%p2191_p3), 0  }
 0x1bc   : > { %s2757_s4 = smov (!%p2191_p3), 0  }
 0x1c0 LB: >> { %v1878_v22 = vld [vmem:[%s2751_s24] sm:$0xff]  ;;  %s1880_s14 = sadd.s32 1, %s2755_s28  ;;  %s1872_s4 = sadd.s32 1, %s2759_s4   ;;  %s2759_s4 = sphi %s2757_s4, %s1872_s4   ;;  %s2755_s28 = sphi %s2753_s28, %s2754_s28   ;;  %s2751_s24 = sphi %s2749_s24, %s1885_s24   ;;  %s2747_s12 = sphi %s2745_s12, %s1886_s12  }
 0x1c1   : >> { %1879 = vst [vmem:[%s2747_s12] sm:$0xff] %v1878_v22  ;;  %p1881_p4 = scmp.ge.s32.totalorder %s1880_s14, %s3456_s10  ;;  %p1871_p5 = scmp.ge.s32.totalorder %s1872_s4, %s3456_s10 }
 0x1c3   : >> { %s3544_s14 = smov (%p1881_p4, %s1880_s14), 0  ;;  %1874 = sbr.rel (!%p1871_p5) target bundleno = 448 (0x1c0), region = 145 }
 0x1c4   : >> { %s2192_s26 = sshll.u32 %s3544_s14, 3  ;;  %s2754_s28 = smov %s3544_s14  }
 0x1c5   : >> { %s1885_s24 = scalar_lea.vmem %s1866_s22, %s2192_s26 [#allocation2]   ;;  %s1886_s12 = scalar_lea.vmem %s1868_s25, %s2192_s26  }
 0x1c8 PF: > { %s14_s18 = sadd.s32 1, %s2727_s18   ;;  %s3527_s12 = smov %s2707_s13 }
 0x1c9   : > { %p11_p6 = scmp.ge.s32.totalorder %s14_s18, 6   ;;  %s3528_s13 = smov %s2839_s27 }
 0x1ca   : > { %s3529_s14 = smov %s2719_s16  ;;  %s3530_s15 = smov %s2723_s17 }
 0x1cb   : > { %s3531_s16 = smov %s3534_s19  ;;  %s3532_s17 = smov %s3538_s20 }
 0x1cc   :  { %13 = sbr.rel (!%p11_p6) target bundleno = 4 (0x4), region = 156 }

// kernel: gaugan_discriminator_forward.10
= control target key start
LH: loop header
LB: loop body
LE: loop exit
PB: predicated region body
PF: predicated region fallthrough
CT: control target
= control target key end

     0   :  { %s937_s9 = smov 0   ;;  %s939_s10 = smov 0   ;;  %s1206_s0 = inlined_call_operand.vmem [shape: f32[2,144,128], index: 0, kind: input, shape index: {}]   ;;  %s1207_s1 = inlined_call_operand.vmem [shape: f32[2,2,128], index: 1, kind: input, shape index: {}]   ;;  %s1208_s2 = inlined_call_operand.vmem [shape: f32[2,144,128], index: 2, kind: output, shape index: {}]  }
   0x1   :  { %s941_s11 = smov 0   ;;  %s943_s12 = smov 0  }
   0x2   :  { %s945_s13 = smov 0   ;;  %s947_s14 = smov 0  }
   0x3   :  { %s949_s15 = smov 0  }
   0x4 LB: > { %s21_s16 = sadd.s32 1, %s880_s13  ;;  %s24_s17 = sadd.s32 1, %s884_s14  ;;  %s888_s15 = sphi %s949_s15, %s12_s15   ;;  %s884_s14 = sphi %s947_s14, %s1218_s14   ;;  %s880_s13 = sphi %s945_s13, %s1217_s13   ;;  %s876_s12 = sphi %s943_s12, %s1216_s12   ;;  %s872_s11 = sphi %s941_s11, %s1215_s11   ;;  %s868_s10 = sphi %s939_s10, %s1214_s10   ;;  %s864_s9 = sphi %s937_s9, %s1213_s9  }
   0x5   : > { %p22_p0 = scmp.ge.s32.totalorder %s21_s16, 2  ;;  %s650_s18 = sadd.s32 4294967295, %s888_s15  }
   0x6   : > { %p97_p1 = scmp.ne.s32.totalorder %s868_s10, %s864_s9  ;;  %p98_p2 = scmp.eq.s32.totalorder %s650_s18, 3 }
   0x7   : > { %s1220_s16 = smov (%p22_p0, %s21_s16), 0  ;;  %s1222_s17 = smov (!%p22_p0, %s24_s17), %s884_s14 }
   0x8   : > { %s83_s19 = ssub.s32 %s880_s13, %s1220_s16  ;;  %p26_p3 = scmp.ge.s32.totalorder %s1222_s17, 2 }
   0x9   : > { %p654_p4 = scmp.ge.s32.totalorder %s888_s15, 1  ;;  %p981_p5 = por %p98_p2, %p97_p1 }
   0xa   : > { %p150_p6 = scmp.lt.s32.totalorder %s888_s15, 5  ;;  %s1224_s17 = smov (%p26_p3, %s1222_s17), 0 }
   0xb   : > { %s82_s21 = ssub.s32 %s884_s14, %s1224_s17  ;;  %s87_s23 = sadd.s32 1, %s868_s10 }
   0xc   : > { %p151_p7 = pnand %p654_p4, %p150_p6  ;;  %s84_s22 = sor.u32 %s83_s19, %s82_s21 }
   0xd   : > { %p85_p8 = scmp.eq.s32.totalorder %s84_s22, 0  ;;  %p188_p9 = scmp.lt.s32.totalorder (!%p151_p7), %s876_s12, 1 }
   0xe   : > { %154 = sbr.rel (%p151_p7) target bundleno = 112 (0x70), region = 28  ;;  %s996_s27 = sshll.u32 (!%p151_p7), %s872_s11, 4 }
   0xf   : > { %s992_s24 = scalar_select %p85_p8, %s868_s10, %s87_s23  }
  0x10   : > { %p190_p10 = scmp.lt.s32.totalorder (!%p151_p7), %s996_s27, 17  ;;  %s180_s18 = sand.u32 (!%p151_p7), 1, %s864_s9  }
  0x11   : > { %s655_s9 = sshll.u32 (!%p151_p7), %s180_s18, 7 }
  0x12   : > { %s1059_s19 = scalar_lea.vmem (!%p151_p7), [#allocation2], %s655_s9  }
  0x13   : > { %s189_s25 = scalar_select %p188_p9, %s876_s12, 1  ;;  %v234_v5 = vlaneseq }
  0x14   : > { %s191_s3 = scalar_select %p190_p10, %s996_s27, 17 }
  0x15   : > { %s658_s26 = sshll.u32 %s189_s25, 1  ;;  %s678_s4 = smul.u32 18, %s189_s25  ;;  %v235_v8 = vshrl.u32 %v234_v5, 7 }
  0x16   : > { %s204_s30 = scalar_lea.vmem %s1207_s1, %s658_s26  ;;  %s348_s21 = ssub.s32 (%p981_p5), 18, %s996_s27 }
  0x17   : > { %v226_v0 = vld [vmem:[%s204_s30] sm:$0x3]  ;;  %s193_s5 = sadd.s32 %s678_s4, %s191_s3  ;;  %v236_v9 = vsub.s32 0, %v235_v8  ;;  %v258_v18 = vsub.s32 1, %v235_v8  ;;  %s679_s22 = smul.u32 (%p981_p5), 18, %s876_s12 }
  0x18   : > { %v227_v1 = vmul.f32 0.0069444445, %v226_v0  ;;  %s657_s6 = sshll.u32 %s193_s5, 3  ;;  %p349_p11 = scmp.lt.s32.totalorder (%p981_p5), %s348_s21, 16 }
  0x19   : > { %s195_s11 = scalar_lea.vmem %s1206_s0, %s657_s6  ;;  %s354_s23 = sadd.s32 (%p981_p5), %s679_s22, %s996_s27 }
  0x1a   : > { %v228_v2 = vmul.f32 %v227_v1, %v227_v1  ;;  %v210_v10 = vld [vmem:[%s195_s11] sm:$0xff]  ;;  %v1006_v11 = vrot.slane %v227_v1, %v236_v9  ;;  %v211_v12 = vld [vmem:[%s195_s11 + $0x8] sm:$0xff]  ;;  %v212_v13 = vld [vmem:[%s195_s11 + $0x10] sm:$0xff]  ;;  %s663_s25 = sshll.u32 (%p981_p5), %s354_s23, 3 }
  0x1b   : > { %v213_v14 = vld [vmem:[%s195_s11 + $0x18] sm:$0xff]  ;;  %v214_v15 = vld [vmem:[%s195_s11 + $0x20] sm:$0xff]  ;;  %v215_v16 = vld [vmem:[%s195_s11 + $0x28] sm:$0xff]  ;;  %s1105_s30 = scalar_lea.vmem (%p981_p5), %s1208_s2, %s663_s25  }
  0x1c   : > { %v230_v3 = vrot.slane %v228_v2, 7  ;;  %v216_v17 = vld [vmem:[%s195_s11 + $0x30] sm:$0xff]  ;;  %v217_v19 = vld [vmem:[%s195_s11 + $0x38] sm:$0xff]  ;;  %v1008_v20 = vld [vmem:[%s195_s11 + $0x40] sm:$0xff]  ;;  %v238_v22 = vsub.f32 %v210_v10, %v1006_v11  ;;  %v239_v26 = vsub.f32 %v211_v12, %v1006_v11  ;;  %v240_v27 = vsub.f32 %v212_v13, %v1006_v11 }
  0x1d   : > { %v1010_v21 = vld [vmem:[%s195_s11 + $0x48] sm:$0xff]  ;;  %v1014_v23 = vld [vmem:[%s195_s11 + $0x50] sm:$0xff]  ;;  %v1016_v24 = vld [vmem:[%s195_s11 + $0x58] sm:$0xff]  ;;  %v241_v28 = vsub.f32 %v213_v14, %v1006_v11  ;;  %v242_v29 = vsub.f32 %v214_v15, %v1006_v11  ;;  %v243_v34 = vsub.f32 %v215_v16, %v1006_v11  ;;  %v244_v35 = vsub.f32 %v216_v17, %v1006_v11 }
  0x1e   : > { %v232_v4 = vsub.f32 %v227_v1, %v230_v3  ;;  %v1018_v25 = vld [vmem:[%s195_s11 + $0x60] sm:$0xff]  ;;  %v1024_v30 = vld [vmem:[%s195_s11 + $0x68] sm:$0xff]  ;;  %v1026_v31 = vld [vmem:[%s195_s11 + $0x70] sm:$0xff]  ;;  %v245_v36 = vsub.f32 %v217_v19, %v1006_v11  ;;  %v246_v37 = vsub.f32 %v1008_v20, %v1006_v11  ;;  %v247_v39 = vsub.f32 %v1010_v21, %v1006_v11 }
  0x1f   : > { %v1028_v32 = vld [vmem:[%s195_s11 + $0x78] sm:$0xff]  ;;  %v248_v40 = vsub.f32 %v1014_v23, %v1006_v11  ;;  %v249_v41 = vsub.f32 %v1016_v24, %v1006_v11  ;;  %v250_v42 = vsub.f32 %v1018_v25, %v1006_v11  ;;  %v251_v43 = vsub.f32 %v1024_v30, %v1006_v11 }
  0x20   : > { %v233_v6 = vmax.f32 %v232_v4, 0.0  ;;  %v252_v44 = vsub.f32 %v1026_v31, %v1006_v11  ;;  %v253_v45 = vsub.f32 %v1028_v32, %v1006_v11 }
  0x22   : > { %v254_v7 = vadd.f32 1e-05, %v233_v6 }
  0x24   : > { %800 = vrsqrt.f32 %v254_v7 }
  0x31   : > { %v801_v33 = vpop.eup %800 }
  0x32   : > { %v1035_v38 = vrot.slane %v801_v33, %v258_v18 }
  0x34   : > { %v260_v46 = vmul.f32 %v1035_v38, %v238_v22  ;;  %v261_v47 = vmul.f32 %v1035_v38, %v239_v26  ;;  %v262_v48 = vmul.f32 %v1035_v38, %v240_v27  ;;  %v263_v49 = vmul.f32 %v1035_v38, %v241_v28 }
  0x35   : > { %v264_v50 = vmul.f32 %v1035_v38, %v242_v29  ;;  %v265_v51 = vmul.f32 %v1035_v38, %v243_v34  ;;  %v266_v52 = vmul.f32 %v1035_v38, %v244_v35  ;;  %v267_v53 = vmul.f32 %v1035_v38, %v245_v36 }
  0x36   : > { %vm276_vm0 = vcmp.gt.f32.partialorder %v260_v46, 0.0  ;;  %v292_v54 = vmul.f32 0.2, %v260_v46  ;;  %vm277_vm1 = vcmp.gt.f32.partialorder %v261_v47, 0.0  ;;  %v293_v55 = vmul.f32 0.2, %v261_v47 }
  0x37   : > { %vm278_vm2 = vcmp.gt.f32.partialorder %v262_v48, 0.0  ;;  %v294_v56 = vmul.f32 0.2, %v262_v48  ;;  %vm279_vm3 = vcmp.gt.f32.partialorder %v263_v49, 0.0  ;;  %v295_v57 = vmul.f32 0.2, %v263_v49 }
  0x38   : > { %v308_v58 = vsel %vm276_vm0, %v260_v46, %v292_v54  ;;  %v309_v59 = vsel %vm277_vm1, %v261_v47, %v293_v55  ;;  %vm280_vm4 = vcmp.gt.f32.partialorder %v264_v50, 0.0  ;;  %v296_v60 = vmul.f32 0.2, %v264_v50 }
  0x39   : > { %324 = vst [vmem:[%s1059_s19] sm:$0xff] %v308_v58  ;;  %325 = vst [vmem:[%s1059_s19 + $0x8] sm:$0xff] %v309_v59  ;;  %v310_v61 = vsel %vm278_vm2, %v262_v48, %v294_v56  ;;  %v311_v62 = vsel %vm279_vm3, %v263_v49, %v295_v57  ;;  %vm281_vm5 = vcmp.gt.f32.partialorder %v265_v51, 0.0  ;;  %v297_v63 = vmul.f32 0.2, %v265_v51 }
  0x3a   : > { %326 = vst [vmem:[%s1059_s19 + $0x10] sm:$0xff] %v310_v61  ;;  %327 = vst [vmem:[%s1059_s19 + $0x18] sm:$0xff] %v311_v62  ;;  %v312_v0 = vsel %vm280_vm4, %v264_v50, %v296_v60  ;;  %vm282_vm6 = vcmp.gt.f32.partialorder %v266_v52, 0.0  ;;  %v298_v1 = vmul.f32 0.2, %v266_v52  ;;  %vm283_vm7 = vcmp.gt.f32.partialorder %v267_v53, 0.0 }
  0x3b   : > { %328 = vst [vmem:[%s1059_s19 + $0x20] sm:$0xff] %v312_v0  ;;  %v313_v2 = vsel %vm281_vm5, %v265_v51, %v297_v63  ;;  %v299_v3 = vmul.f32 0.2, %v267_v53  ;;  %v268_v4 = vmul.f32 %v1035_v38, %v246_v37  ;;  %v269_v5 = vmul.f32 %v1035_v38, %v247_v39 }
  0x3c   : > { %329 = vst [vmem:[%s1059_s19 + $0x28] sm:$0xff] %v313_v2  ;;  %v314_v6 = vsel %vm282_vm6, %v266_v52, %v298_v1  ;;  %v270_v7 = vmul.f32 %v1035_v38, %v248_v40  ;;  %v271_v8 = vmul.f32 %v1035_v38, %v249_v41  ;;  %v272_v9 = vmul.f32 %v1035_v38, %v250_v42 }
  0x3d   : > { %330 = vst [vmem:[%s1059_s19 + $0x30] sm:$0xff] %v314_v6  ;;  %v315_v10 = vsel %vm283_vm7, %v267_v53, %v299_v3  ;;  %vm284_vm8 = vcmp.gt.f32.partialorder %v268_v4, 0.0  ;;  %v300_v12 = vmul.f32 0.2, %v268_v4  ;;  %vm285_vm9 = vcmp.gt.f32.partialorder %v269_v5, 0.0 }
  0x3e   : > { %331 = vst [vmem:[%s1059_s19 + $0x38] sm:$0xff] %v315_v10  ;;  %v301_v13 = vmul.f32 0.2, %v269_v5  ;;  %vm286_vm10 = vcmp.gt.f32.partialorder %v270_v7, 0.0  ;;  %v302_v14 = vmul.f32 0.2, %v270_v7  ;;  %v273_v20 = vmul.f32 %v1035_v38, %v251_v43 }
  0x3f   : > { %vm287_vm11 = vcmp.gt.f32.partialorder %v271_v8, 0.0  ;;  %v316_v15 = vsel %vm284_vm8, %v268_v4, %v300_v12  ;;  %v303_v16 = vmul.f32 0.2, %v271_v8  ;;  %vm288_vm12 = vcmp.gt.f32.partialorder %v272_v9, 0.0 }
  0x40   : > { %v304_v17 = vmul.f32 0.2, %v272_v9  ;;  %332 = vst [vmem:[%s1059_s19 + $0x40] sm:$0xff] %v316_v15  ;;  %v317_v18 = vsel %vm285_vm9, %v269_v5, %v301_v13  ;;  %v318_v19 = vsel %vm286_vm10, %v270_v7, %v302_v14  ;;  %v274_v21 = vmul.f32 %v1035_v38, %v252_v44 }
  0x41   : > { %333 = vst [vmem:[%s1059_s19 + $0x48] sm:$0xff] %v317_v18  ;;  %334 = vst [vmem:[%s1059_s19 + $0x50] sm:$0xff] %v318_v19  ;;  %v319_v22 = vsel %vm287_vm11, %v271_v8, %v303_v16  ;;  %v275_v24 = vmul.f32 %v1035_v38, %v253_v45  ;;  %vm289_vm13 = vcmp.gt.f32.partialorder %v273_v20, 0.0  ;;  %v305_v25 = vmul.f32 0.2, %v273_v20 }
  0x42   : > { %v320_v23 = vsel %vm288_vm12, %v272_v9, %v304_v17  ;;  %335 = vst [vmem:[%s1059_s19 + $0x58] sm:$0xff] %v319_v22  ;;  %vm290_vm14 = vcmp.gt.f32.partialorder %v274_v21, 0.0  ;;  %v306_v26 = vmul.f32 0.2, %v274_v21  ;;  %346 = sbr.rel (!%p981_p5) target bundleno = 112 (0x70), region = 32 }
  0x43   : > { %336 = vst [vmem:[%s1059_s19 + $0x60] sm:$0xff] %v320_v23  ;;  %vm291_vm15 = vcmp.gt.f32.partialorder %v275_v24, 0.0  ;;  %v307_v27 = vmul.f32 0.2, %v275_v24  ;;  %v321_v28 = vsel %vm289_vm13, %v273_v20, %v305_v25 }
  0x44   : > { %v322_v29 = vsel %vm290_vm14, %v274_v21, %v306_v26  ;;  %337 = vst [vmem:[%s1059_s19 + $0x68] sm:$0xff] %v321_v28 }
  0x45   : > { %338 = vst [vmem:[%s1059_s19 + $0x70] sm:$0xff] %v322_v29  ;;  %v323_v30 = vsel %vm291_vm15, %v275_v24, %v307_v27 }
  0x46   : > { %339 = vst [vmem:[%s1059_s19 + $0x78] sm:$0xff] %v323_v30 }
  0x47   : > { %s1226_s21 = smov (!%p349_p11, %s348_s21), 16 }
  0x48   : > { %s661_s26 = sshll.u32 %s1226_s21, 7 }
  0x49   : > { %p664_p12 = scmp.eq.s32.totalorder %s661_s26, 0 }
  0x4a   : > { %s1108_s20 = sshrl.u32 (!%p664_p12), %s1226_s21, 4 }
  0x4b   : > { %359 = sbr.rel (%p664_p12) target bundleno = 112 (0x70), region = 36  ;;  %p665_p13 = scmp.le.s32.totalorder (!%p664_p12), %s1108_s20, 0 }
  0x50   : > { %589 = sbr.rel (%p665_p13) target bundleno = 95 (0x5f), region = 115  ;;  %s1210_s12 = smov (!%p665_p13), %s1105_s30 }
  0x51   : > { %s1211_s27 = smov (!%p665_p13), %s1059_s19  ;;  %s1117_s3 = smov (!%p665_p13), 0  }
  0x52   : > { %s1119_s4 = smov (!%p665_p13), 0  }
  0x55 LB: >> { %v452_v11 = vld [vmem:[%s896_s27] sm:$0xff]  ;;  %v454_v31 = vld [vmem:[%s896_s27 + $0x8] sm:$0xff]  ;;  %v456_v32 = vld [vmem:[%s896_s27 + $0x10] sm:$0xff]  ;;  %s484_s5 = sadd.s32 1, %s900_s3  ;;  %s446_s4 = sadd.s32 1, %s904_s4   ;;  %s904_s4 = sphi %s1119_s4, %s446_s4   ;;  %s900_s3 = sphi %s1117_s3, %s1212_s3   ;;  %s896_s27 = sphi %s1211_s27, %s489_s27   ;;  %s892_s12 = sphi %s1210_s12, %s490_s12  }
  0x56   : >> { %453 = vst [vmem:[%s892_s12] sm:$0xff] %v452_v11  ;;  %455 = vst [vmem:[%s892_s12 + $0x8] sm:$0xff] %v454_v31  ;;  %v458_v33 = vld [vmem:[%s896_s27 + $0x18] sm:$0xff]  ;;  %v460_v34 = vld [vmem:[%s896_s27 + $0x20] sm:$0xff]  ;;  %p485_p0 = scmp.ge.s32.totalorder %s484_s5, %s1108_s20  ;;  %p445_p1 = scmp.ge.s32.totalorder %s446_s4, %s1108_s20 }
  0x57   : >> { %457 = vst [vmem:[%s892_s12 + $0x10] sm:$0xff] %v456_v32  ;;  %v462_v35 = vld [vmem:[%s896_s27 + $0x28] sm:$0xff]  ;;  %459 = vst [vmem:[%s892_s12 + $0x18] sm:$0xff] %v458_v33  ;;  %v464_v36 = vld [vmem:[%s896_s27 + $0x30] sm:$0xff] }
  0x58   : >> { %461 = vst [vmem:[%s892_s12 + $0x20] sm:$0xff] %v460_v34  ;;  %463 = vst [vmem:[%s892_s12 + $0x28] sm:$0xff] %v462_v35  ;;  %v466_v37 = vld [vmem:[%s896_s27 + $0x38] sm:$0xff]  ;;  %v468_v38 = vld [vmem:[%s896_s27 + $0x40] sm:$0xff]  ;;  %s1228_s5 = smov (%p485_p0, %s484_s5), 0 }
  0x59   : >> { %465 = vst [vmem:[%s892_s12 + $0x30] sm:$0xff] %v464_v36  ;;  %467 = vst [vmem:[%s892_s12 + $0x38] sm:$0xff] %v466_v37  ;;  %v470_v39 = vld [vmem:[%s896_s27 + $0x48] sm:$0xff]  ;;  %v472_v40 = vld [vmem:[%s896_s27 + $0x50] sm:$0xff]  ;;  %s666_s6 = sshll.u32 %s1228_s5, 7  ;;  %s1212_s3 = smov %s1228_s5 }
  0x5a   : >> { %469 = vst [vmem:[%s892_s12 + $0x40] sm:$0xff] %v468_v38  ;;  %v474_v41 = vld [vmem:[%s896_s27 + $0x58] sm:$0xff]  ;;  %471 = vst [vmem:[%s892_s12 + $0x48] sm:$0xff] %v470_v39  ;;  %v476_v42 = vld [vmem:[%s896_s27 + $0x60] sm:$0xff]  ;;  %448 = sbr.rel (!%p445_p1) target bundleno = 85 (0x55), region = 121 }
  0x5b   : >> { %473 = vst [vmem:[%s892_s12 + $0x50] sm:$0xff] %v472_v40  ;;  %475 = vst [vmem:[%s892_s12 + $0x58] sm:$0xff] %v474_v41  ;;  %v478_v43 = vld [vmem:[%s896_s27 + $0x68] sm:$0xff]  ;;  %v480_v44 = vld [vmem:[%s896_s27 + $0x70] sm:$0xff] }
  0x5c   : >> { %477 = vst [vmem:[%s892_s12 + $0x60] sm:$0xff] %v476_v42  ;;  %479 = vst [vmem:[%s892_s12 + $0x68] sm:$0xff] %v478_v43  ;;  %v482_v45 = vld [vmem:[%s896_s27 + $0x78] sm:$0xff]  ;;  %s489_s27 = scalar_lea.vmem %s1059_s19, %s666_s6 [#allocation2]  }
  0x5d   : >> { %481 = vst [vmem:[%s892_s12 + $0x70] sm:$0xff] %v480_v44  ;;  %483 = vst [vmem:[%s892_s12 + $0x78] sm:$0xff] %v482_v45  ;;  %s490_s12 = scalar_lea.vmem %s1105_s30, %s666_s6  }
  0x5f PF: > { %s1177_s7 = sand.u32 15, %s1226_s21   ;;  %s676_s8 = sshll.u32 %s1108_s20, 7 }
  0x60   : > { %s495_s11 = scalar_lea.vmem %s1059_s19, %s676_s8 [#allocation2]   ;;  %s497_s18 = scalar_lea.vmem %s1105_s30, %s676_s8  }
  0x61   : > { %p671_p2 = scmp.le.s32.totalorder %s1177_s7, 0 }
  0x62   : > { %s906_s9 = smov (!%p671_p2), %s497_s18   ;;  %s910_s22 = smov (!%p671_p2), %s495_s11  }
  0x63   : > { %603 = sbr.rel (%p671_p2) target bundleno = 112 (0x70), region = 126  ;;  %s914_s23 = smov (!%p671_p2), 0  }
  0x64   : > { %s918_s25 = smov (!%p671_p2), 0  }
  0x68 LB: >> { %v507_v46 = vld [vmem:[%s912_s22] sm:$0xff]  ;;  %s509_s21 = sadd.s32 1, %s916_s23  ;;  %s501_s25 = sadd.s32 1, %s920_s25   ;;  %s920_s25 = sphi %s918_s25, %s501_s25   ;;  %s916_s23 = sphi %s914_s23, %s915_s23   ;;  %s912_s22 = sphi %s910_s22, %s514_s22   ;;  %s908_s9 = sphi %s906_s9, %s515_s9  }
  0x69   : >> { %508 = vst [vmem:[%s908_s9] sm:$0xff] %v507_v46  ;;  %p510_p3 = scmp.ge.s32.totalorder %s509_s21, %s1177_s7  ;;  %p500_p4 = scmp.ge.s32.totalorder %s501_s25, %s1177_s7 }
  0x6b   : >> { %s1230_s21 = smov (%p510_p3, %s509_s21), 0  ;;  %503 = sbr.rel (!%p500_p4) target bundleno = 104 (0x68), region = 132 }
  0x6c   : >> { %s672_s19 = sshll.u32 %s1230_s21, 3  ;;  %s915_s23 = smov %s1230_s21  }
  0x6d   : >> { %s514_s22 = scalar_lea.vmem %s495_s11, %s672_s19 [#allocation2]   ;;  %s515_s9 = scalar_lea.vmem %s497_s18, %s672_s19  }
  0x70 PF: > { %s12_s15 = sadd.s32 1, %s888_s15   ;;  %s1213_s9 = smov %s868_s10 }
  0x71   : > { %p9_p5 = scmp.ge.s32.totalorder %s12_s15, 6   ;;  %s1214_s10 = smov %s992_s24 }
  0x72   : > { %s1215_s11 = smov %s880_s13  ;;  %s1216_s12 = smov %s884_s14 }
  0x73   : > { %s1217_s13 = smov %s1220_s16  ;;  %s1218_s14 = smov %s1224_s17 }
  0x74   :  { %11 = sbr.rel (!%p9_p5) target bundleno = 4 (0x4), region = 143 }

// kernel: gaugan_discriminator_forward.12
= control target key start
LH: loop header
LB: loop body
LE: loop exit
PB: predicated region body
PF: predicated region fallthrough
CT: control target
= control target key end

     0   :  { %s512_s9 = smov 0   ;;  %s514_s10 = smov 0   ;;  %s582_s0 = inlined_call_operand.vmem [shape: f32[2,36,256], index: 0, kind: input, shape index: {}]   ;;  %s583_s1 = inlined_call_operand.vmem [shape: f32[2,2,256], index: 1, kind: input, shape index: {}]   ;;  %s584_s2 = inlined_call_operand.vmem [shape: f32[2,36,256], index: 2, kind: output, shape index: {}]  }
   0x1   :  { %s516_s11 = smov 0  }
   0x2 LB: > { %s24_s12 = sadd.s32 1, %s491_s10  ;;  %p438_p0 = scmp.ge.s32.totalorder %s495_s11, 1  ;;  %s495_s11 = sphi %s516_s11, %s12_s11   ;;  %s491_s10 = sphi %s514_s10, %s586_s10   ;;  %s487_s9 = sphi %s512_s9, %s585_s9  }
   0x3   : > { %p26_p1 = scmp.ge.s32.totalorder %s24_s12, 2  ;;  %p144_p2 = scmp.lt.s32.totalorder %s495_s11, 3 }
   0x5   : > { %s588_s12 = smov (%p26_p1, %s24_s12), 0  ;;  %p145_p3 = pnand %p438_p0, %p144_p2 }
   0x6   : > { %p182_p4 = scmp.lt.s32.totalorder (!%p145_p3), %s487_s9, 1 }
   0x7   : > { %148 = sbr.rel (%p145_p3) target bundleno = 60 (0x3c), region = 28 }
   0xc   : > { %s590_s9 = smov (!%p182_p4, %s487_s9), 1  ;;  %v227_v4 = vlaneseq }
   0xd   : > { %s445_s13 = sshll.u32 %s590_s9, 2  ;;  %s446_s17 = smul.u32 80, %s590_s9 }
   0xe   : > { %s196_s16 = scalar_lea.vmem %s583_s1, %s445_s13  ;;  %v228_v7 = vshrl.u32 %v227_v4, 7 }
   0xf   : > { %v218_v0 = vld [vmem:[%s196_s16] sm:$0xf]  ;;  %s190_s20 = scalar_lea.vmem %s582_s0, %s446_s17  ;;  %s561_s23 = scalar_lea.vmem %s584_s2, %s446_s17 }
  0x10   : > { %v219_v1 = vmul.f32 0.027777778, %v218_v0  ;;  %v229_v9 = vsub.s32 0, %v228_v7  ;;  %v233_v10 = vsub.s32 2, %v228_v7  ;;  %v208_v15 = vld [vmem:[%s190_s20] sm:$0xff]  ;;  %v260_v16 = vsub.s32 1, %v228_v7 }
  0x11   : > { %v209_v17 = vld [vmem:[%s190_s20 + $0x8] sm:$0xff]  ;;  %v264_v18 = vsub.s32 3, %v228_v7  ;;  %v210_v19 = vld [vmem:[%s190_s20 + $0x10] sm:$0xff]  ;;  %v211_v20 = vld [vmem:[%s190_s20 + $0x18] sm:$0xff] }
  0x12   : > { %v220_v2 = vmul.f32 %v219_v1, %v219_v1  ;;  %v230_v11 = vrot.slane %v219_v1, %v229_v9  ;;  %v234_v12 = vrot.slane %v219_v1, %v233_v10  ;;  %v212_v21 = vld [vmem:[%s190_s20 + $0x20] sm:$0xff]  ;;  %v213_v22 = vld [vmem:[%s190_s20 + $0x28] sm:$0xff]  ;;  %v214_v23 = vld [vmem:[%s190_s20 + $0x30] sm:$0xff] }
  0x13   : > { %v215_v24 = vld [vmem:[%s190_s20 + $0x38] sm:$0xff]  ;;  %v216_v32 = vld [vmem:[%s190_s20 + $0x40] sm:$0xf]  ;;  %v217_v33 = vld [vmem:[%s190_s20 + $0x48] sm:$0xf] }
  0x14   : > { %v222_v3 = vrot.slane %v220_v2, 7  ;;  %v542_v13 = vrot.slane %v230_v11, %v229_v9  ;;  %v544_v14 = vrot.slane %v234_v12, %v229_v9 }
  0x16   : > { %v224_v5 = vsub.f32 %v219_v1, %v222_v3  ;;  %v245_v26 = vsub.f32 %v208_v15, %v542_v13  ;;  %v246_v27 = vsub.f32 %v209_v17, %v544_v14  ;;  %v247_v30 = vsub.f32 %v210_v19, %v542_v13 }
  0x17   : > { %v248_v31 = vsub.f32 %v211_v20, %v544_v14  ;;  %v249_v34 = vsub.f32 %v212_v21, %v542_v13  ;;  %v250_v35 = vsub.f32 %v213_v22, %v544_v14  ;;  %v251_v36 = vsub.f32 %v214_v23, %v542_v13 }
  0x18   : > { %v225_v6 = vmax.f32 %v224_v5, 0.0  ;;  %v252_v37 = vsub.f32 %v215_v24, %v544_v14  ;;  %v253_v40 = vsub.f32 %v216_v32, %v542_v13  ;;  %v254_v41 = vsub.f32 %v217_v33, %v544_v14 }
  0x1a   : > { %v255_v8 = vadd.f32 1e-05, %v225_v6 }
  0x1c   : > { %471 = vrsqrt.f32 %v255_v8 }
  0x29   : > { %v472_v25 = vpop.eup %471 }
  0x2a   : > { %v261_v28 = vrot.slane %v472_v25, %v260_v16  ;;  %v265_v29 = vrot.slane %v472_v25, %v264_v18 }
  0x2c   : > { %v271_v38 = vrot.slane %v261_v28, %v260_v16  ;;  %v275_v39 = vrot.slane %v265_v29, %v260_v16 }
  0x2e   : > { %v276_v42 = vmul.f32 %v271_v38, %v245_v26  ;;  %v277_v43 = vmul.f32 %v275_v39, %v246_v27  ;;  %v278_v44 = vmul.f32 %v271_v38, %v247_v30  ;;  %v279_v45 = vmul.f32 %v275_v39, %v248_v31 }
  0x2f   : > { %v280_v46 = vmul.f32 %v271_v38, %v249_v34  ;;  %v281_v47 = vmul.f32 %v275_v39, %v250_v35  ;;  %v282_v48 = vmul.f32 %v271_v38, %v251_v36  ;;  %v283_v49 = vmul.f32 %v275_v39, %v252_v37 }
  0x30   : > { %vm286_vm0 = vcmp.gt.f32.partialorder %v276_v42, 0.0  ;;  %v296_v50 = vmul.f32 0.2, %v276_v42  ;;  %vm287_vm1 = vcmp.gt.f32.partialorder %v277_v43, 0.0  ;;  %v297_v51 = vmul.f32 0.2, %v277_v43 }
  0x31   : > { %vm288_vm2 = vcmp.gt.f32.partialorder %v278_v44, 0.0  ;;  %v298_v52 = vmul.f32 0.2, %v278_v44  ;;  %vm289_vm3 = vcmp.gt.f32.partialorder %v279_v45, 0.0  ;;  %v299_v53 = vmul.f32 0.2, %v279_v45 }
  0x32   : > { %v306_v54 = vsel %vm286_vm0, %v276_v42, %v296_v50  ;;  %v307_v55 = vsel %vm287_vm1, %v277_v43, %v297_v51  ;;  %vm290_vm4 = vcmp.gt.f32.partialorder %v280_v46, 0.0  ;;  %v300_v56 = vmul.f32 0.2, %v280_v46 }
  0x33   : > { %316 = vst [vmem:[%s561_s23] sm:$0xff] %v306_v54  ;;  %317 = vst [vmem:[%s561_s23 + $0x8] sm:$0xff] %v307_v55  ;;  %v308_v57 = vsel %vm288_vm2, %v278_v44, %v298_v52  ;;  %v309_v58 = vsel %vm289_vm3, %v279_v45, %v299_v53  ;;  %vm291_vm5 = vcmp.gt.f32.partialorder %v281_v47, 0.0  ;;  %v301_v59 = vmul.f32 0.2, %v281_v47 }
  0x34   : > { %318 = vst [vmem:[%s561_s23 + $0x10] sm:$0xff] %v308_v57  ;;  %319 = vst [vmem:[%s561_s23 + $0x18] sm:$0xff] %v309_v58  ;;  %v310_v60 = vsel %vm290_vm4, %v280_v46, %v300_v56  ;;  %vm292_vm6 = vcmp.gt.f32.partialorder %v282_v48, 0.0  ;;  %v302_v61 = vmul.f32 0.2, %v282_v48  ;;  %vm293_vm7 = vcmp.gt.f32.partialorder %v283_v49, 0.0 }
  0x35   : > { %320 = vst [vmem:[%s561_s23 + $0x20] sm:$0xff] %v310_v60  ;;  %v311_v62 = vsel %vm291_vm5, %v281_v47, %v301_v59  ;;  %v303_v63 = vmul.f32 0.2, %v283_v49  ;;  %v284_v0 = vmul.f32 %v271_v38, %v253_v40  ;;  %v285_v1 = vmul.f32 %v275_v39, %v254_v41 }
  0x36   : > { %321 = vst [vmem:[%s561_s23 + $0x28] sm:$0xff] %v311_v62  ;;  %v312_v2 = vsel %vm292_vm6, %v282_v48, %v302_v61 }
  0x37   : > { %322 = vst [vmem:[%s561_s23 + $0x30] sm:$0xff] %v312_v2  ;;  %v313_v3 = vsel %vm293_vm7, %v283_v49, %v303_v63  ;;  %vm294_vm8 = vcmp.gt.f32.partialorder %v284_v0, 0.0  ;;  %v304_v4 = vmul.f32 0.2, %v284_v0  ;;  %vm295_vm9 = vcmp.gt.f32.partialorder %v285_v1, 0.0 }
  0x38   : > { %323 = vst [vmem:[%s561_s23 + $0x38] sm:$0xff] %v313_v3  ;;  %v305_v5 = vmul.f32 0.2, %v285_v1 }
  0x39   : > { %v314_v6 = vsel %vm294_vm8, %v284_v0, %v304_v4 }
  0x3a   : > { %324 = vst [vmem:[%s561_s23 + $0x40] sm:$0xf] %v314_v6  ;;  %v315_v7 = vsel %vm295_vm9, %v285_v1, %v305_v5 }
  0x3b   : > { %325 = vst [vmem:[%s561_s23 + $0x48] sm:$0xf] %v315_v7 }
  0x3c PF: > { %s12_s11 = sadd.s32 1, %s495_s11   ;;  %s585_s9 = smov %s491_s10 }
  0x3d   : > { %p9_p5 = scmp.ge.s32.totalorder %s12_s11, 4   ;;  %s586_s10 = smov %s588_s12 }
  0x3f   :  { %11 = sbr.rel (!%p9_p5) target bundleno = 2 (0x2), region = 61 }

// kernel: gaugan_discriminator_forward.11
= control target key start
LH: loop header
LB: loop body
LE: loop exit
PB: predicated region body
PF: predicated region fallthrough
CT: control target
= control target key end

     0   :  { %s3552_s12 = smov 0   ;;  %s3554_s13 = smov 0   ;;  %s4521_s0 = inlined_call_operand.vmem [shape: bf16[2,36,2048], index: 0, kind: input, shape index: {}]   ;;  %s4522_s1 = inlined_call_operand.vmem [shape: bf16[2048,256], index: 1, kind: input, shape index: {}]   ;;  %s4523_s2 = inlined_call_operand.vmem [shape: f32[2,36,256], index: 2, kind: output, shape index: {0}]   ;;  %s4524_s3 = inlined_call_operand.vmem [shape: f32[2,2,256], index: 3, kind: output, shape index: {1}]  }
   0x1   :  { %s3556_s14 = smov 0  }
   0x2 LB: > { %s26_s15 = sadd.s32 1, %s3524_s13  ;;  %p2766_p0 = scmp.ge.s32.totalorder %s3528_s14, 1  ;;  %s3528_s14 = sphi %s3556_s14, %s14_s14   ;;  %s3524_s13 = sphi %s3554_s13, %s4526_s13   ;;  %s3520_s12 = sphi %s3552_s12, %s4525_s12  }
   0x3   : > { %p28_p1 = scmp.ge.s32.totalorder %s26_s15, 2  ;;  %p162_p2 = scmp.lt.s32.totalorder %s3528_s14, 3 }
   0x5   : > { %s4528_s15 = smov (%p28_p1, %s26_s15), 0  ;;  %p163_p3 = pnand %p2766_p0, %p162_p2 }
   0x6   : > { %p202_p4 = scmp.lt.s32.totalorder (!%p163_p3), %s3520_s12, 1 }
   0x7   : > { %166 = sbr.rel (%p163_p3) target bundleno = 511 (0x1ff), region = 28 }
   0xc   : > { %v3106_v0 = vld [vmem:[%s4522_s1 + $0x74] ss:$8 sps:$4 sm:$0xff]   ;;  %v3110_v2 = vld [vmem:[%s4522_s1 + $0x70] ss:$8 sps:$4 sm:$0xff]   ;;  %v3112_v4 = vld [vmem:[%s4522_s1 + $0x64] ss:$8 sps:$4 sm:$0xff]  }
   0xd   : > { %v3108_v1 = vld [vmem:[%s4522_s1 + $0x174] ss:$8 sps:$4 sm:$0xff]   ;;  %2025 = vmatprep.subr.bf16.mxu0 %v3106_v0  ;;  %v3111_v3 = vld [vmem:[%s4522_s1 + $0x170] ss:$8 sps:$4 sm:$0xff]   ;;  %v3114_v5 = vld [vmem:[%s4522_s1 + $0x164] ss:$8 sps:$4 sm:$0xff]  }
   0xe   : > { %2086 = vmatprep.subr.bf16.mxu1 %v3108_v1  ;;  %2026 = vmatpush1.bf16.msra.mxu0 %v3110_v2  ;;  %v3116_v6 = vld [vmem:[%s4522_s1 + $0x60] ss:$8 sps:$4 sm:$0xff]   ;;  %v3118_v8 = vld [vmem:[%s4522_s1 + $0x54] ss:$8 sps:$4 sm:$0xff]   ;;  %v3122_v10 = vld [vmem:[%s4522_s1 + $0x50] ss:$8 sps:$4 sm:$0xff]  }
   0xf   : > { %2087 = vmatpush1.bf16.msra.mxu1 %v3111_v3  ;;  %2027 = vmatprep.subr.bf16.mxu0 %v3112_v4  ;;  %v3117_v7 = vld [vmem:[%s4522_s1 + $0x160] ss:$8 sps:$4 sm:$0xff]   ;;  %v3120_v9 = vld [vmem:[%s4522_s1 + $0x154] ss:$8 sps:$4 sm:$0xff]   ;;  %v3123_v11 = vld [vmem:[%s4522_s1 + $0x150] ss:$8 sps:$4 sm:$0xff]  }
  0x10   : > { %2088 = vmatprep.subr.bf16.mxu1 %v3114_v5  ;;  %v3124_v12 = vld [vmem:[%s4522_s1 + $0x44] ss:$8 sps:$4 sm:$0xff]   ;;  %v3128_v14 = vld [vmem:[%s4522_s1 + $0x40] ss:$8 sps:$4 sm:$0xff]   ;;  %v3130_v16 = vld [vmem:[%s4522_s1 + $0x34] ss:$8 sps:$4 sm:$0xff]  }
  0x11   : > { %v3126_v13 = vld [vmem:[%s4522_s1 + $0x144] ss:$8 sps:$4 sm:$0xff]   ;;  %v3129_v15 = vld [vmem:[%s4522_s1 + $0x140] ss:$8 sps:$4 sm:$0xff]   ;;  %v3132_v17 = vld [vmem:[%s4522_s1 + $0x134] ss:$8 sps:$4 sm:$0xff]  }
  0x12   : > { %2028 = vmatpush1.bf16.msra.mxu0 %v3116_v6  ;;  %v3134_v18 = vld [vmem:[%s4522_s1 + $0x30] ss:$8 sps:$4 sm:$0xff]   ;;  %v3136_v20 = vld [vmem:[%s4522_s1 + $0x24] ss:$8 sps:$4 sm:$0xff]   ;;  %v3140_v22 = vld [vmem:[%s4522_s1 + $0x20] ss:$8 sps:$4 sm:$0xff]  }
  0x13   : > { %2089 = vmatpush1.bf16.msra.mxu1 %v3117_v7  ;;  %2029 = vmatprep.subr.bf16.mxu0 %v3118_v8  ;;  %v3135_v19 = vld [vmem:[%s4522_s1 + $0x130] ss:$8 sps:$4 sm:$0xff]   ;;  %v3138_v21 = vld [vmem:[%s4522_s1 + $0x124] ss:$8 sps:$4 sm:$0xff]   ;;  %v3141_v23 = vld [vmem:[%s4522_s1 + $0x120] ss:$8 sps:$4 sm:$0xff]  }
  0x14   : > { %2090 = vmatprep.subr.bf16.mxu1 %v3120_v9  ;;  %v3142_v24 = vld [vmem:[%s4522_s1 + $0x14] ss:$8 sps:$4 sm:$0xff]   ;;  %v3146_v26 = vld [vmem:[%s4522_s1 + $0x10] ss:$8 sps:$4 sm:$0xff]   ;;  %v3148_v28 = vld [vmem:[%s4522_s1 + $0x4] ss:$8 sps:$4 sm:$0xff]  }
  0x15   : > { %v3144_v25 = vld [vmem:[%s4522_s1 + $0x114] ss:$8 sps:$4 sm:$0xff]   ;;  %v3147_v27 = vld [vmem:[%s4522_s1 + $0x110] ss:$8 sps:$4 sm:$0xff]   ;;  %v3150_v29 = vld [vmem:[%s4522_s1 + $0x104] ss:$8 sps:$4 sm:$0xff]  }
  0x16   : > { %2030 = vmatpush1.bf16.msra.mxu0 %v3122_v10  ;;  %v3152_v30 = vld [vmem:[%s4522_s1] ss:$8 sps:$4 sm:$0xff]   ;;  %v3154_v32 = vld [vmem:[%s4522_s1 + $0xf4] ss:$8 sps:$4 sm:$0xff]   ;;  %v3158_v34 = vld [vmem:[%s4522_s1 + $0xf0] ss:$8 sps:$4 sm:$0xff]  }
  0x17   : > { %2091 = vmatpush1.bf16.msra.mxu1 %v3123_v11  ;;  %2031 = vmatprep.subr.bf16.mxu0 %v3124_v12  ;;  %v3153_v31 = vld [vmem:[%s4522_s1 + $0x100] ss:$8 sps:$4 sm:$0xff]   ;;  %v3156_v33 = vld [vmem:[%s4522_s1 + $0x1f4] ss:$8 sps:$4 sm:$0xff]   ;;  %v3159_v35 = vld [vmem:[%s4522_s1 + $0x1f0] ss:$8 sps:$4 sm:$0xff]  }
  0x18   : > { %2092 = vmatprep.subr.bf16.mxu1 %v3126_v13  ;;  %s4530_s12 = smov (!%p202_p4, %s3520_s12), 1  ;;  %v3160_v36 = vld [vmem:[%s4522_s1 + $0xe4] ss:$8 sps:$4 sm:$0xff]   ;;  %v3164_v38 = vld [vmem:[%s4522_s1 + $0xe0] ss:$8 sps:$4 sm:$0xff]   ;;  %vm2564_vm1 = vcmask 1043456  }
  0x19   : > { %v3162_v37 = vld [vmem:[%s4522_s1 + $0x1e4] ss:$8 sps:$4 sm:$0xff]   ;;  %s3078_s25 = smul.u32 320, %s4530_s12  ;;  %v3165_v39 = vld [vmem:[%s4522_s1 + $0x1e0] ss:$8 sps:$4 sm:$0xff]   ;;  %vm2616_vm2 = vcmask 1040384  }
  0x1a   : > { %2032 = vmatpush1.bf16.msra.mxu0 %v3128_v14  ;;  %v3166_v40 = vld [vmem:[%s4522_s1 + $0xd4] ss:$8 sps:$4 sm:$0xff]   ;;  %v3170_v42 = vld [vmem:[%s4522_s1 + $0xd0] ss:$8 sps:$4 sm:$0xff]   ;;  %v3172_v44 = vld [vmem:[%s4522_s1 + $0xc4] ss:$8 sps:$4 sm:$0xff]  }
  0x1b   : > { %2093 = vmatpush1.bf16.msra.mxu1 %v3129_v15  ;;  %2033 = vmatprep.subr.bf16.mxu0 %v3130_v16  ;;  %v3168_v41 = vld [vmem:[%s4522_s1 + $0x1d4] ss:$8 sps:$4 sm:$0xff]   ;;  %v3171_v43 = vld [vmem:[%s4522_s1 + $0x1d0] ss:$8 sps:$4 sm:$0xff]   ;;  %s3712_s11 = scalar_lea.vmem %s4521_s0, %s3078_s25  ;;  %v3174_v45 = vld [vmem:[%s4522_s1 + $0x1c4] ss:$8 sps:$4 sm:$0xff]  }
  0x1c   : > { %2094 = vmatprep.subr.bf16.mxu1 %v3132_v17  ;;  %v3176_v46 = vld [vmem:[%s4522_s1 + $0xc0] ss:$8 sps:$4 sm:$0xff]   ;;  %v3178_v52 = vld [vmem:[%s4522_s1 + $0xb4] ss:$8 sps:$4 sm:$0xff]   ;;  %v3182_v56 = vld [vmem:[%s4522_s1 + $0xb0] ss:$8 sps:$4 sm:$0xff]  }
  0x1d   : > { %v3177_v47 = vld [vmem:[%s4522_s1 + $0x1c0] ss:$8 sps:$4 sm:$0xff]   ;;  %v3180_v54 = vld [vmem:[%s4522_s1 + $0x1b4] ss:$8 sps:$4 sm:$0xff]   ;;  %v3183_v57 = vld [vmem:[%s4522_s1 + $0x1b0] ss:$8 sps:$4 sm:$0xff]  }
  0x1e   : > { %2034 = vmatpush1.bf16.msra.mxu0 %v3134_v18  ;;  %v233_v48 = vld [vmem:[%s3712_s11] sm:$0xff]  ;;  %v234_v50 = vld [vmem:[%s3712_s11 + $0x8] sm:$0xff]  ;;  %v3190_v62 = vld [vmem:[%s4522_s1 + $0x94] ss:$8 sps:$4 sm:$0xff]   ;;  %s3079_s25 = smul.u32 80, %s4530_s12 }
  0x1f   : > { %2095 = vmatpush1.bf16.msra.mxu1 %v3135_v19  ;;  %2035 = vmatprep.subr.bf16.mxu0 %v3136_v20  ;;  %v241_v49 = vld [vmem:[%s3712_s11 + $0x40] sm:$0xff]  ;;  %v242_v51 = vld [vmem:[%s3712_s11 + $0x48] sm:$0xff]  ;;  %v3192_v63 = vld [vmem:[%s4522_s1 + $0x194] ss:$8 sps:$4 sm:$0xff]  }
  0x20   : > { %2096 = vmatprep.subr.bf16.mxu1 %v3138_v21  ;;  %v2772_v53 = vcombine.high %v233_v48, %v241_v49  ;;  %v2774_v55 = vcombine.high %v234_v50, %v242_v51  ;;  %v3184_v58 = vld [vmem:[%s4522_s1 + $0xa4] ss:$8 sps:$4 sm:$0xff]   ;;  %v3188_v60 = vld [vmem:[%s4522_s1 + $0xa0] ss:$8 sps:$4 sm:$0xff]   ;;  %v3194_v0 = vld [vmem:[%s4522_s1 + $0x90] ss:$8 sps:$4 sm:$0xff]   ;;  %v2771_v8 = vcombine.low %v233_v48, %v241_v49  ;;  %v2773_v9 = vcombine.low %v234_v50, %v242_v51  ;;  %s4479_s28 = scalar_lea.vmem %s4523_s2, %s3079_s25 }
  0x21   : > { %v3186_v59 = vld [vmem:[%s4522_s1 + $0x1a4] ss:$8 sps:$4 sm:$0xff]   ;;  %v3189_v61 = vld [vmem:[%s4522_s1 + $0x1a0] ss:$8 sps:$4 sm:$0xff]   ;;  %v3195_v1 = vld [vmem:[%s4522_s1 + $0x190] ss:$8 sps:$4 sm:$0xff]  }
  0x22   : > { %2036 = vmatpush1.bf16.msra.mxu0 %v3140_v22  ;;  %2057 = vmatprep.mubr.bf16.mxu0 %v2772_v53  ;;  %v3196_v2 = vld [vmem:[%s4522_s1 + $0x84] ss:$8 sps:$4 sm:$0xff]   ;;  %v3200_v4 = vld [vmem:[%s4522_s1 + $0x80] ss:$8 sps:$4 sm:$0xff]   ;;  %v3204_v6 = vld [vmem:[%s4522_s1 + $0x274] ss:$8 sps:$4 sm:$0xff]  }
  0x23   : > { %2097 = vmatpush1.bf16.msra.mxu1 %v3141_v23  ;;  %2037 = vmatprep.subr.bf16.mxu0 %v3142_v24  ;;  %v3198_v3 = vld [vmem:[%s4522_s1 + $0x184] ss:$8 sps:$4 sm:$0xff]   ;;  %v3201_v5 = vld [vmem:[%s4522_s1 + $0x180] ss:$8 sps:$4 sm:$0xff]   ;;  %v3207_v7 = vld [vmem:[%s4522_s1 + $0x374] ss:$8 sps:$4 sm:$0xff]  }
  0x24   : > { %2098 = vmatprep.subr.bf16.mxu1 %v3144_v25  ;;  %2118 = vmatprep.mubr.bf16.mxu1 %v2774_v55  ;;  %v3202_v10 = vld [vmem:[%s4522_s1 + $0x270] ss:$8 sps:$4 sm:$0xff]   ;;  %v3210_v12 = vld [vmem:[%s4522_s1 + $0x264] ss:$8 sps:$4 sm:$0xff]   ;;  %v3208_v14 = vld [vmem:[%s4522_s1 + $0x260] ss:$8 sps:$4 sm:$0xff]  }
  0x25   : > { %v3205_v11 = vld [vmem:[%s4522_s1 + $0x370] ss:$8 sps:$4 sm:$0xff]   ;;  %v3213_v13 = vld [vmem:[%s4522_s1 + $0x364] ss:$8 sps:$4 sm:$0xff]   ;;  %v3211_v15 = vld [vmem:[%s4522_s1 + $0x360] ss:$8 sps:$4 sm:$0xff]  }
  0x26   : > { %2038 = vmatpush1.bf16.msra.mxu0 %v3146_v26  ;;  %v3216_v16 = vld [vmem:[%s4522_s1 + $0x254] ss:$8 sps:$4 sm:$0xff]   ;;  %v3214_v18 = vld [vmem:[%s4522_s1 + $0x250] ss:$8 sps:$4 sm:$0xff]   ;;  %v3222_v20 = vld [vmem:[%s4522_s1 + $0x244] ss:$8 sps:$4 sm:$0xff]  }
  0x27   : > { %2099 = vmatpush1.bf16.msra.mxu1 %v3147_v27  ;;  %2039 = vmatprep.subr.bf16.mxu0 %v3148_v28  ;;  %v3219_v17 = vld [vmem:[%s4522_s1 + $0x354] ss:$8 sps:$4 sm:$0xff]   ;;  %v3217_v19 = vld [vmem:[%s4522_s1 + $0x350] ss:$8 sps:$4 sm:$0xff]   ;;  %v3225_v21 = vld [vmem:[%s4522_s1 + $0x344] ss:$8 sps:$4 sm:$0xff]  }
  0x28   : > { %2100 = vmatprep.subr.bf16.mxu1 %v3150_v29  ;;  %v249_v22 = vld [vmem:[%s3712_s11 + $0x80] sm:$0xff]  ;;  %v250_v25 = vld [vmem:[%s3712_s11 + $0x88] sm:$0xff]  ;;  %v3238_v48 = vld [vmem:[%s4522_s1 + $0x210] ss:$8 sps:$4 sm:$0xff]  }
  0x29   : > { %v257_v23 = vld [vmem:[%s3712_s11 + $0xc0] sm:$0xff]  ;;  %v258_v26 = vld [vmem:[%s3712_s11 + $0xc8] sm:$0xff]  ;;  %v3241_v49 = vld [vmem:[%s4522_s1 + $0x310] ss:$8 sps:$4 sm:$0xff]  }
  0x2a   : > { %2040 = vmatpush1.bf16.msra.mxu0 %v3152_v30  ;;  %v2788_v24 = vcombine.high %v249_v22, %v257_v23  ;;  %v3220_v27 = vld [vmem:[%s4522_s1 + $0x240] ss:$8 sps:$4 sm:$0xff]   ;;  %v2790_v29 = vcombine.high %v250_v25, %v258_v26  ;;  %v2787_v30 = vcombine.low %v249_v22, %v257_v23  ;;  %v3246_v50 = vld [vmem:[%s4522_s1 + $0x204] ss:$8 sps:$4 sm:$0xff]   ;;  %v3878_v53 = vld [vmem:[%s3712_s11 + $0x50] sm:$0xff] }
  0x2b   : > { %2101 = vmatpush1.bf16.msra.mxu1 %v3153_v31  ;;  %2041 = vmatprep.subr.bf16.mxu0 %v3154_v32  ;;  %v3223_v28 = vld [vmem:[%s4522_s1 + $0x340] ss:$8 sps:$4 sm:$0xff]   ;;  %v2789_v31 = vcombine.low %v250_v25, %v258_v26  ;;  %v3228_v32 = vld [vmem:[%s4522_s1 + $0x234] ss:$8 sps:$4 sm:$0xff]   ;;  %v3249_v51 = vld [vmem:[%s4522_s1 + $0x304] ss:$8 sps:$4 sm:$0xff]  }
  0x2c   : > { %2102 = vmatprep.subr.bf16.mxu1 %v3156_v33  ;;  %v3231_v33 = vld [vmem:[%s4522_s1 + $0x334] ss:$8 sps:$4 sm:$0xff]   ;;  %v3290_v22 = vld [vmem:[%s4522_s1 + $0x290] ss:$8 sps:$4 sm:$0xff]   ;;  %v3301_v25 = vld [vmem:[%s4522_s1 + $0x384] ss:$8 sps:$4 sm:$0xff]  }
  0x2d   : > { %v3884_v55 = vld [vmem:[%s3712_s11 + $0x58] sm:$0xff]  ;;  %v3296_v26 = vld [vmem:[%s4522_s1 + $0x280] ss:$8 sps:$4 sm:$0xff]  }
  0x2e   : > { %2042 = vmatpush2.bf16.msra.mxu0 %v3158_v34  ;;  %v3226_v34 = vld [vmem:[%s4522_s1 + $0x230] ss:$8 sps:$4 sm:$0xff]  }
  0x2f   : > { %2103 = vmatpush2.bf16.msra.mxu1 %v3159_v35  ;;  %2043 = vmatprep.subr.bf16.mxu0 %v3160_v36  ;;  %v3229_v35 = vld [vmem:[%s4522_s1 + $0x330] ss:$8 sps:$4 sm:$0xff]   ;;  %v265_v36 = vld [vmem:[%s3712_s11 + $0x100] sm:$0x33] }
  0x30   : > { %2104 = vmatprep.subr.bf16.mxu1 %v3162_v37  ;;  %v266_v37 = vld [vmem:[%s3712_s11 + $0x108] sm:$0x33]  ;;  %v3293_v23 = vld [vmem:[%s4522_s1 + $0x390] ss:$8 sps:$4 sm:$0xff]  }
  0x32   : > { %2044 = vmatpush2.bf16.msra.mxu0 %v3164_v38  ;;  %v3234_v38 = vld [vmem:[%s4522_s1 + $0x224] ss:$8 sps:$4 sm:$0xff]  }
  0x33   : > { %2105 = vmatpush2.bf16.msra.mxu1 %v3165_v39  ;;  %2045 = vmatprep.subr.bf16.mxu0 %v3166_v40  ;;  %v3237_v39 = vld [vmem:[%s4522_s1 + $0x324] ss:$8 sps:$4 sm:$0xff]   ;;  %v2804_v40 = vcombine.high %v265_v36, %v265_v36 }
  0x34   : > { %2106 = vmatprep.subr.bf16.mxu1 %v3168_v41  ;;  %v2806_v41 = vcombine.high %v266_v37, %v266_v37 }
  0x36   : > { %2046 = vmatpush2.bf16.msra.mxu0 %v3170_v42  ;;  %v2803_v42 = vcombine.low %v265_v36, %v265_v36  ;;  %v252_v36 = vld [vmem:[%s3712_s11 + $0x98] sm:$0xff] }
  0x37   : > { %2107 = vmatpush2.bf16.msra.mxu1 %v3171_v43  ;;  %2047 = vmatprep.subr.bf16.mxu0 %v3172_v44  ;;  %v2805_v43 = vcombine.low %v266_v37, %v266_v37  ;;  %v3232_v44 = vld [vmem:[%s4522_s1 + $0x220] ss:$8 sps:$4 sm:$0xff]   ;;  %v260_v37 = vld [vmem:[%s3712_s11 + $0xd8] sm:$0xff] }
  0x38   : > { %2108 = vmatprep.subr.bf16.mxu1 %v3174_v45  ;;  %v3235_v45 = vld [vmem:[%s4522_s1 + $0x320] ss:$8 sps:$4 sm:$0xff]  }
  0x3a   : > { %2048 = vmatpush2.bf16.msra.mxu0 %v3176_v46  ;;  %v3240_v46 = vld [vmem:[%s4522_s1 + $0x214] ss:$8 sps:$4 sm:$0xff]  }
  0x3b   : > { %2109 = vmatpush2.bf16.msra.mxu1 %v3177_v47  ;;  %2049 = vmatprep.subr.bf16.mxu0 %v3178_v52  ;;  %v3243_v47 = vld [vmem:[%s4522_s1 + $0x314] ss:$8 sps:$4 sm:$0xff]  }
  0x3c   : > { %2110 = vmatprep.subr.bf16.mxu1 %v3180_v54  ;;  %v3875_v52 = vld [vmem:[%s3712_s11 + $0x10] sm:$0xff]  ;;  %v3881_v54 = vld [vmem:[%s3712_s11 + $0x18] sm:$0xff] }
  0x3e   : > { %2050 = vmatpush2.bf16.msra.mxu0 %v3182_v56  ;;  %v2776_v56 = vcombine.high %v3875_v52, %v3878_v53 }
  0x3f   : > { %2111 = vmatpush2.bf16.msra.mxu1 %v3183_v57  ;;  %2051 = vmatprep.subr.bf16.mxu0 %v3184_v58  ;;  %v2778_v57 = vcombine.high %v3881_v54, %v3884_v55  ;;  %v3244_v58 = vld [vmem:[%s4522_s1 + $0x200] ss:$8 sps:$4 sm:$0xff]  }
  0x40   : > { %2112 = vmatprep.subr.bf16.mxu1 %v3186_v59  ;;  %v3247_v59 = vld [vmem:[%s4522_s1 + $0x300] ss:$8 sps:$4 sm:$0xff]  }
  0x42   : > { %2052 = vmatpush2.bf16.msra.mxu0 %v3188_v60  ;;  %v3252_v60 = vld [vmem:[%s4522_s1 + $0x2f4] ss:$8 sps:$4 sm:$0xff]  }
  0x43   : > { %2113 = vmatpush2.bf16.msra.mxu1 %v3189_v61  ;;  %2053 = vmatprep.subr.bf16.mxu0 %v3190_v62  ;;  %v3255_v61 = vld [vmem:[%s4522_s1 + $0x3f4] ss:$8 sps:$4 sm:$0xff]   ;;  %v3250_v62 = vld [vmem:[%s4522_s1 + $0x2f0] ss:$8 sps:$4 sm:$0xff]  }
  0x44   : > { %2114 = vmatprep.subr.bf16.mxu1 %v3192_v63  ;;  %v3253_v63 = vld [vmem:[%s4522_s1 + $0x3f0] ss:$8 sps:$4 sm:$0xff]  }
  0x46   : > { %2054 = vmatpush2.bf16.msra.mxu0 %v3194_v0  ;;  %v3258_v0 = vld [vmem:[%s4522_s1 + $0x2e4] ss:$8 sps:$4 sm:$0xff]  }
  0x47   : > { %2115 = vmatpush2.bf16.msra.mxu1 %v3195_v1  ;;  %2055 = vmatprep.subr.bf16.mxu0 %v3196_v2  ;;  %v3261_v1 = vld [vmem:[%s4522_s1 + $0x3e4] ss:$8 sps:$4 sm:$0xff]   ;;  %v3256_v2 = vld [vmem:[%s4522_s1 + $0x2e0] ss:$8 sps:$4 sm:$0xff]  }
  0x48   : > { %2116 = vmatprep.subr.bf16.mxu1 %v3198_v3  ;;  %v3259_v3 = vld [vmem:[%s4522_s1 + $0x3e0] ss:$8 sps:$4 sm:$0xff]  }
  0x4a   : > { %2056 = vmatpush2.bf16.msra.mxu0 %v3200_v4  ;;  %v3264_v4 = vld [vmem:[%s4522_s1 + $0x2d4] ss:$8 sps:$4 sm:$0xff]  }
  0x4b   : > { %2117 = vmatpush2.bf16.msra.mxu1 %v3201_v5  ;;  %2147 = vmatprep.subr.bf16.mxu0 %v3204_v6  ;;  %v3267_v5 = vld [vmem:[%s4522_s1 + $0x3d4] ss:$8 sps:$4 sm:$0xff]   ;;  %v3262_v6 = vld [vmem:[%s4522_s1 + $0x2d0] ss:$8 sps:$4 sm:$0xff]  }
  0x4c   : > { %2208 = vmatprep.subr.bf16.mxu1 %v3207_v7  ;;  %v3265_v7 = vld [vmem:[%s4522_s1 + $0x3d0] ss:$8 sps:$4 sm:$0xff]  }
  0x4d   : > { %2058 = vmatmul.mubr.bf16.vlgmr.msra.gmra.mxu0 %v2771_v8  ;;  %v3270_v8 = vld [vmem:[%s4522_s1 + $0x2c4] ss:$8 sps:$4 sm:$0xff]  }
  0x4e   : > { %2119 = vmatmul.mubr.bf16.vlgmr.msra.gmra.mxu1 %v2773_v9  ;;  %2148 = vmatpush1.bf16.msra.mxu0 %v3202_v10  ;;  %v3273_v9 = vld [vmem:[%s4522_s1 + $0x3c4] ss:$8 sps:$4 sm:$0xff]   ;;  %v3268_v10 = vld [vmem:[%s4522_s1 + $0x2c0] ss:$8 sps:$4 sm:$0xff]  }
  0x4f   : > { %2209 = vmatpush1.bf16.msra.mxu1 %v3205_v11  ;;  %2149 = vmatprep.subr.bf16.mxu0 %v3210_v12  ;;  %v3271_v11 = vld [vmem:[%s4522_s1 + $0x3c0] ss:$8 sps:$4 sm:$0xff]   ;;  %v3276_v12 = vld [vmem:[%s4522_s1 + $0x2b4] ss:$8 sps:$4 sm:$0xff]  }
  0x50   : > { %2210 = vmatprep.subr.bf16.mxu1 %v3213_v13  ;;  %2067 = vmatprep.mubr.bf16.mxu0 %v2788_v24  ;;  %v3279_v13 = vld [vmem:[%s4522_s1 + $0x3b4] ss:$8 sps:$4 sm:$0xff]   ;;  %v3298_v24 = vld [vmem:[%s4522_s1 + $0x284] ss:$8 sps:$4 sm:$0xff]  }
  0x51   : > { %2128 = vmatprep.mubr.bf16.mxu1 %v2790_v29  ;;  %v3307_v29 = vld [vmem:[%s4522_s1 + $0x574] ss:$8 sps:$4 sm:$0xff]  }
  0x52   : > { %2150 = vmatpush1.bf16.msra.mxu0 %v3208_v14  ;;  %v3274_v14 = vld [vmem:[%s4522_s1 + $0x2b0] ss:$8 sps:$4 sm:$0xff]  }
  0x53   : > { %2211 = vmatpush1.bf16.msra.mxu1 %v3211_v15  ;;  %2151 = vmatprep.subr.bf16.mxu0 %v3216_v16  ;;  %v3277_v15 = vld [vmem:[%s4522_s1 + $0x3b0] ss:$8 sps:$4 sm:$0xff]   ;;  %v3285_v16 = vld [vmem:[%s4522_s1 + $0x2a4] ss:$8 sps:$4 sm:$0xff]  }
  0x54   : > { %2212 = vmatprep.subr.bf16.mxu1 %v3219_v17  ;;  %v3288_v17 = vld [vmem:[%s4522_s1 + $0x3a4] ss:$8 sps:$4 sm:$0xff]  }
  0x55   : > { %2068 = vmatmul.mubr.bf16.gmra.mxu0 %v2787_v30  ;;  %v3302_v30 = vld [vmem:[%s4522_s1 + $0x470] ss:$8 sps:$4 sm:$0xff]  }
  0x56   : > { %2152 = vmatpush1.bf16.msra.mxu0 %v3214_v18  ;;  %2129 = vmatmul.mubr.bf16.gmra.mxu1 %v2789_v31  ;;  %v3283_v18 = vld [vmem:[%s4522_s1 + $0x2a0] ss:$8 sps:$4 sm:$0xff]   ;;  %v3305_v31 = vld [vmem:[%s4522_s1 + $0x570] ss:$8 sps:$4 sm:$0xff]  }
  0x57   : > { %2213 = vmatpush1.bf16.msra.mxu1 %v3217_v19  ;;  %2153 = vmatprep.subr.bf16.mxu0 %v3222_v20  ;;  %v3286_v19 = vld [vmem:[%s4522_s1 + $0x3a0] ss:$8 sps:$4 sm:$0xff]   ;;  %v3292_v20 = vld [vmem:[%s4522_s1 + $0x294] ss:$8 sps:$4 sm:$0xff]  }
  0x58   : > { %2214 = vmatprep.subr.bf16.mxu1 %v3225_v21  ;;  %2077 = vmatprep.mubr.bf16.mxu0 %v2804_v40  ;;  %v3295_v21 = vld [vmem:[%s4522_s1 + $0x394] ss:$8 sps:$4 sm:$0xff]  }
  0x59   : > { %2138 = vmatprep.mubr.bf16.mxu1 %v2806_v41  ;;  %v2794_v41 = vcombine.high %v252_v36, %v260_v37 }
  0x5a   : > { %2154 = vmatpush1.bf16.msra.mxu0 %v3220_v27  ;;  %v3299_v27 = vld [vmem:[%s4522_s1 + $0x380] ss:$8 sps:$4 sm:$0xff]  }
  0x5b   : > { %2215 = vmatpush1.bf16.msra.mxu1 %v3223_v28  ;;  %2155 = vmatprep.subr.bf16.mxu0 %v3228_v32  ;;  %v3304_v28 = vld [vmem:[%s4522_s1 + $0x474] ss:$8 sps:$4 sm:$0xff]  }
  0x5c   : > { %2216 = vmatprep.subr.bf16.mxu1 %v3231_v33  ;;  %v251_v32 = vld [vmem:[%s3712_s11 + $0x90] sm:$0xff] }
  0x5d   : > { %2078 = vmatmul.mubr.bf16.gmra.mxu0 %v2803_v42  ;;  %v259_v33 = vld [vmem:[%s3712_s11 + $0xd0] sm:$0xff]  ;;  %v3308_v42 = vld [vmem:[%s4522_s1 + $0x460] ss:$8 sps:$4 sm:$0xff]  }
  0x5e   : > { %2156 = vmatpush1.bf16.msra.mxu0 %v3226_v34  ;;  %2139 = vmatmul.mubr.bf16.gmra.mxu1 %v2805_v43  ;;  %v2775_v34 = vcombine.low %v3875_v52, %v3878_v53  ;;  %v2792_v40 = vcombine.high %v251_v32, %v259_v33  ;;  %v3311_v43 = vld [vmem:[%s4522_s1 + $0x560] ss:$8 sps:$4 sm:$0xff]   ;;  %v3322_v52 = vld [vmem:[%s4522_s1 + $0x444] ss:$8 sps:$4 sm:$0xff]  }
  0x5f   : > { %2217 = vmatpush1.bf16.msra.mxu1 %v3229_v35  ;;  %2157 = vmatprep.subr.bf16.mxu0 %v3234_v38  ;;  %v2777_v35 = vcombine.low %v3881_v54, %v3884_v55  ;;  %v3310_v38 = vld [vmem:[%s4522_s1 + $0x464] ss:$8 sps:$4 sm:$0xff]  }
  0x60   : > { %2218 = vmatprep.subr.bf16.mxu1 %v3237_v39  ;;  %2179 = vmatprep.mubr.bf16.mxu0 %v2776_v56  ;;  %v3313_v39 = vld [vmem:[%s4522_s1 + $0x564] ss:$8 sps:$4 sm:$0xff]   ;;  %v3320_v56 = vld [vmem:[%s4522_s1 + $0x440] ss:$8 sps:$4 sm:$0xff]  }
  0x61   : > { %2240 = vmatprep.mubr.bf16.mxu1 %v2778_v57  ;;  %v3325_v53 = vld [vmem:[%s4522_s1 + $0x544] ss:$8 sps:$4 sm:$0xff]   ;;  %v3323_v57 = vld [vmem:[%s4522_s1 + $0x540] ss:$8 sps:$4 sm:$0xff]  }
  0x62   : > { %2158 = vmatpush1.bf16.msra.mxu0 %v3232_v44  ;;  %v3316_v44 = vld [vmem:[%s4522_s1 + $0x454] ss:$8 sps:$4 sm:$0xff]  }
  0x63   : > { %2219 = vmatpush1.bf16.msra.mxu1 %v3235_v45  ;;  %2159 = vmatprep.subr.bf16.mxu0 %v3240_v46  ;;  %v3319_v45 = vld [vmem:[%s4522_s1 + $0x554] ss:$8 sps:$4 sm:$0xff]   ;;  %v3314_v46 = vld [vmem:[%s4522_s1 + $0x450] ss:$8 sps:$4 sm:$0xff]  }
  0x64   : > { %2220 = vmatprep.subr.bf16.mxu1 %v3243_v47  ;;  %v2791_v47 = vcombine.low %v251_v32, %v259_v33  ;;  %v3372_v32 = vld [vmem:[%s4522_s1 + $0x4c0] ss:$8 sps:$4 sm:$0xff]  }
  0x65   : > { %v3375_v33 = vld [vmem:[%s4522_s1 + $0x5c0] ss:$8 sps:$4 sm:$0xff]  }
  0x66   : > { %2160 = vmatpush1.bf16.msra.mxu0 %v3238_v48  ;;  %v3317_v48 = vld [vmem:[%s4522_s1 + $0x550] ss:$8 sps:$4 sm:$0xff]  }
  0x67   : > { %2221 = vmatpush1.bf16.msra.mxu1 %v3241_v49  ;;  %2161 = vmatprep.subr.bf16.mxu0 %v3246_v50  ;;  %v2793_v49 = vcombine.low %v252_v36, %v260_v37  ;;  %v267_v50 = vld [vmem:[%s3712_s11 + $0x110] sm:$0x33] }
  0x68   : > { %2222 = vmatprep.subr.bf16.mxu1 %v3249_v51  ;;  %v268_v51 = vld [vmem:[%s3712_s11 + $0x118] sm:$0x33]  ;;  %v2808_v54 = vcombine.high %v267_v50, %v267_v50 }
  0x69   : > { %v2810_v55 = vcombine.high %v268_v51, %v268_v51  ;;  %v3378_v36 = vld [vmem:[%s4522_s1 + $0x4b0] ss:$8 sps:$4 sm:$0xff]  }
  0x6a   : > { %2162 = vmatpush1.bf16.msra.mxu0 %v3244_v58  ;;  %v3330_v58 = vld [vmem:[%s4522_s1 + $0x434] ss:$8 sps:$4 sm:$0xff]   ;;  %v3381_v37 = vld [vmem:[%s4522_s1 + $0x5b0] ss:$8 sps:$4 sm:$0xff]  }
  0x6b   : > { %2223 = vmatpush1.bf16.msra.mxu1 %v3247_v59  ;;  %2163 = vmatprep.subr.bf16.mxu0 %v3252_v60  ;;  %v3333_v59 = vld [vmem:[%s4522_s1 + $0x534] ss:$8 sps:$4 sm:$0xff]   ;;  %v4057_v60 = vld [vmem:[%s3712_s11 + $0x20] sm:$0xff] }
  0x6c   : > { %2224 = vmatprep.subr.bf16.mxu1 %v3255_v61  ;;  %v4060_v61 = vld [vmem:[%s3712_s11 + $0x60] sm:$0xff] }
  0x6e   : > { %2164 = vmatpush2.bf16.msra.mxu0 %v3250_v62  ;;  %v4063_v62 = vld [vmem:[%s3712_s11 + $0x28] sm:$0xff] }
  0x6f   : > { %2225 = vmatpush2.bf16.msra.mxu1 %v3253_v63  ;;  %2165 = vmatprep.subr.bf16.mxu0 %v3258_v0  ;;  %v2807_v63 = vcombine.low %v267_v50, %v267_v50  ;;  %v2809_v0 = vcombine.low %v268_v51, %v268_v51  ;;  %v3404_v50 = vld [vmem:[%s4522_s1 + $0x674] ss:$8 sps:$4 sm:$0xff]  }
  0x70   : > { %2226 = vmatprep.subr.bf16.mxu1 %v3261_v1  ;;  %v4066_v1 = vld [vmem:[%s3712_s11 + $0x68] sm:$0xff]  ;;  %v3407_v51 = vld [vmem:[%s4522_s1 + $0x774] ss:$8 sps:$4 sm:$0xff]  }
  0x72   : > { %2166 = vmatpush2.bf16.msra.mxu0 %v3256_v2  ;;  %v3328_v2 = vld [vmem:[%s4522_s1 + $0x430] ss:$8 sps:$4 sm:$0xff]  }
  0x73   : > { %2227 = vmatpush2.bf16.msra.mxu1 %v3259_v3  ;;  %2167 = vmatprep.subr.bf16.mxu0 %v3264_v4  ;;  %v3331_v3 = vld [vmem:[%s4522_s1 + $0x530] ss:$8 sps:$4 sm:$0xff]   ;;  %v3338_v4 = vld [vmem:[%s4522_s1 + $0x424] ss:$8 sps:$4 sm:$0xff]  }
  0x74   : > { %2228 = vmatprep.subr.bf16.mxu1 %v3267_v5  ;;  %v3341_v5 = vld [vmem:[%s4522_s1 + $0x524] ss:$8 sps:$4 sm:$0xff]  }
  0x76   : > { %2168 = vmatpush2.bf16.msra.mxu0 %v3262_v6  ;;  %v2780_v6 = vcombine.high %v4057_v60, %v4060_v61 }
  0x77   : > { %2229 = vmatpush2.bf16.msra.mxu1 %v3265_v7  ;;  %2169 = vmatprep.subr.bf16.mxu0 %v3270_v8  ;;  %v2782_v7 = vcombine.high %v4063_v62, %v4066_v1  ;;  %v3336_v8 = vld [vmem:[%s4522_s1 + $0x420] ss:$8 sps:$4 sm:$0xff]  }
  0x78   : > { %2230 = vmatprep.subr.bf16.mxu1 %v3273_v9  ;;  %v3339_v9 = vld [vmem:[%s4522_s1 + $0x520] ss:$8 sps:$4 sm:$0xff]  }
  0x7a   : > { %2170 = vmatpush2.bf16.msra.mxu0 %v3268_v10  ;;  %v3344_v10 = vld [vmem:[%s4522_s1 + $0x414] ss:$8 sps:$4 sm:$0xff]  }
  0x7b   : > { %2231 = vmatpush2.bf16.msra.mxu1 %v3271_v11  ;;  %2171 = vmatprep.subr.bf16.mxu0 %v3276_v12  ;;  %v3347_v11 = vld [vmem:[%s4522_s1 + $0x514] ss:$8 sps:$4 sm:$0xff]   ;;  %v3342_v12 = vld [vmem:[%s4522_s1 + $0x410] ss:$8 sps:$4 sm:$0xff]  }
  0x7c   : > { %2232 = vmatprep.subr.bf16.mxu1 %v3279_v13  ;;  %v3345_v13 = vld [vmem:[%s4522_s1 + $0x510] ss:$8 sps:$4 sm:$0xff]  }
  0x7e   : > { %2172 = vmatpush2.bf16.msra.mxu0 %v3274_v14  ;;  %v3350_v14 = vld [vmem:[%s4522_s1 + $0x404] ss:$8 sps:$4 sm:$0xff]  }
  0x7f   : > { %2233 = vmatpush2.bf16.msra.mxu1 %v3277_v15  ;;  %2173 = vmatprep.subr.bf16.mxu0 %v3285_v16  ;;  %v3353_v15 = vld [vmem:[%s4522_s1 + $0x504] ss:$8 sps:$4 sm:$0xff]   ;;  %v3348_v16 = vld [vmem:[%s4522_s1 + $0x400] ss:$8 sps:$4 sm:$0xff]  }
  0x80   : > { %2234 = vmatprep.subr.bf16.mxu1 %v3288_v17  ;;  %v3351_v17 = vld [vmem:[%s4522_s1 + $0x500] ss:$8 sps:$4 sm:$0xff]  }
  0x82   : > { %2174 = vmatpush2.bf16.msra.mxu0 %v3283_v18  ;;  %v3356_v18 = vld [vmem:[%s4522_s1 + $0x4f4] ss:$8 sps:$4 sm:$0xff]  }
  0x83   : > { %2235 = vmatpush2.bf16.msra.mxu1 %v3286_v19  ;;  %2175 = vmatprep.subr.bf16.mxu0 %v3292_v20  ;;  %v3359_v19 = vld [vmem:[%s4522_s1 + $0x5f4] ss:$8 sps:$4 sm:$0xff]   ;;  %v3354_v20 = vld [vmem:[%s4522_s1 + $0x4f0] ss:$8 sps:$4 sm:$0xff]  }
  0x84   : > { %2236 = vmatprep.subr.bf16.mxu1 %v3295_v21  ;;  %v3357_v21 = vld [vmem:[%s4522_s1 + $0x5f0] ss:$8 sps:$4 sm:$0xff]  }
  0x86   : > { %2176 = vmatpush2.bf16.msra.mxu0 %v3290_v22  ;;  %v3362_v22 = vld [vmem:[%s4522_s1 + $0x4e4] ss:$8 sps:$4 sm:$0xff]  }
  0x87   : > { %2237 = vmatpush2.bf16.msra.mxu1 %v3293_v23  ;;  %2177 = vmatprep.subr.bf16.mxu0 %v3298_v24  ;;  %v3365_v23 = vld [vmem:[%s4522_s1 + $0x5e4] ss:$8 sps:$4 sm:$0xff]   ;;  %v3360_v24 = vld [vmem:[%s4522_s1 + $0x4e0] ss:$8 sps:$4 sm:$0xff]  }
  0x88   : > { %2238 = vmatprep.subr.bf16.mxu1 %v3301_v25  ;;  %v3363_v25 = vld [vmem:[%s4522_s1 + $0x5e0] ss:$8 sps:$4 sm:$0xff]  }
  0x8a   : > { %2178 = vmatpush2.bf16.msra.mxu0 %v3296_v26  ;;  %v3368_v26 = vld [vmem:[%s4522_s1 + $0x4d4] ss:$8 sps:$4 sm:$0xff]  }
  0x8b   : > { %2239 = vmatpush2.bf16.msra.mxu1 %v3299_v27  ;;  %2269 = vmatprep.subr.bf16.mxu0 %v3304_v28  ;;  %v3371_v27 = vld [vmem:[%s4522_s1 + $0x5d4] ss:$8 sps:$4 sm:$0xff]   ;;  %v3366_v28 = vld [vmem:[%s4522_s1 + $0x4d0] ss:$8 sps:$4 sm:$0xff]  }
  0x8c   : > { %2330 = vmatprep.subr.bf16.mxu1 %v3307_v29  ;;  %v3369_v29 = vld [vmem:[%s4522_s1 + $0x5d0] ss:$8 sps:$4 sm:$0xff]  }
  0x8d   : > { %2180 = vmatmul.mubr.bf16.vlgmr.msra.gmra.mxu0 %v2775_v34  ;;  %v3380_v34 = vld [vmem:[%s4522_s1 + $0x4b4] ss:$8 sps:$4 sm:$0xff]  }
  0x8e   : > { %2241 = vmatmul.mubr.bf16.vlgmr.msra.gmra.mxu1 %v2777_v35  ;;  %2270 = vmatpush1.bf16.msra.mxu0 %v3302_v30  ;;  %v3374_v30 = vld [vmem:[%s4522_s1 + $0x4c4] ss:$8 sps:$4 sm:$0xff]   ;;  %v3383_v35 = vld [vmem:[%s4522_s1 + $0x5b4] ss:$8 sps:$4 sm:$0xff]  }
  0x8f   : > { %2331 = vmatpush1.bf16.msra.mxu1 %v3305_v31  ;;  %2271 = vmatprep.subr.bf16.mxu0 %v3310_v38  ;;  %v3377_v31 = vld [vmem:[%s4522_s1 + $0x5c4] ss:$8 sps:$4 sm:$0xff]  }
  0x90   : > { %2332 = vmatprep.subr.bf16.mxu1 %v3313_v39  ;;  %2189 = vmatprep.mubr.bf16.mxu0 %v2792_v40  ;;  %v3386_v38 = vld [vmem:[%s4522_s1 + $0x4a4] ss:$8 sps:$4 sm:$0xff]   ;;  %v3384_v40 = vld [vmem:[%s4522_s1 + $0x4a0] ss:$8 sps:$4 sm:$0xff]  }
  0x91   : > { %2250 = vmatprep.mubr.bf16.mxu1 %v2794_v41  ;;  %v3389_v39 = vld [vmem:[%s4522_s1 + $0x5a4] ss:$8 sps:$4 sm:$0xff]   ;;  %v3387_v41 = vld [vmem:[%s4522_s1 + $0x5a0] ss:$8 sps:$4 sm:$0xff]  }
  0x92   : > { %2272 = vmatpush1.bf16.msra.mxu0 %v3308_v42  ;;  %v3392_v42 = vld [vmem:[%s4522_s1 + $0x494] ss:$8 sps:$4 sm:$0xff]  }
  0x93   : > { %2333 = vmatpush1.bf16.msra.mxu1 %v3311_v43  ;;  %2273 = vmatprep.subr.bf16.mxu0 %v3316_v44  ;;  %v3395_v43 = vld [vmem:[%s4522_s1 + $0x594] ss:$8 sps:$4 sm:$0xff]   ;;  %v3390_v44 = vld [vmem:[%s4522_s1 + $0x490] ss:$8 sps:$4 sm:$0xff]  }
  0x94   : > { %2334 = vmatprep.subr.bf16.mxu1 %v3319_v45  ;;  %v3393_v45 = vld [vmem:[%s4522_s1 + $0x590] ss:$8 sps:$4 sm:$0xff]  }
  0x95   : > { %2190 = vmatmul.mubr.bf16.gmra.mxu0 %v2791_v47  ;;  %v3401_v47 = vld [vmem:[%s4522_s1 + $0x584] ss:$8 sps:$4 sm:$0xff]  }
  0x96   : > { %2251 = vmatmul.mubr.bf16.gmra.mxu1 %v2793_v49  ;;  %2274 = vmatpush1.bf16.msra.mxu0 %v3314_v46  ;;  %v3398_v46 = vld [vmem:[%s4522_s1 + $0x484] ss:$8 sps:$4 sm:$0xff]   ;;  %v3399_v49 = vld [vmem:[%s4522_s1 + $0x580] ss:$8 sps:$4 sm:$0xff]  }
  0x97   : > { %2335 = vmatpush1.bf16.msra.mxu1 %v3317_v48  ;;  %2275 = vmatprep.subr.bf16.mxu0 %v3322_v52  ;;  %v3396_v48 = vld [vmem:[%s4522_s1 + $0x480] ss:$8 sps:$4 sm:$0xff]  }
  0x98   : > { %2336 = vmatprep.subr.bf16.mxu1 %v3325_v53  ;;  %2199 = vmatprep.mubr.bf16.mxu0 %v2808_v54  ;;  %v253_v52 = vld [vmem:[%s3712_s11 + $0xa0] sm:$0xff]  ;;  %v2779_v53 = vcombine.low %v4057_v60, %v4060_v61  ;;  %v2781_v54 = vcombine.low %v4063_v62, %v4066_v1 }
  0x99   : > { %2260 = vmatprep.mubr.bf16.mxu1 %v2810_v55  ;;  %v261_v55 = vld [vmem:[%s3712_s11 + $0xe0] sm:$0xff] }
  0x9a   : > { %2276 = vmatpush1.bf16.msra.mxu0 %v3320_v56  ;;  %v254_v56 = vld [vmem:[%s3712_s11 + $0xa8] sm:$0xff]  ;;  %v2796_v62 = vcombine.high %v253_v52, %v261_v55 }
  0x9b   : > { %2337 = vmatpush1.bf16.msra.mxu1 %v3323_v57  ;;  %2277 = vmatprep.subr.bf16.mxu0 %v3330_v58  ;;  %v262_v57 = vld [vmem:[%s3712_s11 + $0xe8] sm:$0xff]  ;;  %v3402_v58 = vld [vmem:[%s4522_s1 + $0x670] ss:$8 sps:$4 sm:$0xff]  }
  0x9c   : > { %2338 = vmatprep.subr.bf16.mxu1 %v3333_v59  ;;  %v3405_v59 = vld [vmem:[%s4522_s1 + $0x770] ss:$8 sps:$4 sm:$0xff]   ;;  %v3410_v60 = vld [vmem:[%s4522_s1 + $0x664] ss:$8 sps:$4 sm:$0xff]   ;;  %v3411_v1 = vld [vmem:[%s4522_s1 + $0x760] ss:$8 sps:$4 sm:$0xff]  }
  0x9d   : > { %2200 = vmatmul.mubr.bf16.gmra.mxu0 %v2807_v63  ;;  %v3413_v61 = vld [vmem:[%s4522_s1 + $0x764] ss:$8 sps:$4 sm:$0xff]   ;;  %v2798_v63 = vcombine.high %v254_v56, %v262_v57 }
  0x9e   : > { %2261 = vmatmul.mubr.bf16.gmra.mxu1 %v2809_v0  ;;  %2278 = vmatpush1.bf16.msra.mxu0 %v3328_v2  ;;  %v3408_v0 = vld [vmem:[%s4522_s1 + $0x660] ss:$8 sps:$4 sm:$0xff]   ;;  %v3416_v2 = vld [vmem:[%s4522_s1 + $0x654] ss:$8 sps:$4 sm:$0xff]  }
  0x9f   : > { %2339 = vmatpush1.bf16.msra.mxu1 %v3331_v3  ;;  %2279 = vmatprep.subr.bf16.mxu0 %v3338_v4  ;;  %v3419_v3 = vld [vmem:[%s4522_s1 + $0x754] ss:$8 sps:$4 sm:$0xff]   ;;  %v2795_v4 = vcombine.low %v253_v52, %v261_v55  ;;  %v3474_v52 = vld [vmem:[%s4522_s1 + $0x6c4] ss:$8 sps:$4 sm:$0xff]   ;;  %v3475_v55 = vld [vmem:[%s4522_s1 + $0x7c0] ss:$8 sps:$4 sm:$0xff]  }
  0xa0   : > { %2340 = vmatprep.subr.bf16.mxu1 %v3341_v5  ;;  %2301 = vmatprep.mubr.bf16.mxu0 %v2780_v6  ;;  %v2797_v5 = vcombine.low %v254_v56, %v262_v57  ;;  %v269_v6 = vld [vmem:[%s3712_s11 + $0x120] sm:$0x33]  ;;  %v3480_v56 = vld [vmem:[%s4522_s1 + $0x6b4] ss:$8 sps:$4 sm:$0xff]  }
  0xa1   : > { %2362 = vmatprep.mubr.bf16.mxu1 %v2782_v7  ;;  %v270_v7 = vld [vmem:[%s3712_s11 + $0x128] sm:$0x33]  ;;  %v3483_v57 = vld [vmem:[%s4522_s1 + $0x7b4] ss:$8 sps:$4 sm:$0xff]  }
  0xa2   : > { %2280 = vmatpush1.bf16.msra.mxu0 %v3336_v8  ;;  %v3414_v8 = vld [vmem:[%s4522_s1 + $0x650] ss:$8 sps:$4 sm:$0xff]  }
  0xa3   : > { %2341 = vmatpush1.bf16.msra.mxu1 %v3339_v9  ;;  %2281 = vmatprep.subr.bf16.mxu0 %v3344_v10  ;;  %v3417_v9 = vld [vmem:[%s4522_s1 + $0x750] ss:$8 sps:$4 sm:$0xff]   ;;  %v3422_v10 = vld [vmem:[%s4522_s1 + $0x644] ss:$8 sps:$4 sm:$0xff]  }
  0xa4   : > { %2342 = vmatprep.subr.bf16.mxu1 %v3347_v11  ;;  %v3425_v11 = vld [vmem:[%s4522_s1 + $0x744] ss:$8 sps:$4 sm:$0xff]  }
  0xa6   : > { %2282 = vmatpush1.bf16.msra.mxu0 %v3342_v12  ;;  %v2812_v12 = vcombine.high %v269_v6, %v269_v6 }
  0xa7   : > { %2343 = vmatpush1.bf16.msra.mxu1 %v3345_v13  ;;  %2283 = vmatprep.subr.bf16.mxu0 %v3350_v14  ;;  %v2814_v13 = vcombine.high %v270_v7, %v270_v7  ;;  %v3420_v14 = vld [vmem:[%s4522_s1 + $0x640] ss:$8 sps:$4 sm:$0xff]  }
  0xa8   : > { %2344 = vmatprep.subr.bf16.mxu1 %v3353_v15  ;;  %v3423_v15 = vld [vmem:[%s4522_s1 + $0x740] ss:$8 sps:$4 sm:$0xff]  }
  0xaa   : > { %2284 = vmatpush1.bf16.msra.mxu0 %v3348_v16  ;;  %v3430_v16 = vld [vmem:[%s4522_s1 + $0x634] ss:$8 sps:$4 sm:$0xff]  }
  0xab   : > { %2345 = vmatpush1.bf16.msra.mxu1 %v3351_v17  ;;  %2285 = vmatprep.subr.bf16.mxu0 %v3356_v18  ;;  %v3433_v17 = vld [vmem:[%s4522_s1 + $0x734] ss:$8 sps:$4 sm:$0xff]  }
  0xac   : > { %2346 = vmatprep.subr.bf16.mxu1 %v3359_v19  ;;  %v4275_v18 = vld [vmem:[%s3712_s11 + $0x30] sm:$0xff]  ;;  %v2811_v19 = vcombine.low %v269_v6, %v269_v6  ;;  %v3496_v6 = vld [vmem:[%s4522_s1 + $0x680] ss:$8 sps:$4 sm:$0xff]  }
  0xae   : > { %2286 = vmatpush2.bf16.msra.mxu0 %v3354_v20  ;;  %v2813_v20 = vcombine.low %v270_v7, %v270_v7  ;;  %v3499_v7 = vld [vmem:[%s4522_s1 + $0x780] ss:$8 sps:$4 sm:$0xff]  }
  0xaf   : > { %2347 = vmatpush2.bf16.msra.mxu1 %v3357_v21  ;;  %2287 = vmatprep.subr.bf16.mxu0 %v3362_v22  ;;  %v4278_v21 = vld [vmem:[%s3712_s11 + $0x70] sm:$0xff]  ;;  %v4281_v22 = vld [vmem:[%s3712_s11 + $0x38] sm:$0xff] }
  0xb0   : > { %2348 = vmatprep.subr.bf16.mxu1 %v3365_v23  ;;  %v4284_v23 = vld [vmem:[%s3712_s11 + $0x78] sm:$0xff] }
  0xb2   : > { %2288 = vmatpush2.bf16.msra.mxu0 %v3360_v24  ;;  %v3428_v24 = vld [vmem:[%s4522_s1 + $0x630] ss:$8 sps:$4 sm:$0xff]  }
  0xb3   : > { %2349 = vmatpush2.bf16.msra.mxu1 %v3363_v25  ;;  %2289 = vmatprep.subr.bf16.mxu0 %v3368_v26  ;;  %v3431_v25 = vld [vmem:[%s4522_s1 + $0x730] ss:$8 sps:$4 sm:$0xff]   ;;  %v3438_v26 = vld [vmem:[%s4522_s1 + $0x624] ss:$8 sps:$4 sm:$0xff]  }
  0xb4   : > { %2350 = vmatprep.subr.bf16.mxu1 %v3371_v27  ;;  %v3441_v27 = vld [vmem:[%s4522_s1 + $0x724] ss:$8 sps:$4 sm:$0xff]  }
  0xb6   : > { %2290 = vmatpush2.bf16.msra.mxu0 %v3366_v28  ;;  %v2784_v28 = vcombine.high %v4275_v18, %v4278_v21 }
  0xb7   : > { %2351 = vmatpush2.bf16.msra.mxu1 %v3369_v29  ;;  %2291 = vmatprep.subr.bf16.mxu0 %v3374_v30  ;;  %v2786_v29 = vcombine.high %v4281_v22, %v4284_v23  ;;  %v3436_v30 = vld [vmem:[%s4522_s1 + $0x620] ss:$8 sps:$4 sm:$0xff]  }
  0xb8   : > { %2352 = vmatprep.subr.bf16.mxu1 %v3377_v31  ;;  %v3439_v31 = vld [vmem:[%s4522_s1 + $0x720] ss:$8 sps:$4 sm:$0xff]  }
  0xba   : > { %2292 = vmatpush2.bf16.msra.mxu0 %v3372_v32  ;;  %v3444_v32 = vld [vmem:[%s4522_s1 + $0x614] ss:$8 sps:$4 sm:$0xff]  }
  0xbb   : > { %2353 = vmatpush2.bf16.msra.mxu1 %v3375_v33  ;;  %2293 = vmatprep.subr.bf16.mxu0 %v3380_v34  ;;  %v3447_v33 = vld [vmem:[%s4522_s1 + $0x714] ss:$8 sps:$4 sm:$0xff]   ;;  %v3442_v34 = vld [vmem:[%s4522_s1 + $0x610] ss:$8 sps:$4 sm:$0xff]  }
  0xbc   : > { %2354 = vmatprep.subr.bf16.mxu1 %v3383_v35  ;;  %v3445_v35 = vld [vmem:[%s4522_s1 + $0x710] ss:$8 sps:$4 sm:$0xff]  }
  0xbe   : > { %2294 = vmatpush2.bf16.msra.mxu0 %v3378_v36  ;;  %v3450_v36 = vld [vmem:[%s4522_s1 + $0x604] ss:$8 sps:$4 sm:$0xff]  }
  0xbf   : > { %2355 = vmatpush2.bf16.msra.mxu1 %v3381_v37  ;;  %2295 = vmatprep.subr.bf16.mxu0 %v3386_v38  ;;  %v3453_v37 = vld [vmem:[%s4522_s1 + $0x704] ss:$8 sps:$4 sm:$0xff]   ;;  %v3448_v38 = vld [vmem:[%s4522_s1 + $0x600] ss:$8 sps:$4 sm:$0xff]  }
  0xc0   : > { %2356 = vmatprep.subr.bf16.mxu1 %v3389_v39  ;;  %v3451_v39 = vld [vmem:[%s4522_s1 + $0x700] ss:$8 sps:$4 sm:$0xff]  }
  0xc2   : > { %2296 = vmatpush2.bf16.msra.mxu0 %v3384_v40  ;;  %v3456_v40 = vld [vmem:[%s4522_s1 + $0x6f4] ss:$8 sps:$4 sm:$0xff]  }
  0xc3   : > { %2357 = vmatpush2.bf16.msra.mxu1 %v3387_v41  ;;  %2297 = vmatprep.subr.bf16.mxu0 %v3392_v42  ;;  %v3459_v41 = vld [vmem:[%s4522_s1 + $0x7f4] ss:$8 sps:$4 sm:$0xff]   ;;  %v3454_v42 = vld [vmem:[%s4522_s1 + $0x6f0] ss:$8 sps:$4 sm:$0xff]  }
  0xc4   : > { %2358 = vmatprep.subr.bf16.mxu1 %v3395_v43  ;;  %v3457_v43 = vld [vmem:[%s4522_s1 + $0x7f0] ss:$8 sps:$4 sm:$0xff]  }
  0xc6   : > { %2298 = vmatpush2.bf16.msra.mxu0 %v3390_v44  ;;  %v3462_v44 = vld [vmem:[%s4522_s1 + $0x6e4] ss:$8 sps:$4 sm:$0xff]  }
  0xc7   : > { %2359 = vmatpush2.bf16.msra.mxu1 %v3393_v45  ;;  %2299 = vmatprep.subr.bf16.mxu0 %v3398_v46  ;;  %v3465_v45 = vld [vmem:[%s4522_s1 + $0x7e4] ss:$8 sps:$4 sm:$0xff]   ;;  %v3460_v46 = vld [vmem:[%s4522_s1 + $0x6e0] ss:$8 sps:$4 sm:$0xff]  }
  0xc8   : > { %2360 = vmatprep.subr.bf16.mxu1 %v3401_v47  ;;  %v3463_v47 = vld [vmem:[%s4522_s1 + $0x7e0] ss:$8 sps:$4 sm:$0xff]  }
  0xca   : > { %2300 = vmatpush2.bf16.msra.mxu0 %v3396_v48  ;;  %v3468_v48 = vld [vmem:[%s4522_s1 + $0x6d4] ss:$8 sps:$4 sm:$0xff]  }
  0xcb   : > { %2361 = vmatpush2.bf16.msra.mxu1 %v3399_v49  ;;  %2391 = vmatprep.subr.bf16.mxu0 %v3404_v50  ;;  %v3471_v49 = vld [vmem:[%s4522_s1 + $0x7d4] ss:$8 sps:$4 sm:$0xff]   ;;  %v3466_v50 = vld [vmem:[%s4522_s1 + $0x6d0] ss:$8 sps:$4 sm:$0xff]  }
  0xcc   : > { %2452 = vmatprep.subr.bf16.mxu1 %v3407_v51  ;;  %v3469_v51 = vld [vmem:[%s4522_s1 + $0x7d0] ss:$8 sps:$4 sm:$0xff]  }
  0xcd   : > { %2302 = vmatmul.mubr.bf16.vlgmr.msra.gmra.mxu0 %v2779_v53  ;;  %v3477_v53 = vld [vmem:[%s4522_s1 + $0x7c4] ss:$8 sps:$4 sm:$0xff]  }
  0xce   : > { %2363 = vmatmul.mubr.bf16.vlgmr.msra.gmra.mxu1 %v2781_v54  ;;  %2392 = vmatpush1.bf16.msra.mxu0 %v3402_v58  ;;  %v3472_v54 = vld [vmem:[%s4522_s1 + $0x6c0] ss:$8 sps:$4 sm:$0xff]   ;;  %v3478_v58 = vld [vmem:[%s4522_s1 + $0x6b0] ss:$8 sps:$4 sm:$0xff]  }
  0xcf   : > { %2453 = vmatpush1.bf16.msra.mxu1 %v3405_v59  ;;  %2393 = vmatprep.subr.bf16.mxu0 %v3410_v60  ;;  %v3481_v59 = vld [vmem:[%s4522_s1 + $0x7b0] ss:$8 sps:$4 sm:$0xff]   ;;  %v3486_v60 = vld [vmem:[%s4522_s1 + $0x6a4] ss:$8 sps:$4 sm:$0xff]  }
  0xd0   : > { %2454 = vmatprep.subr.bf16.mxu1 %v3413_v61  ;;  %2311 = vmatprep.mubr.bf16.mxu0 %v2796_v62  ;;  %v3489_v61 = vld [vmem:[%s4522_s1 + $0x7a4] ss:$8 sps:$4 sm:$0xff]   ;;  %v3484_v62 = vld [vmem:[%s4522_s1 + $0x6a0] ss:$8 sps:$4 sm:$0xff]  }
  0xd1   : > { %2372 = vmatprep.mubr.bf16.mxu1 %v2798_v63  ;;  %v3487_v63 = vld [vmem:[%s4522_s1 + $0x7a0] ss:$8 sps:$4 sm:$0xff]  }
  0xd2   : > { %2394 = vmatpush1.bf16.msra.mxu0 %v3408_v0  ;;  %v3492_v0 = vld [vmem:[%s4522_s1 + $0x694] ss:$8 sps:$4 sm:$0xff]  }
  0xd3   : > { %2455 = vmatpush1.bf16.msra.mxu1 %v3411_v1  ;;  %2395 = vmatprep.subr.bf16.mxu0 %v3416_v2  ;;  %v3495_v1 = vld [vmem:[%s4522_s1 + $0x794] ss:$8 sps:$4 sm:$0xff]   ;;  %v3490_v2 = vld [vmem:[%s4522_s1 + $0x690] ss:$8 sps:$4 sm:$0xff]  }
  0xd4   : > { %2456 = vmatprep.subr.bf16.mxu1 %v3419_v3  ;;  %v3493_v3 = vld [vmem:[%s4522_s1 + $0x790] ss:$8 sps:$4 sm:$0xff]  }
  0xd5   : > { %2312 = vmatmul.mubr.bf16.gmra.mxu0 %v2795_v4  ;;  %v3498_v4 = vld [vmem:[%s4522_s1 + $0x684] ss:$8 sps:$4 sm:$0xff]  }
  0xd6   : > { %2373 = vmatmul.mubr.bf16.gmra.mxu1 %v2797_v5  ;;  %2396 = vmatpush1.bf16.msra.mxu0 %v3414_v8  ;;  %v3501_v5 = vld [vmem:[%s4522_s1 + $0x784] ss:$8 sps:$4 sm:$0xff]   ;;  %v255_v8 = vld [vmem:[%s3712_s11 + $0xb0] sm:$0xff] }
  0xd7   : > { %2457 = vmatpush1.bf16.msra.mxu1 %v3417_v9  ;;  %2397 = vmatprep.subr.bf16.mxu0 %v3422_v10  ;;  %v263_v9 = vld [vmem:[%s3712_s11 + $0xf0] sm:$0xff]  ;;  %v256_v10 = vld [vmem:[%s3712_s11 + $0xb8] sm:$0xff] }
  0xd8   : > { %2458 = vmatprep.subr.bf16.mxu1 %v3425_v11  ;;  %2321 = vmatprep.mubr.bf16.mxu0 %v2812_v12  ;;  %v264_v11 = vld [vmem:[%s3712_s11 + $0xf8] sm:$0xff]  ;;  %v2783_v12 = vcombine.low %v4275_v18, %v4278_v21 }
  0xd9   : > { %2382 = vmatprep.mubr.bf16.mxu1 %v2814_v13  ;;  %v2785_v13 = vcombine.low %v4281_v22, %v4284_v23  ;;  %v2801_v22 = vcombine.low %v256_v10, %v264_v11 }
  0xda   : > { %2398 = vmatpush1.bf16.msra.mxu0 %v3420_v14  ;;  %v2800_v14 = vcombine.high %v255_v8, %v263_v9 }
  0xdb   : > { %2459 = vmatpush1.bf16.msra.mxu1 %v3423_v15  ;;  %2399 = vmatprep.subr.bf16.mxu0 %v3430_v16  ;;  %v2802_v15 = vcombine.high %v256_v10, %v264_v11 }
  0xdc   : > { %2460 = vmatprep.subr.bf16.mxu1 %v3433_v17 }
  0xdd   : > { %2322 = vmatmul.mubr.bf16.gmra.mxu0 %v2811_v19 }
  0xde   : > { %2383 = vmatmul.mubr.bf16.gmra.mxu1 %v2813_v20  ;;  %2400 = vmatpush1.bf16.msra.mxu0 %v3428_v24 }
  0xdf   : > { %2461 = vmatpush1.bf16.msra.mxu1 %v3431_v25  ;;  %2401 = vmatprep.subr.bf16.mxu0 %v3438_v26  ;;  %v271_v25 = vld [vmem:[%s3712_s11 + $0x130] sm:$0x33]  ;;  %v272_v26 = vld [vmem:[%s3712_s11 + $0x138] sm:$0x33]  ;;  %s3077_s11 = sshll.u32 %s4530_s12, 2 }
  0xe0   : > { %2462 = vmatprep.subr.bf16.mxu1 %v3441_v27  ;;  %2423 = vmatprep.mubr.bf16.mxu0 %v2784_v28  ;;  %v2799_v28 = vcombine.low %v255_v8, %v263_v9  ;;  %s4462_s24 = scalar_lea.vmem %s4524_s3, %s3077_s11 }
  0xe1   : > { %2484 = vmatprep.mubr.bf16.mxu1 %v2786_v29  ;;  %v2816_v29 = vcombine.high %v271_v25, %v271_v25 }
  0xe2   : > { %2402 = vmatpush1.bf16.msra.mxu0 %v3436_v30  ;;  %v2818_v30 = vcombine.high %v272_v26, %v272_v26 }
  0xe3   : > { %2463 = vmatpush1.bf16.msra.mxu1 %v3439_v31  ;;  %2403 = vmatprep.subr.bf16.mxu0 %v3444_v32 }
  0xe4   : > { %2464 = vmatprep.subr.bf16.mxu1 %v3447_v33 }
  0xe6   : > { %2404 = vmatpush1.bf16.msra.mxu0 %v3442_v34  ;;  %v2815_v34 = vcombine.low %v271_v25, %v271_v25 }
  0xe7   : > { %2465 = vmatpush1.bf16.msra.mxu1 %v3445_v35  ;;  %2405 = vmatprep.subr.bf16.mxu0 %v3450_v36  ;;  %v2817_v35 = vcombine.low %v272_v26, %v272_v26 }
  0xe8   : > { %2466 = vmatprep.subr.bf16.mxu1 %v3453_v37 }
  0xea   : > { %2406 = vmatpush1.bf16.msra.mxu0 %v3448_v38 }
  0xeb   : > { %2467 = vmatpush1.bf16.msra.mxu1 %v3451_v39  ;;  %2407 = vmatprep.subr.bf16.mxu0 %v3456_v40 }
  0xec   : > { %2468 = vmatprep.subr.bf16.mxu1 %v3459_v41 }
  0xee   : > { %2408 = vmatpush2.bf16.msra.mxu0 %v3454_v42 }
  0xef   : > { %2469 = vmatpush2.bf16.msra.mxu1 %v3457_v43  ;;  %2409 = vmatprep.subr.bf16.mxu0 %v3462_v44 }
  0xf0   : > { %2470 = vmatprep.subr.bf16.mxu1 %v3465_v45 }
  0xf2   : > { %2410 = vmatpush2.bf16.msra.mxu0 %v3460_v46 }
  0xf3   : > { %2471 = vmatpush2.bf16.msra.mxu1 %v3463_v47  ;;  %2411 = vmatprep.subr.bf16.mxu0 %v3468_v48 }
  0xf4   : > { %2472 = vmatprep.subr.bf16.mxu1 %v3471_v49 }
  0xf6   : > { %2412 = vmatpush2.bf16.msra.mxu0 %v3466_v50 }
  0xf7   : > { %2473 = vmatpush2.bf16.msra.mxu1 %v3469_v51  ;;  %2413 = vmatprep.subr.bf16.mxu0 %v3474_v52 }
  0xf8   : > { %2474 = vmatprep.subr.bf16.mxu1 %v3477_v53 }
  0xfa   : > { %2414 = vmatpush2.bf16.msra.mxu0 %v3472_v54 }
  0xfb   : > { %2475 = vmatpush2.bf16.msra.mxu1 %v3475_v55  ;;  %2415 = vmatprep.subr.bf16.mxu0 %v3480_v56 }
  0xfc   : > { %2476 = vmatprep.subr.bf16.mxu1 %v3483_v57 }
  0xfe   : > { %2416 = vmatpush2.bf16.msra.mxu0 %v3478_v58 }
  0xff   : > { %2477 = vmatpush2.bf16.msra.mxu1 %v3481_v59  ;;  %2417 = vmatprep.subr.bf16.mxu0 %v3486_v60 }
 0x100   : > { %2478 = vmatprep.subr.bf16.mxu1 %v3489_v61 }
 0x102   : > { %2418 = vmatpush2.bf16.msra.mxu0 %v3484_v62 }
 0x103   : > { %2479 = vmatpush2.bf16.msra.mxu1 %v3487_v63  ;;  %2419 = vmatprep.subr.bf16.mxu0 %v3492_v0 }
 0x104   : > { %2480 = vmatprep.subr.bf16.mxu1 %v3495_v1 }
 0x106   : > { %2420 = vmatpush2.bf16.msra.mxu0 %v3490_v2 }
 0x107   : > { %2481 = vmatpush2.bf16.msra.mxu1 %v3493_v3  ;;  %2421 = vmatprep.subr.bf16.mxu0 %v3498_v4 }
 0x108   : > { %2482 = vmatprep.subr.bf16.mxu1 %v3501_v5 }
 0x10a   : > { %2422 = vmatpush2.bf16.msra.mxu0 %v3496_v6 }
 0x10b   : > { %2483 = vmatpush2.bf16.msra.mxu1 %v3499_v7 }
 0x10d   : > { %v2059_v16 = vpop.f32.mrf.mxu0  ;;  %2424 = vmatmul.mubr.bf16.vlgmr.msra.gmra.mxu0 %v2783_v12 }
 0x10e   : > { %v2120_v17 = vpop.f32.mrf.mxu1  ;;  %2485 = vmatmul.mubr.bf16.vlgmr.msra.gmra.mxu1 %v2785_v13  ;;  %2433 = vmatprep.mubr.bf16.mxu0 %v2800_v14 }
 0x10f   : > { %v2121_v19 = vadd.f32 %v2120_v17, %v2059_v16  ;;  %2494 = vmatprep.mubr.bf16.mxu1 %v2802_v15  ;;  %v2061_v20 = vpop.f32.mrf.mxu0 }
 0x110   : > { %v2122_v24 = vpop.f32.mrf.mxu1 }
 0x111   : > { %v2123_v18 = vadd.f32 %v2122_v24, %v2061_v20  ;;  %v2063_v21 = vpop.f32.mrf.mxu0 }
 0x112   : > { %v2124_v27 = vpop.f32.mrf.mxu1 }
 0x113   : > { %v2125_v23 = vadd.f32 %v2124_v27, %v2063_v21  ;;  %v2065_v31 = vpop.f32.mrf.mxu0 }
 0x114   : > { %v2126_v32 = vpop.f32.mrf.mxu1 }
 0x115   : > { %v2127_v33 = vadd.f32 %v2126_v32, %v2065_v31  ;;  %2434 = vmatmul.mubr.bf16.gmra.mxu0 %v2799_v28  ;;  %v2069_v36 = vpop.f32.mrf.mxu0 }
 0x116   : > { %2495 = vmatmul.mubr.bf16.gmra.mxu1 %v2801_v22  ;;  %2443 = vmatprep.mubr.bf16.mxu0 %v2816_v29  ;;  %v2130_v37 = vpop.f32.mrf.mxu1 }
 0x117   : > { %2504 = vmatprep.mubr.bf16.mxu1 %v2818_v30  ;;  %v2131_v38 = vadd.f32 %v2130_v37, %v2069_v36  ;;  %v2071_v39 = vpop.f32.mrf.mxu0 }
 0x118   : > { %v2132_v40 = vpop.f32.mrf.mxu1 }
 0x119   : > { %v2133_v41 = vadd.f32 %v2132_v40, %v2071_v39  ;;  %v2073_v42 = vpop.f32.mrf.mxu0 }
 0x11a   : > { %v2134_v43 = vpop.f32.mrf.mxu1 }
 0x11b   : > { %v2135_v44 = vadd.f32 %v2134_v43, %v2073_v42  ;;  %v2075_v45 = vpop.f32.mrf.mxu0 }
 0x11c   : > { %v2136_v46 = vpop.f32.mrf.mxu1 }
 0x11d   : > { %2444 = vmatmul.mubr.bf16.gmra.mxu0 %v2815_v34  ;;  %v2137_v47 = vadd.f32 %v2136_v46, %v2075_v45  ;;  %v2079_v48 = vpop.f32.mrf.mxu0 }
 0x11e   : > { %2505 = vmatmul.mubr.bf16.gmra.mxu1 %v2817_v35  ;;  %v2140_v49 = vpop.f32.mrf.mxu1 }
 0x11f   : > { %v2141_v50 = vadd.f32 %v2140_v49, %v2079_v48  ;;  %v2081_v51 = vpop.f32.mrf.mxu0 }
 0x120   : > { %v2142_v52 = vpop.f32.mrf.mxu1 }
 0x121   : > { %v2143_v53 = vadd.f32 %v2142_v52, %v2081_v51  ;;  %v2083_v54 = vpop.f32.mrf.mxu0 }
 0x122   : > { %v2144_v55 = vpop.f32.mrf.mxu1 }
 0x123   : > { %v2084_v56 = vpop.f32.mrf.mxu0 }
 0x124   : > { %v2145_v57 = vpop.f32.mrf.mxu1 }
 0x14d   : > { %v2181_v58 = vpop.f32.mrf.mxu0 }
 0x14e   : > { %v2242_v59 = vpop.f32.mrf.mxu1  ;;  %v2182_v60 = vadd.f32 %v2181_v58, %v2121_v19 }
 0x14f   : > { %v2183_v61 = vpop.f32.mrf.mxu0 }
 0x150   : > { %v2244_v62 = vpop.f32.mrf.mxu1  ;;  %v4438_v63 = vadd.f32 %v2242_v59, %v2182_v60  ;;  %v2184_v0 = vadd.f32 %v2183_v61, %v2123_v18 }
 0x151   : > { %v2185_v1 = vpop.f32.mrf.mxu0 }
 0x152   : > { %v2246_v2 = vpop.f32.mrf.mxu1  ;;  %v4440_v3 = vadd.f32 %v2244_v62, %v2184_v0  ;;  %v2186_v4 = vadd.f32 %v2185_v1, %v2125_v23 }
 0x153   : > { %v2187_v5 = vpop.f32.mrf.mxu0 }
 0x154   : > { %v2248_v6 = vpop.f32.mrf.mxu1  ;;  %v4442_v7 = vadd.f32 %v2246_v2, %v2186_v4  ;;  %v2188_v8 = vadd.f32 %v2187_v5, %v2127_v33 }
 0x155   : > { %v2191_v9 = vpop.f32.mrf.mxu0 }
 0x156   : > { %v2252_v10 = vpop.f32.mrf.mxu1  ;;  %v4444_v11 = vadd.f32 %v2248_v6, %v2188_v8  ;;  %v2192_v12 = vadd.f32 %v2191_v9, %v2131_v38  ;;  %v3530_v38 = vmov 0.0  }
 0x157   : > { %v2193_v13 = vpop.f32.mrf.mxu0  ;;  %232 = vst [vmem:[%s4462_s24] sm:$0xf] %v3530_v38 }
 0x158   : > { %v2254_v14 = vpop.f32.mrf.mxu1  ;;  %v2194_v15 = vadd.f32 %v2193_v13, %v2133_v41  ;;  %v4446_v16 = vadd.f32 %v2252_v10, %v2192_v12 }
 0x159   : > { %v2195_v17 = vpop.f32.mrf.mxu0 }
 0x15a   : > { %v2256_v19 = vpop.f32.mrf.mxu1  ;;  %v2196_v20 = vadd.f32 %v2195_v17, %v2135_v44  ;;  %v4448_v24 = vadd.f32 %v2254_v14, %v2194_v15 }
 0x15b   : > { %v2197_v25 = vpop.f32.mrf.mxu0 }
 0x15c   : > { %v2258_v26 = vpop.f32.mrf.mxu1  ;;  %v2198_v18 = vadd.f32 %v2197_v25, %v2137_v47  ;;  %v4450_v21 = vadd.f32 %v2256_v19, %v2196_v20  ;;  %v2523_v19 = vlaneseq }
 0x15d   : > { %v2201_v27 = vpop.f32.mrf.mxu0 }
 0x15e   : > { %v2262_v28 = vpop.f32.mrf.mxu1  ;;  %v2202_v22 = vadd.f32 %v2201_v27, %v2141_v50  ;;  %v4452_v23 = vadd.f32 %v2258_v26, %v2198_v18 }
 0x15f   : > { %v2203_v29 = vpop.f32.mrf.mxu0 }
 0x160   : > { %v2264_v30 = vpop.f32.mrf.mxu1  ;;  %v2204_v31 = vadd.f32 %v2203_v29, %v2143_v53  ;;  %v4454_v32 = vadd.f32 %v2262_v28, %v2202_v22 }
 0x161   : > { %v2205_v33 = vpop.f32.mrf.mxu0 }
 0x162   : > { %v2266_v34 = vpop.f32.mrf.mxu1  ;;  %v4456_v35 = vadd.f32 %v2264_v30, %v2204_v31 }
 0x163   : > { %v2206_v36 = vpop.f32.mrf.mxu0 }
 0x164   : > { %v2267_v37 = vpop.f32.mrf.mxu1  ;;  %v4487_v36 = vshrl.u32 %v2523_v19, 7 }
 0x18d   : > { %v2303_v39 = vpop.f32.mrf.mxu0 }
 0x18e   : > { %v2364_v40 = vpop.f32.mrf.mxu1  ;;  %v2304_v0 = vadd.f32 %v2303_v39, %v4438_v63 }
 0x18f   : > { %v2305_v41 = vpop.f32.mrf.mxu0 }
 0x190   : > { %v2366_v42 = vpop.f32.mrf.mxu1  ;;  %v2306_v1 = vadd.f32 %v2305_v41, %v4440_v3  ;;  %v2365_v2 = vadd.f32 %v2364_v40, %v2304_v0  ;;  %v2528_v0 = vadd.s32 32, %v4487_v36 }
 0x191   : > { %v2307_v43 = vpop.f32.mrf.mxu0 }
 0x192   : > { %v2368_v44 = vpop.f32.mrf.mxu1  ;;  %v2308_v4 = vadd.f32 %v2307_v43, %v4442_v7  ;;  %v2367_v8 = vadd.f32 %v2366_v42, %v2306_v1  ;;  %vm2540_vm0 = vcmp.lt.s32.totalorder %v2528_v0, 36 }
 0x193   : > { %v2309_v45 = vpop.f32.mrf.mxu0 }
 0x194   : > { %v2370_v46 = vpop.f32.mrf.mxu1  ;;  %v2310_v9 = vadd.f32 %v2309_v45, %v4444_v11  ;;  %v2369_v13 = vadd.f32 %v2368_v44, %v2308_v4 }
 0x195   : > { %v2313_v47 = vpop.f32.mrf.mxu0 }
 0x196   : > { %v2374_v48 = vpop.f32.mrf.mxu1  ;;  %v2314_v3 = vadd.f32 %v2313_v47, %v4446_v16  ;;  %v2371_v20 = vadd.f32 %v2370_v46, %v2310_v9 }
 0x197   : > { %v2315_v49 = vpop.f32.mrf.mxu0 }
 0x198   : > { %v2376_v50 = vpop.f32.mrf.mxu1  ;;  %v2316_v26 = vadd.f32 %v2315_v49, %v4448_v24  ;;  %v2375_v22 = vadd.f32 %v2374_v48, %v2314_v3 }
 0x199   : > { %v2317_v51 = vpop.f32.mrf.mxu0 }
 0x19a   : > { %v2378_v52 = vpop.f32.mrf.mxu1  ;;  %v2318_v18 = vadd.f32 %v2317_v51, %v4450_v21  ;;  %v2377_v21 = vadd.f32 %v2376_v50, %v2316_v26 }
 0x19b   : > { %v2319_v53 = vpop.f32.mrf.mxu0 }
 0x19c   : > { %v2380_v54 = vpop.f32.mrf.mxu1  ;;  %v2320_v30 = vadd.f32 %v2319_v53, %v4452_v23  ;;  %v2379_v40 = vadd.f32 %v2378_v52, %v2318_v18 }
 0x19d   : > { %v2323_v55 = vpop.f32.mrf.mxu0 }
 0x19e   : > { %v4465_v56 = vpop.f32.mrf.mxu1  ;;  %v2324_v41 = vadd.f32 %v2323_v55, %v4454_v32  ;;  %v2381_v48 = vadd.f32 %v2380_v54, %v2320_v30 }
 0x19f   : > { %v4467_v57 = vpop.f32.mrf.mxu0 }
 0x1a0   : > { %v4469_v58 = vpop.f32.mrf.mxu1  ;;  %v2326_v32 = vadd.f32 %v4467_v57, %v4456_v35  ;;  %v2385_v54 = vadd.f32 %v4465_v56, %v2324_v41 }
 0x1a1   : > { %v2327_v59 = vpop.f32.mrf.mxu0 }
 0x1a2   : > { %v2388_v60 = vpop.f32.mrf.mxu1 }
 0x1a3   : > { %v2328_v61 = vpop.f32.mrf.mxu0 }
 0x1a4   : > { %v2389_v62 = vpop.f32.mrf.mxu1 }
 0x1cd   : > { %v2425_v5 = vpop.f32.mrf.mxu0 }
 0x1ce   : > { %v2486_v6 = vpop.f32.mrf.mxu1  ;;  %v2426_v10 = vadd.f32 %v2425_v5, %v2365_v2 }
 0x1cf   : > { %v2427_v12 = vpop.f32.mrf.mxu0 }
 0x1d0   : > { %v2488_v63 = vpop.f32.mrf.mxu1  ;;  %v2487_v14 = vadd.f32 %v2486_v6, %v2426_v10  ;;  %v2428_v7 = vadd.f32 %v2427_v12, %v2367_v8 }
 0x1d1   : > { %v2429_v15 = vpop.f32.mrf.mxu0 }
 0x1d2   : > { %v2490_v17 = vpop.f32.mrf.mxu1  ;;  %2513 = vst [vmem:[%s4479_s28] sm:$0xff] %v2487_v14  ;;  %v2489_v11 = vadd.f32 %v2488_v63, %v2428_v7  ;;  %v2430_v25 = vadd.f32 %v2429_v15, %v2369_v13  ;;  %v2584_v31 = vmul.f32 %v2487_v14, %v2487_v14  ;;  %v2387_v63 = vadd.f32 %v4469_v58, %v2326_v32 }
 0x1d3   : > { %v2431_v27 = vpop.f32.mrf.mxu0 }
 0x1d4   : > { %v2492_v28 = vpop.f32.mrf.mxu1  ;;  %2514 = vst [vmem:[%s4479_s28 + $0x8] sm:$0xff] %v2489_v11  ;;  %v2491_v29 = vadd.f32 %v2490_v17, %v2430_v25  ;;  %v2432_v16 = vadd.f32 %v2431_v27, %v2371_v20  ;;  %v2585_v42 = vmul.f32 %v2489_v11, %v2489_v11 }
 0x1d5   : > { %v2435_v33 = vpop.f32.mrf.mxu0 }
 0x1d6   : > { %v2496_v34 = vpop.f32.mrf.mxu1  ;;  %2515 = vst [vmem:[%s4479_s28 + $0x10] sm:$0xff] %v2491_v29  ;;  %v2561_v37 = vadd.f32 %v2491_v29, %v2487_v14  ;;  %v2586_v38 = vmul.f32 %v2491_v29, %v2491_v29  ;;  %v2493_v24 = vadd.f32 %v2492_v28, %v2432_v16  ;;  %v2436_v39 = vadd.f32 %v2435_v33, %v2375_v22 }
 0x1d7   : > { %v2437_v43 = vpop.f32.mrf.mxu0 }
 0x1d8   : > { %v2498_v44 = vpop.f32.mrf.mxu1  ;;  %v2594_v23 = vadd.f32 %v2586_v38, %v2584_v31  ;;  %2516 = vst [vmem:[%s4479_s28 + $0x18] sm:$0xff] %v2493_v24  ;;  %v2573_v45 = vadd.f32 %v2493_v24, %v2489_v11  ;;  %v2587_v46 = vmul.f32 %v2493_v24, %v2493_v24  ;;  %v2497_v47 = vadd.f32 %v2496_v34, %v2436_v39 }
 0x1d9   : > { %v2438_v49 = vadd.f32 %v2437_v43, %v2377_v21  ;;  %v2439_v51 = vpop.f32.mrf.mxu0 }
 0x1da   : > { %v2500_v53 = vpop.f32.mrf.mxu1  ;;  %v2605_v59 = vadd.f32 %v2587_v46, %v2585_v42  ;;  %2517 = vst [vmem:[%s4479_s28 + $0x20] sm:$0xff] %v2497_v47  ;;  %v2562_v50 = vadd.f32 %v2561_v37, %v2497_v47  ;;  %v2588_v60 = vmul.f32 %v2497_v47, %v2497_v47  ;;  %v2440_v52 = vadd.f32 %v2439_v51, %v2379_v40 }
 0x1db   : > { %v2499_v55 = vadd.f32 %v2498_v44, %v2438_v49  ;;  %v2441_v61 = vpop.f32.mrf.mxu0 }
 0x1dc   : > { %v2502_v62 = vpop.f32.mrf.mxu1  ;;  %v2595_v1 = vadd.f32 %v2594_v23, %v2588_v60  ;;  %v2501_v2 = vadd.f32 %v2500_v53, %v2440_v52  ;;  %v2442_v4 = vadd.f32 %v2441_v61, %v2381_v48  ;;  %v3531_v53 = vmov 1983009808  }
 0x1dd   : > { %2518 = vst [vmem:[%s4479_s28 + $0x28] sm:$0xff] %v2499_v55  ;;  %v2574_v5 = vadd.f32 %v2573_v45, %v2499_v55  ;;  %v2589_v6 = vmul.f32 %v2499_v55, %v2499_v55  ;;  %v2445_v8 = vpop.f32.mrf.mxu0 }
 0x1de   : > { %v2506_v9 = vpop.f32.mrf.mxu1  ;;  %2519 = vst [vmem:[%s4479_s28 + $0x30] sm:$0xff] %v2501_v2  ;;  %v2563_v10 = vadd.f32 %v2562_v50, %v2501_v2  ;;  %v2590_v12 = vmul.f32 %v2501_v2, %v2501_v2  ;;  %v2503_v35 = vadd.f32 %v2502_v62, %v2442_v4  ;;  %v2446_v57 = vadd.f32 %v2445_v8, %v2385_v54 }
 0x1df   : > { %v2606_v13 = vadd.f32 %v2605_v59, %v2589_v6  ;;  %v2447_v56 = vpop.f32.mrf.mxu0  ;;  %v2624_v59 = vunpack.c.l.s4 %v3531_v53 }
 0x1e0   : > { %v2508_v3 = vpop.f32.mrf.mxu1  ;;  %v2596_v14 = vadd.f32 %v2595_v1, %v2590_v12  ;;  %2520 = vst [vmem:[%s4479_s28 + $0x38] sm:$0xff] %v2503_v35  ;;  %v2575_v7 = vadd.f32 %v2574_v5, %v2503_v35  ;;  %v2591_v15 = vmul.f32 %v2503_v35, %v2503_v35  ;;  %v2507_v17 = vadd.f32 %v2506_v9, %v2446_v57  ;;  %v2619_v9 = vld [vmem:[%s4462_s24] sm:$0xf] }
 0x1e1   : > { %v2448_v19 = vadd.f32 %v2447_v56, %v2387_v63  ;;  %v2449_v20 = vpop.f32.mrf.mxu0  ;;  %v2625_v0 = vunpack.c.0.s8 %v2624_v59 }
 0x1e2   : > { %v2510_v11 = vpop.f32.mrf.mxu1  ;;  %v2607_v25 = vadd.f32 %v2606_v13, %v2591_v15  ;;  %2521 = vst [vmem:[%s4479_s28 + $0x40] sm:$0xf] %v2507_v17  ;;  %v2559_v26 = vsel %vm2540_vm0, %v2507_v17, 0.0 }
 0x1e3   : > { %v2565_v58 = vsel %vm2564_vm1, %v2559_v26, 0.0  ;;  %v2592_v18 = vmul.f32 %v2559_v26, %v2559_v26  ;;  %v2509_v27 = vadd.f32 %v2508_v3, %v2448_v19  ;;  %v2450_v28 = vpop.f32.mrf.mxu0  ;;  %v2628_v5 = vsub.s32 %v2625_v0, %v4487_v36 }
 0x1e4   : > { %v2511_v22 = vpop.f32.mrf.mxu1  ;;  %v2566_v29 = vadd.f32 %v2565_v58, %v2563_v10 }
 0x1e5   : > { %v2597_v16 = vsel %vm2564_vm1, %v2592_v18, 0.0  ;;  %2522 = vst [vmem:[%s4479_s28 + $0x48] sm:$0xf] %v2509_v27  ;;  %v2560_v30 = vsel %vm2540_vm0, %v2509_v27, 0.0 }
 0x1e6   : > { %v2567_v31 = vrot.slane %v2566_v29, 4  ;;  %v2598_v33 = vadd.f32 %v2597_v16, %v2596_v14  ;;  %v2576_v34 = vsel %vm2564_vm1, %v2560_v30, 0.0  ;;  %v2593_v37 = vmul.f32 %v2560_v30, %v2560_v30 }
 0x1e7   : > { %v2577_v38 = vadd.f32 %v2576_v34, %v2575_v7 }
 0x1e8   : > { %v2568_v24 = vadd.f32 %v2567_v31, %v2566_v29  ;;  %v2599_v39 = vrot.slane %v2598_v33, 4  ;;  %v2608_v21 = vsel %vm2564_vm1, %v2593_v37, 0.0 }
 0x1e9   : > { %v2578_v40 = vrot.slane %v2577_v38, 4  ;;  %v2609_v41 = vadd.f32 %v2608_v21, %v2607_v25 }
 0x1ea   : > { %v2569_v42 = vrot.slane %v2568_v24, 2  ;;  %v2600_v43 = vadd.f32 %v2599_v39, %v2598_v33 }
 0x1eb   : > { %v2579_v44 = vadd.f32 %v2578_v40, %v2577_v38  ;;  %v2610_v23 = vrot.slane %v2609_v41, 4 }
 0x1ec   : > { %v2570_v45 = vadd.f32 %v2569_v42, %v2568_v24  ;;  %v2601_v46 = vrot.slane %v2600_v43, 2 }
 0x1ed   : > { %v2580_v47 = vrot.slane %v2579_v44, 2  ;;  %v2611_v48 = vadd.f32 %v2610_v23, %v2609_v41 }
 0x1ee   : > { %v2571_v49 = vrot.slane %v2570_v45, 1  ;;  %v2602_v51 = vadd.f32 %v2601_v46, %v2600_v43 }
 0x1ef   : > { %v2581_v50 = vadd.f32 %v2580_v47, %v2579_v44  ;;  %v2612_v60 = vrot.slane %v2611_v48, 2 }
 0x1f0   : > { %v2603_v52 = vrot.slane %v2602_v51, 1  ;;  %v2572_v61 = vadd.f32 %v2571_v49, %v2570_v45 }
 0x1f1   : > { %v2582_v32 = vrot.slane %v2581_v50, 1  ;;  %v2613_v55 = vadd.f32 %v2612_v60, %v2611_v48 }
 0x1f2   : > { %v2604_v62 = vadd.f32 %v2603_v52, %v2602_v51 }
 0x1f3   : > { %v2614_v54 = vrot.slane %v2613_v55, 1  ;;  %v2583_v2 = vadd.f32 %v2582_v32, %v2581_v50 }
 0x1f4   : > { %v2617_v1 = vsel %vm2616_vm2, %v2572_v61, %v2604_v62 }
 0x1f5   : > { %v2615_v4 = vadd.f32 %v2614_v54, %v2613_v55 }
 0x1f7   : > { %v2618_v6 = vsel %vm2616_vm2, %v2583_v2, %v2615_v4 }
 0x1f8   : > { %v2622_v8 = vcombine.low %v2617_v1, %v2618_v6 }
 0x1fa   : > { %v2629_v10 = vrot.slane %v2622_v8, %v2628_v5 }
 0x1fc   : > { %v2631_v12 = vadd.f32 %v2629_v10, %v2619_v9 }
 0x1fe   : > { %2632 = vst [vmem:[%s4462_s24] sm:$0xf] %v2631_v12 }
 0x1ff PF: > { %s14_s14 = sadd.s32 1, %s3528_s14   ;;  %s4525_s12 = smov %s3524_s13 }
 0x200   : > { %p11_p5 = scmp.ge.s32.totalorder %s14_s14, 4   ;;  %s4526_s13 = smov %s4528_s15 }
 0x202   :  { %13 = sbr.rel (!%p11_p5) target bundleno = 2 (0x2), region = 74 }

// kernel: gaugan_discriminator_forward.14
= control target key start
LH: loop header
LB: loop body
LE: loop exit
PB: predicated region body
PF: predicated region fallthrough
CT: control target
= control target key end

     0   :  { %s537_s9 = smov 0   ;;  %s539_s10 = smov 0   ;;  %s591_s0 = inlined_call_operand.vmem [shape: f32[2,9,512], index: 0, kind: input, shape index: {}]   ;;  %s592_s1 = inlined_call_operand.vmem [shape: f32[2,2,512], index: 1, kind: input, shape index: {}]   ;;  %s593_s2 = inlined_call_operand.vmem [shape: f32[2,9,512], index: 2, kind: output, shape index: {}]  }
   0x1   :  { %s541_s11 = smov 0  }
   0x2 LB: > { %s24_s12 = sadd.s32 1, %s516_s10  ;;  %p460_p0 = scmp.ge.s32.totalorder %s520_s11, 1  ;;  %s520_s11 = sphi %s541_s11, %s12_s11   ;;  %s516_s10 = sphi %s539_s10, %s595_s10   ;;  %s512_s9 = sphi %s537_s9, %s594_s9  }
   0x3   : > { %p26_p1 = scmp.ge.s32.totalorder %s24_s12, 2  ;;  %p144_p2 = scmp.lt.s32.totalorder %s520_s11, 3 }
   0x5   : > { %s597_s12 = smov (%p26_p1, %s24_s12), 0  ;;  %p145_p3 = pnand %p460_p0, %p144_p2 }
   0x6   : > { %p182_p4 = scmp.lt.s32.totalorder (!%p145_p3), %s512_s9, 1 }
   0x7   : > { %148 = sbr.rel (%p145_p3) target bundleno = 57 (0x39), region = 28 }
   0xc   : > { %s599_s9 = smov (!%p182_p4, %s512_s9), 1  ;;  %v225_v4 = vlaneseq }
   0xd   : > { %s470_s13 = sshll.u32 %s599_s9, 3  ;;  %s469_s17 = sshll.u32 %s599_s9, 6 }
   0xe   : > { %s196_s16 = scalar_lea.vmem %s592_s1, %s470_s13  ;;  %v226_v7 = vshrl.u32 %v225_v4, 7  ;;  %s190_s20 = scalar_lea.vmem %s591_s0, %s469_s17 }
   0xf   : > { %v216_v0 = vld [vmem:[%s196_s16] sm:$0xff]  ;;  %v209_v23 = vld [vmem:[%s190_s20 + $0x8] sm:$0xff]  ;;  %v210_v25 = vld [vmem:[%s190_s20 + $0x10] sm:$0xff]  ;;  %s572_s23 = scalar_lea.vmem %s593_s2, %s469_s17 }
  0x10   : > { %v217_v1 = vmul.f32 0.11111111, %v216_v0  ;;  %v227_v9 = vsub.s32 0, %v226_v7  ;;  %v231_v10 = vsub.s32 2, %v226_v7  ;;  %v235_v11 = vsub.s32 4, %v226_v7  ;;  %v208_v18 = vld [vmem:[%s190_s20] sm:$0xff] }
  0x11   : > { %v239_v12 = vsub.s32 6, %v226_v7  ;;  %v274_v17 = vsub.s32 1, %v226_v7  ;;  %v278_v24 = vsub.s32 3, %v226_v7  ;;  %v282_v26 = vsub.s32 5, %v226_v7  ;;  %v211_v27 = vld [vmem:[%s190_s20 + $0x18] sm:$0xff] }
  0x12   : > { %v218_v2 = vmul.f32 %v217_v1, %v217_v1  ;;  %v228_v13 = vrot.slane %v217_v1, %v227_v9  ;;  %v232_v14 = vrot.slane %v217_v1, %v231_v10  ;;  %v236_v15 = vrot.slane %v217_v1, %v235_v11  ;;  %v212_v29 = vld [vmem:[%s190_s20 + $0x20] sm:$0x1]  ;;  %v213_v30 = vld [vmem:[%s190_s20 + $0x28] sm:$0x1]  ;;  %v214_v31 = vld [vmem:[%s190_s20 + $0x30] sm:$0x1] }
  0x13   : > { %v240_v16 = vrot.slane %v217_v1, %v239_v12  ;;  %v286_v28 = vsub.s32 7, %v226_v7  ;;  %v215_v32 = vld [vmem:[%s190_s20 + $0x38] sm:$0x1] }
  0x14   : > { %v220_v3 = vrot.slane %v218_v2, 7  ;;  %v248_v19 = vrot.slane %v228_v13, %v227_v9  ;;  %v252_v20 = vrot.slane %v232_v14, %v227_v9  ;;  %v256_v21 = vrot.slane %v236_v15, %v227_v9 }
  0x15   : > { %v260_v22 = vrot.slane %v240_v16, %v227_v9 }
  0x16   : > { %v222_v5 = vsub.f32 %v217_v1, %v220_v3  ;;  %v261_v34 = vsub.f32 %v208_v18, %v248_v19  ;;  %v262_v35 = vsub.f32 %v209_v23, %v252_v20  ;;  %v263_v36 = vsub.f32 %v210_v25, %v256_v21 }
  0x17   : > { %v264_v37 = vsub.f32 %v211_v27, %v260_v22  ;;  %v265_v42 = vsub.f32 %v212_v29, %v248_v19  ;;  %v266_v43 = vsub.f32 %v213_v30, %v252_v20  ;;  %v267_v44 = vsub.f32 %v214_v31, %v256_v21 }
  0x18   : > { %v223_v6 = vmax.f32 %v222_v5, 0.0  ;;  %v268_v45 = vsub.f32 %v215_v32, %v260_v22 }
  0x1a   : > { %v269_v8 = vadd.f32 1e-05, %v223_v6 }
  0x1c   : > { %496 = vrsqrt.f32 %v269_v8 }
  0x29   : > { %v497_v33 = vpop.eup %496 }
  0x2a   : > { %v275_v38 = vrot.slane %v497_v33, %v274_v17  ;;  %v279_v39 = vrot.slane %v497_v33, %v278_v24  ;;  %v283_v40 = vrot.slane %v497_v33, %v282_v26  ;;  %v287_v41 = vrot.slane %v497_v33, %v286_v28 }
  0x2c   : > { %v295_v46 = vrot.slane %v275_v38, %v274_v17  ;;  %v299_v47 = vrot.slane %v279_v39, %v274_v17  ;;  %v303_v48 = vrot.slane %v283_v40, %v274_v17  ;;  %v307_v49 = vrot.slane %v287_v41, %v274_v17 }
  0x2e   : > { %v308_v50 = vmul.f32 %v295_v46, %v261_v34  ;;  %v309_v51 = vmul.f32 %v299_v47, %v262_v35  ;;  %v310_v52 = vmul.f32 %v303_v48, %v263_v36  ;;  %v311_v53 = vmul.f32 %v307_v49, %v264_v37 }
  0x2f   : > { %v312_v54 = vmul.f32 %v295_v46, %v265_v42  ;;  %v313_v55 = vmul.f32 %v299_v47, %v266_v43  ;;  %v314_v56 = vmul.f32 %v303_v48, %v267_v44  ;;  %v315_v57 = vmul.f32 %v307_v49, %v268_v45 }
  0x30   : > { %vm316_vm0 = vcmp.gt.f32.partialorder %v308_v50, 0.0  ;;  %v324_v58 = vmul.f32 0.2, %v308_v50  ;;  %vm317_vm1 = vcmp.gt.f32.partialorder %v309_v51, 0.0  ;;  %v325_v59 = vmul.f32 0.2, %v309_v51 }
  0x31   : > { %vm318_vm2 = vcmp.gt.f32.partialorder %v310_v52, 0.0  ;;  %v326_v60 = vmul.f32 0.2, %v310_v52  ;;  %vm319_vm3 = vcmp.gt.f32.partialorder %v311_v53, 0.0  ;;  %v327_v61 = vmul.f32 0.2, %v311_v53 }
  0x32   : > { %v332_v62 = vsel %vm316_vm0, %v308_v50, %v324_v58  ;;  %v333_v63 = vsel %vm317_vm1, %v309_v51, %v325_v59  ;;  %vm320_vm4 = vcmp.gt.f32.partialorder %v312_v54, 0.0  ;;  %v328_v0 = vmul.f32 0.2, %v312_v54 }
  0x33   : > { %340 = vst [vmem:[%s572_s23] sm:$0xff] %v332_v62  ;;  %341 = vst [vmem:[%s572_s23 + $0x8] sm:$0xff] %v333_v63  ;;  %v334_v1 = vsel %vm318_vm2, %v310_v52, %v326_v60  ;;  %v335_v2 = vsel %vm319_vm3, %v311_v53, %v327_v61  ;;  %vm321_vm5 = vcmp.gt.f32.partialorder %v313_v55, 0.0  ;;  %v329_v3 = vmul.f32 0.2, %v313_v55 }
  0x34   : > { %342 = vst [vmem:[%s572_s23 + $0x10] sm:$0xff] %v334_v1  ;;  %343 = vst [vmem:[%s572_s23 + $0x18] sm:$0xff] %v335_v2  ;;  %v336_v4 = vsel %vm320_vm4, %v312_v54, %v328_v0  ;;  %vm322_vm6 = vcmp.gt.f32.partialorder %v314_v56, 0.0  ;;  %v330_v5 = vmul.f32 0.2, %v314_v56  ;;  %vm323_vm7 = vcmp.gt.f32.partialorder %v315_v57, 0.0 }
  0x35   : > { %344 = vst [vmem:[%s572_s23 + $0x20] sm:$0x1] %v336_v4  ;;  %v337_v6 = vsel %vm321_vm5, %v313_v55, %v329_v3  ;;  %v331_v7 = vmul.f32 0.2, %v315_v57 }
  0x36   : > { %345 = vst [vmem:[%s572_s23 + $0x28] sm:$0x1] %v337_v6  ;;  %v338_v8 = vsel %vm322_vm6, %v314_v56, %v330_v5 }
  0x37   : > { %346 = vst [vmem:[%s572_s23 + $0x30] sm:$0x1] %v338_v8  ;;  %v339_v9 = vsel %vm323_vm7, %v315_v57, %v331_v7 }
  0x38   : > { %347 = vst [vmem:[%s572_s23 + $0x38] sm:$0x1] %v339_v9 }
  0x39 PF: > { %s12_s11 = sadd.s32 1, %s520_s11   ;;  %s594_s9 = smov %s516_s10 }
  0x3a   : > { %p9_p5 = scmp.ge.s32.totalorder %s12_s11, 4   ;;  %s595_s10 = smov %s597_s12 }
  0x3c   :  { %11 = sbr.rel (!%p9_p5) target bundleno = 2 (0x2), region = 61 }

// kernel: gaugan_discriminator_forward.13
= control target key start
LH: loop header
LB: loop body
LE: loop exit
PB: predicated region body
PF: predicated region fallthrough
CT: control target
= control target key end

     0   :  { %s10884_s12 = smov 0   ;;  %s10886_s13 = smov 0   ;;  %s14453_s0 = inlined_call_operand.vmem [shape: bf16[2,9,4096], index: 0, kind: input, shape index: {}]   ;;  %s14454_s1 = inlined_call_operand.vmem [shape: bf16[4096,512], index: 1, kind: input, shape index: {}]   ;;  %s14455_s2 = inlined_call_operand.vmem [shape: f32[2,9,512], index: 2, kind: output, shape index: {0}]   ;;  %s14456_s3 = inlined_call_operand.vmem [shape: f32[2,2,512], index: 3, kind: output, shape index: {1}]  }
   0x1   :  { %s10888_s14 = smov 0  }
   0x2 LB: > { %s26_s15 = sadd.s32 1, %s10857_s13  ;;  %p8209_p0 = scmp.ge.s32.totalorder %s10861_s14, 1  ;;  %s10861_s14 = sphi %s10888_s14, %s14_s14   ;;  %s10857_s13 = sphi %s10886_s13, %s14473_s13   ;;  %s10853_s12 = sphi %s10884_s12, %s14472_s12  }
   0x3   : > { %p28_p1 = scmp.ge.s32.totalorder %s26_s15, 2  ;;  %p162_p2 = scmp.lt.s32.totalorder %s10861_s14, 3 }
   0x5   : > { %s14475_s15 = smov (%p28_p1, %s26_s15), 0  ;;  %p163_p3 = pnand %p8209_p0, %p162_p2 }
   0x7   : > { %166 = sbr.rel (%p163_p3) target bundleno = 1266 (0x4f2), region = 28 }
   0xc   : > { %v9303_v0 = vld [vmem:[%s14454_s1 + $0xe4] ss:$16 sps:$4 sm:$0xff]   ;;  %v9307_v2 = vld [vmem:[%s14454_s1 + $0xe0] ss:$16 sps:$4 sm:$0xff]   ;;  %p202_p4 = scmp.lt.s32.totalorder %s10853_s12, 1  ;;  %vm7974_vm1 = vcmask 1040384  }
   0xd   : > { %v9305_v1 = vld [vmem:[%s14454_s1 + $0x2e4] ss:$16 sps:$4 sm:$0xff]   ;;  %6569 = vmatprep.subr.bf16.mxu0 %v9303_v0  ;;  %v9308_v3 = vld [vmem:[%s14454_s1 + $0x2e0] ss:$16 sps:$4 sm:$0xff]  }
   0xe   : > { %6612 = vmatprep.subr.bf16.mxu1 %v9305_v1  ;;  %v9309_v4 = vld [vmem:[%s14454_s1 + $0xc4] ss:$16 sps:$4 sm:$0xff]   ;;  %6570 = vmatpush1.bf16.msra.mxu0 %v9307_v2  ;;  %v9313_v6 = vld [vmem:[%s14454_s1 + $0xc0] ss:$16 sps:$4 sm:$0xff]   ;;  %s14477_s12 = smov (!%p202_p4, %s10853_s12), 1 }
   0xf   : > { %6613 = vmatpush1.bf16.msra.mxu1 %v9308_v3  ;;  %v9311_v5 = vld [vmem:[%s14454_s1 + $0x2c4] ss:$16 sps:$4 sm:$0xff]   ;;  %6571 = vmatprep.subr.bf16.mxu0 %v9309_v4  ;;  %v9314_v7 = vld [vmem:[%s14454_s1 + $0x2c0] ss:$16 sps:$4 sm:$0xff]   ;;  %s9274_s29 = sshll.u32 %s14477_s12, 8  ;;  %s9275_s27 = sshll.u32 %s14477_s12, 6 }
  0x10   : > { %6614 = vmatprep.subr.bf16.mxu1 %v9311_v5  ;;  %v9315_v8 = vld [vmem:[%s14454_s1 + $0xa4] ss:$16 sps:$4 sm:$0xff]   ;;  %v9319_v10 = vld [vmem:[%s14454_s1 + $0xa0] ss:$16 sps:$4 sm:$0xff]   ;;  %s11044_s11 = scalar_lea.vmem %s14453_s0, %s9274_s29  ;;  %s13440_s7 = scalar_lea.vmem %s14455_s2, %s9275_s27 }
  0x11   : > { %v9317_v9 = vld [vmem:[%s14454_s1 + $0x2a4] ss:$16 sps:$4 sm:$0xff]   ;;  %v9320_v11 = vld [vmem:[%s14454_s1 + $0x2a0] ss:$16 sps:$4 sm:$0xff]   ;;  %v234_v50 = vld [vmem:[%s11044_s11 + $0x8] sm:$0xff] }
  0x12   : > { %6572 = vmatpush1.bf16.msra.mxu0 %v9313_v6  ;;  %v9321_v12 = vld [vmem:[%s14454_s1 + $0x84] ss:$16 sps:$4 sm:$0xff]   ;;  %v9325_v14 = vld [vmem:[%s14454_s1 + $0x80] ss:$16 sps:$4 sm:$0xff]   ;;  %v250_v51 = vld [vmem:[%s11044_s11 + $0x88] sm:$0x11] }
  0x13   : > { %6615 = vmatpush1.bf16.msra.mxu1 %v9314_v7  ;;  %6573 = vmatprep.subr.bf16.mxu0 %v9315_v8  ;;  %v9323_v13 = vld [vmem:[%s14454_s1 + $0x284] ss:$16 sps:$4 sm:$0xff]   ;;  %v9326_v15 = vld [vmem:[%s14454_s1 + $0x280] ss:$16 sps:$4 sm:$0xff]   ;;  %v11070_v55 = vcombine.high %v234_v50, %v250_v51 }
  0x14   : > { %6616 = vmatprep.subr.bf16.mxu1 %v9317_v9  ;;  %v9327_v16 = vld [vmem:[%s14454_s1 + $0x64] ss:$16 sps:$4 sm:$0xff]   ;;  %v9331_v18 = vld [vmem:[%s14454_s1 + $0x60] ss:$16 sps:$4 sm:$0xff]   ;;  %v11124_v9 = vcombine.low %v234_v50, %v250_v51 }
  0x15   : > { %v9329_v17 = vld [vmem:[%s14454_s1 + $0x264] ss:$16 sps:$4 sm:$0xff]   ;;  %v9332_v19 = vld [vmem:[%s14454_s1 + $0x260] ss:$16 sps:$4 sm:$0xff]   ;;  %6644 = vmatprep.mubr.bf16.mxu1 %v11070_v55 }
  0x16   : > { %6574 = vmatpush1.bf16.msra.mxu0 %v9319_v10  ;;  %v9333_v20 = vld [vmem:[%s14454_s1 + $0x44] ss:$16 sps:$4 sm:$0xff]   ;;  %v9337_v22 = vld [vmem:[%s14454_s1 + $0x40] ss:$16 sps:$4 sm:$0xff]  }
  0x17   : > { %6617 = vmatpush1.bf16.msra.mxu1 %v9320_v11  ;;  %6575 = vmatprep.subr.bf16.mxu0 %v9321_v12  ;;  %v9335_v21 = vld [vmem:[%s14454_s1 + $0x244] ss:$16 sps:$4 sm:$0xff]   ;;  %v9338_v23 = vld [vmem:[%s14454_s1 + $0x240] ss:$16 sps:$4 sm:$0xff]  }
  0x18   : > { %6618 = vmatprep.subr.bf16.mxu1 %v9323_v13  ;;  %v9339_v24 = vld [vmem:[%s14454_s1 + $0x24] ss:$16 sps:$4 sm:$0xff]   ;;  %v9343_v26 = vld [vmem:[%s14454_s1 + $0x20] ss:$16 sps:$4 sm:$0xff]  }
  0x19   : > { %v9341_v25 = vld [vmem:[%s14454_s1 + $0x224] ss:$16 sps:$4 sm:$0xff]   ;;  %v9344_v27 = vld [vmem:[%s14454_s1 + $0x220] ss:$16 sps:$4 sm:$0xff]  }
  0x1a   : > { %6576 = vmatpush1.bf16.msra.mxu0 %v9325_v14  ;;  %v9345_v28 = vld [vmem:[%s14454_s1 + $0x4] ss:$16 sps:$4 sm:$0xff]   ;;  %v9349_v30 = vld [vmem:[%s14454_s1] ss:$16 sps:$4 sm:$0xff]  }
  0x1b   : > { %6619 = vmatpush1.bf16.msra.mxu1 %v9326_v15  ;;  %6577 = vmatprep.subr.bf16.mxu0 %v9327_v16  ;;  %v9347_v29 = vld [vmem:[%s14454_s1 + $0x204] ss:$16 sps:$4 sm:$0xff]   ;;  %v9350_v31 = vld [vmem:[%s14454_s1 + $0x200] ss:$16 sps:$4 sm:$0xff]  }
  0x1c   : > { %6620 = vmatprep.subr.bf16.mxu1 %v9329_v17  ;;  %v9351_v32 = vld [vmem:[%s14454_s1 + $0x1e4] ss:$16 sps:$4 sm:$0xff]   ;;  %v9355_v34 = vld [vmem:[%s14454_s1 + $0x1e0] ss:$16 sps:$4 sm:$0xff]  }
  0x1d   : > { %v9353_v33 = vld [vmem:[%s14454_s1 + $0x3e4] ss:$16 sps:$4 sm:$0xff]   ;;  %v9356_v35 = vld [vmem:[%s14454_s1 + $0x3e0] ss:$16 sps:$4 sm:$0xff]  }
  0x1e   : > { %6578 = vmatpush1.bf16.msra.mxu0 %v9331_v18  ;;  %v9357_v36 = vld [vmem:[%s14454_s1 + $0x1c4] ss:$16 sps:$4 sm:$0xff]   ;;  %v9361_v38 = vld [vmem:[%s14454_s1 + $0x1c0] ss:$16 sps:$4 sm:$0xff]  }
  0x1f   : > { %6621 = vmatpush1.bf16.msra.mxu1 %v9332_v19  ;;  %6579 = vmatprep.subr.bf16.mxu0 %v9333_v20  ;;  %v9359_v37 = vld [vmem:[%s14454_s1 + $0x3c4] ss:$16 sps:$4 sm:$0xff]   ;;  %v9362_v39 = vld [vmem:[%s14454_s1 + $0x3c0] ss:$16 sps:$4 sm:$0xff]  }
  0x20   : > { %6622 = vmatprep.subr.bf16.mxu1 %v9335_v21  ;;  %v9363_v40 = vld [vmem:[%s14454_s1 + $0x1a4] ss:$16 sps:$4 sm:$0xff]   ;;  %v9367_v42 = vld [vmem:[%s14454_s1 + $0x1a0] ss:$16 sps:$4 sm:$0xff]  }
  0x21   : > { %v9365_v41 = vld [vmem:[%s14454_s1 + $0x3a4] ss:$16 sps:$4 sm:$0xff]   ;;  %v9368_v43 = vld [vmem:[%s14454_s1 + $0x3a0] ss:$16 sps:$4 sm:$0xff]  }
  0x22   : > { %6580 = vmatpush1.bf16.msra.mxu0 %v9337_v22  ;;  %v9369_v44 = vld [vmem:[%s14454_s1 + $0x184] ss:$16 sps:$4 sm:$0xff]   ;;  %v9373_v46 = vld [vmem:[%s14454_s1 + $0x180] ss:$16 sps:$4 sm:$0xff]  }
  0x23   : > { %6623 = vmatpush1.bf16.msra.mxu1 %v9338_v23  ;;  %6581 = vmatprep.subr.bf16.mxu0 %v9339_v24  ;;  %v9371_v45 = vld [vmem:[%s14454_s1 + $0x384] ss:$16 sps:$4 sm:$0xff]   ;;  %v9374_v47 = vld [vmem:[%s14454_s1 + $0x380] ss:$16 sps:$4 sm:$0xff]  }
  0x24   : > { %6624 = vmatprep.subr.bf16.mxu1 %v9341_v25  ;;  %v233_v48 = vld [vmem:[%s11044_s11] sm:$0xff] }
  0x25   : > { %v249_v49 = vld [vmem:[%s11044_s11 + $0x80] sm:$0x11] }
  0x26   : > { %6582 = vmatpush1.bf16.msra.mxu0 %v9343_v26  ;;  %v9375_v52 = vld [vmem:[%s14454_s1 + $0x164] ss:$16 sps:$4 sm:$0xff]   ;;  %v11065_v53 = vcombine.high %v233_v48, %v249_v49  ;;  %v9379_v56 = vld [vmem:[%s14454_s1 + $0x160] ss:$16 sps:$4 sm:$0xff]   ;;  %v11122_v8 = vcombine.low %v233_v48, %v249_v49 }
  0x27   : > { %6625 = vmatpush1.bf16.msra.mxu1 %v9344_v27  ;;  %6583 = vmatprep.subr.bf16.mxu0 %v9345_v28  ;;  %v9377_v54 = vld [vmem:[%s14454_s1 + $0x364] ss:$16 sps:$4 sm:$0xff]   ;;  %v9380_v57 = vld [vmem:[%s14454_s1 + $0x360] ss:$16 sps:$4 sm:$0xff]  }
  0x28   : > { %6626 = vmatprep.subr.bf16.mxu1 %v9347_v29  ;;  %6601 = vmatprep.mubr.bf16.mxu0 %v11065_v53  ;;  %v9381_v58 = vld [vmem:[%s14454_s1 + $0x144] ss:$16 sps:$4 sm:$0xff]   ;;  %v9385_v60 = vld [vmem:[%s14454_s1 + $0x140] ss:$16 sps:$4 sm:$0xff]  }
  0x29   : > { %v9383_v59 = vld [vmem:[%s14454_s1 + $0x344] ss:$16 sps:$4 sm:$0xff]   ;;  %v9386_v61 = vld [vmem:[%s14454_s1 + $0x340] ss:$16 sps:$4 sm:$0xff]  }
  0x2a   : > { %6584 = vmatpush1.bf16.msra.mxu0 %v9349_v30  ;;  %v9387_v62 = vld [vmem:[%s14454_s1 + $0x124] ss:$16 sps:$4 sm:$0xff]   ;;  %v9391_v0 = vld [vmem:[%s14454_s1 + $0x120] ss:$16 sps:$4 sm:$0xff]  }
  0x2b   : > { %6627 = vmatpush1.bf16.msra.mxu1 %v9350_v31  ;;  %6585 = vmatprep.subr.bf16.mxu0 %v9351_v32  ;;  %v9389_v63 = vld [vmem:[%s14454_s1 + $0x324] ss:$16 sps:$4 sm:$0xff]   ;;  %v9392_v1 = vld [vmem:[%s14454_s1 + $0x320] ss:$16 sps:$4 sm:$0xff]  }
  0x2c   : > { %6628 = vmatprep.subr.bf16.mxu1 %v9353_v33  ;;  %v9393_v2 = vld [vmem:[%s14454_s1 + $0x104] ss:$16 sps:$4 sm:$0xff]   ;;  %v9397_v4 = vld [vmem:[%s14454_s1 + $0x100] ss:$16 sps:$4 sm:$0xff]  }
  0x2d   : > { %v9395_v3 = vld [vmem:[%s14454_s1 + $0x304] ss:$16 sps:$4 sm:$0xff]   ;;  %v9398_v5 = vld [vmem:[%s14454_s1 + $0x300] ss:$16 sps:$4 sm:$0xff]  }
  0x2e   : > { %6586 = vmatpush2.bf16.msra.mxu0 %v9355_v34  ;;  %v9401_v6 = vld [vmem:[%s14454_s1 + $0x4e4] ss:$16 sps:$4 sm:$0xff]   ;;  %v9399_v10 = vld [vmem:[%s14454_s1 + $0x4e0] ss:$16 sps:$4 sm:$0xff]  }
  0x2f   : > { %6629 = vmatpush2.bf16.msra.mxu1 %v9356_v35  ;;  %6587 = vmatprep.subr.bf16.mxu0 %v9357_v36  ;;  %v9404_v7 = vld [vmem:[%s14454_s1 + $0x6e4] ss:$16 sps:$4 sm:$0xff]   ;;  %v9402_v11 = vld [vmem:[%s14454_s1 + $0x6e0] ss:$16 sps:$4 sm:$0xff]  }
  0x30   : > { %6630 = vmatprep.subr.bf16.mxu1 %v9359_v37  ;;  %v9407_v12 = vld [vmem:[%s14454_s1 + $0x4c4] ss:$16 sps:$4 sm:$0xff]   ;;  %v9405_v14 = vld [vmem:[%s14454_s1 + $0x4c0] ss:$16 sps:$4 sm:$0xff]  }
  0x31   : > { %v9410_v13 = vld [vmem:[%s14454_s1 + $0x6c4] ss:$16 sps:$4 sm:$0xff]   ;;  %v9408_v15 = vld [vmem:[%s14454_s1 + $0x6c0] ss:$16 sps:$4 sm:$0xff]  }
  0x32   : > { %6588 = vmatpush2.bf16.msra.mxu0 %v9361_v38  ;;  %v9413_v16 = vld [vmem:[%s14454_s1 + $0x4a4] ss:$16 sps:$4 sm:$0xff]   ;;  %v9411_v18 = vld [vmem:[%s14454_s1 + $0x4a0] ss:$16 sps:$4 sm:$0xff]   ;;  %v11213_v38 = vld [vmem:[%s11044_s11 + $0x18] sm:$0xff] }
  0x33   : > { %6631 = vmatpush2.bf16.msra.mxu1 %v9362_v39  ;;  %6589 = vmatprep.subr.bf16.mxu0 %v9363_v40  ;;  %v9416_v17 = vld [vmem:[%s14454_s1 + $0x6a4] ss:$16 sps:$4 sm:$0xff]   ;;  %v9414_v19 = vld [vmem:[%s14454_s1 + $0x6a0] ss:$16 sps:$4 sm:$0xff]   ;;  %v11216_v39 = vld [vmem:[%s11044_s11 + $0x98] sm:$0x11] }
  0x34   : > { %6632 = vmatprep.subr.bf16.mxu1 %v9365_v41  ;;  %v9419_v20 = vld [vmem:[%s14454_s1 + $0x484] ss:$16 sps:$4 sm:$0xff]   ;;  %v9417_v22 = vld [vmem:[%s14454_s1 + $0x480] ss:$16 sps:$4 sm:$0xff]  }
  0x35   : > { %v9422_v21 = vld [vmem:[%s14454_s1 + $0x684] ss:$16 sps:$4 sm:$0xff]   ;;  %v9420_v23 = vld [vmem:[%s14454_s1 + $0x680] ss:$16 sps:$4 sm:$0xff]  }
  0x36   : > { %6590 = vmatpush2.bf16.msra.mxu0 %v9367_v42  ;;  %v9425_v24 = vld [vmem:[%s14454_s1 + $0x464] ss:$16 sps:$4 sm:$0xff]   ;;  %v9423_v26 = vld [vmem:[%s14454_s1 + $0x460] ss:$16 sps:$4 sm:$0xff]  }
  0x37   : > { %6633 = vmatpush2.bf16.msra.mxu1 %v9368_v43  ;;  %6591 = vmatprep.subr.bf16.mxu0 %v9369_v44  ;;  %v9428_v25 = vld [vmem:[%s14454_s1 + $0x664] ss:$16 sps:$4 sm:$0xff]   ;;  %v9426_v27 = vld [vmem:[%s14454_s1 + $0x660] ss:$16 sps:$4 sm:$0xff]   ;;  %v11230_v43 = vcombine.high %v11213_v38, %v11216_v39 }
  0x38   : > { %6634 = vmatprep.subr.bf16.mxu1 %v9371_v45  ;;  %v9431_v28 = vld [vmem:[%s14454_s1 + $0x444] ss:$16 sps:$4 sm:$0xff]   ;;  %v9429_v30 = vld [vmem:[%s14454_s1 + $0x440] ss:$16 sps:$4 sm:$0xff]  }
  0x39   : > { %v9434_v29 = vld [vmem:[%s14454_s1 + $0x644] ss:$16 sps:$4 sm:$0xff]   ;;  %v9432_v31 = vld [vmem:[%s14454_s1 + $0x640] ss:$16 sps:$4 sm:$0xff]  }
  0x3a   : > { %6592 = vmatpush2.bf16.msra.mxu0 %v9373_v46  ;;  %v9437_v32 = vld [vmem:[%s14454_s1 + $0x424] ss:$16 sps:$4 sm:$0xff]   ;;  %v9435_v34 = vld [vmem:[%s14454_s1 + $0x420] ss:$16 sps:$4 sm:$0xff]  }
  0x3b   : > { %6635 = vmatpush2.bf16.msra.mxu1 %v9374_v47  ;;  %6593 = vmatprep.subr.bf16.mxu0 %v9375_v52  ;;  %v9440_v33 = vld [vmem:[%s14454_s1 + $0x624] ss:$16 sps:$4 sm:$0xff]   ;;  %v9438_v35 = vld [vmem:[%s14454_s1 + $0x620] ss:$16 sps:$4 sm:$0xff]  }
  0x3c   : > { %6636 = vmatprep.subr.bf16.mxu1 %v9377_v54  ;;  %v11207_v36 = vld [vmem:[%s11044_s11 + $0x10] sm:$0xff] }
  0x3d   : > { %v11210_v37 = vld [vmem:[%s11044_s11 + $0x90] sm:$0x11] }
  0x3e   : > { %6594 = vmatpush2.bf16.msra.mxu0 %v9379_v56  ;;  %v9443_v40 = vld [vmem:[%s14454_s1 + $0x404] ss:$16 sps:$4 sm:$0xff]   ;;  %v11223_v41 = vcombine.high %v11207_v36, %v11210_v37  ;;  %v9441_v44 = vld [vmem:[%s14454_s1 + $0x400] ss:$16 sps:$4 sm:$0xff]  }
  0x3f   : > { %6637 = vmatpush2.bf16.msra.mxu1 %v9380_v57  ;;  %6595 = vmatprep.subr.bf16.mxu0 %v9381_v58  ;;  %v9446_v42 = vld [vmem:[%s14454_s1 + $0x604] ss:$16 sps:$4 sm:$0xff]   ;;  %v9444_v45 = vld [vmem:[%s14454_s1 + $0x600] ss:$16 sps:$4 sm:$0xff]  }
  0x40   : > { %6638 = vmatprep.subr.bf16.mxu1 %v9383_v59  ;;  %v9449_v46 = vld [vmem:[%s14454_s1 + $0x5e4] ss:$16 sps:$4 sm:$0xff]   ;;  %v9447_v48 = vld [vmem:[%s14454_s1 + $0x5e0] ss:$16 sps:$4 sm:$0xff]  }
  0x41   : > { %v9452_v47 = vld [vmem:[%s14454_s1 + $0x7e4] ss:$16 sps:$4 sm:$0xff]   ;;  %v9450_v49 = vld [vmem:[%s14454_s1 + $0x7e0] ss:$16 sps:$4 sm:$0xff]  }
  0x42   : > { %6596 = vmatpush2.bf16.msra.mxu0 %v9385_v60  ;;  %v9455_v50 = vld [vmem:[%s14454_s1 + $0x5c4] ss:$16 sps:$4 sm:$0xff]   ;;  %v9453_v52 = vld [vmem:[%s14454_s1 + $0x5c0] ss:$16 sps:$4 sm:$0xff]  }
  0x43   : > { %6639 = vmatpush2.bf16.msra.mxu1 %v9386_v61  ;;  %6597 = vmatprep.subr.bf16.mxu0 %v9387_v62  ;;  %v9458_v51 = vld [vmem:[%s14454_s1 + $0x7c4] ss:$16 sps:$4 sm:$0xff]   ;;  %v9456_v54 = vld [vmem:[%s14454_s1 + $0x7c0] ss:$16 sps:$4 sm:$0xff]  }
  0x44   : > { %6640 = vmatprep.subr.bf16.mxu1 %v9389_v63  ;;  %v9461_v56 = vld [vmem:[%s14454_s1 + $0x5a4] ss:$16 sps:$4 sm:$0xff]   ;;  %v9459_v58 = vld [vmem:[%s14454_s1 + $0x5a0] ss:$16 sps:$4 sm:$0xff]  }
  0x45   : > { %v9464_v57 = vld [vmem:[%s14454_s1 + $0x7a4] ss:$16 sps:$4 sm:$0xff]   ;;  %v9462_v59 = vld [vmem:[%s14454_s1 + $0x7a0] ss:$16 sps:$4 sm:$0xff]  }
  0x46   : > { %6598 = vmatpush2.bf16.msra.mxu0 %v9391_v0  ;;  %v9467_v60 = vld [vmem:[%s14454_s1 + $0x584] ss:$16 sps:$4 sm:$0xff]   ;;  %v9465_v62 = vld [vmem:[%s14454_s1 + $0x580] ss:$16 sps:$4 sm:$0xff]  }
  0x47   : > { %6641 = vmatpush2.bf16.msra.mxu1 %v9392_v1  ;;  %6599 = vmatprep.subr.bf16.mxu0 %v9393_v2  ;;  %v9470_v61 = vld [vmem:[%s14454_s1 + $0x784] ss:$16 sps:$4 sm:$0xff]   ;;  %v9468_v63 = vld [vmem:[%s14454_s1 + $0x780] ss:$16 sps:$4 sm:$0xff]  }
  0x48   : > { %6642 = vmatprep.subr.bf16.mxu1 %v9395_v3  ;;  %v9473_v0 = vld [vmem:[%s14454_s1 + $0x564] ss:$16 sps:$4 sm:$0xff]   ;;  %v9471_v2 = vld [vmem:[%s14454_s1 + $0x560] ss:$16 sps:$4 sm:$0xff]  }
  0x49   : > { %v9476_v1 = vld [vmem:[%s14454_s1 + $0x764] ss:$16 sps:$4 sm:$0xff]   ;;  %v9474_v3 = vld [vmem:[%s14454_s1 + $0x760] ss:$16 sps:$4 sm:$0xff]  }
  0x4a   : > { %6600 = vmatpush2.bf16.msra.mxu0 %v9397_v4  ;;  %v9479_v4 = vld [vmem:[%s14454_s1 + $0x544] ss:$16 sps:$4 sm:$0xff]  }
  0x4b   : > { %6643 = vmatpush2.bf16.msra.mxu1 %v9398_v5  ;;  %6655 = vmatprep.subr.bf16.mxu0 %v9401_v6  ;;  %v9482_v5 = vld [vmem:[%s14454_s1 + $0x744] ss:$16 sps:$4 sm:$0xff]   ;;  %v9477_v6 = vld [vmem:[%s14454_s1 + $0x540] ss:$16 sps:$4 sm:$0xff]  }
  0x4c   : > { %6698 = vmatprep.subr.bf16.mxu1 %v9404_v7  ;;  %v9480_v7 = vld [vmem:[%s14454_s1 + $0x740] ss:$16 sps:$4 sm:$0xff]  }
  0x4d   : > { %6602 = vmatmul.mubr.bf16.vlgmr.msra.gmra.mxu0 %v11122_v8 }
  0x4e   : > { %6645 = vmatmul.mubr.bf16.vlgmr.msra.gmra.mxu1 %v11124_v9  ;;  %6656 = vmatpush1.bf16.msra.mxu0 %v9399_v10  ;;  %v9485_v10 = vld [vmem:[%s14454_s1 + $0x524] ss:$16 sps:$4 sm:$0xff]  }
  0x4f   : > { %6699 = vmatpush1.bf16.msra.mxu1 %v9402_v11  ;;  %6657 = vmatprep.subr.bf16.mxu0 %v9407_v12  ;;  %v9488_v11 = vld [vmem:[%s14454_s1 + $0x724] ss:$16 sps:$4 sm:$0xff]   ;;  %v9483_v12 = vld [vmem:[%s14454_s1 + $0x520] ss:$16 sps:$4 sm:$0xff]  }
  0x50   : > { %6700 = vmatprep.subr.bf16.mxu1 %v9410_v13  ;;  %6687 = vmatprep.mubr.bf16.mxu0 %v11223_v41  ;;  %v9486_v13 = vld [vmem:[%s14454_s1 + $0x720] ss:$16 sps:$4 sm:$0xff]  }
  0x51   : > { %6730 = vmatprep.mubr.bf16.mxu1 %v11230_v43 }
  0x52   : > { %6658 = vmatpush1.bf16.msra.mxu0 %v9405_v14  ;;  %v9491_v14 = vld [vmem:[%s14454_s1 + $0x504] ss:$16 sps:$4 sm:$0xff]  }
  0x53   : > { %6701 = vmatpush1.bf16.msra.mxu1 %v9408_v15  ;;  %6659 = vmatprep.subr.bf16.mxu0 %v9413_v16  ;;  %v9494_v15 = vld [vmem:[%s14454_s1 + $0x704] ss:$16 sps:$4 sm:$0xff]   ;;  %v9489_v16 = vld [vmem:[%s14454_s1 + $0x500] ss:$16 sps:$4 sm:$0xff]  }
  0x54   : > { %6702 = vmatprep.subr.bf16.mxu1 %v9416_v17  ;;  %v9492_v17 = vld [vmem:[%s14454_s1 + $0x700] ss:$16 sps:$4 sm:$0xff]  }
  0x56   : > { %6660 = vmatpush1.bf16.msra.mxu0 %v9411_v18  ;;  %v9497_v18 = vld [vmem:[%s14454_s1 + $0x8e4] ss:$16 sps:$4 sm:$0xff]  }
  0x57   : > { %6703 = vmatpush1.bf16.msra.mxu1 %v9414_v19  ;;  %6661 = vmatprep.subr.bf16.mxu0 %v9419_v20  ;;  %v9500_v19 = vld [vmem:[%s14454_s1 + $0xae4] ss:$16 sps:$4 sm:$0xff]   ;;  %v11344_v20 = vcombine.low %v11207_v36, %v11210_v37  ;;  %v9507_v36 = vld [vmem:[%s14454_s1 + $0x8a0] ss:$16 sps:$4 sm:$0xff]  }
  0x58   : > { %6704 = vmatprep.subr.bf16.mxu1 %v9422_v21  ;;  %v11348_v21 = vcombine.low %v11213_v38, %v11216_v39  ;;  %v9510_v37 = vld [vmem:[%s14454_s1 + $0xaa0] ss:$16 sps:$4 sm:$0xff]   ;;  %v9515_v38 = vld [vmem:[%s14454_s1 + $0x884] ss:$16 sps:$4 sm:$0xff]  }
  0x59   : > { %v9518_v39 = vld [vmem:[%s14454_s1 + $0xa84] ss:$16 sps:$4 sm:$0xff]  }
  0x5a   : > { %6662 = vmatpush1.bf16.msra.mxu0 %v9417_v22  ;;  %v9495_v22 = vld [vmem:[%s14454_s1 + $0x8e0] ss:$16 sps:$4 sm:$0xff]  }
  0x5b   : > { %6705 = vmatpush1.bf16.msra.mxu1 %v9420_v23  ;;  %6663 = vmatprep.subr.bf16.mxu0 %v9425_v24  ;;  %v9498_v23 = vld [vmem:[%s14454_s1 + $0xae0] ss:$16 sps:$4 sm:$0xff]   ;;  %v9503_v24 = vld [vmem:[%s14454_s1 + $0x8c4] ss:$16 sps:$4 sm:$0xff]  }
  0x5c   : > { %6706 = vmatprep.subr.bf16.mxu1 %v9428_v25  ;;  %v9506_v25 = vld [vmem:[%s14454_s1 + $0xac4] ss:$16 sps:$4 sm:$0xff]  }
  0x5e   : > { %6664 = vmatpush1.bf16.msra.mxu0 %v9423_v26  ;;  %v9501_v26 = vld [vmem:[%s14454_s1 + $0x8c0] ss:$16 sps:$4 sm:$0xff]  }
  0x5f   : > { %6707 = vmatpush1.bf16.msra.mxu1 %v9426_v27  ;;  %6665 = vmatprep.subr.bf16.mxu0 %v9431_v28  ;;  %v9504_v27 = vld [vmem:[%s14454_s1 + $0xac0] ss:$16 sps:$4 sm:$0xff]  }
  0x60   : > { %6708 = vmatprep.subr.bf16.mxu1 %v9434_v29  ;;  %v11369_v28 = vld [vmem:[%s11044_s11 + $0x20] sm:$0xff] }
  0x61   : > { %v11374_v29 = vld [vmem:[%s11044_s11 + $0xa0] sm:$0x11] }
  0x62   : > { %6666 = vmatpush1.bf16.msra.mxu0 %v9429_v30  ;;  %v11377_v30 = vld [vmem:[%s11044_s11 + $0x28] sm:$0xff] }
  0x63   : > { %6709 = vmatpush1.bf16.msra.mxu1 %v9432_v31  ;;  %6667 = vmatprep.subr.bf16.mxu0 %v9437_v32  ;;  %v11380_v31 = vld [vmem:[%s11044_s11 + $0xa8] sm:$0x11]  ;;  %v9509_v32 = vld [vmem:[%s14454_s1 + $0x8a4] ss:$16 sps:$4 sm:$0xff]  }
  0x64   : > { %6710 = vmatprep.subr.bf16.mxu1 %v9440_v33  ;;  %v11387_v33 = vcombine.high %v11369_v28, %v11374_v29 }
  0x66   : > { %6668 = vmatpush1.bf16.msra.mxu0 %v9435_v34  ;;  %v9512_v34 = vld [vmem:[%s14454_s1 + $0xaa4] ss:$16 sps:$4 sm:$0xff]  }
  0x67   : > { %6711 = vmatpush1.bf16.msra.mxu1 %v9438_v35  ;;  %6669 = vmatprep.subr.bf16.mxu0 %v9443_v40  ;;  %v11394_v35 = vcombine.high %v11377_v30, %v11380_v31  ;;  %v9513_v40 = vld [vmem:[%s14454_s1 + $0x880] ss:$16 sps:$4 sm:$0xff]  }
  0x68   : > { %6712 = vmatprep.subr.bf16.mxu1 %v9446_v42  ;;  %v9516_v42 = vld [vmem:[%s14454_s1 + $0xa80] ss:$16 sps:$4 sm:$0xff]  }
  0x6a   : > { %6670 = vmatpush1.bf16.msra.mxu0 %v9441_v44  ;;  %v9521_v44 = vld [vmem:[%s14454_s1 + $0x864] ss:$16 sps:$4 sm:$0xff]  }
  0x6b   : > { %6713 = vmatpush1.bf16.msra.mxu1 %v9444_v45  ;;  %6671 = vmatprep.subr.bf16.mxu0 %v9449_v46  ;;  %v9524_v45 = vld [vmem:[%s14454_s1 + $0xa64] ss:$16 sps:$4 sm:$0xff]   ;;  %v9519_v46 = vld [vmem:[%s14454_s1 + $0x860] ss:$16 sps:$4 sm:$0xff]  }
  0x6c   : > { %6714 = vmatprep.subr.bf16.mxu1 %v9452_v47  ;;  %v9522_v47 = vld [vmem:[%s14454_s1 + $0xa60] ss:$16 sps:$4 sm:$0xff]  }
  0x6e   : > { %6672 = vmatpush2.bf16.msra.mxu0 %v9447_v48  ;;  %v9527_v48 = vld [vmem:[%s14454_s1 + $0x844] ss:$16 sps:$4 sm:$0xff]  }
  0x6f   : > { %6715 = vmatpush2.bf16.msra.mxu1 %v9450_v49  ;;  %6673 = vmatprep.subr.bf16.mxu0 %v9455_v50  ;;  %v9530_v49 = vld [vmem:[%s14454_s1 + $0xa44] ss:$16 sps:$4 sm:$0xff]   ;;  %v9525_v50 = vld [vmem:[%s14454_s1 + $0x840] ss:$16 sps:$4 sm:$0xff]  }
  0x70   : > { %6716 = vmatprep.subr.bf16.mxu1 %v9458_v51  ;;  %v9528_v51 = vld [vmem:[%s14454_s1 + $0xa40] ss:$16 sps:$4 sm:$0xff]  }
  0x72   : > { %6674 = vmatpush2.bf16.msra.mxu0 %v9453_v52  ;;  %v9533_v52 = vld [vmem:[%s14454_s1 + $0x824] ss:$16 sps:$4 sm:$0xff]  }
  0x73   : > { %6717 = vmatpush2.bf16.msra.mxu1 %v9456_v54  ;;  %6675 = vmatprep.subr.bf16.mxu0 %v9461_v56  ;;  %v9536_v54 = vld [vmem:[%s14454_s1 + $0xa24] ss:$16 sps:$4 sm:$0xff]   ;;  %v9531_v56 = vld [vmem:[%s14454_s1 + $0x820] ss:$16 sps:$4 sm:$0xff]  }
  0x74   : > { %6718 = vmatprep.subr.bf16.mxu1 %v9464_v57  ;;  %v9534_v57 = vld [vmem:[%s14454_s1 + $0xa20] ss:$16 sps:$4 sm:$0xff]  }
  0x76   : > { %6676 = vmatpush2.bf16.msra.mxu0 %v9459_v58  ;;  %v9539_v58 = vld [vmem:[%s14454_s1 + $0x804] ss:$16 sps:$4 sm:$0xff]  }
  0x77   : > { %6719 = vmatpush2.bf16.msra.mxu1 %v9462_v59  ;;  %6677 = vmatprep.subr.bf16.mxu0 %v9467_v60  ;;  %v9542_v59 = vld [vmem:[%s14454_s1 + $0xa04] ss:$16 sps:$4 sm:$0xff]   ;;  %v9537_v60 = vld [vmem:[%s14454_s1 + $0x800] ss:$16 sps:$4 sm:$0xff]  }
  0x78   : > { %6720 = vmatprep.subr.bf16.mxu1 %v9470_v61  ;;  %v9540_v61 = vld [vmem:[%s14454_s1 + $0xa00] ss:$16 sps:$4 sm:$0xff]  }
  0x7a   : > { %6678 = vmatpush2.bf16.msra.mxu0 %v9465_v62  ;;  %v9545_v62 = vld [vmem:[%s14454_s1 + $0x9e4] ss:$16 sps:$4 sm:$0xff]  }
  0x7b   : > { %6721 = vmatpush2.bf16.msra.mxu1 %v9468_v63  ;;  %6679 = vmatprep.subr.bf16.mxu0 %v9473_v0  ;;  %v9548_v63 = vld [vmem:[%s14454_s1 + $0xbe4] ss:$16 sps:$4 sm:$0xff]   ;;  %v9543_v0 = vld [vmem:[%s14454_s1 + $0x9e0] ss:$16 sps:$4 sm:$0xff]  }
  0x7c   : > { %6722 = vmatprep.subr.bf16.mxu1 %v9476_v1  ;;  %v9546_v1 = vld [vmem:[%s14454_s1 + $0xbe0] ss:$16 sps:$4 sm:$0xff]  }
  0x7e   : > { %6680 = vmatpush2.bf16.msra.mxu0 %v9471_v2  ;;  %v9551_v2 = vld [vmem:[%s14454_s1 + $0x9c4] ss:$16 sps:$4 sm:$0xff]  }
  0x7f   : > { %6723 = vmatpush2.bf16.msra.mxu1 %v9474_v3  ;;  %6681 = vmatprep.subr.bf16.mxu0 %v9479_v4  ;;  %v9554_v3 = vld [vmem:[%s14454_s1 + $0xbc4] ss:$16 sps:$4 sm:$0xff]   ;;  %v9549_v4 = vld [vmem:[%s14454_s1 + $0x9c0] ss:$16 sps:$4 sm:$0xff]  }
  0x80   : > { %6724 = vmatprep.subr.bf16.mxu1 %v9482_v5  ;;  %v9552_v5 = vld [vmem:[%s14454_s1 + $0xbc0] ss:$16 sps:$4 sm:$0xff]  }
  0x82   : > { %6682 = vmatpush2.bf16.msra.mxu0 %v9477_v6  ;;  %v9557_v6 = vld [vmem:[%s14454_s1 + $0x9a4] ss:$16 sps:$4 sm:$0xff]  }
  0x83   : > { %6725 = vmatpush2.bf16.msra.mxu1 %v9480_v7  ;;  %6683 = vmatprep.subr.bf16.mxu0 %v9485_v10  ;;  %v9560_v7 = vld [vmem:[%s14454_s1 + $0xba4] ss:$16 sps:$4 sm:$0xff]   ;;  %v9555_v10 = vld [vmem:[%s14454_s1 + $0x9a0] ss:$16 sps:$4 sm:$0xff]  }
  0x84   : > { %6726 = vmatprep.subr.bf16.mxu1 %v9488_v11  ;;  %v9558_v11 = vld [vmem:[%s14454_s1 + $0xba0] ss:$16 sps:$4 sm:$0xff]  }
  0x86   : > { %6684 = vmatpush2.bf16.msra.mxu0 %v9483_v12  ;;  %v9563_v12 = vld [vmem:[%s14454_s1 + $0x984] ss:$16 sps:$4 sm:$0xff]  }
  0x87   : > { %6727 = vmatpush2.bf16.msra.mxu1 %v9486_v13  ;;  %6685 = vmatprep.subr.bf16.mxu0 %v9491_v14  ;;  %v9566_v13 = vld [vmem:[%s14454_s1 + $0xb84] ss:$16 sps:$4 sm:$0xff]   ;;  %v9561_v14 = vld [vmem:[%s14454_s1 + $0x980] ss:$16 sps:$4 sm:$0xff]  }
  0x88   : > { %6728 = vmatprep.subr.bf16.mxu1 %v9494_v15  ;;  %v9564_v15 = vld [vmem:[%s14454_s1 + $0xb80] ss:$16 sps:$4 sm:$0xff]  }
  0x8a   : > { %6686 = vmatpush2.bf16.msra.mxu0 %v9489_v16  ;;  %v9569_v16 = vld [vmem:[%s14454_s1 + $0x964] ss:$16 sps:$4 sm:$0xff]  }
  0x8b   : > { %6729 = vmatpush2.bf16.msra.mxu1 %v9492_v17  ;;  %6741 = vmatprep.subr.bf16.mxu0 %v9497_v18  ;;  %v9572_v17 = vld [vmem:[%s14454_s1 + $0xb64] ss:$16 sps:$4 sm:$0xff]   ;;  %v9567_v18 = vld [vmem:[%s14454_s1 + $0x960] ss:$16 sps:$4 sm:$0xff]  }
  0x8c   : > { %6784 = vmatprep.subr.bf16.mxu1 %v9500_v19  ;;  %v9570_v19 = vld [vmem:[%s14454_s1 + $0xb60] ss:$16 sps:$4 sm:$0xff]  }
  0x8d   : > { %6688 = vmatmul.mubr.bf16.vlgmr.msra.gmra.mxu0 %v11344_v20 }
  0x8e   : > { %6731 = vmatmul.mubr.bf16.vlgmr.msra.gmra.mxu1 %v11348_v21  ;;  %6742 = vmatpush1.bf16.msra.mxu0 %v9495_v22  ;;  %v9575_v22 = vld [vmem:[%s14454_s1 + $0x944] ss:$16 sps:$4 sm:$0xff]  }
  0x8f   : > { %6785 = vmatpush1.bf16.msra.mxu1 %v9498_v23  ;;  %6743 = vmatprep.subr.bf16.mxu0 %v9503_v24  ;;  %v9578_v23 = vld [vmem:[%s14454_s1 + $0xb44] ss:$16 sps:$4 sm:$0xff]   ;;  %v9573_v24 = vld [vmem:[%s14454_s1 + $0x940] ss:$16 sps:$4 sm:$0xff]  }
  0x90   : > { %6786 = vmatprep.subr.bf16.mxu1 %v9506_v25  ;;  %6773 = vmatprep.mubr.bf16.mxu0 %v11387_v33  ;;  %v9576_v25 = vld [vmem:[%s14454_s1 + $0xb40] ss:$16 sps:$4 sm:$0xff]  }
  0x91   : > { %6816 = vmatprep.mubr.bf16.mxu1 %v11394_v35 }
  0x92   : > { %6744 = vmatpush1.bf16.msra.mxu0 %v9501_v26  ;;  %v9581_v26 = vld [vmem:[%s14454_s1 + $0x924] ss:$16 sps:$4 sm:$0xff]  }
  0x93   : > { %6787 = vmatpush1.bf16.msra.mxu1 %v9504_v27  ;;  %6745 = vmatprep.subr.bf16.mxu0 %v9509_v32  ;;  %v9584_v27 = vld [vmem:[%s14454_s1 + $0xb24] ss:$16 sps:$4 sm:$0xff]   ;;  %v9579_v32 = vld [vmem:[%s14454_s1 + $0x920] ss:$16 sps:$4 sm:$0xff]  }
  0x94   : > { %6788 = vmatprep.subr.bf16.mxu1 %v9512_v34  ;;  %v9582_v34 = vld [vmem:[%s14454_s1 + $0xb20] ss:$16 sps:$4 sm:$0xff]  }
  0x96   : > { %6746 = vmatpush1.bf16.msra.mxu0 %v9507_v36  ;;  %v9587_v36 = vld [vmem:[%s14454_s1 + $0x904] ss:$16 sps:$4 sm:$0xff]  }
  0x97   : > { %6789 = vmatpush1.bf16.msra.mxu1 %v9510_v37  ;;  %6747 = vmatprep.subr.bf16.mxu0 %v9515_v38  ;;  %v9590_v37 = vld [vmem:[%s14454_s1 + $0xb04] ss:$16 sps:$4 sm:$0xff]   ;;  %v9585_v38 = vld [vmem:[%s14454_s1 + $0x900] ss:$16 sps:$4 sm:$0xff]  }
  0x98   : > { %6790 = vmatprep.subr.bf16.mxu1 %v9518_v39  ;;  %v9588_v39 = vld [vmem:[%s14454_s1 + $0xb00] ss:$16 sps:$4 sm:$0xff]  }
  0x9a   : > { %6748 = vmatpush1.bf16.msra.mxu0 %v9513_v40  ;;  %v9593_v40 = vld [vmem:[%s14454_s1 + $0xce4] ss:$16 sps:$4 sm:$0xff]  }
  0x9b   : > { %6791 = vmatpush1.bf16.msra.mxu1 %v9516_v42  ;;  %6749 = vmatprep.subr.bf16.mxu0 %v9521_v44  ;;  %v9596_v42 = vld [vmem:[%s14454_s1 + $0xee4] ss:$16 sps:$4 sm:$0xff]   ;;  %v9591_v44 = vld [vmem:[%s14454_s1 + $0xce0] ss:$16 sps:$4 sm:$0xff]  }
  0x9c   : > { %6792 = vmatprep.subr.bf16.mxu1 %v9524_v45  ;;  %v9594_v45 = vld [vmem:[%s14454_s1 + $0xee0] ss:$16 sps:$4 sm:$0xff]  }
  0x9e   : > { %6750 = vmatpush1.bf16.msra.mxu0 %v9519_v46  ;;  %v11573_v46 = vld [vmem:[%s11044_s11 + $0x30] sm:$0xff] }
  0x9f   : > { %6793 = vmatpush1.bf16.msra.mxu1 %v9522_v47  ;;  %6751 = vmatprep.subr.bf16.mxu0 %v9527_v48  ;;  %v11576_v47 = vld [vmem:[%s11044_s11 + $0xb0] sm:$0x11]  ;;  %v11580_v48 = vcombine.low %v11369_v28, %v11374_v29 }
  0xa0   : > { %6794 = vmatprep.subr.bf16.mxu1 %v9530_v49  ;;  %v11584_v49 = vcombine.low %v11377_v30, %v11380_v31  ;;  %v9602_v28 = vld [vmem:[%s14454_s1 + $0xec4] ss:$16 sps:$4 sm:$0xff]   ;;  %v11600_v29 = vcombine.high %v11573_v46, %v11576_v47  ;;  %v9597_v31 = vld [vmem:[%s14454_s1 + $0xcc0] ss:$16 sps:$4 sm:$0xff]  }
  0xa2   : > { %6752 = vmatpush1.bf16.msra.mxu0 %v9525_v50  ;;  %v11587_v50 = vld [vmem:[%s11044_s11 + $0x38] sm:$0xff] }
  0xa3   : > { %6795 = vmatpush1.bf16.msra.mxu1 %v9528_v51  ;;  %6753 = vmatprep.subr.bf16.mxu0 %v9533_v52  ;;  %v11590_v51 = vld [vmem:[%s11044_s11 + $0xb8] sm:$0x11]  ;;  %v9599_v52 = vld [vmem:[%s14454_s1 + $0xcc4] ss:$16 sps:$4 sm:$0xff]  }
  0xa4   : > { %6796 = vmatprep.subr.bf16.mxu1 %v9536_v54  ;;  %v11604_v30 = vcombine.high %v11587_v50, %v11590_v51  ;;  %v9600_v54 = vld [vmem:[%s14454_s1 + $0xec0] ss:$16 sps:$4 sm:$0xff]  }
  0xa6   : > { %6754 = vmatpush1.bf16.msra.mxu0 %v9531_v56  ;;  %v9605_v56 = vld [vmem:[%s14454_s1 + $0xca4] ss:$16 sps:$4 sm:$0xff]  }
  0xa7   : > { %6797 = vmatpush1.bf16.msra.mxu1 %v9534_v57  ;;  %6755 = vmatprep.subr.bf16.mxu0 %v9539_v58  ;;  %v9608_v57 = vld [vmem:[%s14454_s1 + $0xea4] ss:$16 sps:$4 sm:$0xff]   ;;  %v9603_v58 = vld [vmem:[%s14454_s1 + $0xca0] ss:$16 sps:$4 sm:$0xff]  }
  0xa8   : > { %6798 = vmatprep.subr.bf16.mxu1 %v9542_v59  ;;  %v9606_v59 = vld [vmem:[%s14454_s1 + $0xea0] ss:$16 sps:$4 sm:$0xff]  }
  0xaa   : > { %6756 = vmatpush1.bf16.msra.mxu0 %v9537_v60  ;;  %v9611_v60 = vld [vmem:[%s14454_s1 + $0xc84] ss:$16 sps:$4 sm:$0xff]  }
  0xab   : > { %6799 = vmatpush1.bf16.msra.mxu1 %v9540_v61  ;;  %6757 = vmatprep.subr.bf16.mxu0 %v9545_v62  ;;  %v9614_v61 = vld [vmem:[%s14454_s1 + $0xe84] ss:$16 sps:$4 sm:$0xff]   ;;  %v9609_v62 = vld [vmem:[%s14454_s1 + $0xc80] ss:$16 sps:$4 sm:$0xff]  }
  0xac   : > { %6800 = vmatprep.subr.bf16.mxu1 %v9548_v63  ;;  %v9612_v63 = vld [vmem:[%s14454_s1 + $0xe80] ss:$16 sps:$4 sm:$0xff]  }
  0xae   : > { %6758 = vmatpush2.bf16.msra.mxu0 %v9543_v0  ;;  %v9617_v0 = vld [vmem:[%s14454_s1 + $0xc64] ss:$16 sps:$4 sm:$0xff]  }
  0xaf   : > { %6801 = vmatpush2.bf16.msra.mxu1 %v9546_v1  ;;  %6759 = vmatprep.subr.bf16.mxu0 %v9551_v2  ;;  %v9620_v1 = vld [vmem:[%s14454_s1 + $0xe64] ss:$16 sps:$4 sm:$0xff]   ;;  %v9615_v2 = vld [vmem:[%s14454_s1 + $0xc60] ss:$16 sps:$4 sm:$0xff]  }
  0xb0   : > { %6802 = vmatprep.subr.bf16.mxu1 %v9554_v3  ;;  %v9618_v3 = vld [vmem:[%s14454_s1 + $0xe60] ss:$16 sps:$4 sm:$0xff]  }
  0xb2   : > { %6760 = vmatpush2.bf16.msra.mxu0 %v9549_v4  ;;  %v9623_v4 = vld [vmem:[%s14454_s1 + $0xc44] ss:$16 sps:$4 sm:$0xff]  }
  0xb3   : > { %6803 = vmatpush2.bf16.msra.mxu1 %v9552_v5  ;;  %6761 = vmatprep.subr.bf16.mxu0 %v9557_v6  ;;  %v9626_v5 = vld [vmem:[%s14454_s1 + $0xe44] ss:$16 sps:$4 sm:$0xff]   ;;  %v9621_v6 = vld [vmem:[%s14454_s1 + $0xc40] ss:$16 sps:$4 sm:$0xff]  }
  0xb4   : > { %6804 = vmatprep.subr.bf16.mxu1 %v9560_v7  ;;  %v9624_v7 = vld [vmem:[%s14454_s1 + $0xe40] ss:$16 sps:$4 sm:$0xff]  }
  0xb6   : > { %6762 = vmatpush2.bf16.msra.mxu0 %v9555_v10  ;;  %v9629_v10 = vld [vmem:[%s14454_s1 + $0xc24] ss:$16 sps:$4 sm:$0xff]  }
  0xb7   : > { %6805 = vmatpush2.bf16.msra.mxu1 %v9558_v11  ;;  %6763 = vmatprep.subr.bf16.mxu0 %v9563_v12  ;;  %v9632_v11 = vld [vmem:[%s14454_s1 + $0xe24] ss:$16 sps:$4 sm:$0xff]   ;;  %v9627_v12 = vld [vmem:[%s14454_s1 + $0xc20] ss:$16 sps:$4 sm:$0xff]  }
  0xb8   : > { %6806 = vmatprep.subr.bf16.mxu1 %v9566_v13  ;;  %v9630_v13 = vld [vmem:[%s14454_s1 + $0xe20] ss:$16 sps:$4 sm:$0xff]  }
  0xba   : > { %6764 = vmatpush2.bf16.msra.mxu0 %v9561_v14  ;;  %v9635_v14 = vld [vmem:[%s14454_s1 + $0xc04] ss:$16 sps:$4 sm:$0xff]  }
  0xbb   : > { %6807 = vmatpush2.bf16.msra.mxu1 %v9564_v15  ;;  %6765 = vmatprep.subr.bf16.mxu0 %v9569_v16  ;;  %v9638_v15 = vld [vmem:[%s14454_s1 + $0xe04] ss:$16 sps:$4 sm:$0xff]   ;;  %v9633_v16 = vld [vmem:[%s14454_s1 + $0xc00] ss:$16 sps:$4 sm:$0xff]  }
  0xbc   : > { %6808 = vmatprep.subr.bf16.mxu1 %v9572_v17  ;;  %v9636_v17 = vld [vmem:[%s14454_s1 + $0xe00] ss:$16 sps:$4 sm:$0xff]  }
  0xbe   : > { %6766 = vmatpush2.bf16.msra.mxu0 %v9567_v18  ;;  %v9641_v18 = vld [vmem:[%s14454_s1 + $0xde4] ss:$16 sps:$4 sm:$0xff]  }
  0xbf   : > { %6809 = vmatpush2.bf16.msra.mxu1 %v9570_v19  ;;  %6767 = vmatprep.subr.bf16.mxu0 %v9575_v22  ;;  %v9644_v19 = vld [vmem:[%s14454_s1 + $0xfe4] ss:$16 sps:$4 sm:$0xff]   ;;  %v9639_v22 = vld [vmem:[%s14454_s1 + $0xde0] ss:$16 sps:$4 sm:$0xff]  }
  0xc0   : > { %6810 = vmatprep.subr.bf16.mxu1 %v9578_v23  ;;  %v9642_v23 = vld [vmem:[%s14454_s1 + $0xfe0] ss:$16 sps:$4 sm:$0xff]  }
  0xc2   : > { %6768 = vmatpush2.bf16.msra.mxu0 %v9573_v24  ;;  %v9647_v24 = vld [vmem:[%s14454_s1 + $0xdc4] ss:$16 sps:$4 sm:$0xff]  }
  0xc3   : > { %6811 = vmatpush2.bf16.msra.mxu1 %v9576_v25  ;;  %6769 = vmatprep.subr.bf16.mxu0 %v9581_v26  ;;  %v9650_v25 = vld [vmem:[%s14454_s1 + $0xfc4] ss:$16 sps:$4 sm:$0xff]   ;;  %v9645_v26 = vld [vmem:[%s14454_s1 + $0xdc0] ss:$16 sps:$4 sm:$0xff]  }
  0xc4   : > { %6812 = vmatprep.subr.bf16.mxu1 %v9584_v27  ;;  %v9648_v27 = vld [vmem:[%s14454_s1 + $0xfc0] ss:$16 sps:$4 sm:$0xff]  }
  0xc6   : > { %6770 = vmatpush2.bf16.msra.mxu0 %v9579_v32  ;;  %v9653_v32 = vld [vmem:[%s14454_s1 + $0xda4] ss:$16 sps:$4 sm:$0xff]  }
  0xc7   : > { %6813 = vmatpush2.bf16.msra.mxu1 %v9582_v34  ;;  %6771 = vmatprep.subr.bf16.mxu0 %v9587_v36  ;;  %v9656_v34 = vld [vmem:[%s14454_s1 + $0xfa4] ss:$16 sps:$4 sm:$0xff]   ;;  %v9651_v36 = vld [vmem:[%s14454_s1 + $0xda0] ss:$16 sps:$4 sm:$0xff]  }
  0xc8   : > { %6814 = vmatprep.subr.bf16.mxu1 %v9590_v37  ;;  %v9654_v37 = vld [vmem:[%s14454_s1 + $0xfa0] ss:$16 sps:$4 sm:$0xff]  }
  0xca   : > { %6772 = vmatpush2.bf16.msra.mxu0 %v9585_v38  ;;  %v9659_v38 = vld [vmem:[%s14454_s1 + $0xd84] ss:$16 sps:$4 sm:$0xff]  }
  0xcb   : > { %6815 = vmatpush2.bf16.msra.mxu1 %v9588_v39  ;;  %6827 = vmatprep.subr.bf16.mxu0 %v9593_v40  ;;  %v9662_v39 = vld [vmem:[%s14454_s1 + $0xf84] ss:$16 sps:$4 sm:$0xff]   ;;  %v9657_v40 = vld [vmem:[%s14454_s1 + $0xd80] ss:$16 sps:$4 sm:$0xff]  }
  0xcc   : > { %6870 = vmatprep.subr.bf16.mxu1 %v9596_v42  ;;  %v9660_v42 = vld [vmem:[%s14454_s1 + $0xf80] ss:$16 sps:$4 sm:$0xff]  }
  0xcd   : > { %6774 = vmatmul.mubr.bf16.vlgmr.msra.gmra.mxu0 %v11580_v48 }
  0xce   : > { %6817 = vmatmul.mubr.bf16.vlgmr.msra.gmra.mxu1 %v11584_v49  ;;  %6828 = vmatpush1.bf16.msra.mxu0 %v9591_v44  ;;  %v9665_v44 = vld [vmem:[%s14454_s1 + $0xd64] ss:$16 sps:$4 sm:$0xff]  }
  0xcf   : > { %6871 = vmatpush1.bf16.msra.mxu1 %v9594_v45  ;;  %6829 = vmatprep.subr.bf16.mxu0 %v9599_v52  ;;  %v9668_v45 = vld [vmem:[%s14454_s1 + $0xf64] ss:$16 sps:$4 sm:$0xff]   ;;  %v9663_v52 = vld [vmem:[%s14454_s1 + $0xd60] ss:$16 sps:$4 sm:$0xff]  }
  0xd0   : > { %6872 = vmatprep.subr.bf16.mxu1 %v9602_v28  ;;  %6859 = vmatprep.mubr.bf16.mxu0 %v11600_v29  ;;  %v9666_v28 = vld [vmem:[%s14454_s1 + $0xf60] ss:$16 sps:$4 sm:$0xff]  }
  0xd1   : > { %6902 = vmatprep.mubr.bf16.mxu1 %v11604_v30 }
  0xd2   : > { %6830 = vmatpush1.bf16.msra.mxu0 %v9597_v31  ;;  %v9671_v31 = vld [vmem:[%s14454_s1 + $0xd44] ss:$16 sps:$4 sm:$0xff]  }
  0xd3   : > { %6873 = vmatpush1.bf16.msra.mxu1 %v9600_v54  ;;  %6831 = vmatprep.subr.bf16.mxu0 %v9605_v56  ;;  %v9674_v54 = vld [vmem:[%s14454_s1 + $0xf44] ss:$16 sps:$4 sm:$0xff]   ;;  %v9669_v56 = vld [vmem:[%s14454_s1 + $0xd40] ss:$16 sps:$4 sm:$0xff]  }
  0xd4   : > { %6874 = vmatprep.subr.bf16.mxu1 %v9608_v57  ;;  %v9672_v57 = vld [vmem:[%s14454_s1 + $0xf40] ss:$16 sps:$4 sm:$0xff]  }
  0xd6   : > { %6832 = vmatpush1.bf16.msra.mxu0 %v9603_v58  ;;  %v9677_v58 = vld [vmem:[%s14454_s1 + $0xd24] ss:$16 sps:$4 sm:$0xff]  }
  0xd7   : > { %6875 = vmatpush1.bf16.msra.mxu1 %v9606_v59  ;;  %6833 = vmatprep.subr.bf16.mxu0 %v9611_v60  ;;  %v9680_v59 = vld [vmem:[%s14454_s1 + $0xf24] ss:$16 sps:$4 sm:$0xff]   ;;  %v9675_v60 = vld [vmem:[%s14454_s1 + $0xd20] ss:$16 sps:$4 sm:$0xff]  }
  0xd8   : > { %6876 = vmatprep.subr.bf16.mxu1 %v9614_v61  ;;  %v9678_v61 = vld [vmem:[%s14454_s1 + $0xf20] ss:$16 sps:$4 sm:$0xff]  }
  0xda   : > { %6834 = vmatpush1.bf16.msra.mxu0 %v9609_v62  ;;  %v9683_v62 = vld [vmem:[%s14454_s1 + $0xd04] ss:$16 sps:$4 sm:$0xff]  }
  0xdb   : > { %6877 = vmatpush1.bf16.msra.mxu1 %v9612_v63  ;;  %6835 = vmatprep.subr.bf16.mxu0 %v9617_v0  ;;  %v9686_v63 = vld [vmem:[%s14454_s1 + $0xf04] ss:$16 sps:$4 sm:$0xff]   ;;  %v9681_v0 = vld [vmem:[%s14454_s1 + $0xd00] ss:$16 sps:$4 sm:$0xff]  }
  0xdc   : > { %6878 = vmatprep.subr.bf16.mxu1 %v9620_v1  ;;  %v9684_v1 = vld [vmem:[%s14454_s1 + $0xf00] ss:$16 sps:$4 sm:$0xff]  }
  0xde   : > { %6836 = vmatpush1.bf16.msra.mxu0 %v9615_v2  ;;  %v9689_v2 = vld [vmem:[%s14454_s1 + $0x10e4] ss:$16 sps:$4 sm:$0xff]  }
  0xdf   : > { %6879 = vmatpush1.bf16.msra.mxu1 %v9618_v3  ;;  %6837 = vmatprep.subr.bf16.mxu0 %v9623_v4  ;;  %v9692_v3 = vld [vmem:[%s14454_s1 + $0x12e4] ss:$16 sps:$4 sm:$0xff]   ;;  %v9687_v4 = vld [vmem:[%s14454_s1 + $0x10e0] ss:$16 sps:$4 sm:$0xff]  }
  0xe0   : > { %6880 = vmatprep.subr.bf16.mxu1 %v9626_v5  ;;  %v9690_v5 = vld [vmem:[%s14454_s1 + $0x12e0] ss:$16 sps:$4 sm:$0xff]  }
  0xe2   : > { %6838 = vmatpush1.bf16.msra.mxu0 %v9621_v6  ;;  %v11797_v6 = vld [vmem:[%s11044_s11 + $0x40] sm:$0xff] }
  0xe3   : > { %6881 = vmatpush1.bf16.msra.mxu1 %v9624_v7  ;;  %6839 = vmatprep.subr.bf16.mxu0 %v9629_v10  ;;  %v11800_v7 = vld [vmem:[%s11044_s11 + $0xc0] sm:$0x11]  ;;  %v11804_v10 = vcombine.low %v11573_v46, %v11576_v47 }
  0xe4   : > { %6882 = vmatprep.subr.bf16.mxu1 %v9632_v11  ;;  %v11808_v11 = vcombine.low %v11587_v50, %v11590_v51  ;;  %v9698_v46 = vld [vmem:[%s14454_s1 + $0x12c4] ss:$16 sps:$4 sm:$0xff]   ;;  %v11824_v47 = vcombine.high %v11797_v6, %v11800_v7  ;;  %v9693_v51 = vld [vmem:[%s14454_s1 + $0x10c0] ss:$16 sps:$4 sm:$0xff]  }
  0xe6   : > { %6840 = vmatpush1.bf16.msra.mxu0 %v9627_v12  ;;  %v11811_v12 = vld [vmem:[%s11044_s11 + $0x48] sm:$0xff] }
  0xe7   : > { %6883 = vmatpush1.bf16.msra.mxu1 %v9630_v13  ;;  %6841 = vmatprep.subr.bf16.mxu0 %v9635_v14  ;;  %v11814_v13 = vld [vmem:[%s11044_s11 + $0xc8] sm:$0x11]  ;;  %v9695_v14 = vld [vmem:[%s14454_s1 + $0x10c4] ss:$16 sps:$4 sm:$0xff]  }
  0xe8   : > { %6884 = vmatprep.subr.bf16.mxu1 %v9638_v15  ;;  %v11828_v50 = vcombine.high %v11811_v12, %v11814_v13  ;;  %v9696_v15 = vld [vmem:[%s14454_s1 + $0x12c0] ss:$16 sps:$4 sm:$0xff]  }
  0xea   : > { %6842 = vmatpush1.bf16.msra.mxu0 %v9633_v16  ;;  %v9701_v16 = vld [vmem:[%s14454_s1 + $0x10a4] ss:$16 sps:$4 sm:$0xff]  }
  0xeb   : > { %6885 = vmatpush1.bf16.msra.mxu1 %v9636_v17  ;;  %6843 = vmatprep.subr.bf16.mxu0 %v9641_v18  ;;  %v9704_v17 = vld [vmem:[%s14454_s1 + $0x12a4] ss:$16 sps:$4 sm:$0xff]   ;;  %v9699_v18 = vld [vmem:[%s14454_s1 + $0x10a0] ss:$16 sps:$4 sm:$0xff]  }
  0xec   : > { %6886 = vmatprep.subr.bf16.mxu1 %v9644_v19  ;;  %v9702_v19 = vld [vmem:[%s14454_s1 + $0x12a0] ss:$16 sps:$4 sm:$0xff]  }
  0xee   : > { %6844 = vmatpush2.bf16.msra.mxu0 %v9639_v22  ;;  %v9707_v22 = vld [vmem:[%s14454_s1 + $0x1084] ss:$16 sps:$4 sm:$0xff]  }
  0xef   : > { %6887 = vmatpush2.bf16.msra.mxu1 %v9642_v23  ;;  %6845 = vmatprep.subr.bf16.mxu0 %v9647_v24  ;;  %v9710_v23 = vld [vmem:[%s14454_s1 + $0x1284] ss:$16 sps:$4 sm:$0xff]   ;;  %v9705_v24 = vld [vmem:[%s14454_s1 + $0x1080] ss:$16 sps:$4 sm:$0xff]  }
  0xf0   : > { %6888 = vmatprep.subr.bf16.mxu1 %v9650_v25  ;;  %v9708_v25 = vld [vmem:[%s14454_s1 + $0x1280] ss:$16 sps:$4 sm:$0xff]  }
  0xf2   : > { %6846 = vmatpush2.bf16.msra.mxu0 %v9645_v26  ;;  %v9713_v26 = vld [vmem:[%s14454_s1 + $0x1064] ss:$16 sps:$4 sm:$0xff]  }
  0xf3   : > { %6889 = vmatpush2.bf16.msra.mxu1 %v9648_v27  ;;  %6847 = vmatprep.subr.bf16.mxu0 %v9653_v32  ;;  %v9716_v27 = vld [vmem:[%s14454_s1 + $0x1264] ss:$16 sps:$4 sm:$0xff]   ;;  %v9711_v32 = vld [vmem:[%s14454_s1 + $0x1060] ss:$16 sps:$4 sm:$0xff]  }
  0xf4   : > { %6890 = vmatprep.subr.bf16.mxu1 %v9656_v34  ;;  %v9714_v34 = vld [vmem:[%s14454_s1 + $0x1260] ss:$16 sps:$4 sm:$0xff]  }
  0xf6   : > { %6848 = vmatpush2.bf16.msra.mxu0 %v9651_v36  ;;  %v9719_v36 = vld [vmem:[%s14454_s1 + $0x1044] ss:$16 sps:$4 sm:$0xff]  }
  0xf7   : > { %6891 = vmatpush2.bf16.msra.mxu1 %v9654_v37  ;;  %6849 = vmatprep.subr.bf16.mxu0 %v9659_v38  ;;  %v9722_v37 = vld [vmem:[%s14454_s1 + $0x1244] ss:$16 sps:$4 sm:$0xff]   ;;  %v9717_v38 = vld [vmem:[%s14454_s1 + $0x1040] ss:$16 sps:$4 sm:$0xff]  }
  0xf8   : > { %6892 = vmatprep.subr.bf16.mxu1 %v9662_v39  ;;  %v9720_v39 = vld [vmem:[%s14454_s1 + $0x1240] ss:$16 sps:$4 sm:$0xff]  }
  0xfa   : > { %6850 = vmatpush2.bf16.msra.mxu0 %v9657_v40  ;;  %v9725_v40 = vld [vmem:[%s14454_s1 + $0x1024] ss:$16 sps:$4 sm:$0xff]  }
  0xfb   : > { %6893 = vmatpush2.bf16.msra.mxu1 %v9660_v42  ;;  %6851 = vmatprep.subr.bf16.mxu0 %v9665_v44  ;;  %v9728_v42 = vld [vmem:[%s14454_s1 + $0x1224] ss:$16 sps:$4 sm:$0xff]   ;;  %v9723_v44 = vld [vmem:[%s14454_s1 + $0x1020] ss:$16 sps:$4 sm:$0xff]  }
  0xfc   : > { %6894 = vmatprep.subr.bf16.mxu1 %v9668_v45  ;;  %v9726_v45 = vld [vmem:[%s14454_s1 + $0x1220] ss:$16 sps:$4 sm:$0xff]  }
  0xfe   : > { %6852 = vmatpush2.bf16.msra.mxu0 %v9663_v52  ;;  %v9731_v52 = vld [vmem:[%s14454_s1 + $0x1004] ss:$16 sps:$4 sm:$0xff]  }
  0xff   : > { %6895 = vmatpush2.bf16.msra.mxu1 %v9666_v28  ;;  %6853 = vmatprep.subr.bf16.mxu0 %v9671_v31  ;;  %v9734_v28 = vld [vmem:[%s14454_s1 + $0x1204] ss:$16 sps:$4 sm:$0xff]   ;;  %v9729_v31 = vld [vmem:[%s14454_s1 + $0x1000] ss:$16 sps:$4 sm:$0xff]  }
 0x100   : > { %6896 = vmatprep.subr.bf16.mxu1 %v9674_v54  ;;  %v9732_v54 = vld [vmem:[%s14454_s1 + $0x1200] ss:$16 sps:$4 sm:$0xff]  }
 0x102   : > { %6854 = vmatpush2.bf16.msra.mxu0 %v9669_v56  ;;  %v9737_v56 = vld [vmem:[%s14454_s1 + $0x11e4] ss:$16 sps:$4 sm:$0xff]  }
 0x103   : > { %6897 = vmatpush2.bf16.msra.mxu1 %v9672_v57  ;;  %6855 = vmatprep.subr.bf16.mxu0 %v9677_v58  ;;  %v9740_v57 = vld [vmem:[%s14454_s1 + $0x13e4] ss:$16 sps:$4 sm:$0xff]   ;;  %v9735_v58 = vld [vmem:[%s14454_s1 + $0x11e0] ss:$16 sps:$4 sm:$0xff]  }
 0x104   : > { %6898 = vmatprep.subr.bf16.mxu1 %v9680_v59  ;;  %v9738_v59 = vld [vmem:[%s14454_s1 + $0x13e0] ss:$16 sps:$4 sm:$0xff]  }
 0x106   : > { %6856 = vmatpush2.bf16.msra.mxu0 %v9675_v60  ;;  %v9743_v60 = vld [vmem:[%s14454_s1 + $0x11c4] ss:$16 sps:$4 sm:$0xff]  }
 0x107   : > { %6899 = vmatpush2.bf16.msra.mxu1 %v9678_v61  ;;  %6857 = vmatprep.subr.bf16.mxu0 %v9683_v62  ;;  %v9746_v61 = vld [vmem:[%s14454_s1 + $0x13c4] ss:$16 sps:$4 sm:$0xff]   ;;  %v9741_v62 = vld [vmem:[%s14454_s1 + $0x11c0] ss:$16 sps:$4 sm:$0xff]  }
 0x108   : > { %6900 = vmatprep.subr.bf16.mxu1 %v9686_v63  ;;  %v9744_v63 = vld [vmem:[%s14454_s1 + $0x13c0] ss:$16 sps:$4 sm:$0xff]  }
 0x10a   : > { %6858 = vmatpush2.bf16.msra.mxu0 %v9681_v0  ;;  %v9749_v0 = vld [vmem:[%s14454_s1 + $0x11a4] ss:$16 sps:$4 sm:$0xff]  }
 0x10b   : > { %6901 = vmatpush2.bf16.msra.mxu1 %v9684_v1  ;;  %6913 = vmatprep.subr.bf16.mxu0 %v9689_v2  ;;  %v9752_v1 = vld [vmem:[%s14454_s1 + $0x13a4] ss:$16 sps:$4 sm:$0xff]   ;;  %v9747_v2 = vld [vmem:[%s14454_s1 + $0x11a0] ss:$16 sps:$4 sm:$0xff]  }
 0x10c   : > { %6956 = vmatprep.subr.bf16.mxu1 %v9692_v3  ;;  %v9750_v3 = vld [vmem:[%s14454_s1 + $0x13a0] ss:$16 sps:$4 sm:$0xff]  }
 0x10d   : > { %6860 = vmatmul.mubr.bf16.vlgmr.msra.gmra.mxu0 %v11804_v10 }
 0x10e   : > { %6903 = vmatmul.mubr.bf16.vlgmr.msra.gmra.mxu1 %v11808_v11  ;;  %6914 = vmatpush1.bf16.msra.mxu0 %v9687_v4  ;;  %v9755_v4 = vld [vmem:[%s14454_s1 + $0x1184] ss:$16 sps:$4 sm:$0xff]  }
 0x10f   : > { %6957 = vmatpush1.bf16.msra.mxu1 %v9690_v5  ;;  %6915 = vmatprep.subr.bf16.mxu0 %v9695_v14  ;;  %v9758_v5 = vld [vmem:[%s14454_s1 + $0x1384] ss:$16 sps:$4 sm:$0xff]   ;;  %v9753_v14 = vld [vmem:[%s14454_s1 + $0x1180] ss:$16 sps:$4 sm:$0xff]  }
 0x110   : > { %6958 = vmatprep.subr.bf16.mxu1 %v9698_v46  ;;  %6945 = vmatprep.mubr.bf16.mxu0 %v11824_v47  ;;  %v9756_v46 = vld [vmem:[%s14454_s1 + $0x1380] ss:$16 sps:$4 sm:$0xff]  }
 0x111   : > { %6988 = vmatprep.mubr.bf16.mxu1 %v11828_v50 }
 0x112   : > { %6916 = vmatpush1.bf16.msra.mxu0 %v9693_v51  ;;  %v9761_v51 = vld [vmem:[%s14454_s1 + $0x1164] ss:$16 sps:$4 sm:$0xff]  }
 0x113   : > { %6959 = vmatpush1.bf16.msra.mxu1 %v9696_v15  ;;  %6917 = vmatprep.subr.bf16.mxu0 %v9701_v16  ;;  %v9764_v15 = vld [vmem:[%s14454_s1 + $0x1364] ss:$16 sps:$4 sm:$0xff]   ;;  %v9759_v16 = vld [vmem:[%s14454_s1 + $0x1160] ss:$16 sps:$4 sm:$0xff]  }
 0x114   : > { %6960 = vmatprep.subr.bf16.mxu1 %v9704_v17  ;;  %v9762_v17 = vld [vmem:[%s14454_s1 + $0x1360] ss:$16 sps:$4 sm:$0xff]  }
 0x116   : > { %6918 = vmatpush1.bf16.msra.mxu0 %v9699_v18  ;;  %v9767_v18 = vld [vmem:[%s14454_s1 + $0x1144] ss:$16 sps:$4 sm:$0xff]  }
 0x117   : > { %6961 = vmatpush1.bf16.msra.mxu1 %v9702_v19  ;;  %6919 = vmatprep.subr.bf16.mxu0 %v9707_v22  ;;  %v9770_v19 = vld [vmem:[%s14454_s1 + $0x1344] ss:$16 sps:$4 sm:$0xff]   ;;  %v9765_v22 = vld [vmem:[%s14454_s1 + $0x1140] ss:$16 sps:$4 sm:$0xff]  }
 0x118   : > { %6962 = vmatprep.subr.bf16.mxu1 %v9710_v23  ;;  %v9768_v23 = vld [vmem:[%s14454_s1 + $0x1340] ss:$16 sps:$4 sm:$0xff]  }
 0x11a   : > { %6920 = vmatpush1.bf16.msra.mxu0 %v9705_v24  ;;  %v9773_v24 = vld [vmem:[%s14454_s1 + $0x1124] ss:$16 sps:$4 sm:$0xff]  }
 0x11b   : > { %6963 = vmatpush1.bf16.msra.mxu1 %v9708_v25  ;;  %6921 = vmatprep.subr.bf16.mxu0 %v9713_v26  ;;  %v9776_v25 = vld [vmem:[%s14454_s1 + $0x1324] ss:$16 sps:$4 sm:$0xff]   ;;  %v9771_v26 = vld [vmem:[%s14454_s1 + $0x1120] ss:$16 sps:$4 sm:$0xff]  }
 0x11c   : > { %6964 = vmatprep.subr.bf16.mxu1 %v9716_v27  ;;  %v9774_v27 = vld [vmem:[%s14454_s1 + $0x1320] ss:$16 sps:$4 sm:$0xff]  }
 0x11e   : > { %6922 = vmatpush1.bf16.msra.mxu0 %v9711_v32  ;;  %v9779_v32 = vld [vmem:[%s14454_s1 + $0x1104] ss:$16 sps:$4 sm:$0xff]  }
 0x11f   : > { %6965 = vmatpush1.bf16.msra.mxu1 %v9714_v34  ;;  %6923 = vmatprep.subr.bf16.mxu0 %v9719_v36  ;;  %v9782_v34 = vld [vmem:[%s14454_s1 + $0x1304] ss:$16 sps:$4 sm:$0xff]   ;;  %v9777_v36 = vld [vmem:[%s14454_s1 + $0x1100] ss:$16 sps:$4 sm:$0xff]  }
 0x120   : > { %6966 = vmatprep.subr.bf16.mxu1 %v9722_v37  ;;  %v9780_v37 = vld [vmem:[%s14454_s1 + $0x1300] ss:$16 sps:$4 sm:$0xff]  }
 0x122   : > { %6924 = vmatpush1.bf16.msra.mxu0 %v9717_v38  ;;  %v9785_v38 = vld [vmem:[%s14454_s1 + $0x14e4] ss:$16 sps:$4 sm:$0xff]  }
 0x123   : > { %6967 = vmatpush1.bf16.msra.mxu1 %v9720_v39  ;;  %6925 = vmatprep.subr.bf16.mxu0 %v9725_v40  ;;  %v9788_v39 = vld [vmem:[%s14454_s1 + $0x16e4] ss:$16 sps:$4 sm:$0xff]  }
 0x124   : > { %6968 = vmatprep.subr.bf16.mxu1 %v9728_v42  ;;  %v12015_v40 = vld [vmem:[%s11044_s11 + $0x50] sm:$0xff] }
 0x125   : > { %v9783_v42 = vld [vmem:[%s14454_s1 + $0x14e0] ss:$16 sps:$4 sm:$0xff]  }
 0x126   : > { %6926 = vmatpush1.bf16.msra.mxu0 %v9723_v44  ;;  %v12022_v44 = vcombine.low %v11797_v6, %v11800_v7  ;;  %v9791_v6 = vld [vmem:[%s14454_s1 + $0x14c4] ss:$16 sps:$4 sm:$0xff]  }
 0x127   : > { %6969 = vmatpush1.bf16.msra.mxu1 %v9726_v45  ;;  %6927 = vmatprep.subr.bf16.mxu0 %v9731_v52  ;;  %v12026_v45 = vcombine.low %v11811_v12, %v11814_v13  ;;  %v12029_v52 = vld [vmem:[%s11044_s11 + $0xd0] sm:$0x11] }
 0x128   : > { %6970 = vmatprep.subr.bf16.mxu1 %v9734_v28  ;;  %v12032_v28 = vld [vmem:[%s11044_s11 + $0x58] sm:$0xff]  ;;  %v9794_v7 = vld [vmem:[%s14454_s1 + $0x16c4] ss:$16 sps:$4 sm:$0xff]   ;;  %v9789_v12 = vld [vmem:[%s14454_s1 + $0x14c0] ss:$16 sps:$4 sm:$0xff]  }
 0x129   : > { %v9792_v13 = vld [vmem:[%s14454_s1 + $0x16c0] ss:$16 sps:$4 sm:$0xff]  }
 0x12a   : > { %6928 = vmatpush1.bf16.msra.mxu0 %v9729_v31  ;;  %v12035_v31 = vld [vmem:[%s11044_s11 + $0xd8] sm:$0x11] }
 0x12b   : > { %6971 = vmatpush1.bf16.msra.mxu1 %v9732_v54  ;;  %6929 = vmatprep.subr.bf16.mxu0 %v9737_v56  ;;  %v9786_v54 = vld [vmem:[%s14454_s1 + $0x16e0] ss:$16 sps:$4 sm:$0xff]   ;;  %v12054_v56 = vcombine.high %v12015_v40, %v12029_v52 }
 0x12c   : > { %6972 = vmatprep.subr.bf16.mxu1 %v9740_v57  ;;  %v12058_v57 = vcombine.high %v12032_v28, %v12035_v31 }
 0x12e   : > { %6930 = vmatpush2.bf16.msra.mxu0 %v9735_v58  ;;  %v9797_v58 = vld [vmem:[%s14454_s1 + $0x14a4] ss:$16 sps:$4 sm:$0xff]  }
 0x12f   : > { %6973 = vmatpush2.bf16.msra.mxu1 %v9738_v59  ;;  %6931 = vmatprep.subr.bf16.mxu0 %v9743_v60  ;;  %v9800_v59 = vld [vmem:[%s14454_s1 + $0x16a4] ss:$16 sps:$4 sm:$0xff]   ;;  %v9795_v60 = vld [vmem:[%s14454_s1 + $0x14a0] ss:$16 sps:$4 sm:$0xff]  }
 0x130   : > { %6974 = vmatprep.subr.bf16.mxu1 %v9746_v61  ;;  %v9798_v61 = vld [vmem:[%s14454_s1 + $0x16a0] ss:$16 sps:$4 sm:$0xff]  }
 0x132   : > { %6932 = vmatpush2.bf16.msra.mxu0 %v9741_v62  ;;  %v9803_v62 = vld [vmem:[%s14454_s1 + $0x1484] ss:$16 sps:$4 sm:$0xff]  }
 0x133   : > { %6975 = vmatpush2.bf16.msra.mxu1 %v9744_v63  ;;  %6933 = vmatprep.subr.bf16.mxu0 %v9749_v0  ;;  %v9806_v63 = vld [vmem:[%s14454_s1 + $0x1684] ss:$16 sps:$4 sm:$0xff]   ;;  %v9801_v0 = vld [vmem:[%s14454_s1 + $0x1480] ss:$16 sps:$4 sm:$0xff]  }
 0x134   : > { %6976 = vmatprep.subr.bf16.mxu1 %v9752_v1  ;;  %v9804_v1 = vld [vmem:[%s14454_s1 + $0x1680] ss:$16 sps:$4 sm:$0xff]  }
 0x136   : > { %6934 = vmatpush2.bf16.msra.mxu0 %v9747_v2  ;;  %v9809_v2 = vld [vmem:[%s14454_s1 + $0x1464] ss:$16 sps:$4 sm:$0xff]  }
 0x137   : > { %6977 = vmatpush2.bf16.msra.mxu1 %v9750_v3  ;;  %6935 = vmatprep.subr.bf16.mxu0 %v9755_v4  ;;  %v9812_v3 = vld [vmem:[%s14454_s1 + $0x1664] ss:$16 sps:$4 sm:$0xff]   ;;  %v9807_v4 = vld [vmem:[%s14454_s1 + $0x1460] ss:$16 sps:$4 sm:$0xff]  }
 0x138   : > { %6978 = vmatprep.subr.bf16.mxu1 %v9758_v5  ;;  %v9810_v5 = vld [vmem:[%s14454_s1 + $0x1660] ss:$16 sps:$4 sm:$0xff]  }
 0x13a   : > { %6936 = vmatpush2.bf16.msra.mxu0 %v9753_v14  ;;  %v9815_v14 = vld [vmem:[%s14454_s1 + $0x1444] ss:$16 sps:$4 sm:$0xff]  }
 0x13b   : > { %6979 = vmatpush2.bf16.msra.mxu1 %v9756_v46  ;;  %6937 = vmatprep.subr.bf16.mxu0 %v9761_v51  ;;  %v9818_v46 = vld [vmem:[%s14454_s1 + $0x1644] ss:$16 sps:$4 sm:$0xff]   ;;  %v9813_v51 = vld [vmem:[%s14454_s1 + $0x1440] ss:$16 sps:$4 sm:$0xff]  }
 0x13c   : > { %6980 = vmatprep.subr.bf16.mxu1 %v9764_v15  ;;  %v9816_v15 = vld [vmem:[%s14454_s1 + $0x1640] ss:$16 sps:$4 sm:$0xff]  }
 0x13e   : > { %6938 = vmatpush2.bf16.msra.mxu0 %v9759_v16  ;;  %v9821_v16 = vld [vmem:[%s14454_s1 + $0x1424] ss:$16 sps:$4 sm:$0xff]  }
 0x13f   : > { %6981 = vmatpush2.bf16.msra.mxu1 %v9762_v17  ;;  %6939 = vmatprep.subr.bf16.mxu0 %v9767_v18  ;;  %v9824_v17 = vld [vmem:[%s14454_s1 + $0x1624] ss:$16 sps:$4 sm:$0xff]   ;;  %v9819_v18 = vld [vmem:[%s14454_s1 + $0x1420] ss:$16 sps:$4 sm:$0xff]  }
 0x140   : > { %6982 = vmatprep.subr.bf16.mxu1 %v9770_v19  ;;  %v9822_v19 = vld [vmem:[%s14454_s1 + $0x1620] ss:$16 sps:$4 sm:$0xff]  }
 0x142   : > { %6940 = vmatpush2.bf16.msra.mxu0 %v9765_v22  ;;  %v9827_v22 = vld [vmem:[%s14454_s1 + $0x1404] ss:$16 sps:$4 sm:$0xff]  }
 0x143   : > { %6983 = vmatpush2.bf16.msra.mxu1 %v9768_v23  ;;  %6941 = vmatprep.subr.bf16.mxu0 %v9773_v24  ;;  %v9830_v23 = vld [vmem:[%s14454_s1 + $0x1604] ss:$16 sps:$4 sm:$0xff]   ;;  %v9825_v24 = vld [vmem:[%s14454_s1 + $0x1400] ss:$16 sps:$4 sm:$0xff]  }
 0x144   : > { %6984 = vmatprep.subr.bf16.mxu1 %v9776_v25  ;;  %v9828_v25 = vld [vmem:[%s14454_s1 + $0x1600] ss:$16 sps:$4 sm:$0xff]  }
 0x146   : > { %6942 = vmatpush2.bf16.msra.mxu0 %v9771_v26  ;;  %v9833_v26 = vld [vmem:[%s14454_s1 + $0x15e4] ss:$16 sps:$4 sm:$0xff]  }
 0x147   : > { %6985 = vmatpush2.bf16.msra.mxu1 %v9774_v27  ;;  %6943 = vmatprep.subr.bf16.mxu0 %v9779_v32  ;;  %v9836_v27 = vld [vmem:[%s14454_s1 + $0x17e4] ss:$16 sps:$4 sm:$0xff]   ;;  %v9831_v32 = vld [vmem:[%s14454_s1 + $0x15e0] ss:$16 sps:$4 sm:$0xff]  }
 0x148   : > { %6986 = vmatprep.subr.bf16.mxu1 %v9782_v34  ;;  %v9834_v34 = vld [vmem:[%s14454_s1 + $0x17e0] ss:$16 sps:$4 sm:$0xff]  }
 0x14a   : > { %6944 = vmatpush2.bf16.msra.mxu0 %v9777_v36  ;;  %v9839_v36 = vld [vmem:[%s14454_s1 + $0x15c4] ss:$16 sps:$4 sm:$0xff]  }
 0x14b   : > { %6987 = vmatpush2.bf16.msra.mxu1 %v9780_v37  ;;  %6999 = vmatprep.subr.bf16.mxu0 %v9785_v38  ;;  %v9842_v37 = vld [vmem:[%s14454_s1 + $0x17c4] ss:$16 sps:$4 sm:$0xff]   ;;  %v9837_v38 = vld [vmem:[%s14454_s1 + $0x15c0] ss:$16 sps:$4 sm:$0xff]  }
 0x14c   : > { %7042 = vmatprep.subr.bf16.mxu1 %v9788_v39  ;;  %v9840_v39 = vld [vmem:[%s14454_s1 + $0x17c0] ss:$16 sps:$4 sm:$0xff]  }
 0x14d   : > { %6946 = vmatmul.mubr.bf16.vlgmr.msra.gmra.mxu0 %v12022_v44 }
 0x14e   : > { %6989 = vmatmul.mubr.bf16.vlgmr.msra.gmra.mxu1 %v12026_v45  ;;  %7000 = vmatpush1.bf16.msra.mxu0 %v9783_v42  ;;  %v9845_v42 = vld [vmem:[%s14454_s1 + $0x15a4] ss:$16 sps:$4 sm:$0xff]  }
 0x14f   : > { %7043 = vmatpush1.bf16.msra.mxu1 %v9786_v54  ;;  %7001 = vmatprep.subr.bf16.mxu0 %v9791_v6  ;;  %v9848_v54 = vld [vmem:[%s14454_s1 + $0x17a4] ss:$16 sps:$4 sm:$0xff]   ;;  %v9843_v6 = vld [vmem:[%s14454_s1 + $0x15a0] ss:$16 sps:$4 sm:$0xff]  }
 0x150   : > { %7044 = vmatprep.subr.bf16.mxu1 %v9794_v7  ;;  %7031 = vmatprep.mubr.bf16.mxu0 %v12054_v56  ;;  %v9846_v7 = vld [vmem:[%s14454_s1 + $0x17a0] ss:$16 sps:$4 sm:$0xff]  }
 0x151   : > { %7074 = vmatprep.mubr.bf16.mxu1 %v12058_v57 }
 0x152   : > { %7002 = vmatpush1.bf16.msra.mxu0 %v9789_v12  ;;  %v9851_v12 = vld [vmem:[%s14454_s1 + $0x1584] ss:$16 sps:$4 sm:$0xff]  }
 0x153   : > { %7045 = vmatpush1.bf16.msra.mxu1 %v9792_v13  ;;  %7003 = vmatprep.subr.bf16.mxu0 %v9797_v58  ;;  %v9854_v13 = vld [vmem:[%s14454_s1 + $0x1784] ss:$16 sps:$4 sm:$0xff]   ;;  %v9849_v58 = vld [vmem:[%s14454_s1 + $0x1580] ss:$16 sps:$4 sm:$0xff]  }
 0x154   : > { %7046 = vmatprep.subr.bf16.mxu1 %v9800_v59  ;;  %v9852_v59 = vld [vmem:[%s14454_s1 + $0x1780] ss:$16 sps:$4 sm:$0xff]  }
 0x156   : > { %7004 = vmatpush1.bf16.msra.mxu0 %v9795_v60  ;;  %v9857_v60 = vld [vmem:[%s14454_s1 + $0x1564] ss:$16 sps:$4 sm:$0xff]  }
 0x157   : > { %7047 = vmatpush1.bf16.msra.mxu1 %v9798_v61  ;;  %7005 = vmatprep.subr.bf16.mxu0 %v9803_v62  ;;  %v9860_v61 = vld [vmem:[%s14454_s1 + $0x1764] ss:$16 sps:$4 sm:$0xff]   ;;  %v9855_v62 = vld [vmem:[%s14454_s1 + $0x1560] ss:$16 sps:$4 sm:$0xff]  }
 0x158   : > { %7048 = vmatprep.subr.bf16.mxu1 %v9806_v63  ;;  %v9858_v63 = vld [vmem:[%s14454_s1 + $0x1760] ss:$16 sps:$4 sm:$0xff]  }
 0x15a   : > { %7006 = vmatpush1.bf16.msra.mxu0 %v9801_v0  ;;  %v9863_v0 = vld [vmem:[%s14454_s1 + $0x1544] ss:$16 sps:$4 sm:$0xff]  }
 0x15b   : > { %7049 = vmatpush1.bf16.msra.mxu1 %v9804_v1  ;;  %7007 = vmatprep.subr.bf16.mxu0 %v9809_v2  ;;  %v9866_v1 = vld [vmem:[%s14454_s1 + $0x1744] ss:$16 sps:$4 sm:$0xff]   ;;  %v9861_v2 = vld [vmem:[%s14454_s1 + $0x1540] ss:$16 sps:$4 sm:$0xff]  }
 0x15c   : > { %7050 = vmatprep.subr.bf16.mxu1 %v9812_v3  ;;  %v9864_v3 = vld [vmem:[%s14454_s1 + $0x1740] ss:$16 sps:$4 sm:$0xff]  }
 0x15e   : > { %7008 = vmatpush1.bf16.msra.mxu0 %v9807_v4  ;;  %v9869_v4 = vld [vmem:[%s14454_s1 + $0x1524] ss:$16 sps:$4 sm:$0xff]  }
 0x15f   : > { %7051 = vmatpush1.bf16.msra.mxu1 %v9810_v5  ;;  %7009 = vmatprep.subr.bf16.mxu0 %v9815_v14  ;;  %v9872_v5 = vld [vmem:[%s14454_s1 + $0x1724] ss:$16 sps:$4 sm:$0xff]   ;;  %v9867_v14 = vld [vmem:[%s14454_s1 + $0x1520] ss:$16 sps:$4 sm:$0xff]  }
 0x160   : > { %7052 = vmatprep.subr.bf16.mxu1 %v9818_v46  ;;  %v9870_v46 = vld [vmem:[%s14454_s1 + $0x1720] ss:$16 sps:$4 sm:$0xff]  }
 0x162   : > { %7010 = vmatpush1.bf16.msra.mxu0 %v9813_v51  ;;  %v9875_v51 = vld [vmem:[%s14454_s1 + $0x1504] ss:$16 sps:$4 sm:$0xff]  }
 0x163   : > { %7053 = vmatpush1.bf16.msra.mxu1 %v9816_v15  ;;  %7011 = vmatprep.subr.bf16.mxu0 %v9821_v16  ;;  %v9878_v15 = vld [vmem:[%s14454_s1 + $0x1704] ss:$16 sps:$4 sm:$0xff]   ;;  %v9873_v16 = vld [vmem:[%s14454_s1 + $0x1500] ss:$16 sps:$4 sm:$0xff]  }
 0x164   : > { %7054 = vmatprep.subr.bf16.mxu1 %v9824_v17  ;;  %v9876_v17 = vld [vmem:[%s14454_s1 + $0x1700] ss:$16 sps:$4 sm:$0xff]  }
 0x166   : > { %7012 = vmatpush1.bf16.msra.mxu0 %v9819_v18  ;;  %v9881_v18 = vld [vmem:[%s14454_s1 + $0x18e4] ss:$16 sps:$4 sm:$0xff]  }
 0x167   : > { %7055 = vmatpush1.bf16.msra.mxu1 %v9822_v19  ;;  %7013 = vmatprep.subr.bf16.mxu0 %v9827_v22  ;;  %v9884_v19 = vld [vmem:[%s14454_s1 + $0x1ae4] ss:$16 sps:$4 sm:$0xff]  }
 0x168   : > { %7056 = vmatprep.subr.bf16.mxu1 %v9830_v23  ;;  %v12239_v22 = vld [vmem:[%s11044_s11 + $0x60] sm:$0xff] }
 0x169   : > { %v9879_v23 = vld [vmem:[%s14454_s1 + $0x18e0] ss:$16 sps:$4 sm:$0xff]  }
 0x16a   : > { %7014 = vmatpush1.bf16.msra.mxu0 %v9825_v24  ;;  %v12246_v24 = vcombine.low %v12015_v40, %v12029_v52  ;;  %v9887_v40 = vld [vmem:[%s14454_s1 + $0x18c4] ss:$16 sps:$4 sm:$0xff]  }
 0x16b   : > { %7057 = vmatpush1.bf16.msra.mxu1 %v9828_v25  ;;  %7015 = vmatprep.subr.bf16.mxu0 %v9833_v26  ;;  %v12250_v25 = vcombine.low %v12032_v28, %v12035_v31  ;;  %v12253_v26 = vld [vmem:[%s11044_s11 + $0xe0] sm:$0x11] }
 0x16c   : > { %7058 = vmatprep.subr.bf16.mxu1 %v9836_v27  ;;  %v12256_v27 = vld [vmem:[%s11044_s11 + $0x68] sm:$0xff]  ;;  %v9890_v52 = vld [vmem:[%s14454_s1 + $0x1ac4] ss:$16 sps:$4 sm:$0xff]   ;;  %v9885_v28 = vld [vmem:[%s14454_s1 + $0x18c0] ss:$16 sps:$4 sm:$0xff]  }
 0x16d   : > { %v9888_v31 = vld [vmem:[%s14454_s1 + $0x1ac0] ss:$16 sps:$4 sm:$0xff]  }
 0x16e   : > { %7016 = vmatpush2.bf16.msra.mxu0 %v9831_v32  ;;  %v12259_v32 = vld [vmem:[%s11044_s11 + $0xe8] sm:$0x11] }
 0x16f   : > { %7059 = vmatpush2.bf16.msra.mxu1 %v9834_v34  ;;  %7017 = vmatprep.subr.bf16.mxu0 %v9839_v36  ;;  %v9882_v34 = vld [vmem:[%s14454_s1 + $0x1ae0] ss:$16 sps:$4 sm:$0xff]   ;;  %v12278_v36 = vcombine.high %v12239_v22, %v12253_v26 }
 0x170   : > { %7060 = vmatprep.subr.bf16.mxu1 %v9842_v37  ;;  %v12282_v37 = vcombine.high %v12256_v27, %v12259_v32 }
 0x172   : > { %7018 = vmatpush2.bf16.msra.mxu0 %v9837_v38  ;;  %v9893_v38 = vld [vmem:[%s14454_s1 + $0x18a4] ss:$16 sps:$4 sm:$0xff]  }
 0x173   : > { %7061 = vmatpush2.bf16.msra.mxu1 %v9840_v39  ;;  %7019 = vmatprep.subr.bf16.mxu0 %v9845_v42  ;;  %v9896_v39 = vld [vmem:[%s14454_s1 + $0x1aa4] ss:$16 sps:$4 sm:$0xff]   ;;  %v9891_v42 = vld [vmem:[%s14454_s1 + $0x18a0] ss:$16 sps:$4 sm:$0xff]  }
 0x174   : > { %7062 = vmatprep.subr.bf16.mxu1 %v9848_v54  ;;  %v9894_v54 = vld [vmem:[%s14454_s1 + $0x1aa0] ss:$16 sps:$4 sm:$0xff]  }
 0x176   : > { %7020 = vmatpush2.bf16.msra.mxu0 %v9843_v6  ;;  %v9899_v6 = vld [vmem:[%s14454_s1 + $0x1884] ss:$16 sps:$4 sm:$0xff]  }
 0x177   : > { %7063 = vmatpush2.bf16.msra.mxu1 %v9846_v7  ;;  %7021 = vmatprep.subr.bf16.mxu0 %v9851_v12  ;;  %v9902_v7 = vld [vmem:[%s14454_s1 + $0x1a84] ss:$16 sps:$4 sm:$0xff]   ;;  %v9897_v12 = vld [vmem:[%s14454_s1 + $0x1880] ss:$16 sps:$4 sm:$0xff]  }
 0x178   : > { %7064 = vmatprep.subr.bf16.mxu1 %v9854_v13  ;;  %v9900_v13 = vld [vmem:[%s14454_s1 + $0x1a80] ss:$16 sps:$4 sm:$0xff]  }
 0x17a   : > { %7022 = vmatpush2.bf16.msra.mxu0 %v9849_v58  ;;  %v9905_v58 = vld [vmem:[%s14454_s1 + $0x1864] ss:$16 sps:$4 sm:$0xff]  }
 0x17b   : > { %7065 = vmatpush2.bf16.msra.mxu1 %v9852_v59  ;;  %7023 = vmatprep.subr.bf16.mxu0 %v9857_v60  ;;  %v9908_v59 = vld [vmem:[%s14454_s1 + $0x1a64] ss:$16 sps:$4 sm:$0xff]   ;;  %v9903_v60 = vld [vmem:[%s14454_s1 + $0x1860] ss:$16 sps:$4 sm:$0xff]  }
 0x17c   : > { %7066 = vmatprep.subr.bf16.mxu1 %v9860_v61  ;;  %v9906_v61 = vld [vmem:[%s14454_s1 + $0x1a60] ss:$16 sps:$4 sm:$0xff]  }
 0x17e   : > { %7024 = vmatpush2.bf16.msra.mxu0 %v9855_v62  ;;  %v9911_v62 = vld [vmem:[%s14454_s1 + $0x1844] ss:$16 sps:$4 sm:$0xff]  }
 0x17f   : > { %7067 = vmatpush2.bf16.msra.mxu1 %v9858_v63  ;;  %7025 = vmatprep.subr.bf16.mxu0 %v9863_v0  ;;  %v9914_v63 = vld [vmem:[%s14454_s1 + $0x1a44] ss:$16 sps:$4 sm:$0xff]   ;;  %v9909_v0 = vld [vmem:[%s14454_s1 + $0x1840] ss:$16 sps:$4 sm:$0xff]  }
 0x180   : > { %7068 = vmatprep.subr.bf16.mxu1 %v9866_v1  ;;  %v9912_v1 = vld [vmem:[%s14454_s1 + $0x1a40] ss:$16 sps:$4 sm:$0xff]  }
 0x182   : > { %7026 = vmatpush2.bf16.msra.mxu0 %v9861_v2  ;;  %v9917_v2 = vld [vmem:[%s14454_s1 + $0x1824] ss:$16 sps:$4 sm:$0xff]  }
 0x183   : > { %7069 = vmatpush2.bf16.msra.mxu1 %v9864_v3  ;;  %7027 = vmatprep.subr.bf16.mxu0 %v9869_v4  ;;  %v9920_v3 = vld [vmem:[%s14454_s1 + $0x1a24] ss:$16 sps:$4 sm:$0xff]   ;;  %v9915_v4 = vld [vmem:[%s14454_s1 + $0x1820] ss:$16 sps:$4 sm:$0xff]  }
 0x184   : > { %7070 = vmatprep.subr.bf16.mxu1 %v9872_v5  ;;  %v9918_v5 = vld [vmem:[%s14454_s1 + $0x1a20] ss:$16 sps:$4 sm:$0xff]  }
 0x186   : > { %7028 = vmatpush2.bf16.msra.mxu0 %v9867_v14  ;;  %v9923_v14 = vld [vmem:[%s14454_s1 + $0x1804] ss:$16 sps:$4 sm:$0xff]  }
 0x187   : > { %7071 = vmatpush2.bf16.msra.mxu1 %v9870_v46  ;;  %7029 = vmatprep.subr.bf16.mxu0 %v9875_v51  ;;  %v9926_v46 = vld [vmem:[%s14454_s1 + $0x1a04] ss:$16 sps:$4 sm:$0xff]   ;;  %v9921_v51 = vld [vmem:[%s14454_s1 + $0x1800] ss:$16 sps:$4 sm:$0xff]  }
 0x188   : > { %7072 = vmatprep.subr.bf16.mxu1 %v9878_v15  ;;  %v9924_v15 = vld [vmem:[%s14454_s1 + $0x1a00] ss:$16 sps:$4 sm:$0xff]  }
 0x18a   : > { %7030 = vmatpush2.bf16.msra.mxu0 %v9873_v16  ;;  %v9929_v16 = vld [vmem:[%s14454_s1 + $0x19e4] ss:$16 sps:$4 sm:$0xff]  }
 0x18b   : > { %7073 = vmatpush2.bf16.msra.mxu1 %v9876_v17  ;;  %7085 = vmatprep.subr.bf16.mxu0 %v9881_v18  ;;  %v9932_v17 = vld [vmem:[%s14454_s1 + $0x1be4] ss:$16 sps:$4 sm:$0xff]   ;;  %v9927_v18 = vld [vmem:[%s14454_s1 + $0x19e0] ss:$16 sps:$4 sm:$0xff]  }
 0x18c   : > { %7128 = vmatprep.subr.bf16.mxu1 %v9884_v19  ;;  %v9930_v19 = vld [vmem:[%s14454_s1 + $0x1be0] ss:$16 sps:$4 sm:$0xff]  }
 0x18d   : > { %7032 = vmatmul.mubr.bf16.vlgmr.msra.gmra.mxu0 %v12246_v24 }
 0x18e   : > { %7075 = vmatmul.mubr.bf16.vlgmr.msra.gmra.mxu1 %v12250_v25  ;;  %7086 = vmatpush1.bf16.msra.mxu0 %v9879_v23  ;;  %v9935_v23 = vld [vmem:[%s14454_s1 + $0x19c4] ss:$16 sps:$4 sm:$0xff]  }
 0x18f   : > { %7129 = vmatpush1.bf16.msra.mxu1 %v9882_v34  ;;  %7087 = vmatprep.subr.bf16.mxu0 %v9887_v40  ;;  %v9938_v34 = vld [vmem:[%s14454_s1 + $0x1bc4] ss:$16 sps:$4 sm:$0xff]   ;;  %v9933_v40 = vld [vmem:[%s14454_s1 + $0x19c0] ss:$16 sps:$4 sm:$0xff]  }
 0x190   : > { %7130 = vmatprep.subr.bf16.mxu1 %v9890_v52  ;;  %7117 = vmatprep.mubr.bf16.mxu0 %v12278_v36  ;;  %v9936_v52 = vld [vmem:[%s14454_s1 + $0x1bc0] ss:$16 sps:$4 sm:$0xff]  }
 0x191   : > { %7160 = vmatprep.mubr.bf16.mxu1 %v12282_v37 }
 0x192   : > { %7088 = vmatpush1.bf16.msra.mxu0 %v9885_v28  ;;  %v9941_v28 = vld [vmem:[%s14454_s1 + $0x19a4] ss:$16 sps:$4 sm:$0xff]  }
 0x193   : > { %7131 = vmatpush1.bf16.msra.mxu1 %v9888_v31  ;;  %7089 = vmatprep.subr.bf16.mxu0 %v9893_v38  ;;  %v9944_v31 = vld [vmem:[%s14454_s1 + $0x1ba4] ss:$16 sps:$4 sm:$0xff]   ;;  %v9939_v38 = vld [vmem:[%s14454_s1 + $0x19a0] ss:$16 sps:$4 sm:$0xff]  }
 0x194   : > { %7132 = vmatprep.subr.bf16.mxu1 %v9896_v39  ;;  %v9942_v39 = vld [vmem:[%s14454_s1 + $0x1ba0] ss:$16 sps:$4 sm:$0xff]  }
 0x196   : > { %7090 = vmatpush1.bf16.msra.mxu0 %v9891_v42  ;;  %v9947_v42 = vld [vmem:[%s14454_s1 + $0x1984] ss:$16 sps:$4 sm:$0xff]  }
 0x197   : > { %7133 = vmatpush1.bf16.msra.mxu1 %v9894_v54  ;;  %7091 = vmatprep.subr.bf16.mxu0 %v9899_v6  ;;  %v9950_v54 = vld [vmem:[%s14454_s1 + $0x1b84] ss:$16 sps:$4 sm:$0xff]   ;;  %v9945_v6 = vld [vmem:[%s14454_s1 + $0x1980] ss:$16 sps:$4 sm:$0xff]  }
 0x198   : > { %7134 = vmatprep.subr.bf16.mxu1 %v9902_v7  ;;  %v9948_v7 = vld [vmem:[%s14454_s1 + $0x1b80] ss:$16 sps:$4 sm:$0xff]  }
 0x19a   : > { %7092 = vmatpush1.bf16.msra.mxu0 %v9897_v12  ;;  %v9953_v12 = vld [vmem:[%s14454_s1 + $0x1964] ss:$16 sps:$4 sm:$0xff]  }
 0x19b   : > { %7135 = vmatpush1.bf16.msra.mxu1 %v9900_v13  ;;  %7093 = vmatprep.subr.bf16.mxu0 %v9905_v58  ;;  %v9956_v13 = vld [vmem:[%s14454_s1 + $0x1b64] ss:$16 sps:$4 sm:$0xff]   ;;  %v9951_v58 = vld [vmem:[%s14454_s1 + $0x1960] ss:$16 sps:$4 sm:$0xff]  }
 0x19c   : > { %7136 = vmatprep.subr.bf16.mxu1 %v9908_v59  ;;  %v9954_v59 = vld [vmem:[%s14454_s1 + $0x1b60] ss:$16 sps:$4 sm:$0xff]  }
 0x19e   : > { %7094 = vmatpush1.bf16.msra.mxu0 %v9903_v60  ;;  %v9959_v60 = vld [vmem:[%s14454_s1 + $0x1944] ss:$16 sps:$4 sm:$0xff]  }
 0x19f   : > { %7137 = vmatpush1.bf16.msra.mxu1 %v9906_v61  ;;  %7095 = vmatprep.subr.bf16.mxu0 %v9911_v62  ;;  %v9962_v61 = vld [vmem:[%s14454_s1 + $0x1b44] ss:$16 sps:$4 sm:$0xff]   ;;  %v9957_v62 = vld [vmem:[%s14454_s1 + $0x1940] ss:$16 sps:$4 sm:$0xff]  }
 0x1a0   : > { %7138 = vmatprep.subr.bf16.mxu1 %v9914_v63  ;;  %v9960_v63 = vld [vmem:[%s14454_s1 + $0x1b40] ss:$16 sps:$4 sm:$0xff]  }
 0x1a2   : > { %7096 = vmatpush1.bf16.msra.mxu0 %v9909_v0  ;;  %v9965_v0 = vld [vmem:[%s14454_s1 + $0x1924] ss:$16 sps:$4 sm:$0xff]  }
 0x1a3   : > { %7139 = vmatpush1.bf16.msra.mxu1 %v9912_v1  ;;  %7097 = vmatprep.subr.bf16.mxu0 %v9917_v2  ;;  %v9968_v1 = vld [vmem:[%s14454_s1 + $0x1b24] ss:$16 sps:$4 sm:$0xff]   ;;  %v9963_v2 = vld [vmem:[%s14454_s1 + $0x1920] ss:$16 sps:$4 sm:$0xff]  }
 0x1a4   : > { %7140 = vmatprep.subr.bf16.mxu1 %v9920_v3  ;;  %v9966_v3 = vld [vmem:[%s14454_s1 + $0x1b20] ss:$16 sps:$4 sm:$0xff]  }
 0x1a6   : > { %7098 = vmatpush1.bf16.msra.mxu0 %v9915_v4  ;;  %v9971_v4 = vld [vmem:[%s14454_s1 + $0x1904] ss:$16 sps:$4 sm:$0xff]  }
 0x1a7   : > { %7141 = vmatpush1.bf16.msra.mxu1 %v9918_v5  ;;  %7099 = vmatprep.subr.bf16.mxu0 %v9923_v14  ;;  %v9974_v5 = vld [vmem:[%s14454_s1 + $0x1b04] ss:$16 sps:$4 sm:$0xff]   ;;  %v9969_v14 = vld [vmem:[%s14454_s1 + $0x1900] ss:$16 sps:$4 sm:$0xff]  }
 0x1a8   : > { %7142 = vmatprep.subr.bf16.mxu1 %v9926_v46  ;;  %v9972_v46 = vld [vmem:[%s14454_s1 + $0x1b00] ss:$16 sps:$4 sm:$0xff]  }
 0x1aa   : > { %7100 = vmatpush1.bf16.msra.mxu0 %v9921_v51  ;;  %v9977_v51 = vld [vmem:[%s14454_s1 + $0x1ce4] ss:$16 sps:$4 sm:$0xff]  }
 0x1ab   : > { %7143 = vmatpush1.bf16.msra.mxu1 %v9924_v15  ;;  %7101 = vmatprep.subr.bf16.mxu0 %v9929_v16  ;;  %v9980_v15 = vld [vmem:[%s14454_s1 + $0x1ee4] ss:$16 sps:$4 sm:$0xff]  }
 0x1ac   : > { %7144 = vmatprep.subr.bf16.mxu1 %v9932_v17  ;;  %v12463_v16 = vld [vmem:[%s11044_s11 + $0x70] sm:$0xff] }
 0x1ad   : > { %v12466_v17 = vld [vmem:[%s11044_s11 + $0xf0] sm:$0x11] }
 0x1ae   : > { %7102 = vmatpush2.bf16.msra.mxu0 %v9927_v18  ;;  %v12469_v18 = vld [vmem:[%s11044_s11 + $0x78] sm:$0xff] }
 0x1af   : > { %7145 = vmatpush2.bf16.msra.mxu1 %v9930_v19  ;;  %7103 = vmatprep.subr.bf16.mxu0 %v9935_v23  ;;  %v12472_v19 = vld [vmem:[%s11044_s11 + $0xf8] sm:$0x11]  ;;  %v9975_v23 = vld [vmem:[%s14454_s1 + $0x1ce0] ss:$16 sps:$4 sm:$0xff]  }
 0x1b0   : > { %7146 = vmatprep.subr.bf16.mxu1 %v9938_v34  ;;  %v9978_v34 = vld [vmem:[%s14454_s1 + $0x1ee0] ss:$16 sps:$4 sm:$0xff]  }
 0x1b2   : > { %7104 = vmatpush2.bf16.msra.mxu0 %v9933_v40  ;;  %v12482_v40 = vcombine.low %v12239_v22, %v12253_v26  ;;  %v9981_v22 = vld [vmem:[%s14454_s1 + $0x1cc0] ss:$16 sps:$4 sm:$0xff]  }
 0x1b3   : > { %7147 = vmatpush2.bf16.msra.mxu1 %v9936_v52  ;;  %7105 = vmatprep.subr.bf16.mxu0 %v9941_v28  ;;  %v12486_v52 = vcombine.low %v12256_v27, %v12259_v32  ;;  %v9983_v28 = vld [vmem:[%s14454_s1 + $0x1cc4] ss:$16 sps:$4 sm:$0xff]   ;;  %v9984_v26 = vld [vmem:[%s14454_s1 + $0x1ec0] ss:$16 sps:$4 sm:$0xff]   ;;  %v12502_v27 = vcombine.high %v12463_v16, %v12466_v17  ;;  %v12506_v32 = vcombine.high %v12469_v18, %v12472_v19 }
 0x1b4   : > { %7148 = vmatprep.subr.bf16.mxu1 %v9944_v31  ;;  %v9986_v31 = vld [vmem:[%s14454_s1 + $0x1ec4] ss:$16 sps:$4 sm:$0xff]  }
 0x1b5   : > { %14462 = vst [vmem:[#allocation2_spill] sm:$0xff] %v12486_v52  ;;  %14463 = vst [vmem:[#allocation3_spill] sm:$0xff] %v12502_v27 }
 0x1b6   : > { %7106 = vmatpush2.bf16.msra.mxu0 %v9939_v38  ;;  %14464 = vst [vmem:[#allocation4_spill] sm:$0xff] %v12506_v32  ;;  %v9989_v38 = vld [vmem:[%s14454_s1 + $0x1ca4] ss:$16 sps:$4 sm:$0xff]  }
 0x1b7   : > { %7149 = vmatpush2.bf16.msra.mxu1 %v9942_v39  ;;  %7107 = vmatprep.subr.bf16.mxu0 %v9947_v42  ;;  %v9992_v39 = vld [vmem:[%s14454_s1 + $0x1ea4] ss:$16 sps:$4 sm:$0xff]   ;;  %v9987_v42 = vld [vmem:[%s14454_s1 + $0x1ca0] ss:$16 sps:$4 sm:$0xff]  }
 0x1b8   : > { %7150 = vmatprep.subr.bf16.mxu1 %v9950_v54  ;;  %v9990_v54 = vld [vmem:[%s14454_s1 + $0x1ea0] ss:$16 sps:$4 sm:$0xff]  }
 0x1ba   : > { %7108 = vmatpush2.bf16.msra.mxu0 %v9945_v6  ;;  %v9995_v6 = vld [vmem:[%s14454_s1 + $0x1c84] ss:$16 sps:$4 sm:$0xff]  }
 0x1bb   : > { %7151 = vmatpush2.bf16.msra.mxu1 %v9948_v7  ;;  %7109 = vmatprep.subr.bf16.mxu0 %v9953_v12  ;;  %v9998_v7 = vld [vmem:[%s14454_s1 + $0x1e84] ss:$16 sps:$4 sm:$0xff]   ;;  %v9993_v12 = vld [vmem:[%s14454_s1 + $0x1c80] ss:$16 sps:$4 sm:$0xff]  }
 0x1bc   : > { %7152 = vmatprep.subr.bf16.mxu1 %v9956_v13  ;;  %v9996_v13 = vld [vmem:[%s14454_s1 + $0x1e80] ss:$16 sps:$4 sm:$0xff]  }
 0x1be   : > { %7110 = vmatpush2.bf16.msra.mxu0 %v9951_v58  ;;  %v10001_v58 = vld [vmem:[%s14454_s1 + $0x1c64] ss:$16 sps:$4 sm:$0xff]  }
 0x1bf   : > { %7153 = vmatpush2.bf16.msra.mxu1 %v9954_v59  ;;  %7111 = vmatprep.subr.bf16.mxu0 %v9959_v60  ;;  %v10004_v59 = vld [vmem:[%s14454_s1 + $0x1e64] ss:$16 sps:$4 sm:$0xff]   ;;  %v9999_v60 = vld [vmem:[%s14454_s1 + $0x1c60] ss:$16 sps:$4 sm:$0xff]  }
 0x1c0   : > { %7154 = vmatprep.subr.bf16.mxu1 %v9962_v61  ;;  %v10002_v61 = vld [vmem:[%s14454_s1 + $0x1e60] ss:$16 sps:$4 sm:$0xff]  }
 0x1c2   : > { %7112 = vmatpush2.bf16.msra.mxu0 %v9957_v62  ;;  %v10007_v62 = vld [vmem:[%s14454_s1 + $0x1c44] ss:$16 sps:$4 sm:$0xff]  }
 0x1c3   : > { %7155 = vmatpush2.bf16.msra.mxu1 %v9960_v63  ;;  %7113 = vmatprep.subr.bf16.mxu0 %v9965_v0  ;;  %v10010_v63 = vld [vmem:[%s14454_s1 + $0x1e44] ss:$16 sps:$4 sm:$0xff]   ;;  %v10005_v0 = vld [vmem:[%s14454_s1 + $0x1c40] ss:$16 sps:$4 sm:$0xff]  }
 0x1c4   : > { %7156 = vmatprep.subr.bf16.mxu1 %v9968_v1  ;;  %v10008_v1 = vld [vmem:[%s14454_s1 + $0x1e40] ss:$16 sps:$4 sm:$0xff]  }
 0x1c6   : > { %7114 = vmatpush2.bf16.msra.mxu0 %v9963_v2  ;;  %v10013_v2 = vld [vmem:[%s14454_s1 + $0x1c24] ss:$16 sps:$4 sm:$0xff]  }
 0x1c7   : > { %7157 = vmatpush2.bf16.msra.mxu1 %v9966_v3  ;;  %7115 = vmatprep.subr.bf16.mxu0 %v9971_v4  ;;  %v10016_v3 = vld [vmem:[%s14454_s1 + $0x1e24] ss:$16 sps:$4 sm:$0xff]   ;;  %v10011_v4 = vld [vmem:[%s14454_s1 + $0x1c20] ss:$16 sps:$4 sm:$0xff]  }
 0x1c8   : > { %7158 = vmatprep.subr.bf16.mxu1 %v9974_v5  ;;  %v10014_v5 = vld [vmem:[%s14454_s1 + $0x1e20] ss:$16 sps:$4 sm:$0xff]  }
 0x1ca   : > { %7116 = vmatpush2.bf16.msra.mxu0 %v9969_v14  ;;  %v10019_v14 = vld [vmem:[%s14454_s1 + $0x1c04] ss:$16 sps:$4 sm:$0xff]  }
 0x1cb   : > { %7159 = vmatpush2.bf16.msra.mxu1 %v9972_v46  ;;  %7171 = vmatprep.subr.bf16.mxu0 %v9977_v51  ;;  %v10022_v46 = vld [vmem:[%s14454_s1 + $0x1e04] ss:$16 sps:$4 sm:$0xff]   ;;  %v10017_v51 = vld [vmem:[%s14454_s1 + $0x1c00] ss:$16 sps:$4 sm:$0xff]  }
 0x1cc   : > { %7214 = vmatprep.subr.bf16.mxu1 %v9980_v15  ;;  %v10020_v15 = vld [vmem:[%s14454_s1 + $0x1e00] ss:$16 sps:$4 sm:$0xff]  }
 0x1cd   : > { %7118 = vmatmul.mubr.bf16.vlgmr.msra.gmra.mxu0 %v12482_v40 }
 0x1ce   : > { %7161 = vmatmul.mubr.bf16.vlgmr.msra.gmra.mxu1 %v12486_v52  ;;  %7172 = vmatpush1.bf16.msra.mxu0 %v9975_v23  ;;  %v10025_v23 = vld [vmem:[%s14454_s1 + $0x1de4] ss:$16 sps:$4 sm:$0xff]  }
 0x1cf   : > { %7215 = vmatpush1.bf16.msra.mxu1 %v9978_v34  ;;  %7173 = vmatprep.subr.bf16.mxu0 %v9983_v28  ;;  %v10028_v34 = vld [vmem:[%s14454_s1 + $0x1fe4] ss:$16 sps:$4 sm:$0xff]   ;;  %v10023_v28 = vld [vmem:[%s14454_s1 + $0x1de0] ss:$16 sps:$4 sm:$0xff]  }
 0x1d0   : > { %7216 = vmatprep.subr.bf16.mxu1 %v9986_v31  ;;  %7203 = vmatprep.mubr.bf16.mxu0 %v12502_v27  ;;  %v10026_v31 = vld [vmem:[%s14454_s1 + $0x1fe0] ss:$16 sps:$4 sm:$0xff]  }
 0x1d1   : > { %7246 = vmatprep.mubr.bf16.mxu1 %v12506_v32 }
 0x1d2   : > { %7174 = vmatpush1.bf16.msra.mxu0 %v9981_v22  ;;  %v10031_v22 = vld [vmem:[%s14454_s1 + $0x1dc4] ss:$16 sps:$4 sm:$0xff]  }
 0x1d3   : > { %7217 = vmatpush1.bf16.msra.mxu1 %v9984_v26  ;;  %7175 = vmatprep.subr.bf16.mxu0 %v9989_v38  ;;  %v10034_v26 = vld [vmem:[%s14454_s1 + $0x1fc4] ss:$16 sps:$4 sm:$0xff]   ;;  %v10029_v38 = vld [vmem:[%s14454_s1 + $0x1dc0] ss:$16 sps:$4 sm:$0xff]  }
 0x1d4   : > { %7218 = vmatprep.subr.bf16.mxu1 %v9992_v39  ;;  %v10032_v39 = vld [vmem:[%s14454_s1 + $0x1fc0] ss:$16 sps:$4 sm:$0xff]  }
 0x1d6   : > { %7176 = vmatpush1.bf16.msra.mxu0 %v9987_v42  ;;  %v10037_v42 = vld [vmem:[%s14454_s1 + $0x1da4] ss:$16 sps:$4 sm:$0xff]  }
 0x1d7   : > { %7219 = vmatpush1.bf16.msra.mxu1 %v9990_v54  ;;  %7177 = vmatprep.subr.bf16.mxu0 %v9995_v6  ;;  %v10040_v54 = vld [vmem:[%s14454_s1 + $0x1fa4] ss:$16 sps:$4 sm:$0xff]   ;;  %v10035_v6 = vld [vmem:[%s14454_s1 + $0x1da0] ss:$16 sps:$4 sm:$0xff]  }
 0x1d8   : > { %7220 = vmatprep.subr.bf16.mxu1 %v9998_v7  ;;  %v10038_v7 = vld [vmem:[%s14454_s1 + $0x1fa0] ss:$16 sps:$4 sm:$0xff]  }
 0x1da   : > { %7178 = vmatpush1.bf16.msra.mxu0 %v9993_v12  ;;  %v10043_v12 = vld [vmem:[%s14454_s1 + $0x1d84] ss:$16 sps:$4 sm:$0xff]  }
 0x1db   : > { %7221 = vmatpush1.bf16.msra.mxu1 %v9996_v13  ;;  %7179 = vmatprep.subr.bf16.mxu0 %v10001_v58  ;;  %v10046_v13 = vld [vmem:[%s14454_s1 + $0x1f84] ss:$16 sps:$4 sm:$0xff]   ;;  %v10041_v58 = vld [vmem:[%s14454_s1 + $0x1d80] ss:$16 sps:$4 sm:$0xff]  }
 0x1dc   : > { %7222 = vmatprep.subr.bf16.mxu1 %v10004_v59  ;;  %v10044_v59 = vld [vmem:[%s14454_s1 + $0x1f80] ss:$16 sps:$4 sm:$0xff]  }
 0x1de   : > { %7180 = vmatpush1.bf16.msra.mxu0 %v9999_v60  ;;  %v10049_v60 = vld [vmem:[%s14454_s1 + $0x1d64] ss:$16 sps:$4 sm:$0xff]  }
 0x1df   : > { %7223 = vmatpush1.bf16.msra.mxu1 %v10002_v61  ;;  %7181 = vmatprep.subr.bf16.mxu0 %v10007_v62  ;;  %v10052_v61 = vld [vmem:[%s14454_s1 + $0x1f64] ss:$16 sps:$4 sm:$0xff]   ;;  %v10047_v62 = vld [vmem:[%s14454_s1 + $0x1d60] ss:$16 sps:$4 sm:$0xff]  }
 0x1e0   : > { %7224 = vmatprep.subr.bf16.mxu1 %v10010_v63  ;;  %v10050_v63 = vld [vmem:[%s14454_s1 + $0x1f60] ss:$16 sps:$4 sm:$0xff]  }
 0x1e2   : > { %7182 = vmatpush1.bf16.msra.mxu0 %v10005_v0  ;;  %v10055_v0 = vld [vmem:[%s14454_s1 + $0x1d44] ss:$16 sps:$4 sm:$0xff]  }
 0x1e3   : > { %7225 = vmatpush1.bf16.msra.mxu1 %v10008_v1  ;;  %7183 = vmatprep.subr.bf16.mxu0 %v10013_v2  ;;  %v10058_v1 = vld [vmem:[%s14454_s1 + $0x1f44] ss:$16 sps:$4 sm:$0xff]   ;;  %v10053_v2 = vld [vmem:[%s14454_s1 + $0x1d40] ss:$16 sps:$4 sm:$0xff]  }
 0x1e4   : > { %7226 = vmatprep.subr.bf16.mxu1 %v10016_v3  ;;  %v10056_v3 = vld [vmem:[%s14454_s1 + $0x1f40] ss:$16 sps:$4 sm:$0xff]  }
 0x1e6   : > { %7184 = vmatpush1.bf16.msra.mxu0 %v10011_v4  ;;  %v10061_v4 = vld [vmem:[%s14454_s1 + $0x1d24] ss:$16 sps:$4 sm:$0xff]  }
 0x1e7   : > { %7227 = vmatpush1.bf16.msra.mxu1 %v10014_v5  ;;  %7185 = vmatprep.subr.bf16.mxu0 %v10019_v14  ;;  %v10064_v5 = vld [vmem:[%s14454_s1 + $0x1f24] ss:$16 sps:$4 sm:$0xff]   ;;  %v10059_v14 = vld [vmem:[%s14454_s1 + $0x1d20] ss:$16 sps:$4 sm:$0xff]  }
 0x1e8   : > { %7228 = vmatprep.subr.bf16.mxu1 %v10022_v46  ;;  %v10062_v46 = vld [vmem:[%s14454_s1 + $0x1f20] ss:$16 sps:$4 sm:$0xff]  }
 0x1ea   : > { %7186 = vmatpush1.bf16.msra.mxu0 %v10017_v51  ;;  %v10067_v51 = vld [vmem:[%s14454_s1 + $0x1d04] ss:$16 sps:$4 sm:$0xff]  }
 0x1eb   : > { %7229 = vmatpush1.bf16.msra.mxu1 %v10020_v15  ;;  %7187 = vmatprep.subr.bf16.mxu0 %v10025_v23  ;;  %v10070_v15 = vld [vmem:[%s14454_s1 + $0x1f04] ss:$16 sps:$4 sm:$0xff]   ;;  %v10065_v23 = vld [vmem:[%s14454_s1 + $0x1d00] ss:$16 sps:$4 sm:$0xff]  }
 0x1ec   : > { %7230 = vmatprep.subr.bf16.mxu1 %v10028_v34  ;;  %v10068_v34 = vld [vmem:[%s14454_s1 + $0x1f00] ss:$16 sps:$4 sm:$0xff]  }
 0x1ee   : > { %7188 = vmatpush2.bf16.msra.mxu0 %v10023_v28  ;;  %v10073_v28 = vld [vmem:[%s14454_s1 + $0xec] ss:$16 sps:$4 sm:$0xff]  }
 0x1ef   : > { %7231 = vmatpush2.bf16.msra.mxu1 %v10026_v31  ;;  %7189 = vmatprep.subr.bf16.mxu0 %v10031_v22  ;;  %v10076_v31 = vld [vmem:[%s14454_s1 + $0x2ec] ss:$16 sps:$4 sm:$0xff]   ;;  %v10071_v22 = vld [vmem:[%s14454_s1 + $0xe8] ss:$16 sps:$4 sm:$0xff]  }
 0x1f0   : > { %7232 = vmatprep.subr.bf16.mxu1 %v10034_v26  ;;  %v10074_v26 = vld [vmem:[%s14454_s1 + $0x2e8] ss:$16 sps:$4 sm:$0xff]  }
 0x1f2   : > { %7190 = vmatpush2.bf16.msra.mxu0 %v10029_v38  ;;  %v12694_v38 = vcombine.low %v12463_v16, %v12466_v17  ;;  %v10077_v16 = vld [vmem:[%s14454_s1 + $0xc8] ss:$16 sps:$4 sm:$0xff]  }
 0x1f3   : > { %7233 = vmatpush2.bf16.msra.mxu1 %v10032_v39  ;;  %7191 = vmatprep.subr.bf16.mxu0 %v10037_v42  ;;  %v12698_v39 = vcombine.low %v12469_v18, %v12472_v19  ;;  %v10079_v42 = vld [vmem:[%s14454_s1 + $0xcc] ss:$16 sps:$4 sm:$0xff]   ;;  %v10080_v17 = vld [vmem:[%s14454_s1 + $0x2c8] ss:$16 sps:$4 sm:$0xff]  }
 0x1f4   : > { %7234 = vmatprep.subr.bf16.mxu1 %v10040_v54  ;;  %14465 = vst [vmem:[#allocation5_spill] sm:$0xff] %v12694_v38  ;;  %v10082_v54 = vld [vmem:[%s14454_s1 + $0x2cc] ss:$16 sps:$4 sm:$0xff]  }
 0x1f5   : > { %14466 = vst [vmem:[#allocation6_spill] sm:$0xff] %v12698_v39  ;;  %v10085_v18 = vld [vmem:[%s14454_s1 + $0xac] ss:$16 sps:$4 sm:$0xff]  }
 0x1f6   : > { %7192 = vmatpush2.bf16.msra.mxu0 %v10035_v6  ;;  %v10088_v19 = vld [vmem:[%s14454_s1 + $0x2ac] ss:$16 sps:$4 sm:$0xff]   ;;  %v10083_v6 = vld [vmem:[%s14454_s1 + $0xa8] ss:$16 sps:$4 sm:$0xff]  }
 0x1f7   : > { %7235 = vmatpush2.bf16.msra.mxu1 %v10038_v7  ;;  %7193 = vmatprep.subr.bf16.mxu0 %v10043_v12  ;;  %v10086_v7 = vld [vmem:[%s14454_s1 + $0x2a8] ss:$16 sps:$4 sm:$0xff]   ;;  %v10091_v12 = vld [vmem:[%s14454_s1 + $0x8c] ss:$16 sps:$4 sm:$0xff]  }
 0x1f8   : > { %7236 = vmatprep.subr.bf16.mxu1 %v10046_v13  ;;  %v10094_v13 = vld [vmem:[%s14454_s1 + $0x28c] ss:$16 sps:$4 sm:$0xff]  }
 0x1fa   : > { %7194 = vmatpush2.bf16.msra.mxu0 %v10041_v58  ;;  %v10097_v58 = vld [vmem:[%s14454_s1 + $0x6c] ss:$16 sps:$4 sm:$0xff]  }
 0x1fb   : > { %7237 = vmatpush2.bf16.msra.mxu1 %v10044_v59  ;;  %7195 = vmatprep.subr.bf16.mxu0 %v10049_v60  ;;  %v10100_v59 = vld [vmem:[%s14454_s1 + $0x26c] ss:$16 sps:$4 sm:$0xff]   ;;  %v10095_v60 = vld [vmem:[%s14454_s1 + $0x68] ss:$16 sps:$4 sm:$0xff]  }
 0x1fc   : > { %7238 = vmatprep.subr.bf16.mxu1 %v10052_v61  ;;  %v10098_v61 = vld [vmem:[%s14454_s1 + $0x268] ss:$16 sps:$4 sm:$0xff]  }
 0x1fe   : > { %7196 = vmatpush2.bf16.msra.mxu0 %v10047_v62  ;;  %v10103_v62 = vld [vmem:[%s14454_s1 + $0x4c] ss:$16 sps:$4 sm:$0xff]  }
 0x1ff   : > { %7239 = vmatpush2.bf16.msra.mxu1 %v10050_v63  ;;  %7197 = vmatprep.subr.bf16.mxu0 %v10055_v0  ;;  %v10106_v63 = vld [vmem:[%s14454_s1 + $0x24c] ss:$16 sps:$4 sm:$0xff]   ;;  %v10101_v0 = vld [vmem:[%s14454_s1 + $0x48] ss:$16 sps:$4 sm:$0xff]  }
 0x200   : > { %7240 = vmatprep.subr.bf16.mxu1 %v10058_v1  ;;  %v10104_v1 = vld [vmem:[%s14454_s1 + $0x248] ss:$16 sps:$4 sm:$0xff]  }
 0x202   : > { %7198 = vmatpush2.bf16.msra.mxu0 %v10053_v2  ;;  %v10109_v2 = vld [vmem:[%s14454_s1 + $0x2c] ss:$16 sps:$4 sm:$0xff]  }
 0x203   : > { %7241 = vmatpush2.bf16.msra.mxu1 %v10056_v3  ;;  %7199 = vmatprep.subr.bf16.mxu0 %v10061_v4  ;;  %v10112_v3 = vld [vmem:[%s14454_s1 + $0x22c] ss:$16 sps:$4 sm:$0xff]   ;;  %v10107_v4 = vld [vmem:[%s14454_s1 + $0x28] ss:$16 sps:$4 sm:$0xff]  }
 0x204   : > { %7242 = vmatprep.subr.bf16.mxu1 %v10064_v5  ;;  %v10110_v5 = vld [vmem:[%s14454_s1 + $0x228] ss:$16 sps:$4 sm:$0xff]  }
 0x206   : > { %7200 = vmatpush2.bf16.msra.mxu0 %v10059_v14  ;;  %v10115_v14 = vld [vmem:[%s14454_s1 + $0xc] ss:$16 sps:$4 sm:$0xff]  }
 0x207   : > { %7243 = vmatpush2.bf16.msra.mxu1 %v10062_v46  ;;  %7201 = vmatprep.subr.bf16.mxu0 %v10067_v51  ;;  %v10118_v46 = vld [vmem:[%s14454_s1 + $0x20c] ss:$16 sps:$4 sm:$0xff]   ;;  %v10113_v51 = vld [vmem:[%s14454_s1 + $0x8] ss:$16 sps:$4 sm:$0xff]  }
 0x208   : > { %7244 = vmatprep.subr.bf16.mxu1 %v10070_v15  ;;  %v10116_v15 = vld [vmem:[%s14454_s1 + $0x208] ss:$16 sps:$4 sm:$0xff]  }
 0x20a   : > { %7202 = vmatpush2.bf16.msra.mxu0 %v10065_v23  ;;  %v10121_v23 = vld [vmem:[%s14454_s1 + $0x1ec] ss:$16 sps:$4 sm:$0xff]  }
 0x20b   : > { %7245 = vmatpush2.bf16.msra.mxu1 %v10068_v34  ;;  %7257 = vmatprep.subr.bf16.mxu0 %v10073_v28  ;;  %v10124_v34 = vld [vmem:[%s14454_s1 + $0x3ec] ss:$16 sps:$4 sm:$0xff]   ;;  %v10119_v28 = vld [vmem:[%s14454_s1 + $0x1e8] ss:$16 sps:$4 sm:$0xff]  }
 0x20c   : > { %7300 = vmatprep.subr.bf16.mxu1 %v10076_v31  ;;  %v10122_v31 = vld [vmem:[%s14454_s1 + $0x3e8] ss:$16 sps:$4 sm:$0xff]  }
 0x20d   : > { %7204 = vmatmul.mubr.bf16.vlgmr.msra.gmra.mxu0 %v12694_v38 }
 0x20e   : > { %7247 = vmatmul.mubr.bf16.vlgmr.msra.gmra.mxu1 %v12698_v39  ;;  %7258 = vmatpush1.bf16.msra.mxu0 %v10071_v22  ;;  %v10127_v22 = vld [vmem:[%s14454_s1 + $0x1cc] ss:$16 sps:$4 sm:$0xff]  }
 0x20f   : > { %7301 = vmatpush1.bf16.msra.mxu1 %v10074_v26  ;;  %7259 = vmatprep.subr.bf16.mxu0 %v10079_v42  ;;  %v10130_v26 = vld [vmem:[%s14454_s1 + $0x3cc] ss:$16 sps:$4 sm:$0xff]   ;;  %v10125_v42 = vld [vmem:[%s14454_s1 + $0x1c8] ss:$16 sps:$4 sm:$0xff]  }
 0x210   : > { %7302 = vmatprep.subr.bf16.mxu1 %v10082_v54  ;;  %7289 = vmatprep.mubr.bf16.mxu0 %v11065_v53  ;;  %v10089_v53 = vld [vmem:[%s14454_s1 + $0x88] ss:$16 sps:$4 sm:$0xff]   ;;  %v10313_v39 = vld [vmem:[%s14454_s1 + $0x9ec] ss:$16 sps:$4 sm:$0xff]  }
 0x211   : > { %7332 = vmatprep.mubr.bf16.mxu1 %v11070_v55  ;;  %v10092_v55 = vld [vmem:[%s14454_s1 + $0x288] ss:$16 sps:$4 sm:$0xff]  }
 0x212   : > { %7260 = vmatpush1.bf16.msra.mxu0 %v10077_v16  ;;  %v10128_v54 = vld [vmem:[%s14454_s1 + $0x3c8] ss:$16 sps:$4 sm:$0xff]   ;;  %v10133_v16 = vld [vmem:[%s14454_s1 + $0x1ac] ss:$16 sps:$4 sm:$0xff]  }
 0x213   : > { %7303 = vmatpush1.bf16.msra.mxu1 %v10080_v17  ;;  %7261 = vmatprep.subr.bf16.mxu0 %v10085_v18  ;;  %v10136_v17 = vld [vmem:[%s14454_s1 + $0x3ac] ss:$16 sps:$4 sm:$0xff]   ;;  %v10131_v18 = vld [vmem:[%s14454_s1 + $0x1a8] ss:$16 sps:$4 sm:$0xff]  }
 0x214   : > { %7304 = vmatprep.subr.bf16.mxu1 %v10088_v19  ;;  %v10134_v19 = vld [vmem:[%s14454_s1 + $0x3a8] ss:$16 sps:$4 sm:$0xff]  }
 0x216   : > { %7262 = vmatpush1.bf16.msra.mxu0 %v10083_v6  ;;  %v10139_v6 = vld [vmem:[%s14454_s1 + $0x18c] ss:$16 sps:$4 sm:$0xff]  }
 0x217   : > { %7305 = vmatpush1.bf16.msra.mxu1 %v10086_v7  ;;  %7263 = vmatprep.subr.bf16.mxu0 %v10091_v12  ;;  %v10142_v7 = vld [vmem:[%s14454_s1 + $0x38c] ss:$16 sps:$4 sm:$0xff]   ;;  %v10137_v12 = vld [vmem:[%s14454_s1 + $0x188] ss:$16 sps:$4 sm:$0xff]  }
 0x218   : > { %7306 = vmatprep.subr.bf16.mxu1 %v10094_v13  ;;  %v10140_v13 = vld [vmem:[%s14454_s1 + $0x388] ss:$16 sps:$4 sm:$0xff]  }
 0x21a   : > { %7264 = vmatpush1.bf16.msra.mxu0 %v10089_v53  ;;  %v10145_v53 = vld [vmem:[%s14454_s1 + $0x16c] ss:$16 sps:$4 sm:$0xff]  }
 0x21b   : > { %7307 = vmatpush1.bf16.msra.mxu1 %v10092_v55  ;;  %7265 = vmatprep.subr.bf16.mxu0 %v10097_v58  ;;  %v10148_v55 = vld [vmem:[%s14454_s1 + $0x36c] ss:$16 sps:$4 sm:$0xff]   ;;  %v10143_v58 = vld [vmem:[%s14454_s1 + $0x168] ss:$16 sps:$4 sm:$0xff]  }
 0x21c   : > { %7308 = vmatprep.subr.bf16.mxu1 %v10100_v59  ;;  %v10146_v59 = vld [vmem:[%s14454_s1 + $0x368] ss:$16 sps:$4 sm:$0xff]  }
 0x21e   : > { %7266 = vmatpush1.bf16.msra.mxu0 %v10095_v60  ;;  %v10151_v60 = vld [vmem:[%s14454_s1 + $0x14c] ss:$16 sps:$4 sm:$0xff]  }
 0x21f   : > { %7309 = vmatpush1.bf16.msra.mxu1 %v10098_v61  ;;  %7267 = vmatprep.subr.bf16.mxu0 %v10103_v62  ;;  %v10154_v61 = vld [vmem:[%s14454_s1 + $0x34c] ss:$16 sps:$4 sm:$0xff]   ;;  %v10149_v62 = vld [vmem:[%s14454_s1 + $0x148] ss:$16 sps:$4 sm:$0xff]  }
 0x220   : > { %7310 = vmatprep.subr.bf16.mxu1 %v10106_v63  ;;  %v10152_v63 = vld [vmem:[%s14454_s1 + $0x348] ss:$16 sps:$4 sm:$0xff]  }
 0x222   : > { %7268 = vmatpush1.bf16.msra.mxu0 %v10101_v0  ;;  %v10157_v0 = vld [vmem:[%s14454_s1 + $0x12c] ss:$16 sps:$4 sm:$0xff]  }
 0x223   : > { %7311 = vmatpush1.bf16.msra.mxu1 %v10104_v1  ;;  %7269 = vmatprep.subr.bf16.mxu0 %v10109_v2  ;;  %v10160_v1 = vld [vmem:[%s14454_s1 + $0x32c] ss:$16 sps:$4 sm:$0xff]   ;;  %v10155_v2 = vld [vmem:[%s14454_s1 + $0x128] ss:$16 sps:$4 sm:$0xff]  }
 0x224   : > { %7312 = vmatprep.subr.bf16.mxu1 %v10112_v3  ;;  %v10158_v3 = vld [vmem:[%s14454_s1 + $0x328] ss:$16 sps:$4 sm:$0xff]  }
 0x226   : > { %7270 = vmatpush1.bf16.msra.mxu0 %v10107_v4  ;;  %v10163_v4 = vld [vmem:[%s14454_s1 + $0x10c] ss:$16 sps:$4 sm:$0xff]  }
 0x227   : > { %7313 = vmatpush1.bf16.msra.mxu1 %v10110_v5  ;;  %7271 = vmatprep.subr.bf16.mxu0 %v10115_v14  ;;  %v10166_v5 = vld [vmem:[%s14454_s1 + $0x30c] ss:$16 sps:$4 sm:$0xff]   ;;  %v10161_v14 = vld [vmem:[%s14454_s1 + $0x108] ss:$16 sps:$4 sm:$0xff]  }
 0x228   : > { %7314 = vmatprep.subr.bf16.mxu1 %v10118_v46  ;;  %v10164_v46 = vld [vmem:[%s14454_s1 + $0x308] ss:$16 sps:$4 sm:$0xff]  }
 0x22a   : > { %7272 = vmatpush1.bf16.msra.mxu0 %v10113_v51  ;;  %v10169_v51 = vld [vmem:[%s14454_s1 + $0x4ec] ss:$16 sps:$4 sm:$0xff]  }
 0x22b   : > { %7315 = vmatpush1.bf16.msra.mxu1 %v10116_v15  ;;  %7273 = vmatprep.subr.bf16.mxu0 %v10121_v23  ;;  %v10172_v15 = vld [vmem:[%s14454_s1 + $0x6ec] ss:$16 sps:$4 sm:$0xff]   ;;  %v10167_v23 = vld [vmem:[%s14454_s1 + $0x4e8] ss:$16 sps:$4 sm:$0xff]  }
 0x22c   : > { %7316 = vmatprep.subr.bf16.mxu1 %v10124_v34  ;;  %v10170_v34 = vld [vmem:[%s14454_s1 + $0x6e8] ss:$16 sps:$4 sm:$0xff]  }
 0x22e   : > { %7274 = vmatpush2.bf16.msra.mxu0 %v10119_v28  ;;  %v10175_v28 = vld [vmem:[%s14454_s1 + $0x4cc] ss:$16 sps:$4 sm:$0xff]  }
 0x22f   : > { %7317 = vmatpush2.bf16.msra.mxu1 %v10122_v31  ;;  %7275 = vmatprep.subr.bf16.mxu0 %v10127_v22  ;;  %v10178_v31 = vld [vmem:[%s14454_s1 + $0x6cc] ss:$16 sps:$4 sm:$0xff]   ;;  %v10173_v22 = vld [vmem:[%s14454_s1 + $0x4c8] ss:$16 sps:$4 sm:$0xff]  }
 0x230   : > { %7318 = vmatprep.subr.bf16.mxu1 %v10130_v26  ;;  %v10176_v26 = vld [vmem:[%s14454_s1 + $0x6c8] ss:$16 sps:$4 sm:$0xff]  }
 0x232   : > { %7276 = vmatpush2.bf16.msra.mxu0 %v10125_v42  ;;  %v10181_v42 = vld [vmem:[%s14454_s1 + $0x4ac] ss:$16 sps:$4 sm:$0xff]  }
 0x233   : > { %7319 = vmatpush2.bf16.msra.mxu1 %v10128_v54  ;;  %7277 = vmatprep.subr.bf16.mxu0 %v10133_v16  ;;  %v10184_v54 = vld [vmem:[%s14454_s1 + $0x6ac] ss:$16 sps:$4 sm:$0xff]   ;;  %v10179_v16 = vld [vmem:[%s14454_s1 + $0x4a8] ss:$16 sps:$4 sm:$0xff]  }
 0x234   : > { %7320 = vmatprep.subr.bf16.mxu1 %v10136_v17  ;;  %v10190_v17 = vld [vmem:[%s14454_s1 + $0x68c] ss:$16 sps:$4 sm:$0xff]  }
 0x236   : > { %7278 = vmatpush2.bf16.msra.mxu0 %v10131_v18  ;;  %v10185_v18 = vld [vmem:[%s14454_s1 + $0x488] ss:$16 sps:$4 sm:$0xff]  }
 0x237   : > { %7321 = vmatpush2.bf16.msra.mxu1 %v10134_v19  ;;  %7279 = vmatprep.subr.bf16.mxu0 %v10139_v6  ;;  %v10196_v19 = vld [vmem:[%s14454_s1 + $0x66c] ss:$16 sps:$4 sm:$0xff]   ;;  %v10191_v6 = vld [vmem:[%s14454_s1 + $0x468] ss:$16 sps:$4 sm:$0xff]  }
 0x238   : > { %7322 = vmatprep.subr.bf16.mxu1 %v10142_v7  ;;  %v10194_v7 = vld [vmem:[%s14454_s1 + $0x668] ss:$16 sps:$4 sm:$0xff]  }
 0x23a   : > { %7280 = vmatpush2.bf16.msra.mxu0 %v10137_v12  ;;  %v10199_v12 = vld [vmem:[%s14454_s1 + $0x44c] ss:$16 sps:$4 sm:$0xff]  }
 0x23b   : > { %7323 = vmatpush2.bf16.msra.mxu1 %v10140_v13  ;;  %7281 = vmatprep.subr.bf16.mxu0 %v10145_v53  ;;  %v10202_v13 = vld [vmem:[%s14454_s1 + $0x64c] ss:$16 sps:$4 sm:$0xff]   ;;  %v10197_v53 = vld [vmem:[%s14454_s1 + $0x448] ss:$16 sps:$4 sm:$0xff]  }
 0x23c   : > { %7324 = vmatprep.subr.bf16.mxu1 %v10148_v55  ;;  %v10200_v55 = vld [vmem:[%s14454_s1 + $0x648] ss:$16 sps:$4 sm:$0xff]  }
 0x23e   : > { %7282 = vmatpush2.bf16.msra.mxu0 %v10143_v58  ;;  %v10205_v58 = vld [vmem:[%s14454_s1 + $0x42c] ss:$16 sps:$4 sm:$0xff]  }
 0x23f   : > { %7325 = vmatpush2.bf16.msra.mxu1 %v10146_v59  ;;  %7283 = vmatprep.subr.bf16.mxu0 %v10151_v60  ;;  %v10208_v59 = vld [vmem:[%s14454_s1 + $0x62c] ss:$16 sps:$4 sm:$0xff]   ;;  %v10203_v60 = vld [vmem:[%s14454_s1 + $0x428] ss:$16 sps:$4 sm:$0xff]  }
 0x240   : > { %7326 = vmatprep.subr.bf16.mxu1 %v10154_v61  ;;  %v10206_v61 = vld [vmem:[%s14454_s1 + $0x628] ss:$16 sps:$4 sm:$0xff]  }
 0x242   : > { %7284 = vmatpush2.bf16.msra.mxu0 %v10149_v62  ;;  %v10211_v62 = vld [vmem:[%s14454_s1 + $0x40c] ss:$16 sps:$4 sm:$0xff]  }
 0x243   : > { %7327 = vmatpush2.bf16.msra.mxu1 %v10152_v63  ;;  %7285 = vmatprep.subr.bf16.mxu0 %v10157_v0  ;;  %v10214_v63 = vld [vmem:[%s14454_s1 + $0x60c] ss:$16 sps:$4 sm:$0xff]   ;;  %v10209_v0 = vld [vmem:[%s14454_s1 + $0x408] ss:$16 sps:$4 sm:$0xff]  }
 0x244   : > { %7328 = vmatprep.subr.bf16.mxu1 %v10160_v1  ;;  %v10212_v1 = vld [vmem:[%s14454_s1 + $0x608] ss:$16 sps:$4 sm:$0xff]  }
 0x246   : > { %7286 = vmatpush2.bf16.msra.mxu0 %v10155_v2  ;;  %v10217_v2 = vld [vmem:[%s14454_s1 + $0x5ec] ss:$16 sps:$4 sm:$0xff]  }
 0x247   : > { %7329 = vmatpush2.bf16.msra.mxu1 %v10158_v3  ;;  %7287 = vmatprep.subr.bf16.mxu0 %v10163_v4  ;;  %v10220_v3 = vld [vmem:[%s14454_s1 + $0x7ec] ss:$16 sps:$4 sm:$0xff]   ;;  %v10215_v4 = vld [vmem:[%s14454_s1 + $0x5e8] ss:$16 sps:$4 sm:$0xff]  }
 0x248   : > { %7330 = vmatprep.subr.bf16.mxu1 %v10166_v5  ;;  %v10218_v5 = vld [vmem:[%s14454_s1 + $0x7e8] ss:$16 sps:$4 sm:$0xff]  }
 0x24a   : > { %7288 = vmatpush2.bf16.msra.mxu0 %v10161_v14  ;;  %v12996_v14 = vpop.f32.mrf.mxu0 }
 0x24b   : > { %7331 = vmatpush2.bf16.msra.mxu1 %v10164_v46  ;;  %7343 = vmatprep.subr.bf16.mxu0 %v10169_v51  ;;  %v12998_v46 = vpop.f32.mrf.mxu1  ;;  %v10223_v51 = vld [vmem:[%s14454_s1 + $0x5cc] ss:$16 sps:$4 sm:$0xff]  }
 0x24c   : > { %7386 = vmatprep.subr.bf16.mxu1 %v10172_v15  ;;  %v10226_v15 = vld [vmem:[%s14454_s1 + $0x7cc] ss:$16 sps:$4 sm:$0xff]  }
 0x24d   : > { %7290 = vmatmul.mubr.bf16.vlgmr.msra.gmra.mxu0 %v11122_v8  ;;  %v10182_v8 = vld [vmem:[%s14454_s1 + $0x6a8] ss:$16 sps:$4 sm:$0xff]  }
 0x24e   : > { %7333 = vmatmul.mubr.bf16.vlgmr.msra.gmra.mxu1 %v11124_v9  ;;  %7344 = vmatpush1.bf16.msra.mxu0 %v10167_v23  ;;  %v10187_v9 = vld [vmem:[%s14454_s1 + $0x48c] ss:$16 sps:$4 sm:$0xff]   ;;  %v10221_v23 = vld [vmem:[%s14454_s1 + $0x5c8] ss:$16 sps:$4 sm:$0xff]  }
 0x24f   : > { %7387 = vmatpush1.bf16.msra.mxu1 %v10170_v34  ;;  %7345 = vmatprep.subr.bf16.mxu0 %v10175_v28  ;;  %v10224_v34 = vld [vmem:[%s14454_s1 + $0x7c8] ss:$16 sps:$4 sm:$0xff]   ;;  %v13012_v28 = vpop.f32.mrf.mxu0 }
 0x250   : > { %7388 = vmatprep.subr.bf16.mxu1 %v10178_v31  ;;  %7375 = vmatprep.mubr.bf16.mxu0 %v11223_v41  ;;  %v10188_v41 = vld [vmem:[%s14454_s1 + $0x688] ss:$16 sps:$4 sm:$0xff]   ;;  %v13014_v31 = vpop.f32.mrf.mxu1 }
 0x251   : > { %7418 = vmatprep.mubr.bf16.mxu1 %v11230_v43  ;;  %v10193_v43 = vld [vmem:[%s14454_s1 + $0x46c] ss:$16 sps:$4 sm:$0xff]   ;;  %v6649_v38 = vadd.f32 %v13014_v31, %v13012_v28 }
 0x252   : > { %7346 = vmatpush1.bf16.msra.mxu0 %v10173_v22  ;;  %v10229_v22 = vld [vmem:[%s14454_s1 + $0x5ac] ss:$16 sps:$4 sm:$0xff]  }
 0x253   : > { %7389 = vmatpush1.bf16.msra.mxu1 %v10176_v26  ;;  %7347 = vmatprep.subr.bf16.mxu0 %v10181_v42  ;;  %v10232_v26 = vld [vmem:[%s14454_s1 + $0x7ac] ss:$16 sps:$4 sm:$0xff]   ;;  %v10227_v42 = vld [vmem:[%s14454_s1 + $0x5a8] ss:$16 sps:$4 sm:$0xff]  }
 0x254   : > { %7390 = vmatprep.subr.bf16.mxu1 %v10184_v54  ;;  %v10230_v54 = vld [vmem:[%s14454_s1 + $0x7a8] ss:$16 sps:$4 sm:$0xff]  }
 0x256   : > { %7348 = vmatpush1.bf16.msra.mxu0 %v10179_v16  ;;  %v13028_v16 = vpop.f32.mrf.mxu0 }
 0x257   : > { %7391 = vmatpush1.bf16.msra.mxu1 %v10182_v8  ;;  %7349 = vmatprep.subr.bf16.mxu0 %v10187_v9  ;;  %v13030_v8 = vpop.f32.mrf.mxu1  ;;  %v10235_v9 = vld [vmem:[%s14454_s1 + $0x58c] ss:$16 sps:$4 sm:$0xff]  }
 0x258   : > { %7392 = vmatprep.subr.bf16.mxu1 %v10190_v17  ;;  %v10238_v17 = vld [vmem:[%s14454_s1 + $0x78c] ss:$16 sps:$4 sm:$0xff]   ;;  %v6651_v28 = vadd.f32 %v13030_v8, %v13028_v16 }
 0x259   : > { %v10328_v8 = vld [vmem:[%s14454_s1 + $0xbac] ss:$16 sps:$4 sm:$0xff]  }
 0x25a   : > { %7350 = vmatpush1.bf16.msra.mxu0 %v10185_v18  ;;  %v10233_v18 = vld [vmem:[%s14454_s1 + $0x588] ss:$16 sps:$4 sm:$0xff]  }
 0x25b   : > { %7393 = vmatpush1.bf16.msra.mxu1 %v10188_v41  ;;  %7351 = vmatprep.subr.bf16.mxu0 %v10193_v43  ;;  %v10236_v41 = vld [vmem:[%s14454_s1 + $0x788] ss:$16 sps:$4 sm:$0xff]   ;;  %v13044_v43 = vpop.f32.mrf.mxu0 }
 0x25c   : > { %7394 = vmatprep.subr.bf16.mxu1 %v10196_v19  ;;  %v13046_v19 = vpop.f32.mrf.mxu1 }
 0x25e   : > { %7352 = vmatpush1.bf16.msra.mxu0 %v10191_v6  ;;  %v10241_v6 = vld [vmem:[%s14454_s1 + $0x56c] ss:$16 sps:$4 sm:$0xff]  }
 0x25f   : > { %7395 = vmatpush1.bf16.msra.mxu1 %v10194_v7  ;;  %7353 = vmatprep.subr.bf16.mxu0 %v10199_v12  ;;  %v10244_v7 = vld [vmem:[%s14454_s1 + $0x76c] ss:$16 sps:$4 sm:$0xff]   ;;  %v13054_v12 = vpop.f32.mrf.mxu0 }
 0x260   : > { %7396 = vmatprep.subr.bf16.mxu1 %v10202_v13  ;;  %v13056_v13 = vpop.f32.mrf.mxu1 }
 0x262   : > { %7354 = vmatpush1.bf16.msra.mxu0 %v10197_v53  ;;  %v10239_v53 = vld [vmem:[%s14454_s1 + $0x568] ss:$16 sps:$4 sm:$0xff]  }
 0x263   : > { %7397 = vmatpush1.bf16.msra.mxu1 %v10200_v55  ;;  %7355 = vmatprep.subr.bf16.mxu0 %v10205_v58  ;;  %v10242_v55 = vld [vmem:[%s14454_s1 + $0x768] ss:$16 sps:$4 sm:$0xff]   ;;  %v10247_v58 = vld [vmem:[%s14454_s1 + $0x54c] ss:$16 sps:$4 sm:$0xff]  }
 0x264   : > { %7398 = vmatprep.subr.bf16.mxu1 %v10208_v59  ;;  %v10250_v59 = vld [vmem:[%s14454_s1 + $0x74c] ss:$16 sps:$4 sm:$0xff]  }
 0x266   : > { %7356 = vmatpush1.bf16.msra.mxu0 %v10203_v60  ;;  %v13070_v60 = vpop.f32.mrf.mxu0 }
 0x267   : > { %7399 = vmatpush1.bf16.msra.mxu1 %v10206_v61  ;;  %7357 = vmatprep.subr.bf16.mxu0 %v10211_v62  ;;  %v13072_v61 = vpop.f32.mrf.mxu1  ;;  %v10245_v62 = vld [vmem:[%s14454_s1 + $0x548] ss:$16 sps:$4 sm:$0xff]   ;;  %v6692_v31 = vadd.f32 %v13070_v60, %v6649_v38 }
 0x268   : > { %7400 = vmatprep.subr.bf16.mxu1 %v10214_v63  ;;  %v10248_v63 = vld [vmem:[%s14454_s1 + $0x748] ss:$16 sps:$4 sm:$0xff]  }
 0x26a   : > { %7358 = vmatpush1.bf16.msra.mxu0 %v10209_v0  ;;  %v10253_v0 = vld [vmem:[%s14454_s1 + $0x52c] ss:$16 sps:$4 sm:$0xff]  }
 0x26b   : > { %7401 = vmatpush1.bf16.msra.mxu1 %v10212_v1  ;;  %7359 = vmatprep.subr.bf16.mxu0 %v10217_v2  ;;  %v10256_v1 = vld [vmem:[%s14454_s1 + $0x72c] ss:$16 sps:$4 sm:$0xff]   ;;  %v13086_v2 = vpop.f32.mrf.mxu0 }
 0x26c   : > { %7402 = vmatprep.subr.bf16.mxu1 %v10220_v3  ;;  %v13088_v3 = vpop.f32.mrf.mxu1 }
 0x26e   : > { %7360 = vmatpush2.bf16.msra.mxu0 %v10215_v4  ;;  %v10251_v4 = vld [vmem:[%s14454_s1 + $0x528] ss:$16 sps:$4 sm:$0xff]  }
 0x26f   : > { %7403 = vmatpush2.bf16.msra.mxu1 %v10218_v5  ;;  %7361 = vmatprep.subr.bf16.mxu0 %v10223_v51  ;;  %v10254_v5 = vld [vmem:[%s14454_s1 + $0x728] ss:$16 sps:$4 sm:$0xff]   ;;  %v10259_v51 = vld [vmem:[%s14454_s1 + $0x50c] ss:$16 sps:$4 sm:$0xff]  }
 0x270   : > { %7404 = vmatprep.subr.bf16.mxu1 %v10226_v15  ;;  %v10262_v15 = vld [vmem:[%s14454_s1 + $0x70c] ss:$16 sps:$4 sm:$0xff]  }
 0x272   : > { %7362 = vmatpush2.bf16.msra.mxu0 %v10221_v23  ;;  %v13102_v23 = vpop.f32.mrf.mxu0 }
 0x273   : > { %7405 = vmatpush2.bf16.msra.mxu1 %v10224_v34  ;;  %7363 = vmatprep.subr.bf16.mxu0 %v10229_v22  ;;  %v13104_v34 = vpop.f32.mrf.mxu1  ;;  %v10257_v22 = vld [vmem:[%s14454_s1 + $0x508] ss:$16 sps:$4 sm:$0xff]  }
 0x274   : > { %7406 = vmatprep.subr.bf16.mxu1 %v10232_v26  ;;  %v10260_v26 = vld [vmem:[%s14454_s1 + $0x708] ss:$16 sps:$4 sm:$0xff]  }
 0x276   : > { %7364 = vmatpush2.bf16.msra.mxu0 %v10227_v42  ;;  %v13112_v42 = vpop.f32.mrf.mxu0 }
 0x277   : > { %7407 = vmatpush2.bf16.msra.mxu1 %v10230_v54  ;;  %7365 = vmatprep.subr.bf16.mxu0 %v10235_v9  ;;  %v13114_v54 = vpop.f32.mrf.mxu1  ;;  %v10265_v9 = vld [vmem:[%s14454_s1 + $0x8ec] ss:$16 sps:$4 sm:$0xff]  }
 0x278   : > { %7408 = vmatprep.subr.bf16.mxu1 %v10238_v17  ;;  %v10268_v17 = vld [vmem:[%s14454_s1 + $0xaec] ss:$16 sps:$4 sm:$0xff]  }
 0x27a   : > { %7366 = vmatpush2.bf16.msra.mxu0 %v10233_v18  ;;  %v10263_v18 = vld [vmem:[%s14454_s1 + $0x8e8] ss:$16 sps:$4 sm:$0xff]  }
 0x27b   : > { %7409 = vmatpush2.bf16.msra.mxu1 %v10236_v41  ;;  %7367 = vmatprep.subr.bf16.mxu0 %v10241_v6  ;;  %v10266_v41 = vld [vmem:[%s14454_s1 + $0xae8] ss:$16 sps:$4 sm:$0xff]   ;;  %v13128_v6 = vpop.f32.mrf.mxu0 }
 0x27c   : > { %7410 = vmatprep.subr.bf16.mxu1 %v10244_v7  ;;  %v13130_v7 = vpop.f32.mrf.mxu1 }
 0x27e   : > { %7368 = vmatpush2.bf16.msra.mxu0 %v10239_v53  ;;  %v10271_v53 = vld [vmem:[%s14454_s1 + $0x8cc] ss:$16 sps:$4 sm:$0xff]  }
 0x27f   : > { %7411 = vmatpush2.bf16.msra.mxu1 %v10242_v55  ;;  %7369 = vmatprep.subr.bf16.mxu0 %v10247_v58  ;;  %v10274_v55 = vld [vmem:[%s14454_s1 + $0xacc] ss:$16 sps:$4 sm:$0xff]   ;;  %v10269_v58 = vld [vmem:[%s14454_s1 + $0x8c8] ss:$16 sps:$4 sm:$0xff]  }
 0x280   : > { %7412 = vmatprep.subr.bf16.mxu1 %v10250_v59  ;;  %v10272_v59 = vld [vmem:[%s14454_s1 + $0xac8] ss:$16 sps:$4 sm:$0xff]  }
 0x282   : > { %7370 = vmatpush2.bf16.msra.mxu0 %v10245_v62  ;;  %v13146_v62 = vpop.f32.mrf.mxu0 }
 0x283   : > { %7413 = vmatpush2.bf16.msra.mxu1 %v10248_v63  ;;  %7371 = vmatprep.subr.bf16.mxu0 %v10253_v0  ;;  %v13148_v63 = vpop.f32.mrf.mxu1  ;;  %v10275_v0 = vld [vmem:[%s14454_s1 + $0x8a8] ss:$16 sps:$4 sm:$0xff]  }
 0x284   : > { %7414 = vmatprep.subr.bf16.mxu1 %v10256_v1  ;;  %v10278_v1 = vld [vmem:[%s14454_s1 + $0xaa8] ss:$16 sps:$4 sm:$0xff]  }
 0x286   : > { %7372 = vmatpush2.bf16.msra.mxu0 %v10251_v4  ;;  %v13164_v4 = vpop.f32.mrf.mxu0 }
 0x287   : > { %7415 = vmatpush2.bf16.msra.mxu1 %v10254_v5  ;;  %7373 = vmatprep.subr.bf16.mxu0 %v10259_v51  ;;  %v13166_v5 = vpop.f32.mrf.mxu1 }
 0x288   : > { %7416 = vmatprep.subr.bf16.mxu1 %v10262_v15  ;;  %v13174_v51 = vpop.f32.mrf.mxu0 }
 0x289   : > { %v13176_v15 = vpop.f32.mrf.mxu1 }
 0x28a   : > { %7374 = vmatpush2.bf16.msra.mxu0 %v10257_v22  ;;  %v10281_v22 = vld [vmem:[%s14454_s1 + $0x888] ss:$16 sps:$4 sm:$0xff]  }
 0x28b   : > { %7417 = vmatpush2.bf16.msra.mxu1 %v10260_v26  ;;  %7429 = vmatprep.subr.bf16.mxu0 %v10265_v9  ;;  %v10284_v26 = vld [vmem:[%s14454_s1 + $0xa88] ss:$16 sps:$4 sm:$0xff]   ;;  %v10289_v9 = vld [vmem:[%s14454_s1 + $0x86c] ss:$16 sps:$4 sm:$0xff]  }
 0x28c   : > { %7472 = vmatprep.subr.bf16.mxu1 %v10268_v17  ;;  %v10292_v17 = vld [vmem:[%s14454_s1 + $0xa6c] ss:$16 sps:$4 sm:$0xff]  }
 0x28d   : > { %7376 = vmatmul.mubr.bf16.vlgmr.msra.gmra.mxu0 %v11344_v20  ;;  %v10277_v20 = vld [vmem:[%s14454_s1 + $0x8ac] ss:$16 sps:$4 sm:$0xff]  }
 0x28e   : > { %7419 = vmatmul.mubr.bf16.vlgmr.msra.gmra.mxu1 %v11348_v21  ;;  %7430 = vmatpush1.bf16.msra.mxu0 %v10263_v18  ;;  %v10280_v21 = vld [vmem:[%s14454_s1 + $0xaac] ss:$16 sps:$4 sm:$0xff]   ;;  %v13190_v18 = vpop.f32.mrf.mxu0 }
 0x28f   : > { %7473 = vmatpush1.bf16.msra.mxu1 %v10266_v41  ;;  %7431 = vmatprep.subr.bf16.mxu0 %v10271_v53  ;;  %v13192_v41 = vpop.f32.mrf.mxu1  ;;  %v10287_v53 = vld [vmem:[%s14454_s1 + $0x868] ss:$16 sps:$4 sm:$0xff]  }
 0x290   : > { %7474 = vmatprep.subr.bf16.mxu1 %v10274_v55  ;;  %7461 = vmatprep.mubr.bf16.mxu0 %v11387_v33  ;;  %v10283_v33 = vld [vmem:[%s14454_s1 + $0x88c] ss:$16 sps:$4 sm:$0xff]   ;;  %v10290_v55 = vld [vmem:[%s14454_s1 + $0xa68] ss:$16 sps:$4 sm:$0xff]  }
 0x291   : > { %7504 = vmatprep.mubr.bf16.mxu1 %v11394_v35  ;;  %v10286_v35 = vld [vmem:[%s14454_s1 + $0xa8c] ss:$16 sps:$4 sm:$0xff]  }
 0x292   : > { %7432 = vmatpush1.bf16.msra.mxu0 %v10269_v58  ;;  %v10295_v58 = vld [vmem:[%s14454_s1 + $0x84c] ss:$16 sps:$4 sm:$0xff]  }
 0x293   : > { %7475 = vmatpush1.bf16.msra.mxu1 %v10272_v59  ;;  %7433 = vmatprep.subr.bf16.mxu0 %v10277_v20  ;;  %v10298_v59 = vld [vmem:[%s14454_s1 + $0xa4c] ss:$16 sps:$4 sm:$0xff]   ;;  %v13206_v20 = vpop.f32.mrf.mxu0 }
 0x294   : > { %7476 = vmatprep.subr.bf16.mxu1 %v10280_v21  ;;  %v13208_v21 = vpop.f32.mrf.mxu1 }
 0x296   : > { %7434 = vmatpush1.bf16.msra.mxu0 %v10275_v0  ;;  %v10293_v0 = vld [vmem:[%s14454_s1 + $0x848] ss:$16 sps:$4 sm:$0xff]  }
 0x297   : > { %7477 = vmatpush1.bf16.msra.mxu1 %v10278_v1  ;;  %7435 = vmatprep.subr.bf16.mxu0 %v10283_v33  ;;  %v10296_v1 = vld [vmem:[%s14454_s1 + $0xa48] ss:$16 sps:$4 sm:$0xff]   ;;  %v10301_v33 = vld [vmem:[%s14454_s1 + $0x82c] ss:$16 sps:$4 sm:$0xff]  }
 0x298   : > { %7478 = vmatprep.subr.bf16.mxu1 %v10286_v35  ;;  %v10304_v35 = vld [vmem:[%s14454_s1 + $0xa2c] ss:$16 sps:$4 sm:$0xff]  }
 0x29a   : > { %7436 = vmatpush1.bf16.msra.mxu0 %v10281_v22  ;;  %v13222_v22 = vpop.f32.mrf.mxu0 }
 0x29b   : > { %7479 = vmatpush1.bf16.msra.mxu1 %v10284_v26  ;;  %7437 = vmatprep.subr.bf16.mxu0 %v10289_v9  ;;  %v13224_v26 = vpop.f32.mrf.mxu1  ;;  %v10299_v9 = vld [vmem:[%s14454_s1 + $0x828] ss:$16 sps:$4 sm:$0xff]  }
 0x29c   : > { %7480 = vmatprep.subr.bf16.mxu1 %v10292_v17  ;;  %v10302_v17 = vld [vmem:[%s14454_s1 + $0xa28] ss:$16 sps:$4 sm:$0xff]  }
 0x29e   : > { %7438 = vmatpush1.bf16.msra.mxu0 %v10287_v53  ;;  %v13232_v53 = vpop.f32.mrf.mxu0 }
 0x29f   : > { %7481 = vmatpush1.bf16.msra.mxu1 %v10290_v55  ;;  %7439 = vmatprep.subr.bf16.mxu0 %v10295_v58  ;;  %v13234_v55 = vpop.f32.mrf.mxu1  ;;  %v10307_v58 = vld [vmem:[%s14454_s1 + $0x80c] ss:$16 sps:$4 sm:$0xff]  }
 0x2a0   : > { %7482 = vmatprep.subr.bf16.mxu1 %v10298_v59  ;;  %v10310_v59 = vld [vmem:[%s14454_s1 + $0xa0c] ss:$16 sps:$4 sm:$0xff]  }
 0x2a2   : > { %7440 = vmatpush1.bf16.msra.mxu0 %v10293_v0  ;;  %v10305_v0 = vld [vmem:[%s14454_s1 + $0x808] ss:$16 sps:$4 sm:$0xff]  }
 0x2a3   : > { %7483 = vmatpush1.bf16.msra.mxu1 %v10296_v1  ;;  %7441 = vmatprep.subr.bf16.mxu0 %v10301_v33  ;;  %v10308_v1 = vld [vmem:[%s14454_s1 + $0xa08] ss:$16 sps:$4 sm:$0xff]   ;;  %v13248_v33 = vpop.f32.mrf.mxu0 }
 0x2a4   : > { %7484 = vmatprep.subr.bf16.mxu1 %v10304_v35  ;;  %v13250_v35 = vpop.f32.mrf.mxu1 }
 0x2a5   : > { %v13269_v27 = vpop.f32.mrf.mxu0 }
 0x2a6   : > { %7442 = vmatpush1.bf16.msra.mxu0 %v10299_v9  ;;  %v10316_v9 = vld [vmem:[%s14454_s1 + $0xbec] ss:$16 sps:$4 sm:$0xff]   ;;  %v13271_v52 = vpop.f32.mrf.mxu1 }
 0x2a7   : > { %7485 = vmatpush1.bf16.msra.mxu1 %v10302_v17  ;;  %7443 = vmatprep.subr.bf16.mxu0 %v10307_v58  ;;  %v6647_v17 = vadd.f32 %v12998_v46, %v12996_v14  ;;  %v10311_v58 = vld [vmem:[%s14454_s1 + $0x9e8] ss:$16 sps:$4 sm:$0xff]   ;;  %v10319_v14 = vld [vmem:[%s14454_s1 + $0x9cc] ss:$16 sps:$4 sm:$0xff]   ;;  %v13292_v16 = vpop.f32.mrf.mxu0 }
 0x2a8   : > { %7486 = vmatprep.subr.bf16.mxu1 %v10310_v59  ;;  %v10314_v59 = vld [vmem:[%s14454_s1 + $0xbe8] ss:$16 sps:$4 sm:$0xff]   ;;  %v10322_v46 = vld [vmem:[%s14454_s1 + $0xbcc] ss:$16 sps:$4 sm:$0xff]   ;;  %v13294_v38 = vpop.f32.mrf.mxu1 }
 0x2a9   : > { %v6690_v32 = vadd.f32 %v13054_v12, %v6647_v17  ;;  %v6653_v12 = vadd.f32 %v13046_v19, %v13044_v43  ;;  %v6735_v43 = vadd.f32 %v13072_v61, %v6692_v31  ;;  %v13305_v60 = vpop.f32.mrf.mxu0  ;;  %v10326_v61 = vld [vmem:[%s14454_s1 + $0xba8] ss:$16 sps:$4 sm:$0xff]  }
 0x2aa   : > { %7444 = vmatpush1.bf16.msra.mxu0 %v10305_v0 }
 0x2ab   : > { %7487 = vmatpush1.bf16.msra.mxu1 %v10308_v1  ;;  %7445 = vmatprep.subr.bf16.mxu0 %v10313_v39  ;;  %v6733_v0 = vadd.f32 %v13056_v13, %v6690_v32  ;;  %v6694_v39 = vadd.f32 %v13086_v2, %v6651_v28  ;;  %v10317_v1 = vld [vmem:[%s14454_s1 + $0x9c8] ss:$16 sps:$4 sm:$0xff]   ;;  %v10325_v32 = vld [vmem:[%s14454_s1 + $0x9ac] ss:$16 sps:$4 sm:$0xff]   ;;  %v6696_v19 = vadd.f32 %v13102_v23, %v6653_v12  ;;  %v13307_v2 = vpop.f32.mrf.mxu1 }
 0x2ac   : > { %7488 = vmatprep.subr.bf16.mxu1 %v10316_v9  ;;  %v10320_v9 = vld [vmem:[%s14454_s1 + $0xbc8] ss:$16 sps:$4 sm:$0xff]   ;;  %v10331_v23 = vld [vmem:[%s14454_s1 + $0x98c] ss:$16 sps:$4 sm:$0xff]  }
 0x2ad   : > { %v6776_v13 = vadd.f32 %v13112_v42, %v6733_v0  ;;  %v6737_v17 = vadd.f32 %v13088_v3, %v6694_v39  ;;  %v10334_v3 = vld [vmem:[%s14454_s1 + $0xb8c] ss:$16 sps:$4 sm:$0xff]   ;;  %v6739_v42 = vadd.f32 %v13104_v34, %v6696_v19  ;;  %v13326_v28 = vpop.f32.mrf.mxu1  ;;  %v10329_v39 = vld [vmem:[%s14454_s1 + $0x988] ss:$16 sps:$4 sm:$0xff]  }
 0x2ae   : > { %7446 = vmatpush2.bf16.msra.mxu0 %v10311_v58  ;;  %v6778_v58 = vadd.f32 %v13128_v6, %v6735_v43  ;;  %v10332_v34 = vld [vmem:[%s14454_s1 + $0xb88] ss:$16 sps:$4 sm:$0xff]  }
 0x2af   : > { %7489 = vmatpush2.bf16.msra.mxu1 %v10314_v59  ;;  %7447 = vmatprep.subr.bf16.mxu0 %v10319_v14  ;;  %v10323_v59 = vld [vmem:[%s14454_s1 + $0x9a8] ss:$16 sps:$4 sm:$0xff]   ;;  %v6819_v6 = vadd.f32 %v13114_v54, %v6776_v13  ;;  %v6780_v14 = vadd.f32 %v13146_v62, %v6737_v17  ;;  %v6782_v12 = vadd.f32 %v13164_v4, %v6739_v42  ;;  %v10337_v54 = vld [vmem:[%s14454_s1 + $0x96c] ss:$16 sps:$4 sm:$0xff]  }
 0x2b0   : > { %7490 = vmatprep.subr.bf16.mxu1 %v10322_v46  ;;  %v7035_v46 = vpop.f32.mrf.mxu0  ;;  %v6821_v31 = vadd.f32 %v13130_v7, %v6778_v58  ;;  %v10340_v7 = vld [vmem:[%s14454_s1 + $0xb6c] ss:$16 sps:$4 sm:$0xff]   ;;  %v10335_v43 = vld [vmem:[%s14454_s1 + $0x968] ss:$16 sps:$4 sm:$0xff]  }
 0x2b1   : > { %v6862_v0 = vadd.f32 %v13174_v51, %v6819_v6  ;;  %v6823_v62 = vadd.f32 %v13148_v63, %v6780_v14  ;;  %v10338_v63 = vld [vmem:[%s14454_s1 + $0xb68] ss:$16 sps:$4 sm:$0xff]  }
 0x2b2   : > { %7448 = vmatpush2.bf16.msra.mxu0 %v10317_v1  ;;  %v6864_v4 = vadd.f32 %v13190_v18, %v6821_v31  ;;  %v7037_v51 = vpop.f32.mrf.mxu0  ;;  %v13345_v1 = vpop.f32.mrf.mxu1 }
 0x2b3   : > { %7491 = vmatpush2.bf16.msra.mxu1 %v10320_v9  ;;  %7449 = vmatprep.subr.bf16.mxu0 %v10325_v32  ;;  %v6825_v9 = vadd.f32 %v13166_v5, %v6782_v12  ;;  %v6905_v32 = vadd.f32 %v13176_v15, %v6862_v0  ;;  %v10343_v5 = vld [vmem:[%s14454_s1 + $0x94c] ss:$16 sps:$4 sm:$0xff]   ;;  %v10347_v12 = vld [vmem:[%s14454_s1 + $0x928] ss:$16 sps:$4 sm:$0xff]  }
 0x2b4   : > { %7492 = vmatprep.subr.bf16.mxu1 %v10328_v8  ;;  %v6866_v8 = vadd.f32 %v13206_v20, %v6823_v62  ;;  %v10346_v15 = vld [vmem:[%s14454_s1 + $0xb4c] ss:$16 sps:$4 sm:$0xff]   ;;  %v6907_v18 = vadd.f32 %v13192_v41, %v6864_v4  ;;  %v7039_v13 = vpop.f32.mrf.mxu0  ;;  %v7082_v17 = vpop.f32.mrf.mxu1  ;;  %v10344_v41 = vld [vmem:[%s14454_s1 + $0xb48] ss:$16 sps:$4 sm:$0xff]  }
 0x2b5   : > { %v6868_v20 = vadd.f32 %v13222_v22, %v6825_v9  ;;  %v6948_v19 = vadd.f32 %v13232_v53, %v6905_v32  ;;  %v10352_v53 = vld [vmem:[%s14454_s1 + $0xb2c] ss:$16 sps:$4 sm:$0xff]   ;;  %v10356_v62 = vld [vmem:[%s14454_s1 + $0xb08] ss:$16 sps:$4 sm:$0xff]  }
 0x2b6   : > { %7450 = vmatpush2.bf16.msra.mxu0 %v10323_v59  ;;  %v6909_v58 = vadd.f32 %v13208_v21, %v6866_v8  ;;  %v6950_v59 = vadd.f32 %v13248_v33, %v6907_v18  ;;  %v7162_v22 = vpop.f32.mrf.mxu1  ;;  %v10349_v21 = vld [vmem:[%s14454_s1 + $0x92c] ss:$16 sps:$4 sm:$0xff]  }
 0x2b7   : > { %7493 = vmatpush2.bf16.msra.mxu1 %v10326_v61  ;;  %7451 = vmatprep.subr.bf16.mxu0 %v10331_v23  ;;  %v10341_v61 = vld [vmem:[%s14454_s1 + $0x948] ss:$16 sps:$4 sm:$0xff]   ;;  %v7119_v23 = vpop.f32.mrf.mxu0  ;;  %v6911_v33 = vadd.f32 %v13224_v26, %v6868_v20  ;;  %v10370_v20 = vld [vmem:[%s14454_s1 + $0xecc] ss:$16 sps:$4 sm:$0xff]  }
 0x2b8   : > { %7494 = vmatprep.subr.bf16.mxu1 %v10334_v3  ;;  %v6991_v3 = vadd.f32 %v13234_v55, %v6948_v19  ;;  %v6952_v42 = vadd.f32 %v13269_v27, %v6909_v58  ;;  %v6993_v6 = vadd.f32 %v13250_v35, %v6950_v59  ;;  %v10350_v26 = vld [vmem:[%s14454_s1 + $0xb28] ss:$16 sps:$4 sm:$0xff]   ;;  %v7164_v55 = vpop.f32.mrf.mxu1  ;;  %v10355_v27 = vld [vmem:[%s14454_s1 + $0x90c] ss:$16 sps:$4 sm:$0xff]  }
 0x2b9   : > { %v6954_v14 = vadd.f32 %v13292_v16, %v6911_v33  ;;  %v7121_v0 = vpop.f32.mrf.mxu0  ;;  %v10358_v35 = vld [vmem:[%s14454_s1 + $0xb0c] ss:$16 sps:$4 sm:$0xff]  }
 0x2ba   : > { %7452 = vmatpush2.bf16.msra.mxu0 %v10329_v39  ;;  %v7034_v31 = vadd.f32 %v13305_v60, %v6991_v3  ;;  %v6995_v16 = vadd.f32 %v13271_v52, %v6952_v42  ;;  %v7036_v60 = vadd.f32 %v7035_v46, %v6993_v6  ;;  %v7166_v9 = vpop.f32.mrf.mxu1  ;;  %v10361_v52 = vld [vmem:[%s14454_s1 + $0xcec] ss:$16 sps:$4 sm:$0xff]  }
 0x2bb   : > { %7495 = vmatpush2.bf16.msra.mxu1 %v10332_v34  ;;  %7453 = vmatprep.subr.bf16.mxu0 %v10337_v54  ;;  %v6997_v39 = vadd.f32 %v13294_v38, %v6954_v14  ;;  %v7123_v4 = vpop.f32.mrf.mxu0  ;;  %v10364_v38 = vld [vmem:[%s14454_s1 + $0xeec] ss:$16 sps:$4 sm:$0xff]  }
 0x2bc   : > { %7496 = vmatprep.subr.bf16.mxu1 %v10340_v7  ;;  %v7077_v34 = vadd.f32 %v13307_v2, %v7034_v31  ;;  %v7038_v54 = vadd.f32 %v7037_v51, %v6995_v16  ;;  %v10353_v7 = vld [vmem:[%s14454_s1 + $0x908] ss:$16 sps:$4 sm:$0xff]   ;;  %v7953_v2 = vlaneseq  ;;  %v7079_v46 = vadd.f32 %v13326_v28, %v7036_v60  ;;  %v7168_v18 = vpop.f32.mrf.mxu1  ;;  %v10373_v33 = vld [vmem:[%s14454_s1 + $0xcac] ss:$16 sps:$4 sm:$0xff]  }
 0x2bd   : > { %v7040_v51 = vadd.f32 %v7039_v13, %v6997_v39  ;;  %v10376_v3 = vld [vmem:[%s14454_s1 + $0xeac] ss:$16 sps:$4 sm:$0xff]  }
 0x2be   : > { %7454 = vmatpush2.bf16.msra.mxu0 %v10335_v43  ;;  %v7120_v32 = vadd.f32 %v7119_v23, %v7077_v34  ;;  %v7081_v8 = vadd.f32 %v13345_v1, %v7038_v54  ;;  %v7122_v43 = vadd.f32 %v7121_v0, %v7079_v46  ;;  %v13420_v28 = vshrl.u32 %v7953_v2, 7  ;;  %v10367_v1 = vld [vmem:[%s14454_s1 + $0xccc] ss:$16 sps:$4 sm:$0xff]  }
 0x2bf   : > { %7497 = vmatpush2.bf16.msra.mxu1 %v10338_v63  ;;  %7455 = vmatprep.subr.bf16.mxu0 %v10343_v5  ;;  %v10359_v63 = vld [vmem:[%s14454_s1 + $0xce8] ss:$16 sps:$4 sm:$0xff]   ;;  %v7083_v19 = vadd.f32 %v7082_v17, %v7040_v51  ;;  %v10382_v16 = vld [vmem:[%s14454_s1 + $0xe8c] ss:$16 sps:$4 sm:$0xff]  }
 0x2c0   : > { %7498 = vmatprep.subr.bf16.mxu1 %v10346_v15  ;;  %v10362_v5 = vld [vmem:[%s14454_s1 + $0xee8] ss:$16 sps:$4 sm:$0xff]   ;;  %v7125_v15 = vpop.f32.mrf.mxu0  ;;  %v7163_v13 = vadd.f32 %v7162_v22, %v7120_v32  ;;  %v7124_v58 = vadd.f32 %v7123_v4, %v7081_v8  ;;  %v13443_v22 = vadd.s32 8, %v13420_v28  ;;  %v10388_v2 = vld [vmem:[%s14454_s1 + $0xe6c] ss:$16 sps:$4 sm:$0xff]  }
 0x2c1   : > { %v7126_v23 = vadd.f32 %v7125_v15, %v7083_v19  ;;  %v10368_v17 = vld [vmem:[%s14454_s1 + $0xec8] ss:$16 sps:$4 sm:$0xff]  }
 0x2c2   : > { %7456 = vmatpush2.bf16.msra.mxu0 %v10341_v61  ;;  %v7167_v42 = vadd.f32 %v7166_v9, %v7124_v58  ;;  %vm7961_vm0 = vcmp.lt.s32.totalorder %v13443_v22, 9  ;;  %v10380_v4 = vld [vmem:[%s14454_s1 + $0xe88] ss:$16 sps:$4 sm:$0xff]   ;;  %v10391_v58 = vld [vmem:[%s14454_s1 + $0xc4c] ss:$16 sps:$4 sm:$0xff]  }
 0x2c3   : > { %7499 = vmatpush2.bf16.msra.mxu1 %v10344_v41  ;;  %7457 = vmatprep.subr.bf16.mxu0 %v10349_v21  ;;  %v7165_v41 = vadd.f32 %v7164_v55, %v7122_v43  ;;  %v10386_v19 = vld [vmem:[%s14454_s1 + $0xe68] ss:$16 sps:$4 sm:$0xff]  }
 0x2c4   : > { %7500 = vmatprep.subr.bf16.mxu1 %v10352_v53  ;;  %v10365_v53 = vld [vmem:[%s14454_s1 + $0xcc8] ss:$16 sps:$4 sm:$0xff]  }
 0x2c6   : > { %7458 = vmatpush2.bf16.msra.mxu0 %v10347_v12 }
 0x2c7   : > { %7501 = vmatpush2.bf16.msra.mxu1 %v10350_v26  ;;  %7459 = vmatprep.subr.bf16.mxu0 %v10355_v27  ;;  %v7169_v26 = vadd.f32 %v7168_v18, %v7126_v23  ;;  %v10371_v27 = vld [vmem:[%s14454_s1 + $0xca8] ss:$16 sps:$4 sm:$0xff]  }
 0x2c8   : > { %7502 = vmatprep.subr.bf16.mxu1 %v10358_v35  ;;  %v10379_v35 = vld [vmem:[%s14454_s1 + $0xc8c] ss:$16 sps:$4 sm:$0xff]  }
 0x2ca   : > { %7460 = vmatpush2.bf16.msra.mxu0 %v10353_v7 }
 0x2cb   : > { %7503 = vmatpush2.bf16.msra.mxu1 %v10356_v62  ;;  %7515 = vmatprep.subr.bf16.mxu0 %v10361_v52  ;;  %v10377_v62 = vld [vmem:[%s14454_s1 + $0xc88] ss:$16 sps:$4 sm:$0xff]  }
 0x2cc   : > { %7558 = vmatprep.subr.bf16.mxu1 %v10364_v38  ;;  %v10385_v38 = vld [vmem:[%s14454_s1 + $0xc6c] ss:$16 sps:$4 sm:$0xff]  }
 0x2cd   : > { %v7205_v59 = vpop.f32.mrf.mxu0  ;;  %7462 = vmatmul.mubr.bf16.vlgmr.msra.gmra.mxu0 %v11580_v48 }
 0x2ce   : > { %v7248_v61 = vpop.f32.mrf.mxu1  ;;  %7505 = vmatmul.mubr.bf16.vlgmr.msra.gmra.mxu1 %v11584_v49  ;;  %v7206_v21 = vadd.f32 %v7205_v59, %v7163_v13  ;;  %7516 = vmatpush1.bf16.msra.mxu0 %v10359_v63  ;;  %v10394_v59 = vld [vmem:[%s14454_s1 + $0xe4c] ss:$16 sps:$4 sm:$0xff]  }
 0x2cf   : > { %7559 = vmatpush1.bf16.msra.mxu1 %v10362_v5  ;;  %v7207_v48 = vpop.f32.mrf.mxu0  ;;  %7517 = vmatprep.subr.bf16.mxu0 %v10367_v1 }
 0x2d0   : > { %v7250_v49 = vpop.f32.mrf.mxu1  ;;  %7560 = vmatprep.subr.bf16.mxu1 %v10370_v20  ;;  %v7249_v6 = vadd.f32 %v7248_v61, %v7206_v21  ;;  %v7208_v14 = vadd.f32 %v7207_v48, %v7165_v41  ;;  %7547 = vmatprep.mubr.bf16.mxu0 %v11600_v29  ;;  %v10374_v29 = vld [vmem:[%s14454_s1 + $0xea8] ss:$16 sps:$4 sm:$0xff]  }
 0x2d1   : > { %7590 = vmatprep.mubr.bf16.mxu1 %v11604_v30  ;;  %v7209_v31 = vpop.f32.mrf.mxu0  ;;  %v10383_v20 = vld [vmem:[%s14454_s1 + $0xc68] ss:$16 sps:$4 sm:$0xff]  }
 0x2d2   : > { %v7252_v12 = vpop.f32.mrf.mxu1  ;;  %7945 = vst [vmem:[%s13440_s7] sm:$0xff] %v7249_v6  ;;  %v7251_v0 = vadd.f32 %v7250_v49, %v7208_v14  ;;  %v7210_v55 = vadd.f32 %v7209_v31, %v7167_v42  ;;  %7518 = vmatpush1.bf16.msra.mxu0 %v10365_v53  ;;  %v8007_v46 = vmul.f32 %v7249_v6, %v7249_v6  ;;  %v10397_v42 = vld [vmem:[%s14454_s1 + $0xc2c] ss:$16 sps:$4 sm:$0xff]  }
 0x2d3   : > { %7561 = vmatpush1.bf16.msra.mxu1 %v10368_v17  ;;  %v7211_v30 = vpop.f32.mrf.mxu0  ;;  %7519 = vmatprep.subr.bf16.mxu0 %v10373_v33  ;;  %v10389_v33 = vld [vmem:[%s14454_s1 + $0xc48] ss:$16 sps:$4 sm:$0xff]  }
 0x2d4   : > { %7562 = vmatprep.subr.bf16.mxu1 %v10376_v3  ;;  %7946 = vst [vmem:[%s13440_s7 + $0x8] sm:$0xff] %v7251_v0  ;;  %v7253_v60 = vadd.f32 %v7252_v12, %v7210_v55  ;;  %v7212_v39 = vadd.f32 %v7211_v30, %v7169_v26  ;;  %v7254_v34 = vpop.f32.mrf.mxu1  ;;  %v8008_v5 = vmul.f32 %v7251_v0, %v7251_v0  ;;  %v10392_v3 = vld [vmem:[%s14454_s1 + $0xe48] ss:$16 sps:$4 sm:$0xff]  }
 0x2d5   : > { %v10395_v30 = vld [vmem:[%s14454_s1 + $0xc28] ss:$16 sps:$4 sm:$0xff]  }
 0x2d6   : > { %7949 = vst [vmem:[%s13440_s7 + $0x20] sm:$0x1] %v7253_v60  ;;  %v7970_v54 = vsel %vm7961_vm0, %v7253_v60, 0.0  ;;  %v7255_v7 = vadd.f32 %v7254_v34, %v7212_v39  ;;  %7520 = vmatpush1.bf16.msra.mxu0 %v10371_v27  ;;  %v10406_v60 = vld [vmem:[%s14454_s1 + $0xe0c] ss:$16 sps:$4 sm:$0xff]  }
 0x2d7   : > { %7563 = vmatpush1.bf16.msra.mxu1 %v10374_v29  ;;  %v7975_v9 = vsel %vm7974_vm1, %v7970_v54, 0.0  ;;  %v8011_v52 = vmul.f32 %v7970_v54, %v7970_v54  ;;  %7521 = vmatprep.subr.bf16.mxu0 %v10379_v35  ;;  %v10398_v35 = vld [vmem:[%s14454_s1 + $0xe28] ss:$16 sps:$4 sm:$0xff]  }
 0x2d8   : > { %7564 = vmatprep.subr.bf16.mxu1 %v10382_v16  ;;  %v7976_v51 = vadd.f32 %v7975_v9, %v7249_v6  ;;  %7950 = vst [vmem:[%s13440_s7 + $0x28] sm:$0x1] %v7255_v7  ;;  %v7971_v32 = vsel %vm7961_vm0, %v7255_v7, 0.0  ;;  %v10400_v6 = vld [vmem:[%s14454_s1 + $0xe2c] ss:$16 sps:$4 sm:$0xff]  }
 0x2d9   : > { %v8015_v8 = vsel %vm7974_vm1, %v8011_v52, 0.0  ;;  %v7983_v43 = vsel %vm7974_vm1, %v7971_v32, 0.0  ;;  %v8012_v63 = vmul.f32 %v7971_v32, %v7971_v32  ;;  %v10403_v16 = vld [vmem:[%s14454_s1 + $0xc0c] ss:$16 sps:$4 sm:$0xff]   ;;  %v10401_v9 = vld [vmem:[%s14454_s1 + $0xc08] ss:$16 sps:$4 sm:$0xff]  }
 0x2da   : > { %v7977_v15 = vrot.slane %v7976_v51, 4  ;;  %v8016_v18 = vadd.f32 %v8015_v8, %v8007_v46  ;;  %v7984_v1 = vadd.f32 %v7983_v43, %v7251_v0  ;;  %7522 = vmatpush1.bf16.msra.mxu0 %v10377_v62  ;;  %v10404_v52 = vld [vmem:[%s14454_s1 + $0xe08] ss:$16 sps:$4 sm:$0xff]  }
 0x2db   : > { %7565 = vmatpush1.bf16.msra.mxu1 %v10380_v4  ;;  %v8023_v13 = vsel %vm7974_vm1, %v8012_v63, 0.0  ;;  %7523 = vmatprep.subr.bf16.mxu0 %v10385_v38  ;;  %v10409_v38 = vld [vmem:[%s14454_s1 + $0xdec] ss:$16 sps:$4 sm:$0xff]   ;;  %v10407_v43 = vld [vmem:[%s14454_s1 + $0xde8] ss:$16 sps:$4 sm:$0xff]  }
 0x2dc   : > { %7566 = vmatprep.subr.bf16.mxu1 %v10388_v2  ;;  %v7978_v61 = vadd.f32 %v7977_v15, %v7976_v51  ;;  %v8017_v41 = vrot.slane %v8016_v18, 4  ;;  %v7985_v23 = vrot.slane %v7984_v1, 4  ;;  %v8024_v21 = vadd.f32 %v8023_v13, %v8008_v5  ;;  %v10412_v2 = vld [vmem:[%s14454_s1 + $0xfec] ss:$16 sps:$4 sm:$0xff]   ;;  %v10410_v63 = vld [vmem:[%s14454_s1 + $0xfe8] ss:$16 sps:$4 sm:$0xff]  }
 0x2dd   : > { %v10415_v15 = vld [vmem:[%s14454_s1 + $0xdcc] ss:$16 sps:$4 sm:$0xff]  }
 0x2de   : > { %v7979_v53 = vrot.slane %v7978_v61, 2  ;;  %v8018_v17 = vadd.f32 %v8017_v41, %v8016_v18  ;;  %v7986_v48 = vadd.f32 %v7985_v23, %v7984_v1  ;;  %v8025_v49 = vrot.slane %v8024_v21, 4  ;;  %7524 = vmatpush1.bf16.msra.mxu0 %v10383_v20  ;;  %v10418_v18 = vld [vmem:[%s14454_s1 + $0xfcc] ss:$16 sps:$4 sm:$0xff]   ;;  %v10413_v1 = vld [vmem:[%s14454_s1 + $0xdc8] ss:$16 sps:$4 sm:$0xff]  }
 0x2df   : > { %7567 = vmatpush1.bf16.msra.mxu1 %v10386_v19  ;;  %7525 = vmatprep.subr.bf16.mxu0 %v10391_v58  ;;  %v10416_v20 = vld [vmem:[%s14454_s1 + $0xfc8] ss:$16 sps:$4 sm:$0xff]   ;;  %v10421_v19 = vld [vmem:[%s14454_s1 + $0xdac] ss:$16 sps:$4 sm:$0xff]  }
 0x2e0   : > { %7568 = vmatprep.subr.bf16.mxu1 %v10394_v59  ;;  %v7980_v14 = vadd.f32 %v7979_v53, %v7978_v61  ;;  %v8019_v31 = vrot.slane %v8018_v17, 2  ;;  %v7987_v12 = vrot.slane %v7986_v48, 2  ;;  %v8026_v26 = vadd.f32 %v8025_v49, %v8024_v21  ;;  %v10424_v13 = vld [vmem:[%s14454_s1 + $0xfac] ss:$16 sps:$4 sm:$0xff]   ;;  %v10419_v58 = vld [vmem:[%s14454_s1 + $0xda8] ss:$16 sps:$4 sm:$0xff]  }
 0x2e1   : > { %v10422_v59 = vld [vmem:[%s14454_s1 + $0xfa8] ss:$16 sps:$4 sm:$0xff]   ;;  %v10427_v61 = vld [vmem:[%s14454_s1 + $0xd8c] ss:$16 sps:$4 sm:$0xff]  }
 0x2e2   : > { %v7981_v0 = vrot.slane %v7980_v14, 1  ;;  %v8020_v55 = vadd.f32 %v8019_v31, %v8018_v17  ;;  %v7988_v27 = vadd.f32 %v7987_v12, %v7986_v48  ;;  %v8027_v29 = vrot.slane %v8026_v26, 2  ;;  %7526 = vmatpush1.bf16.msra.mxu0 %v10389_v33  ;;  %v10430_v41 = vld [vmem:[%s14454_s1 + $0xf8c] ss:$16 sps:$4 sm:$0xff]   ;;  %v10425_v23 = vld [vmem:[%s14454_s1 + $0xd88] ss:$16 sps:$4 sm:$0xff]  }
 0x2e3   : > { %7569 = vmatpush1.bf16.msra.mxu1 %v10392_v3  ;;  %7527 = vmatprep.subr.bf16.mxu0 %v10397_v42  ;;  %v10428_v21 = vld [vmem:[%s14454_s1 + $0xf88] ss:$16 sps:$4 sm:$0xff]   ;;  %v10433_v53 = vld [vmem:[%s14454_s1 + $0xd6c] ss:$16 sps:$4 sm:$0xff]  }
 0x2e4   : > { %7570 = vmatprep.subr.bf16.mxu1 %v10400_v6  ;;  %v8021_v39 = vrot.slane %v8020_v55, 1  ;;  %v7989_v34 = vrot.slane %v7988_v27, 1  ;;  %v8028_v54 = vadd.f32 %v8027_v29, %v8026_v26  ;;  %v7982_v7 = vadd.f32 %v7981_v0, %v7980_v14  ;;  %v10436_v17 = vld [vmem:[%s14454_s1 + $0xf6c] ss:$16 sps:$4 sm:$0xff]   ;;  %v10431_v48 = vld [vmem:[%s14454_s1 + $0xd68] ss:$16 sps:$4 sm:$0xff]  }
 0x2e5   : > { %v10434_v49 = vld [vmem:[%s14454_s1 + $0xf68] ss:$16 sps:$4 sm:$0xff]   ;;  %v10439_v33 = vld [vmem:[%s14454_s1 + $0xd4c] ss:$16 sps:$4 sm:$0xff]  }
 0x2e6   : > { %v8022_v62 = vadd.f32 %v8021_v39, %v8020_v55  ;;  %v8029_v4 = vrot.slane %v8028_v54, 1  ;;  %7528 = vmatpush1.bf16.msra.mxu0 %v10395_v30  ;;  %v7990_v51 = vadd.f32 %v7989_v34, %v7988_v27  ;;  %v10442_v3 = vld [vmem:[%s14454_s1 + $0xf4c] ss:$16 sps:$4 sm:$0xff]   ;;  %v10437_v42 = vld [vmem:[%s14454_s1 + $0xd48] ss:$16 sps:$4 sm:$0xff]  }
 0x2e7   : > { %7571 = vmatpush1.bf16.msra.mxu1 %v10398_v35  ;;  %7529 = vmatprep.subr.bf16.mxu0 %v10403_v16  ;;  %v10440_v6 = vld [vmem:[%s14454_s1 + $0xf48] ss:$16 sps:$4 sm:$0xff]   ;;  %v10445_v14 = vld [vmem:[%s14454_s1 + $0xd2c] ss:$16 sps:$4 sm:$0xff]  }
 0x2e8   : > { %7572 = vmatprep.subr.bf16.mxu1 %v10406_v60  ;;  %v13539_v46 = vsel %vm7974_vm1, %v7982_v7, %v8022_v62  ;;  %v8030_v32 = vadd.f32 %v8029_v4, %v8028_v54  ;;  %v10448_v31 = vld [vmem:[%s14454_s1 + $0xf2c] ss:$16 sps:$4 sm:$0xff]   ;;  %v10443_v12 = vld [vmem:[%s14454_s1 + $0xd28] ss:$16 sps:$4 sm:$0xff]  }
 0x2e9   : > { %v10446_v26 = vld [vmem:[%s14454_s1 + $0xf28] ss:$16 sps:$4 sm:$0xff]   ;;  %v10451_v0 = vld [vmem:[%s14454_s1 + $0xd0c] ss:$16 sps:$4 sm:$0xff]  }
 0x2ea   : > { %v13542_v8 = vsel %vm7974_vm1, %v7990_v51, %v8030_v32  ;;  %7530 = vmatpush1.bf16.msra.mxu0 %v10401_v9  ;;  %v10454_v55 = vld [vmem:[%s14454_s1 + $0xf0c] ss:$16 sps:$4 sm:$0xff]   ;;  %v10449_v27 = vld [vmem:[%s14454_s1 + $0xd08] ss:$16 sps:$4 sm:$0xff]  }
 0x2eb   : > { %7573 = vmatpush1.bf16.msra.mxu1 %v10404_v52  ;;  %v8056_v5 = vcombine.low %v13539_v46, %v13542_v8  ;;  %7531 = vmatprep.subr.bf16.mxu0 %v10409_v38  ;;  %v10452_v29 = vld [vmem:[%s14454_s1 + $0xf08] ss:$16 sps:$4 sm:$0xff]   ;;  %v10457_v30 = vld [vmem:[%s14454_s1 + $0x10ec] ss:$16 sps:$4 sm:$0xff]  }
 0x2ec   : > { %7574 = vmatprep.subr.bf16.mxu1 %v10412_v2  ;;  %v10460_v35 = vld [vmem:[%s14454_s1 + $0x12ec] ss:$16 sps:$4 sm:$0xff]   ;;  %v10455_v16 = vld [vmem:[%s14454_s1 + $0x10e8] ss:$16 sps:$4 sm:$0xff]  }
 0x2ed   : > { %v10458_v60 = vld [vmem:[%s14454_s1 + $0x12e8] ss:$16 sps:$4 sm:$0xff]   ;;  %v10463_v39 = vld [vmem:[%s14454_s1 + $0x10cc] ss:$16 sps:$4 sm:$0xff]  }
 0x2ee   : > { %7532 = vmatpush2.bf16.msra.mxu0 %v10407_v43  ;;  %v10466_v34 = vld [vmem:[%s14454_s1 + $0x12cc] ss:$16 sps:$4 sm:$0xff]   ;;  %v10461_v54 = vld [vmem:[%s14454_s1 + $0x10c8] ss:$16 sps:$4 sm:$0xff]  }
 0x2ef   : > { %7575 = vmatpush2.bf16.msra.mxu1 %v10410_v63  ;;  %7533 = vmatprep.subr.bf16.mxu0 %v10415_v15  ;;  %v10464_v7 = vld [vmem:[%s14454_s1 + $0x12c8] ss:$16 sps:$4 sm:$0xff]   ;;  %v10469_v62 = vld [vmem:[%s14454_s1 + $0x10ac] ss:$16 sps:$4 sm:$0xff]  }
 0x2f0   : > { %7576 = vmatprep.subr.bf16.mxu1 %v10418_v18  ;;  %v10470_v4 = vld [vmem:[%s14454_s1 + $0x12a8] ss:$16 sps:$4 sm:$0xff]   ;;  %v10475_v9 = vld [vmem:[%s14454_s1 + $0x108c] ss:$16 sps:$4 sm:$0xff]  }
 0x2f1   : > { %v10476_v52 = vld [vmem:[%s14454_s1 + $0x1288] ss:$16 sps:$4 sm:$0xff]   ;;  %v10481_v38 = vld [vmem:[%s14454_s1 + $0x106c] ss:$16 sps:$4 sm:$0xff]  }
 0x2f2   : > { %7534 = vmatpush2.bf16.msra.mxu0 %v10413_v1  ;;  %v10484_v2 = vld [vmem:[%s14454_s1 + $0x126c] ss:$16 sps:$4 sm:$0xff]   ;;  %v10479_v51 = vld [vmem:[%s14454_s1 + $0x1068] ss:$16 sps:$4 sm:$0xff]  }
 0x2f3   : > { %7577 = vmatpush2.bf16.msra.mxu1 %v10416_v20  ;;  %7535 = vmatprep.subr.bf16.mxu0 %v10421_v19  ;;  %v10482_v32 = vld [vmem:[%s14454_s1 + $0x1268] ss:$16 sps:$4 sm:$0xff]   ;;  %v10487_v43 = vld [vmem:[%s14454_s1 + $0x104c] ss:$16 sps:$4 sm:$0xff]  }
 0x2f4   : > { %7578 = vmatprep.subr.bf16.mxu1 %v10424_v13  ;;  %v10490_v63 = vld [vmem:[%s14454_s1 + $0x124c] ss:$16 sps:$4 sm:$0xff]   ;;  %v10485_v15 = vld [vmem:[%s14454_s1 + $0x1048] ss:$16 sps:$4 sm:$0xff]  }
 0x2f5   : > { %v10488_v18 = vld [vmem:[%s14454_s1 + $0x1248] ss:$16 sps:$4 sm:$0xff]   ;;  %v10493_v1 = vld [vmem:[%s14454_s1 + $0x102c] ss:$16 sps:$4 sm:$0xff]  }
 0x2f6   : > { %7536 = vmatpush2.bf16.msra.mxu0 %v10419_v58  ;;  %v10496_v20 = vld [vmem:[%s14454_s1 + $0x122c] ss:$16 sps:$4 sm:$0xff]   ;;  %v10491_v19 = vld [vmem:[%s14454_s1 + $0x1028] ss:$16 sps:$4 sm:$0xff]  }
 0x2f7   : > { %7579 = vmatpush2.bf16.msra.mxu1 %v10422_v59  ;;  %7537 = vmatprep.subr.bf16.mxu0 %v10427_v61  ;;  %v10494_v13 = vld [vmem:[%s14454_s1 + $0x1228] ss:$16 sps:$4 sm:$0xff]   ;;  %v10499_v58 = vld [vmem:[%s14454_s1 + $0x100c] ss:$16 sps:$4 sm:$0xff]  }
 0x2f8   : > { %7580 = vmatprep.subr.bf16.mxu1 %v10430_v41  ;;  %v10502_v59 = vld [vmem:[%s14454_s1 + $0x120c] ss:$16 sps:$4 sm:$0xff]   ;;  %v10497_v61 = vld [vmem:[%s14454_s1 + $0x1008] ss:$16 sps:$4 sm:$0xff]  }
 0x2f9   : > { %v10500_v41 = vld [vmem:[%s14454_s1 + $0x1208] ss:$16 sps:$4 sm:$0xff]  }
 0x2fa   : > { %7538 = vmatpush2.bf16.msra.mxu0 %v10425_v23  ;;  %v10505_v23 = vld [vmem:[%s14454_s1 + $0x11ec] ss:$16 sps:$4 sm:$0xff]  }
 0x2fb   : > { %7581 = vmatpush2.bf16.msra.mxu1 %v10428_v21  ;;  %7539 = vmatprep.subr.bf16.mxu0 %v10433_v53  ;;  %v10508_v21 = vld [vmem:[%s14454_s1 + $0x13ec] ss:$16 sps:$4 sm:$0xff]   ;;  %v10503_v53 = vld [vmem:[%s14454_s1 + $0x11e8] ss:$16 sps:$4 sm:$0xff]  }
 0x2fc   : > { %7582 = vmatprep.subr.bf16.mxu1 %v10436_v17  ;;  %v10506_v17 = vld [vmem:[%s14454_s1 + $0x13e8] ss:$16 sps:$4 sm:$0xff]  }
 0x2fe   : > { %7540 = vmatpush2.bf16.msra.mxu0 %v10431_v48  ;;  %v10511_v48 = vld [vmem:[%s14454_s1 + $0x11cc] ss:$16 sps:$4 sm:$0xff]  }
 0x2ff   : > { %7583 = vmatpush2.bf16.msra.mxu1 %v10434_v49  ;;  %7541 = vmatprep.subr.bf16.mxu0 %v10439_v33  ;;  %v10514_v49 = vld [vmem:[%s14454_s1 + $0x13cc] ss:$16 sps:$4 sm:$0xff]   ;;  %v10509_v33 = vld [vmem:[%s14454_s1 + $0x11c8] ss:$16 sps:$4 sm:$0xff]  }
 0x300   : > { %7584 = vmatprep.subr.bf16.mxu1 %v10442_v3  ;;  %v10512_v3 = vld [vmem:[%s14454_s1 + $0x13c8] ss:$16 sps:$4 sm:$0xff]  }
 0x302   : > { %7542 = vmatpush2.bf16.msra.mxu0 %v10437_v42  ;;  %v10517_v42 = vld [vmem:[%s14454_s1 + $0x11ac] ss:$16 sps:$4 sm:$0xff]  }
 0x303   : > { %7585 = vmatpush2.bf16.msra.mxu1 %v10440_v6  ;;  %7543 = vmatprep.subr.bf16.mxu0 %v10445_v14  ;;  %v10520_v6 = vld [vmem:[%s14454_s1 + $0x13ac] ss:$16 sps:$4 sm:$0xff]   ;;  %v10515_v14 = vld [vmem:[%s14454_s1 + $0x11a8] ss:$16 sps:$4 sm:$0xff]  }
 0x304   : > { %7586 = vmatprep.subr.bf16.mxu1 %v10448_v31  ;;  %v10518_v31 = vld [vmem:[%s14454_s1 + $0x13a8] ss:$16 sps:$4 sm:$0xff]  }
 0x306   : > { %7544 = vmatpush2.bf16.msra.mxu0 %v10443_v12  ;;  %v10523_v12 = vld [vmem:[%s14454_s1 + $0x118c] ss:$16 sps:$4 sm:$0xff]  }
 0x307   : > { %7587 = vmatpush2.bf16.msra.mxu1 %v10446_v26  ;;  %7545 = vmatprep.subr.bf16.mxu0 %v10451_v0  ;;  %v10526_v26 = vld [vmem:[%s14454_s1 + $0x138c] ss:$16 sps:$4 sm:$0xff]   ;;  %v10521_v0 = vld [vmem:[%s14454_s1 + $0x1188] ss:$16 sps:$4 sm:$0xff]  }
 0x308   : > { %7588 = vmatprep.subr.bf16.mxu1 %v10454_v55  ;;  %v10524_v55 = vld [vmem:[%s14454_s1 + $0x1388] ss:$16 sps:$4 sm:$0xff]  }
 0x30a   : > { %7546 = vmatpush2.bf16.msra.mxu0 %v10449_v27  ;;  %v10529_v27 = vld [vmem:[%s14454_s1 + $0x116c] ss:$16 sps:$4 sm:$0xff]  }
 0x30b   : > { %7589 = vmatpush2.bf16.msra.mxu1 %v10452_v29  ;;  %7601 = vmatprep.subr.bf16.mxu0 %v10457_v30  ;;  %v10532_v29 = vld [vmem:[%s14454_s1 + $0x136c] ss:$16 sps:$4 sm:$0xff]   ;;  %v10527_v30 = vld [vmem:[%s14454_s1 + $0x1168] ss:$16 sps:$4 sm:$0xff]  }
 0x30c   : > { %7644 = vmatprep.subr.bf16.mxu1 %v10460_v35  ;;  %v10530_v35 = vld [vmem:[%s14454_s1 + $0x1368] ss:$16 sps:$4 sm:$0xff]  }
 0x30d   : > { %7548 = vmatmul.mubr.bf16.vlgmr.msra.gmra.mxu0 %v11804_v10  ;;  %v10472_v10 = vld [vmem:[%s14454_s1 + $0x12ac] ss:$16 sps:$4 sm:$0xff]  }
 0x30e   : > { %7591 = vmatmul.mubr.bf16.vlgmr.msra.gmra.mxu1 %v11808_v11  ;;  %7602 = vmatpush1.bf16.msra.mxu0 %v10455_v16  ;;  %v10467_v11 = vld [vmem:[%s14454_s1 + $0x10a8] ss:$16 sps:$4 sm:$0xff]   ;;  %v10535_v16 = vld [vmem:[%s14454_s1 + $0x114c] ss:$16 sps:$4 sm:$0xff]  }
 0x30f   : > { %7645 = vmatpush1.bf16.msra.mxu1 %v10458_v60  ;;  %7603 = vmatprep.subr.bf16.mxu0 %v10463_v39  ;;  %v10538_v60 = vld [vmem:[%s14454_s1 + $0x134c] ss:$16 sps:$4 sm:$0xff]   ;;  %v10533_v39 = vld [vmem:[%s14454_s1 + $0x1148] ss:$16 sps:$4 sm:$0xff]  }
 0x310   : > { %7646 = vmatprep.subr.bf16.mxu1 %v10466_v34  ;;  %7633 = vmatprep.mubr.bf16.mxu0 %v11824_v47  ;;  %v10478_v47 = vld [vmem:[%s14454_s1 + $0x128c] ss:$16 sps:$4 sm:$0xff]   ;;  %v10536_v34 = vld [vmem:[%s14454_s1 + $0x1348] ss:$16 sps:$4 sm:$0xff]  }
 0x311   : > { %7676 = vmatprep.mubr.bf16.mxu1 %v11828_v50  ;;  %v10473_v50 = vld [vmem:[%s14454_s1 + $0x1088] ss:$16 sps:$4 sm:$0xff]  }
 0x312   : > { %7604 = vmatpush1.bf16.msra.mxu0 %v10461_v54  ;;  %v10541_v54 = vld [vmem:[%s14454_s1 + $0x112c] ss:$16 sps:$4 sm:$0xff]  }
 0x313   : > { %7647 = vmatpush1.bf16.msra.mxu1 %v10464_v7  ;;  %7605 = vmatprep.subr.bf16.mxu0 %v10469_v62  ;;  %v10544_v7 = vld [vmem:[%s14454_s1 + $0x132c] ss:$16 sps:$4 sm:$0xff]   ;;  %v10539_v62 = vld [vmem:[%s14454_s1 + $0x1128] ss:$16 sps:$4 sm:$0xff]  }
 0x314   : > { %7648 = vmatprep.subr.bf16.mxu1 %v10472_v10  ;;  %v10542_v10 = vld [vmem:[%s14454_s1 + $0x1328] ss:$16 sps:$4 sm:$0xff]  }
 0x316   : > { %7606 = vmatpush1.bf16.msra.mxu0 %v10467_v11  ;;  %v10547_v11 = vld [vmem:[%s14454_s1 + $0x110c] ss:$16 sps:$4 sm:$0xff]  }
 0x317   : > { %7649 = vmatpush1.bf16.msra.mxu1 %v10470_v4  ;;  %7607 = vmatprep.subr.bf16.mxu0 %v10475_v9  ;;  %v10550_v4 = vld [vmem:[%s14454_s1 + $0x130c] ss:$16 sps:$4 sm:$0xff]   ;;  %v10545_v9 = vld [vmem:[%s14454_s1 + $0x1108] ss:$16 sps:$4 sm:$0xff]  }
 0x318   : > { %7650 = vmatprep.subr.bf16.mxu1 %v10478_v47  ;;  %v10548_v47 = vld [vmem:[%s14454_s1 + $0x1308] ss:$16 sps:$4 sm:$0xff]  }
 0x31a   : > { %7608 = vmatpush1.bf16.msra.mxu0 %v10473_v50  ;;  %v10553_v50 = vld [vmem:[%s14454_s1 + $0x14ec] ss:$16 sps:$4 sm:$0xff]  }
 0x31b   : > { %7651 = vmatpush1.bf16.msra.mxu1 %v10476_v52  ;;  %7609 = vmatprep.subr.bf16.mxu0 %v10481_v38  ;;  %v10556_v52 = vld [vmem:[%s14454_s1 + $0x16ec] ss:$16 sps:$4 sm:$0xff]   ;;  %v10551_v38 = vld [vmem:[%s14454_s1 + $0x14e8] ss:$16 sps:$4 sm:$0xff]  }
 0x31c   : > { %7652 = vmatprep.subr.bf16.mxu1 %v10484_v2  ;;  %v10554_v2 = vld [vmem:[%s14454_s1 + $0x16e8] ss:$16 sps:$4 sm:$0xff]  }
 0x31e   : > { %7610 = vmatpush1.bf16.msra.mxu0 %v10479_v51  ;;  %v10559_v51 = vld [vmem:[%s14454_s1 + $0x14cc] ss:$16 sps:$4 sm:$0xff]  }
 0x31f   : > { %7653 = vmatpush1.bf16.msra.mxu1 %v10482_v32  ;;  %7611 = vmatprep.subr.bf16.mxu0 %v10487_v43  ;;  %v10562_v32 = vld [vmem:[%s14454_s1 + $0x16cc] ss:$16 sps:$4 sm:$0xff]   ;;  %v10557_v43 = vld [vmem:[%s14454_s1 + $0x14c8] ss:$16 sps:$4 sm:$0xff]  }
 0x320   : > { %7654 = vmatprep.subr.bf16.mxu1 %v10490_v63  ;;  %v10560_v63 = vld [vmem:[%s14454_s1 + $0x16c8] ss:$16 sps:$4 sm:$0xff]  }
 0x322   : > { %7612 = vmatpush1.bf16.msra.mxu0 %v10485_v15  ;;  %v10565_v15 = vld [vmem:[%s14454_s1 + $0x14ac] ss:$16 sps:$4 sm:$0xff]  }
 0x323   : > { %7655 = vmatpush1.bf16.msra.mxu1 %v10488_v18  ;;  %7613 = vmatprep.subr.bf16.mxu0 %v10493_v1  ;;  %v10566_v18 = vld [vmem:[%s14454_s1 + $0x16a8] ss:$16 sps:$4 sm:$0xff]   ;;  %v10571_v1 = vld [vmem:[%s14454_s1 + $0x148c] ss:$16 sps:$4 sm:$0xff]  }
 0x324   : > { %7656 = vmatprep.subr.bf16.mxu1 %v10496_v20  ;;  %v10572_v20 = vld [vmem:[%s14454_s1 + $0x1688] ss:$16 sps:$4 sm:$0xff]  }
 0x326   : > { %7614 = vmatpush1.bf16.msra.mxu0 %v10491_v19  ;;  %v10577_v19 = vld [vmem:[%s14454_s1 + $0x146c] ss:$16 sps:$4 sm:$0xff]  }
 0x327   : > { %7657 = vmatpush1.bf16.msra.mxu1 %v10494_v13  ;;  %7615 = vmatprep.subr.bf16.mxu0 %v10499_v58  ;;  %v10580_v13 = vld [vmem:[%s14454_s1 + $0x166c] ss:$16 sps:$4 sm:$0xff]   ;;  %v10575_v58 = vld [vmem:[%s14454_s1 + $0x1468] ss:$16 sps:$4 sm:$0xff]  }
 0x328   : > { %7658 = vmatprep.subr.bf16.mxu1 %v10502_v59  ;;  %v10578_v59 = vld [vmem:[%s14454_s1 + $0x1668] ss:$16 sps:$4 sm:$0xff]  }
 0x32a   : > { %7616 = vmatpush1.bf16.msra.mxu0 %v10497_v61  ;;  %v10583_v61 = vld [vmem:[%s14454_s1 + $0x144c] ss:$16 sps:$4 sm:$0xff]  }
 0x32b   : > { %7659 = vmatpush1.bf16.msra.mxu1 %v10500_v41  ;;  %7617 = vmatprep.subr.bf16.mxu0 %v10505_v23  ;;  %v10586_v41 = vld [vmem:[%s14454_s1 + $0x164c] ss:$16 sps:$4 sm:$0xff]   ;;  %v10581_v23 = vld [vmem:[%s14454_s1 + $0x1448] ss:$16 sps:$4 sm:$0xff]  }
 0x32c   : > { %7660 = vmatprep.subr.bf16.mxu1 %v10508_v21  ;;  %v10584_v21 = vld [vmem:[%s14454_s1 + $0x1648] ss:$16 sps:$4 sm:$0xff]  }
 0x32e   : > { %7618 = vmatpush2.bf16.msra.mxu0 %v10503_v53  ;;  %v10589_v53 = vld [vmem:[%s14454_s1 + $0x142c] ss:$16 sps:$4 sm:$0xff]  }
 0x32f   : > { %7661 = vmatpush2.bf16.msra.mxu1 %v10506_v17  ;;  %7619 = vmatprep.subr.bf16.mxu0 %v10511_v48  ;;  %v10592_v17 = vld [vmem:[%s14454_s1 + $0x162c] ss:$16 sps:$4 sm:$0xff]   ;;  %v10587_v48 = vld [vmem:[%s14454_s1 + $0x1428] ss:$16 sps:$4 sm:$0xff]  }
 0x330   : > { %7662 = vmatprep.subr.bf16.mxu1 %v10514_v49  ;;  %v10590_v49 = vld [vmem:[%s14454_s1 + $0x1628] ss:$16 sps:$4 sm:$0xff]  }
 0x332   : > { %7620 = vmatpush2.bf16.msra.mxu0 %v10509_v33  ;;  %v10595_v33 = vld [vmem:[%s14454_s1 + $0x140c] ss:$16 sps:$4 sm:$0xff]  }
 0x333   : > { %7663 = vmatpush2.bf16.msra.mxu1 %v10512_v3  ;;  %7621 = vmatprep.subr.bf16.mxu0 %v10517_v42  ;;  %v10598_v3 = vld [vmem:[%s14454_s1 + $0x160c] ss:$16 sps:$4 sm:$0xff]   ;;  %v10593_v42 = vld [vmem:[%s14454_s1 + $0x1408] ss:$16 sps:$4 sm:$0xff]  }
 0x334   : > { %7664 = vmatprep.subr.bf16.mxu1 %v10520_v6  ;;  %v10596_v6 = vld [vmem:[%s14454_s1 + $0x1608] ss:$16 sps:$4 sm:$0xff]  }
 0x336   : > { %7622 = vmatpush2.bf16.msra.mxu0 %v10515_v14  ;;  %v10601_v14 = vld [vmem:[%s14454_s1 + $0x15ec] ss:$16 sps:$4 sm:$0xff]  }
 0x337   : > { %7665 = vmatpush2.bf16.msra.mxu1 %v10518_v31  ;;  %7623 = vmatprep.subr.bf16.mxu0 %v10523_v12  ;;  %v10604_v31 = vld [vmem:[%s14454_s1 + $0x17ec] ss:$16 sps:$4 sm:$0xff]   ;;  %v10599_v12 = vld [vmem:[%s14454_s1 + $0x15e8] ss:$16 sps:$4 sm:$0xff]  }
 0x338   : > { %7666 = vmatprep.subr.bf16.mxu1 %v10526_v26  ;;  %v10602_v26 = vld [vmem:[%s14454_s1 + $0x17e8] ss:$16 sps:$4 sm:$0xff]  }
 0x33a   : > { %7624 = vmatpush2.bf16.msra.mxu0 %v10521_v0  ;;  %v10607_v0 = vld [vmem:[%s14454_s1 + $0x15cc] ss:$16 sps:$4 sm:$0xff]  }
 0x33b   : > { %7667 = vmatpush2.bf16.msra.mxu1 %v10524_v55  ;;  %7625 = vmatprep.subr.bf16.mxu0 %v10529_v27  ;;  %v10610_v55 = vld [vmem:[%s14454_s1 + $0x17cc] ss:$16 sps:$4 sm:$0xff]   ;;  %v10605_v27 = vld [vmem:[%s14454_s1 + $0x15c8] ss:$16 sps:$4 sm:$0xff]  }
 0x33c   : > { %7668 = vmatprep.subr.bf16.mxu1 %v10532_v29  ;;  %v10608_v29 = vld [vmem:[%s14454_s1 + $0x17c8] ss:$16 sps:$4 sm:$0xff]  }
 0x33e   : > { %7626 = vmatpush2.bf16.msra.mxu0 %v10527_v30  ;;  %v10613_v30 = vld [vmem:[%s14454_s1 + $0x15ac] ss:$16 sps:$4 sm:$0xff]  }
 0x33f   : > { %7669 = vmatpush2.bf16.msra.mxu1 %v10530_v35  ;;  %7627 = vmatprep.subr.bf16.mxu0 %v10535_v16  ;;  %v10616_v35 = vld [vmem:[%s14454_s1 + $0x17ac] ss:$16 sps:$4 sm:$0xff]   ;;  %v10611_v16 = vld [vmem:[%s14454_s1 + $0x15a8] ss:$16 sps:$4 sm:$0xff]  }
 0x340   : > { %7670 = vmatprep.subr.bf16.mxu1 %v10538_v60  ;;  %v10614_v60 = vld [vmem:[%s14454_s1 + $0x17a8] ss:$16 sps:$4 sm:$0xff]  }
 0x342   : > { %7628 = vmatpush2.bf16.msra.mxu0 %v10533_v39  ;;  %v10619_v39 = vld [vmem:[%s14454_s1 + $0x158c] ss:$16 sps:$4 sm:$0xff]  }
 0x343   : > { %7671 = vmatpush2.bf16.msra.mxu1 %v10536_v34  ;;  %7629 = vmatprep.subr.bf16.mxu0 %v10541_v54  ;;  %v10622_v34 = vld [vmem:[%s14454_s1 + $0x178c] ss:$16 sps:$4 sm:$0xff]   ;;  %v10617_v54 = vld [vmem:[%s14454_s1 + $0x1588] ss:$16 sps:$4 sm:$0xff]  }
 0x344   : > { %7672 = vmatprep.subr.bf16.mxu1 %v10544_v7  ;;  %v10620_v7 = vld [vmem:[%s14454_s1 + $0x1788] ss:$16 sps:$4 sm:$0xff]  }
 0x346   : > { %7630 = vmatpush2.bf16.msra.mxu0 %v10539_v62  ;;  %v10625_v62 = vld [vmem:[%s14454_s1 + $0x156c] ss:$16 sps:$4 sm:$0xff]  }
 0x347   : > { %7673 = vmatpush2.bf16.msra.mxu1 %v10542_v10  ;;  %7631 = vmatprep.subr.bf16.mxu0 %v10547_v11  ;;  %v10628_v10 = vld [vmem:[%s14454_s1 + $0x176c] ss:$16 sps:$4 sm:$0xff]   ;;  %v10623_v11 = vld [vmem:[%s14454_s1 + $0x1568] ss:$16 sps:$4 sm:$0xff]  }
 0x348   : > { %7674 = vmatprep.subr.bf16.mxu1 %v10550_v4  ;;  %v10626_v4 = vld [vmem:[%s14454_s1 + $0x1768] ss:$16 sps:$4 sm:$0xff]  }
 0x34a   : > { %7632 = vmatpush2.bf16.msra.mxu0 %v10545_v9  ;;  %v10631_v9 = vld [vmem:[%s14454_s1 + $0x154c] ss:$16 sps:$4 sm:$0xff]  }
 0x34b   : > { %7675 = vmatpush2.bf16.msra.mxu1 %v10548_v47  ;;  %7687 = vmatprep.subr.bf16.mxu0 %v10553_v50  ;;  %v10634_v47 = vld [vmem:[%s14454_s1 + $0x174c] ss:$16 sps:$4 sm:$0xff]   ;;  %v10629_v50 = vld [vmem:[%s14454_s1 + $0x1548] ss:$16 sps:$4 sm:$0xff]  }
 0x34c   : > { %7730 = vmatprep.subr.bf16.mxu1 %v10556_v52  ;;  %v10632_v52 = vld [vmem:[%s14454_s1 + $0x1748] ss:$16 sps:$4 sm:$0xff]  }
 0x34d   : > { %7634 = vmatmul.mubr.bf16.vlgmr.msra.gmra.mxu0 %v12022_v44  ;;  %v10568_v44 = vld [vmem:[%s14454_s1 + $0x16ac] ss:$16 sps:$4 sm:$0xff]  }
 0x34e   : > { %7677 = vmatmul.mubr.bf16.vlgmr.msra.gmra.mxu1 %v12026_v45  ;;  %7688 = vmatpush1.bf16.msra.mxu0 %v10551_v38  ;;  %v10563_v45 = vld [vmem:[%s14454_s1 + $0x14a8] ss:$16 sps:$4 sm:$0xff]   ;;  %v10637_v38 = vld [vmem:[%s14454_s1 + $0x152c] ss:$16 sps:$4 sm:$0xff]  }
 0x34f   : > { %7731 = vmatpush1.bf16.msra.mxu1 %v10554_v2  ;;  %7689 = vmatprep.subr.bf16.mxu0 %v10559_v51  ;;  %v10640_v2 = vld [vmem:[%s14454_s1 + $0x172c] ss:$16 sps:$4 sm:$0xff]   ;;  %v10635_v51 = vld [vmem:[%s14454_s1 + $0x1528] ss:$16 sps:$4 sm:$0xff]  }
 0x350   : > { %7732 = vmatprep.subr.bf16.mxu1 %v10562_v32  ;;  %7719 = vmatprep.mubr.bf16.mxu0 %v12054_v56  ;;  %v10574_v56 = vld [vmem:[%s14454_s1 + $0x168c] ss:$16 sps:$4 sm:$0xff]   ;;  %v10638_v32 = vld [vmem:[%s14454_s1 + $0x1728] ss:$16 sps:$4 sm:$0xff]  }
 0x351   : > { %7762 = vmatprep.mubr.bf16.mxu1 %v12058_v57  ;;  %v10569_v57 = vld [vmem:[%s14454_s1 + $0x1488] ss:$16 sps:$4 sm:$0xff]  }
 0x352   : > { %7690 = vmatpush1.bf16.msra.mxu0 %v10557_v43  ;;  %v10643_v43 = vld [vmem:[%s14454_s1 + $0x150c] ss:$16 sps:$4 sm:$0xff]  }
 0x353   : > { %7733 = vmatpush1.bf16.msra.mxu1 %v10560_v63  ;;  %7691 = vmatprep.subr.bf16.mxu0 %v10565_v15  ;;  %v10646_v63 = vld [vmem:[%s14454_s1 + $0x170c] ss:$16 sps:$4 sm:$0xff]   ;;  %v10641_v15 = vld [vmem:[%s14454_s1 + $0x1508] ss:$16 sps:$4 sm:$0xff]  }
 0x354   : > { %7734 = vmatprep.subr.bf16.mxu1 %v10568_v44  ;;  %v10644_v44 = vld [vmem:[%s14454_s1 + $0x1708] ss:$16 sps:$4 sm:$0xff]  }
 0x356   : > { %7692 = vmatpush1.bf16.msra.mxu0 %v10563_v45  ;;  %v10649_v45 = vld [vmem:[%s14454_s1 + $0x18ec] ss:$16 sps:$4 sm:$0xff]  }
 0x357   : > { %7735 = vmatpush1.bf16.msra.mxu1 %v10566_v18  ;;  %7693 = vmatprep.subr.bf16.mxu0 %v10571_v1  ;;  %v10652_v18 = vld [vmem:[%s14454_s1 + $0x1aec] ss:$16 sps:$4 sm:$0xff]   ;;  %v10647_v1 = vld [vmem:[%s14454_s1 + $0x18e8] ss:$16 sps:$4 sm:$0xff]  }
 0x358   : > { %7736 = vmatprep.subr.bf16.mxu1 %v10574_v56  ;;  %v10650_v56 = vld [vmem:[%s14454_s1 + $0x1ae8] ss:$16 sps:$4 sm:$0xff]  }
 0x35a   : > { %7694 = vmatpush1.bf16.msra.mxu0 %v10569_v57  ;;  %v10655_v57 = vld [vmem:[%s14454_s1 + $0x18cc] ss:$16 sps:$4 sm:$0xff]  }
 0x35b   : > { %7737 = vmatpush1.bf16.msra.mxu1 %v10572_v20  ;;  %7695 = vmatprep.subr.bf16.mxu0 %v10577_v19  ;;  %v10658_v20 = vld [vmem:[%s14454_s1 + $0x1acc] ss:$16 sps:$4 sm:$0xff]   ;;  %v10653_v19 = vld [vmem:[%s14454_s1 + $0x18c8] ss:$16 sps:$4 sm:$0xff]  }
 0x35c   : > { %7738 = vmatprep.subr.bf16.mxu1 %v10580_v13  ;;  %v10656_v13 = vld [vmem:[%s14454_s1 + $0x1ac8] ss:$16 sps:$4 sm:$0xff]  }
 0x35e   : > { %7696 = vmatpush1.bf16.msra.mxu0 %v10575_v58  ;;  %v10661_v58 = vld [vmem:[%s14454_s1 + $0x18ac] ss:$16 sps:$4 sm:$0xff]  }
 0x35f   : > { %7739 = vmatpush1.bf16.msra.mxu1 %v10578_v59  ;;  %7697 = vmatprep.subr.bf16.mxu0 %v10583_v61  ;;  %v10662_v59 = vld [vmem:[%s14454_s1 + $0x1aa8] ss:$16 sps:$4 sm:$0xff]   ;;  %v10667_v61 = vld [vmem:[%s14454_s1 + $0x188c] ss:$16 sps:$4 sm:$0xff]  }
 0x360   : > { %7740 = vmatprep.subr.bf16.mxu1 %v10586_v41  ;;  %v10668_v41 = vld [vmem:[%s14454_s1 + $0x1a88] ss:$16 sps:$4 sm:$0xff]  }
 0x362   : > { %7698 = vmatpush1.bf16.msra.mxu0 %v10581_v23  ;;  %v10673_v23 = vld [vmem:[%s14454_s1 + $0x186c] ss:$16 sps:$4 sm:$0xff]  }
 0x363   : > { %7741 = vmatpush1.bf16.msra.mxu1 %v10584_v21  ;;  %7699 = vmatprep.subr.bf16.mxu0 %v10589_v53  ;;  %v10676_v21 = vld [vmem:[%s14454_s1 + $0x1a6c] ss:$16 sps:$4 sm:$0xff]   ;;  %v10671_v53 = vld [vmem:[%s14454_s1 + $0x1868] ss:$16 sps:$4 sm:$0xff]  }
 0x364   : > { %7742 = vmatprep.subr.bf16.mxu1 %v10592_v17  ;;  %v10674_v17 = vld [vmem:[%s14454_s1 + $0x1a68] ss:$16 sps:$4 sm:$0xff]  }
 0x366   : > { %7700 = vmatpush1.bf16.msra.mxu0 %v10587_v48  ;;  %v10679_v48 = vld [vmem:[%s14454_s1 + $0x184c] ss:$16 sps:$4 sm:$0xff]  }
 0x367   : > { %7743 = vmatpush1.bf16.msra.mxu1 %v10590_v49  ;;  %7701 = vmatprep.subr.bf16.mxu0 %v10595_v33  ;;  %v10682_v49 = vld [vmem:[%s14454_s1 + $0x1a4c] ss:$16 sps:$4 sm:$0xff]   ;;  %v10677_v33 = vld [vmem:[%s14454_s1 + $0x1848] ss:$16 sps:$4 sm:$0xff]  }
 0x368   : > { %7744 = vmatprep.subr.bf16.mxu1 %v10598_v3  ;;  %v10680_v3 = vld [vmem:[%s14454_s1 + $0x1a48] ss:$16 sps:$4 sm:$0xff]  }
 0x36a   : > { %7702 = vmatpush1.bf16.msra.mxu0 %v10593_v42  ;;  %v10685_v42 = vld [vmem:[%s14454_s1 + $0x182c] ss:$16 sps:$4 sm:$0xff]  }
 0x36b   : > { %7745 = vmatpush1.bf16.msra.mxu1 %v10596_v6  ;;  %7703 = vmatprep.subr.bf16.mxu0 %v10601_v14  ;;  %v10688_v6 = vld [vmem:[%s14454_s1 + $0x1a2c] ss:$16 sps:$4 sm:$0xff]   ;;  %v10683_v14 = vld [vmem:[%s14454_s1 + $0x1828] ss:$16 sps:$4 sm:$0xff]  }
 0x36c   : > { %7746 = vmatprep.subr.bf16.mxu1 %v10604_v31  ;;  %v10686_v31 = vld [vmem:[%s14454_s1 + $0x1a28] ss:$16 sps:$4 sm:$0xff]  }
 0x36e   : > { %7704 = vmatpush2.bf16.msra.mxu0 %v10599_v12  ;;  %v10691_v12 = vld [vmem:[%s14454_s1 + $0x180c] ss:$16 sps:$4 sm:$0xff]  }
 0x36f   : > { %7747 = vmatpush2.bf16.msra.mxu1 %v10602_v26  ;;  %7705 = vmatprep.subr.bf16.mxu0 %v10607_v0  ;;  %v10694_v26 = vld [vmem:[%s14454_s1 + $0x1a0c] ss:$16 sps:$4 sm:$0xff]   ;;  %v10689_v0 = vld [vmem:[%s14454_s1 + $0x1808] ss:$16 sps:$4 sm:$0xff]  }
 0x370   : > { %7748 = vmatprep.subr.bf16.mxu1 %v10610_v55  ;;  %v10692_v55 = vld [vmem:[%s14454_s1 + $0x1a08] ss:$16 sps:$4 sm:$0xff]  }
 0x372   : > { %7706 = vmatpush2.bf16.msra.mxu0 %v10605_v27  ;;  %v10697_v27 = vld [vmem:[%s14454_s1 + $0x19ec] ss:$16 sps:$4 sm:$0xff]  }
 0x373   : > { %7749 = vmatpush2.bf16.msra.mxu1 %v10608_v29  ;;  %7707 = vmatprep.subr.bf16.mxu0 %v10613_v30  ;;  %v10700_v29 = vld [vmem:[%s14454_s1 + $0x1bec] ss:$16 sps:$4 sm:$0xff]   ;;  %v10695_v30 = vld [vmem:[%s14454_s1 + $0x19e8] ss:$16 sps:$4 sm:$0xff]  }
 0x374   : > { %7750 = vmatprep.subr.bf16.mxu1 %v10616_v35  ;;  %v10698_v35 = vld [vmem:[%s14454_s1 + $0x1be8] ss:$16 sps:$4 sm:$0xff]  }
 0x376   : > { %7708 = vmatpush2.bf16.msra.mxu0 %v10611_v16  ;;  %v10703_v16 = vld [vmem:[%s14454_s1 + $0x19cc] ss:$16 sps:$4 sm:$0xff]  }
 0x377   : > { %7751 = vmatpush2.bf16.msra.mxu1 %v10614_v60  ;;  %7709 = vmatprep.subr.bf16.mxu0 %v10619_v39  ;;  %v10706_v60 = vld [vmem:[%s14454_s1 + $0x1bcc] ss:$16 sps:$4 sm:$0xff]   ;;  %v10701_v39 = vld [vmem:[%s14454_s1 + $0x19c8] ss:$16 sps:$4 sm:$0xff]  }
 0x378   : > { %7752 = vmatprep.subr.bf16.mxu1 %v10622_v34  ;;  %v10704_v34 = vld [vmem:[%s14454_s1 + $0x1bc8] ss:$16 sps:$4 sm:$0xff]  }
 0x37a   : > { %7710 = vmatpush2.bf16.msra.mxu0 %v10617_v54  ;;  %v10709_v54 = vld [vmem:[%s14454_s1 + $0x19ac] ss:$16 sps:$4 sm:$0xff]  }
 0x37b   : > { %7753 = vmatpush2.bf16.msra.mxu1 %v10620_v7  ;;  %7711 = vmatprep.subr.bf16.mxu0 %v10625_v62  ;;  %v10712_v7 = vld [vmem:[%s14454_s1 + $0x1bac] ss:$16 sps:$4 sm:$0xff]   ;;  %v10707_v62 = vld [vmem:[%s14454_s1 + $0x19a8] ss:$16 sps:$4 sm:$0xff]  }
 0x37c   : > { %7754 = vmatprep.subr.bf16.mxu1 %v10628_v10  ;;  %v10710_v10 = vld [vmem:[%s14454_s1 + $0x1ba8] ss:$16 sps:$4 sm:$0xff]  }
 0x37e   : > { %7712 = vmatpush2.bf16.msra.mxu0 %v10623_v11  ;;  %v10715_v11 = vld [vmem:[%s14454_s1 + $0x198c] ss:$16 sps:$4 sm:$0xff]  }
 0x37f   : > { %7755 = vmatpush2.bf16.msra.mxu1 %v10626_v4  ;;  %7713 = vmatprep.subr.bf16.mxu0 %v10631_v9  ;;  %v10718_v4 = vld [vmem:[%s14454_s1 + $0x1b8c] ss:$16 sps:$4 sm:$0xff]   ;;  %v10713_v9 = vld [vmem:[%s14454_s1 + $0x1988] ss:$16 sps:$4 sm:$0xff]  }
 0x380   : > { %7756 = vmatprep.subr.bf16.mxu1 %v10634_v47  ;;  %v10716_v47 = vld [vmem:[%s14454_s1 + $0x1b88] ss:$16 sps:$4 sm:$0xff]  }
 0x382   : > { %7714 = vmatpush2.bf16.msra.mxu0 %v10629_v50  ;;  %v10721_v50 = vld [vmem:[%s14454_s1 + $0x196c] ss:$16 sps:$4 sm:$0xff]  }
 0x383   : > { %7757 = vmatpush2.bf16.msra.mxu1 %v10632_v52  ;;  %7715 = vmatprep.subr.bf16.mxu0 %v10637_v38  ;;  %v10724_v52 = vld [vmem:[%s14454_s1 + $0x1b6c] ss:$16 sps:$4 sm:$0xff]   ;;  %v10719_v38 = vld [vmem:[%s14454_s1 + $0x1968] ss:$16 sps:$4 sm:$0xff]  }
 0x384   : > { %7758 = vmatprep.subr.bf16.mxu1 %v10640_v2  ;;  %v10722_v2 = vld [vmem:[%s14454_s1 + $0x1b68] ss:$16 sps:$4 sm:$0xff]  }
 0x386   : > { %7716 = vmatpush2.bf16.msra.mxu0 %v10635_v51  ;;  %v10727_v51 = vld [vmem:[%s14454_s1 + $0x194c] ss:$16 sps:$4 sm:$0xff]  }
 0x387   : > { %7759 = vmatpush2.bf16.msra.mxu1 %v10638_v32  ;;  %7717 = vmatprep.subr.bf16.mxu0 %v10643_v43  ;;  %v10730_v32 = vld [vmem:[%s14454_s1 + $0x1b4c] ss:$16 sps:$4 sm:$0xff]   ;;  %v10725_v43 = vld [vmem:[%s14454_s1 + $0x1948] ss:$16 sps:$4 sm:$0xff]  }
 0x388   : > { %7760 = vmatprep.subr.bf16.mxu1 %v10646_v63  ;;  %v10728_v63 = vld [vmem:[%s14454_s1 + $0x1b48] ss:$16 sps:$4 sm:$0xff]  }
 0x38a   : > { %7718 = vmatpush2.bf16.msra.mxu0 %v10641_v15  ;;  %v10733_v15 = vld [vmem:[%s14454_s1 + $0x192c] ss:$16 sps:$4 sm:$0xff]  }
 0x38b   : > { %7761 = vmatpush2.bf16.msra.mxu1 %v10644_v44  ;;  %7773 = vmatprep.subr.bf16.mxu0 %v10649_v45  ;;  %v10736_v44 = vld [vmem:[%s14454_s1 + $0x1b2c] ss:$16 sps:$4 sm:$0xff]   ;;  %v10731_v45 = vld [vmem:[%s14454_s1 + $0x1928] ss:$16 sps:$4 sm:$0xff]  }
 0x38c   : > { %7816 = vmatprep.subr.bf16.mxu1 %v10652_v18  ;;  %v10734_v18 = vld [vmem:[%s14454_s1 + $0x1b28] ss:$16 sps:$4 sm:$0xff]  }
 0x38d   : > { %7720 = vmatmul.mubr.bf16.vlgmr.msra.gmra.mxu0 %v12246_v24  ;;  %v10664_v24 = vld [vmem:[%s14454_s1 + $0x1aac] ss:$16 sps:$4 sm:$0xff]  }
 0x38e   : > { %7763 = vmatmul.mubr.bf16.vlgmr.msra.gmra.mxu1 %v12250_v25  ;;  %7774 = vmatpush1.bf16.msra.mxu0 %v10647_v1  ;;  %v10659_v25 = vld [vmem:[%s14454_s1 + $0x18a8] ss:$16 sps:$4 sm:$0xff]   ;;  %v10739_v1 = vld [vmem:[%s14454_s1 + $0x190c] ss:$16 sps:$4 sm:$0xff]  }
 0x38f   : > { %7817 = vmatpush1.bf16.msra.mxu1 %v10650_v56  ;;  %7775 = vmatprep.subr.bf16.mxu0 %v10655_v57  ;;  %v10742_v56 = vld [vmem:[%s14454_s1 + $0x1b0c] ss:$16 sps:$4 sm:$0xff]   ;;  %v10737_v57 = vld [vmem:[%s14454_s1 + $0x1908] ss:$16 sps:$4 sm:$0xff]  }
 0x390   : > { %7818 = vmatprep.subr.bf16.mxu1 %v10658_v20  ;;  %7805 = vmatprep.mubr.bf16.mxu0 %v12278_v36  ;;  %v10670_v36 = vld [vmem:[%s14454_s1 + $0x1a8c] ss:$16 sps:$4 sm:$0xff]   ;;  %v10740_v20 = vld [vmem:[%s14454_s1 + $0x1b08] ss:$16 sps:$4 sm:$0xff]  }
 0x391   : > { %7848 = vmatprep.mubr.bf16.mxu1 %v12282_v37  ;;  %v10665_v37 = vld [vmem:[%s14454_s1 + $0x1888] ss:$16 sps:$4 sm:$0xff]  }
 0x392   : > { %7776 = vmatpush1.bf16.msra.mxu0 %v10653_v19  ;;  %v10745_v19 = vld [vmem:[%s14454_s1 + $0x1cec] ss:$16 sps:$4 sm:$0xff]  }
 0x393   : > { %7819 = vmatpush1.bf16.msra.mxu1 %v10656_v13  ;;  %7777 = vmatprep.subr.bf16.mxu0 %v10661_v58  ;;  %v10748_v13 = vld [vmem:[%s14454_s1 + $0x1eec] ss:$16 sps:$4 sm:$0xff]   ;;  %v10743_v58 = vld [vmem:[%s14454_s1 + $0x1ce8] ss:$16 sps:$4 sm:$0xff]  }
 0x394   : > { %7820 = vmatprep.subr.bf16.mxu1 %v10664_v24  ;;  %v10746_v24 = vld [vmem:[%s14454_s1 + $0x1ee8] ss:$16 sps:$4 sm:$0xff]  }
 0x396   : > { %7778 = vmatpush1.bf16.msra.mxu0 %v10659_v25  ;;  %v10751_v25 = vld [vmem:[%s14454_s1 + $0x1ccc] ss:$16 sps:$4 sm:$0xff]  }
 0x397   : > { %7821 = vmatpush1.bf16.msra.mxu1 %v10662_v59  ;;  %7779 = vmatprep.subr.bf16.mxu0 %v10667_v61  ;;  %v10754_v59 = vld [vmem:[%s14454_s1 + $0x1ecc] ss:$16 sps:$4 sm:$0xff]   ;;  %v14467_v61 = vld [vmem:[#allocation2_spill] sm:$0xff] }
 0x398   : > { %7822 = vmatprep.subr.bf16.mxu1 %v10670_v36  ;;  %v10749_v36 = vld [vmem:[%s14454_s1 + $0x1cc8] ss:$16 sps:$4 sm:$0xff]  }
 0x39a   : > { %7780 = vmatpush1.bf16.msra.mxu0 %v10665_v37  ;;  %v10752_v37 = vld [vmem:[%s14454_s1 + $0x1ec8] ss:$16 sps:$4 sm:$0xff]  }
 0x39b   : > { %7823 = vmatpush1.bf16.msra.mxu1 %v10668_v41  ;;  %7781 = vmatprep.subr.bf16.mxu0 %v10673_v23  ;;  %v10757_v41 = vld [vmem:[%s14454_s1 + $0x1cac] ss:$16 sps:$4 sm:$0xff]  }
 0x39c   : > { %7824 = vmatprep.subr.bf16.mxu1 %v10676_v21  ;;  %v14468_v23 = vld [vmem:[#allocation3_spill] sm:$0xff]  ;;  %v14469_v21 = vld [vmem:[#allocation4_spill] sm:$0xff] }
 0x39e   : > { %7782 = vmatpush1.bf16.msra.mxu0 %v10671_v53  ;;  %v10755_v53 = vld [vmem:[%s14454_s1 + $0x1ca8] ss:$16 sps:$4 sm:$0xff]  }
 0x39f   : > { %7825 = vmatpush1.bf16.msra.mxu1 %v10674_v17  ;;  %7783 = vmatprep.subr.bf16.mxu0 %v10679_v48  ;;  %v10758_v17 = vld [vmem:[%s14454_s1 + $0x1ea8] ss:$16 sps:$4 sm:$0xff]   ;;  %v10763_v48 = vld [vmem:[%s14454_s1 + $0x1c8c] ss:$16 sps:$4 sm:$0xff]  }
 0x3a0   : > { %7826 = vmatprep.subr.bf16.mxu1 %v10682_v49  ;;  %v10766_v49 = vld [vmem:[%s14454_s1 + $0x1e8c] ss:$16 sps:$4 sm:$0xff]  }
 0x3a2   : > { %7784 = vmatpush1.bf16.msra.mxu0 %v10677_v33  ;;  %v10761_v33 = vld [vmem:[%s14454_s1 + $0x1c88] ss:$16 sps:$4 sm:$0xff]  }
 0x3a3   : > { %7827 = vmatpush1.bf16.msra.mxu1 %v10680_v3  ;;  %7785 = vmatprep.subr.bf16.mxu0 %v10685_v42  ;;  %v10764_v3 = vld [vmem:[%s14454_s1 + $0x1e88] ss:$16 sps:$4 sm:$0xff]   ;;  %v10769_v42 = vld [vmem:[%s14454_s1 + $0x1c6c] ss:$16 sps:$4 sm:$0xff]  }
 0x3a4   : > { %7828 = vmatprep.subr.bf16.mxu1 %v10688_v6  ;;  %v10772_v6 = vld [vmem:[%s14454_s1 + $0x1e6c] ss:$16 sps:$4 sm:$0xff]  }
 0x3a6   : > { %7786 = vmatpush1.bf16.msra.mxu0 %v10683_v14  ;;  %v10767_v14 = vld [vmem:[%s14454_s1 + $0x1c68] ss:$16 sps:$4 sm:$0xff]  }
 0x3a7   : > { %7829 = vmatpush1.bf16.msra.mxu1 %v10686_v31  ;;  %7787 = vmatprep.subr.bf16.mxu0 %v10691_v12  ;;  %v10770_v31 = vld [vmem:[%s14454_s1 + $0x1e68] ss:$16 sps:$4 sm:$0xff]   ;;  %v10775_v12 = vld [vmem:[%s14454_s1 + $0x1c4c] ss:$16 sps:$4 sm:$0xff]  }
 0x3a8   : > { %7830 = vmatprep.subr.bf16.mxu1 %v10694_v26  ;;  %v10778_v26 = vld [vmem:[%s14454_s1 + $0x1e4c] ss:$16 sps:$4 sm:$0xff]  }
 0x3aa   : > { %7788 = vmatpush1.bf16.msra.mxu0 %v10689_v0  ;;  %v10773_v0 = vld [vmem:[%s14454_s1 + $0x1c48] ss:$16 sps:$4 sm:$0xff]  }
 0x3ab   : > { %7831 = vmatpush1.bf16.msra.mxu1 %v10692_v55  ;;  %7789 = vmatprep.subr.bf16.mxu0 %v10697_v27  ;;  %v10776_v55 = vld [vmem:[%s14454_s1 + $0x1e48] ss:$16 sps:$4 sm:$0xff]   ;;  %v10781_v27 = vld [vmem:[%s14454_s1 + $0x1c2c] ss:$16 sps:$4 sm:$0xff]  }
 0x3ac   : > { %7832 = vmatprep.subr.bf16.mxu1 %v10700_v29  ;;  %v10784_v29 = vld [vmem:[%s14454_s1 + $0x1e2c] ss:$16 sps:$4 sm:$0xff]  }
 0x3ae   : > { %7790 = vmatpush2.bf16.msra.mxu0 %v10695_v30  ;;  %v10779_v30 = vld [vmem:[%s14454_s1 + $0x1c28] ss:$16 sps:$4 sm:$0xff]  }
 0x3af   : > { %7833 = vmatpush2.bf16.msra.mxu1 %v10698_v35  ;;  %7791 = vmatprep.subr.bf16.mxu0 %v10703_v16  ;;  %v10782_v35 = vld [vmem:[%s14454_s1 + $0x1e28] ss:$16 sps:$4 sm:$0xff]   ;;  %v10787_v16 = vld [vmem:[%s14454_s1 + $0x1c0c] ss:$16 sps:$4 sm:$0xff]  }
 0x3b0   : > { %7834 = vmatprep.subr.bf16.mxu1 %v10706_v60  ;;  %v10790_v60 = vld [vmem:[%s14454_s1 + $0x1e0c] ss:$16 sps:$4 sm:$0xff]  }
 0x3b2   : > { %7792 = vmatpush2.bf16.msra.mxu0 %v10701_v39  ;;  %v10785_v39 = vld [vmem:[%s14454_s1 + $0x1c08] ss:$16 sps:$4 sm:$0xff]  }
 0x3b3   : > { %7835 = vmatpush2.bf16.msra.mxu1 %v10704_v34  ;;  %7793 = vmatprep.subr.bf16.mxu0 %v10709_v54  ;;  %v10788_v34 = vld [vmem:[%s14454_s1 + $0x1e08] ss:$16 sps:$4 sm:$0xff]   ;;  %v10793_v54 = vld [vmem:[%s14454_s1 + $0x1dec] ss:$16 sps:$4 sm:$0xff]  }
 0x3b4   : > { %7836 = vmatprep.subr.bf16.mxu1 %v10712_v7  ;;  %v10796_v7 = vld [vmem:[%s14454_s1 + $0x1fec] ss:$16 sps:$4 sm:$0xff]  }
 0x3b6   : > { %7794 = vmatpush2.bf16.msra.mxu0 %v10707_v62  ;;  %v10791_v62 = vld [vmem:[%s14454_s1 + $0x1de8] ss:$16 sps:$4 sm:$0xff]  }
 0x3b7   : > { %7837 = vmatpush2.bf16.msra.mxu1 %v10710_v10  ;;  %7795 = vmatprep.subr.bf16.mxu0 %v10715_v11  ;;  %v10794_v10 = vld [vmem:[%s14454_s1 + $0x1fe8] ss:$16 sps:$4 sm:$0xff]   ;;  %v10799_v11 = vld [vmem:[%s14454_s1 + $0x1dcc] ss:$16 sps:$4 sm:$0xff]  }
 0x3b8   : > { %7838 = vmatprep.subr.bf16.mxu1 %v10718_v4  ;;  %v10802_v4 = vld [vmem:[%s14454_s1 + $0x1fcc] ss:$16 sps:$4 sm:$0xff]  }
 0x3ba   : > { %7796 = vmatpush2.bf16.msra.mxu0 %v10713_v9  ;;  %v10797_v9 = vld [vmem:[%s14454_s1 + $0x1dc8] ss:$16 sps:$4 sm:$0xff]  }
 0x3bb   : > { %7839 = vmatpush2.bf16.msra.mxu1 %v10716_v47  ;;  %7797 = vmatprep.subr.bf16.mxu0 %v10721_v50  ;;  %v10800_v47 = vld [vmem:[%s14454_s1 + $0x1fc8] ss:$16 sps:$4 sm:$0xff]   ;;  %v10805_v50 = vld [vmem:[%s14454_s1 + $0x1dac] ss:$16 sps:$4 sm:$0xff]  }
 0x3bc   : > { %7840 = vmatprep.subr.bf16.mxu1 %v10724_v52  ;;  %v10808_v52 = vld [vmem:[%s14454_s1 + $0x1fac] ss:$16 sps:$4 sm:$0xff]  }
 0x3be   : > { %7798 = vmatpush2.bf16.msra.mxu0 %v10719_v38  ;;  %v10803_v38 = vld [vmem:[%s14454_s1 + $0x1da8] ss:$16 sps:$4 sm:$0xff]  }
 0x3bf   : > { %7841 = vmatpush2.bf16.msra.mxu1 %v10722_v2  ;;  %7799 = vmatprep.subr.bf16.mxu0 %v10727_v51  ;;  %v10806_v2 = vld [vmem:[%s14454_s1 + $0x1fa8] ss:$16 sps:$4 sm:$0xff]   ;;  %v10811_v51 = vld [vmem:[%s14454_s1 + $0x1d8c] ss:$16 sps:$4 sm:$0xff]  }
 0x3c0   : > { %7842 = vmatprep.subr.bf16.mxu1 %v10730_v32  ;;  %v10814_v32 = vld [vmem:[%s14454_s1 + $0x1f8c] ss:$16 sps:$4 sm:$0xff]  }
 0x3c2   : > { %7800 = vmatpush2.bf16.msra.mxu0 %v10725_v43  ;;  %v10809_v43 = vld [vmem:[%s14454_s1 + $0x1d88] ss:$16 sps:$4 sm:$0xff]  }
 0x3c3   : > { %7843 = vmatpush2.bf16.msra.mxu1 %v10728_v63  ;;  %7801 = vmatprep.subr.bf16.mxu0 %v10733_v15  ;;  %v10812_v63 = vld [vmem:[%s14454_s1 + $0x1f88] ss:$16 sps:$4 sm:$0xff]   ;;  %v10817_v15 = vld [vmem:[%s14454_s1 + $0x1d6c] ss:$16 sps:$4 sm:$0xff]  }
 0x3c4   : > { %7844 = vmatprep.subr.bf16.mxu1 %v10736_v44  ;;  %v10820_v44 = vld [vmem:[%s14454_s1 + $0x1f6c] ss:$16 sps:$4 sm:$0xff]  }
 0x3c6   : > { %7802 = vmatpush2.bf16.msra.mxu0 %v10731_v45  ;;  %v10815_v45 = vld [vmem:[%s14454_s1 + $0x1d68] ss:$16 sps:$4 sm:$0xff]  }
 0x3c7   : > { %7845 = vmatpush2.bf16.msra.mxu1 %v10734_v18  ;;  %7803 = vmatprep.subr.bf16.mxu0 %v10739_v1  ;;  %v10818_v18 = vld [vmem:[%s14454_s1 + $0x1f68] ss:$16 sps:$4 sm:$0xff]   ;;  %v10823_v1 = vld [vmem:[%s14454_s1 + $0x1d4c] ss:$16 sps:$4 sm:$0xff]  }
 0x3c8   : > { %7846 = vmatprep.subr.bf16.mxu1 %v10742_v56  ;;  %v10826_v56 = vld [vmem:[%s14454_s1 + $0x1f4c] ss:$16 sps:$4 sm:$0xff]  }
 0x3ca   : > { %7804 = vmatpush2.bf16.msra.mxu0 %v10737_v57  ;;  %v10821_v57 = vld [vmem:[%s14454_s1 + $0x1d48] ss:$16 sps:$4 sm:$0xff]  }
 0x3cb   : > { %7847 = vmatpush2.bf16.msra.mxu1 %v10740_v20  ;;  %7859 = vmatprep.subr.bf16.mxu0 %v10745_v19  ;;  %v10824_v20 = vld [vmem:[%s14454_s1 + $0x1f48] ss:$16 sps:$4 sm:$0xff]   ;;  %v10829_v19 = vld [vmem:[%s14454_s1 + $0x1d2c] ss:$16 sps:$4 sm:$0xff]  }
 0x3cc   : > { %7902 = vmatprep.subr.bf16.mxu1 %v10748_v13  ;;  %v10832_v13 = vld [vmem:[%s14454_s1 + $0x1f2c] ss:$16 sps:$4 sm:$0xff]  }
 0x3cd   : > { %7806 = vmatmul.mubr.bf16.vlgmr.msra.gmra.mxu0 %v12482_v40  ;;  %v10760_v40 = vld [vmem:[%s14454_s1 + $0x1eac] ss:$16 sps:$4 sm:$0xff]  }
 0x3ce   : > { %7849 = vmatmul.mubr.bf16.vlgmr.msra.gmra.mxu1 %v14467_v61  ;;  %7860 = vmatpush1.bf16.msra.mxu0 %v10743_v58  ;;  %v10827_v58 = vld [vmem:[%s14454_s1 + $0x1d28] ss:$16 sps:$4 sm:$0xff]  }
 0x3cf   : > { %7903 = vmatpush1.bf16.msra.mxu1 %v10746_v24  ;;  %7861 = vmatprep.subr.bf16.mxu0 %v10751_v25  ;;  %v10830_v24 = vld [vmem:[%s14454_s1 + $0x1f28] ss:$16 sps:$4 sm:$0xff]   ;;  %v10835_v25 = vld [vmem:[%s14454_s1 + $0x1d0c] ss:$16 sps:$4 sm:$0xff]  }
 0x3d0   : > { %7904 = vmatprep.subr.bf16.mxu1 %v10754_v59  ;;  %7891 = vmatprep.mubr.bf16.mxu0 %v14468_v23  ;;  %v10838_v59 = vld [vmem:[%s14454_s1 + $0x1f0c] ss:$16 sps:$4 sm:$0xff]   ;;  %v10833_v61 = vld [vmem:[%s14454_s1 + $0x1d08] ss:$16 sps:$4 sm:$0xff]   ;;  %v7334_v23 = vpop.f32.mrf.mxu1 }
 0x3d1   : > { %7934 = vmatprep.mubr.bf16.mxu1 %v14469_v21 }
 0x3d2   : > { %7862 = vmatpush1.bf16.msra.mxu0 %v10749_v36  ;;  %v10836_v36 = vld [vmem:[%s14454_s1 + $0x1f08] ss:$16 sps:$4 sm:$0xff]  }
 0x3d3   : > { %7905 = vmatpush1.bf16.msra.mxu1 %v10752_v37  ;;  %7863 = vmatprep.subr.bf16.mxu0 %v10757_v41  ;;  %v14470_v37 = vld [vmem:[#allocation5_spill] sm:$0xff]  ;;  %v14471_v41 = vld [vmem:[#allocation6_spill] sm:$0xff] }
 0x3d4   : > { %7906 = vmatprep.subr.bf16.mxu1 %v10760_v40  ;;  %v7291_v40 = vpop.f32.mrf.mxu0 }
 0x3d6   : > { %7864 = vmatpush1.bf16.msra.mxu0 %v10755_v53  ;;  %v7293_v21 = vpop.f32.mrf.mxu0  ;;  %v7336_v53 = vpop.f32.mrf.mxu1 }
 0x3d7   : > { %7907 = vmatpush1.bf16.msra.mxu1 %v10758_v17  ;;  %7865 = vmatprep.subr.bf16.mxu0 %v10763_v48 }
 0x3d8   : > { %7908 = vmatprep.subr.bf16.mxu1 %v10766_v49  ;;  %v7295_v17 = vpop.f32.mrf.mxu0  ;;  %v7338_v48 = vpop.f32.mrf.mxu1 }
 0x3da   : > { %7866 = vmatpush1.bf16.msra.mxu0 %v10761_v33  ;;  %v7297_v49 = vpop.f32.mrf.mxu0  ;;  %v7340_v33 = vpop.f32.mrf.mxu1 }
 0x3db   : > { %7909 = vmatpush1.bf16.msra.mxu1 %v10764_v3  ;;  %7867 = vmatprep.subr.bf16.mxu0 %v10769_v42 }
 0x3dc   : > { %7910 = vmatprep.subr.bf16.mxu1 %v10772_v6  ;;  %v7377_v3 = vpop.f32.mrf.mxu0  ;;  %v7420_v42 = vpop.f32.mrf.mxu1 }
 0x3de   : > { %7868 = vmatpush1.bf16.msra.mxu0 %v10767_v14  ;;  %v7379_v6 = vpop.f32.mrf.mxu0  ;;  %v7422_v14 = vpop.f32.mrf.mxu1 }
 0x3df   : > { %7911 = vmatpush1.bf16.msra.mxu1 %v10770_v31  ;;  %7869 = vmatprep.subr.bf16.mxu0 %v10775_v12 }
 0x3e0   : > { %7912 = vmatprep.subr.bf16.mxu1 %v10778_v26  ;;  %v7381_v31 = vpop.f32.mrf.mxu0  ;;  %v7424_v12 = vpop.f32.mrf.mxu1 }
 0x3e2   : > { %7870 = vmatpush1.bf16.msra.mxu0 %v10773_v0  ;;  %v7383_v26 = vpop.f32.mrf.mxu0  ;;  %v7426_v0 = vpop.f32.mrf.mxu1 }
 0x3e3   : > { %7913 = vmatpush1.bf16.msra.mxu1 %v10776_v55  ;;  %7871 = vmatprep.subr.bf16.mxu0 %v10781_v27 }
 0x3e4   : > { %7914 = vmatprep.subr.bf16.mxu1 %v10784_v29  ;;  %v7463_v55 = vpop.f32.mrf.mxu0  ;;  %v7506_v27 = vpop.f32.mrf.mxu1 }
 0x3e6   : > { %7872 = vmatpush1.bf16.msra.mxu0 %v10779_v30  ;;  %v7465_v29 = vpop.f32.mrf.mxu0  ;;  %v7508_v30 = vpop.f32.mrf.mxu1 }
 0x3e7   : > { %7915 = vmatpush1.bf16.msra.mxu1 %v10782_v35  ;;  %7873 = vmatprep.subr.bf16.mxu0 %v10787_v16 }
 0x3e8   : > { %7916 = vmatprep.subr.bf16.mxu1 %v10790_v60  ;;  %v7467_v35 = vpop.f32.mrf.mxu0  ;;  %v7510_v16 = vpop.f32.mrf.mxu1 }
 0x3ea   : > { %7874 = vmatpush1.bf16.msra.mxu0 %v10785_v39  ;;  %v7469_v60 = vpop.f32.mrf.mxu0  ;;  %v7512_v39 = vpop.f32.mrf.mxu1 }
 0x3eb   : > { %7917 = vmatpush1.bf16.msra.mxu1 %v10788_v34  ;;  %7875 = vmatprep.subr.bf16.mxu0 %v10793_v54 }
 0x3ec   : > { %7918 = vmatprep.subr.bf16.mxu1 %v10796_v7  ;;  %v7549_v34 = vpop.f32.mrf.mxu0  ;;  %v7592_v54 = vpop.f32.mrf.mxu1 }
 0x3ee   : > { %7876 = vmatpush2.bf16.msra.mxu0 %v10791_v62  ;;  %v7551_v7 = vpop.f32.mrf.mxu0  ;;  %v7594_v62 = vpop.f32.mrf.mxu1 }
 0x3ef   : > { %7919 = vmatpush2.bf16.msra.mxu1 %v10794_v10  ;;  %7877 = vmatprep.subr.bf16.mxu0 %v10799_v11 }
 0x3f0   : > { %7920 = vmatprep.subr.bf16.mxu1 %v10802_v4  ;;  %v7553_v10 = vpop.f32.mrf.mxu0  ;;  %v7596_v11 = vpop.f32.mrf.mxu1 }
 0x3f2   : > { %7878 = vmatpush2.bf16.msra.mxu0 %v10797_v9  ;;  %v7555_v4 = vpop.f32.mrf.mxu0  ;;  %v7598_v9 = vpop.f32.mrf.mxu1 }
 0x3f3   : > { %7921 = vmatpush2.bf16.msra.mxu1 %v10800_v47  ;;  %7879 = vmatprep.subr.bf16.mxu0 %v10805_v50 }
 0x3f4   : > { %7922 = vmatprep.subr.bf16.mxu1 %v10808_v52 }
 0x3f6   : > { %7880 = vmatpush2.bf16.msra.mxu0 %v10803_v38 }
 0x3f7   : > { %7923 = vmatpush2.bf16.msra.mxu1 %v10806_v2  ;;  %7881 = vmatprep.subr.bf16.mxu0 %v10811_v51  ;;  %v7335_v2 = vadd.f32 %v7334_v23, %v7291_v40  ;;  %v7337_v51 = vadd.f32 %v7336_v53, %v7293_v21 }
 0x3f8   : > { %7924 = vmatprep.subr.bf16.mxu1 %v10814_v32 }
 0x3f9   : > { %v7378_v32 = vadd.f32 %v7377_v3, %v7335_v2 }
 0x3fa   : > { %7882 = vmatpush2.bf16.msra.mxu0 %v10809_v43 }
 0x3fb   : > { %7925 = vmatpush2.bf16.msra.mxu1 %v10812_v63  ;;  %7883 = vmatprep.subr.bf16.mxu0 %v10817_v15  ;;  %v7339_v15 = vadd.f32 %v7338_v48, %v7295_v17 }
 0x3fc   : > { %7926 = vmatprep.subr.bf16.mxu1 %v10820_v44  ;;  %v7380_v44 = vadd.f32 %v7379_v6, %v7337_v51 }
 0x3fe   : > { %7884 = vmatpush2.bf16.msra.mxu0 %v10815_v45  ;;  %v7341_v45 = vadd.f32 %v7340_v33, %v7297_v49 }
 0x3ff   : > { %7927 = vmatpush2.bf16.msra.mxu1 %v10818_v18  ;;  %7885 = vmatprep.subr.bf16.mxu0 %v10823_v1  ;;  %v7421_v18 = vadd.f32 %v7420_v42, %v7378_v32  ;;  %v7382_v1 = vadd.f32 %v7381_v31, %v7339_v15 }
 0x400   : > { %7928 = vmatprep.subr.bf16.mxu1 %v10826_v56 }
 0x402   : > { %7886 = vmatpush2.bf16.msra.mxu0 %v10821_v57 }
 0x403   : > { %7929 = vmatpush2.bf16.msra.mxu1 %v10824_v20  ;;  %7887 = vmatprep.subr.bf16.mxu0 %v10829_v19  ;;  %v7423_v20 = vadd.f32 %v7422_v14, %v7380_v44  ;;  %v7384_v19 = vadd.f32 %v7383_v26, %v7341_v45 }
 0x404   : > { %7930 = vmatprep.subr.bf16.mxu1 %v10832_v13  ;;  %v7464_v13 = vadd.f32 %v7463_v55, %v7421_v18 }
 0x406   : > { %7888 = vmatpush2.bf16.msra.mxu0 %v10827_v58 }
 0x407   : > { %7931 = vmatpush2.bf16.msra.mxu1 %v10830_v24  ;;  %7889 = vmatprep.subr.bf16.mxu0 %v10835_v25  ;;  %v7425_v25 = vadd.f32 %v7424_v12, %v7382_v1 }
 0x408   : > { %7932 = vmatprep.subr.bf16.mxu1 %v10838_v59  ;;  %v7466_v59 = vadd.f32 %v7465_v29, %v7423_v20 }
 0x40a   : > { %7890 = vmatpush2.bf16.msra.mxu0 %v10833_v61  ;;  %v7427_v61 = vadd.f32 %v7426_v0, %v7384_v19  ;;  %v7509_v23 = vadd.f32 %v7508_v30, %v7466_v59 }
 0x40b   : > { %7933 = vmatpush2.bf16.msra.mxu1 %v10836_v36  ;;  %v7507_v36 = vadd.f32 %v7506_v27, %v7464_v13 }
 0x40c   : > { %v7470_v21 = vadd.f32 %v7469_v60, %v7427_v61  ;;  %v7552_v48 = vadd.f32 %v7551_v7, %v7509_v23 }
 0x40d   : > { %7892 = vmatmul.mubr.bf16.vlgmr.msra.gmra.mxu0 %v14470_v37  ;;  %v7635_v47 = vpop.f32.mrf.mxu0  ;;  %v7468_v37 = vadd.f32 %v7467_v35, %v7425_v25  ;;  %v7550_v53 = vadd.f32 %v7549_v34, %v7507_v36 }
 0x40e   : > { %7935 = vmatmul.mubr.bf16.vlgmr.msra.gmra.mxu1 %v14471_v41  ;;  %v7678_v50 = vpop.f32.mrf.mxu1  ;;  %v7513_v3 = vadd.f32 %v7512_v39, %v7470_v21  ;;  %v7595_v14 = vadd.f32 %v7594_v62, %v7552_v48 }
 0x40f   : > { %v7637_v52 = vpop.f32.mrf.mxu0  ;;  %v7511_v17 = vadd.f32 %v7510_v16, %v7468_v37  ;;  %v7593_v42 = vadd.f32 %v7592_v54, %v7550_v53 }
 0x410   : > { %v7680_v38 = vpop.f32.mrf.mxu1  ;;  %v7556_v31 = vadd.f32 %v7555_v4, %v7513_v3  ;;  %v7638_v27 = vadd.f32 %v7637_v52, %v7595_v14 }
 0x411   : > { %v7639_v43 = vpop.f32.mrf.mxu0  ;;  %v7554_v6 = vadd.f32 %v7553_v10, %v7511_v17  ;;  %v7636_v26 = vadd.f32 %v7635_v47, %v7593_v42 }
 0x412   : > { %v7682_v63 = vpop.f32.mrf.mxu1  ;;  %v7599_v2 = vadd.f32 %v7598_v9, %v7556_v31  ;;  %v7681_v34 = vadd.f32 %v7680_v38, %v7638_v27 }
 0x413   : > { %v7641_v56 = vpop.f32.mrf.mxu0  ;;  %v7597_v0 = vadd.f32 %v7596_v11, %v7554_v6  ;;  %v7679_v30 = vadd.f32 %v7678_v50, %v7636_v26 }
 0x414   : > { %v7684_v57 = vpop.f32.mrf.mxu1  ;;  %v7642_v16 = vadd.f32 %v7641_v56, %v7599_v2 }
 0x415   : > { %v7640_v60 = vadd.f32 %v7639_v43, %v7597_v0 }
 0x416   : > { %v7685_v10 = vadd.f32 %v7684_v57, %v7642_v16 }
 0x417   : > { %v7683_v39 = vadd.f32 %v7682_v63, %v7640_v60 }
 0x44d   : > { %v7721_v58 = vpop.f32.mrf.mxu0 }
 0x44e   : > { %v7764_v24 = vpop.f32.mrf.mxu1  ;;  %v7722_v7 = vadd.f32 %v7721_v58, %v7679_v30 }
 0x44f   : > { %v7723_v41 = vpop.f32.mrf.mxu0 }
 0x450   : > { %v7766_v40 = vpop.f32.mrf.mxu1  ;;  %v7724_v54 = vadd.f32 %v7723_v41, %v7681_v34  ;;  %v7765_v62 = vadd.f32 %v7764_v24, %v7722_v7 }
 0x451   : > { %v7725_v49 = vpop.f32.mrf.mxu0 }
 0x452   : > { %v7768_v33 = vpop.f32.mrf.mxu1  ;;  %v7726_v4 = vadd.f32 %v7725_v49, %v7683_v39  ;;  %v7767_v44 = vadd.f32 %v7766_v40, %v7724_v54 }
 0x453   : > { %v7727_v12 = vpop.f32.mrf.mxu0 }
 0x454   : > { %v7770_v55 = vpop.f32.mrf.mxu1  ;;  %v7728_v11 = vadd.f32 %v7727_v12, %v7685_v10  ;;  %v7769_v45 = vadd.f32 %v7768_v33, %v7726_v4 }
 0x456   : > { %v7771_v43 = vadd.f32 %v7770_v55, %v7728_v11 }
 0x48d   : > { %v7807_v29 = vpop.f32.mrf.mxu0 }
 0x48e   : > { %v7850_v35 = vpop.f32.mrf.mxu1  ;;  %v7808_v52 = vadd.f32 %v7807_v29, %v7765_v62  ;;  %v10863_v62 = vmov 1983009808  }
 0x48f   : > { %v7809_v51 = vpop.f32.mrf.mxu0  ;;  %v8059_v4 = vunpack.c.l.s4 %v10863_v62 }
 0x490   : > { %v7852_v32 = vpop.f32.mrf.mxu1  ;;  %v7810_v18 = vadd.f32 %v7809_v51, %v7767_v44  ;;  %v7851_v38 = vadd.f32 %v7850_v35, %v7808_v52 }
 0x491   : > { %v7811_v47 = vpop.f32.mrf.mxu0 }
 0x492   : > { %v7854_v15 = vpop.f32.mrf.mxu1  ;;  %v7812_v1 = vadd.f32 %v7811_v47, %v7769_v45  ;;  %v7853_v63 = vadd.f32 %v7852_v32, %v7810_v18 }
 0x493   : > { %v7813_v9 = vpop.f32.mrf.mxu0 }
 0x494   : > { %v7856_v50 = vpop.f32.mrf.mxu1  ;;  %v7814_v57 = vadd.f32 %v7813_v9, %v7771_v43  ;;  %v7855_v24 = vadd.f32 %v7854_v15, %v7812_v1  ;;  %v8060_v9 = vunpack.c.0.s8 %v8059_v4 }
 0x496   : > { %v7857_v37 = vadd.f32 %v7856_v50, %v7814_v57 }
 0x4cd   : > { %v7893_v56 = vpop.f32.mrf.mxu0 }
 0x4ce   : > { %v7936_v20 = vpop.f32.mrf.mxu1  ;;  %v7894_v19 = vadd.f32 %v7893_v56, %v7851_v38 }
 0x4cf   : > { %v7895_v13 = vpop.f32.mrf.mxu0 }
 0x4d0   : > { %v7938_v58 = vpop.f32.mrf.mxu1  ;;  %v7937_v25 = vadd.f32 %v7936_v20, %v7894_v19  ;;  %v7896_v59 = vadd.f32 %v7895_v13, %v7853_v63  ;;  %v8063_v20 = vsub.s32 %v8060_v9, %v13420_v28 }
 0x4d1   : > { %v7897_v61 = vpop.f32.mrf.mxu0 }
 0x4d2   : > { %v7940_v36 = vpop.f32.mrf.mxu1  ;;  %7947 = vst [vmem:[%s13440_s7 + $0x10] sm:$0xff] %v7937_v25  ;;  %v7939_v41 = vadd.f32 %v7938_v58, %v7896_v59  ;;  %v7898_v40 = vadd.f32 %v7897_v61, %v7855_v24  ;;  %v8009_v42 = vmul.f32 %v7937_v25, %v7937_v25  ;;  %v8064_v13 = vrot.slane %v8056_v5, %v8063_v20 }
 0x4d3   : > { %v7899_v23 = vpop.f32.mrf.mxu0 }
 0x4d4   : > { %7948 = vst [vmem:[%s13440_s7 + $0x18] sm:$0xff] %v7939_v41  ;;  %v7941_v21 = vadd.f32 %v7940_v36, %v7898_v40  ;;  %v7900_v53 = vadd.f32 %v7899_v23, %v7857_v37  ;;  %v7942_v17 = vpop.f32.mrf.mxu1  ;;  %v8010_v55 = vmul.f32 %v7939_v41, %v7939_v41 }
 0x4d6   : > { %7951 = vst [vmem:[%s13440_s7 + $0x30] sm:$0x1] %v7941_v21  ;;  %v7972_v48 = vsel %vm7961_vm0, %v7941_v21, 0.0  ;;  %v7943_v49 = vadd.f32 %v7942_v17, %v7900_v53 }
 0x4d7   : > { %v7991_v33 = vsel %vm7974_vm1, %v7972_v48, 0.0  ;;  %v8013_v3 = vmul.f32 %v7972_v48, %v7972_v48 }
 0x4d8   : > { %v7992_v6 = vadd.f32 %v7991_v33, %v7937_v25  ;;  %7952 = vst [vmem:[%s13440_s7 + $0x38] sm:$0x1] %v7943_v49  ;;  %v7973_v14 = vsel %vm7961_vm0, %v7943_v49, 0.0  ;;  %s9276_s7 = sshll.u32 %s14477_s12, 3 }
 0x4d9   : > { %v8031_v31 = vsel %vm7974_vm1, %v8013_v3, 0.0  ;;  %v7999_v26 = vsel %vm7974_vm1, %v7973_v14, 0.0  ;;  %v8014_v12 = vmul.f32 %v7973_v14, %v7973_v14  ;;  %s227_s22 = scalar_lea.vmem %s14456_s3, %s9276_s7 }
 0x4da   : > { %v7993_v0 = vrot.slane %v7992_v6, 4  ;;  %v8032_v27 = vadd.f32 %v8031_v31, %v8009_v42  ;;  %v8000_v29 = vadd.f32 %v7999_v26, %v7939_v41 }
 0x4db   : > { %v8039_v35 = vsel %vm7974_vm1, %v8014_v12, 0.0 }
 0x4dc   : > { %v7994_v2 = vadd.f32 %v7993_v0, %v7992_v6  ;;  %v8033_v30 = vrot.slane %v8032_v27, 4  ;;  %v8001_v60 = vrot.slane %v8000_v29, 4  ;;  %v8040_v34 = vadd.f32 %v8039_v35, %v8010_v55 }
 0x4de   : > { %v7995_v16 = vrot.slane %v7994_v2, 2  ;;  %v8034_v7 = vadd.f32 %v8033_v30, %v8032_v27  ;;  %v8002_v51 = vadd.f32 %v8001_v60, %v8000_v29  ;;  %v8041_v22 = vrot.slane %v8040_v34, 4 }
 0x4e0   : > { %v7996_v32 = vadd.f32 %v7995_v16, %v7994_v2  ;;  %v8035_v39 = vrot.slane %v8034_v7, 2  ;;  %v8003_v54 = vrot.slane %v8002_v51, 2  ;;  %v8042_v10 = vadd.f32 %v8041_v22, %v8040_v34 }
 0x4e2   : > { %v8036_v47 = vadd.f32 %v8035_v39, %v8034_v7  ;;  %v8004_v15 = vadd.f32 %v8003_v54, %v8002_v51  ;;  %v8043_v44 = vrot.slane %v8042_v10, 2  ;;  %v7997_v11 = vrot.slane %v7996_v32, 1 }
 0x4e4   : > { %v8037_v52 = vrot.slane %v8036_v47, 1  ;;  %v8005_v45 = vrot.slane %v8004_v15, 1  ;;  %v8044_v18 = vadd.f32 %v8043_v44, %v8042_v10  ;;  %v7998_v38 = vadd.f32 %v7997_v11, %v7996_v32 }
 0x4e6   : > { %v8038_v50 = vadd.f32 %v8037_v52, %v8036_v47  ;;  %v8045_v43 = vrot.slane %v8044_v18, 1  ;;  %v8006_v1 = vadd.f32 %v8005_v45, %v8004_v15 }
 0x4e8   : > { %v8046_v56 = vadd.f32 %v8045_v43, %v8044_v18  ;;  %v8049_v63 = vsel %vm7974_vm1, %v7998_v38, %v8038_v50 }
 0x4ea   : > { %v8050_v57 = vsel %vm7974_vm1, %v8006_v1, %v8046_v56 }
 0x4eb   : > { %v8057_v19 = vcombine.low %v8049_v63, %v8050_v57 }
 0x4ed   : > { %v8071_v58 = vrot.slane %v8057_v19, %v8063_v20 }
 0x4ef   : > { %v8072_v24 = vcombine.low %v8064_v13, %v8071_v58 }
 0x4f1   : > { %8075 = vst [vmem:[%s227_s22] sm:$0xff] %v8072_v24 }
 0x4f2 PF: > { %s14_s14 = sadd.s32 1, %s10861_s14   ;;  %s14472_s12 = smov %s10857_s13 }
 0x4f3   : > { %p11_p5 = scmp.ge.s32.totalorder %s14_s14, 4   ;;  %s14473_s13 = smov %s14475_s15 }
 0x4f5   :  { %13 = sbr.rel (!%p11_p5) target bundleno = 2 (0x2), region = 74 }

// kernel: gaugan_discriminator_forward.15
= control target key start
LH: loop header
LB: loop body
LE: loop exit
PB: predicated region body
PF: predicated region fallthrough
CT: control target
= control target key end

     0   :  { %s9201_s1 = inlined_call_operand.vmem [shape: bf16[8192,128], index: 1, kind: input, shape index: {}]   ;;  %s9202_s0 = inlined_call_operand.vmem [shape: bf16[8,8192], index: 0, kind: input, shape index: {}]   ;;  %s9203_s2 = inlined_call_operand.vmem [shape: f32[1,128], index: 2, kind: input, shape index: {}]   ;;  %s9204_s3 = inlined_call_operand.vmem [shape: f32[8,128], index: 3, kind: output, shape index: {}]  }
   0x1   :  { %v6940_v0 = vld [vmem:[%s9201_s1 + $0x78] sm:$0xff]   ;;  %v6944_v4 = vld [vmem:[%s9201_s1 + $0x70] sm:$0xff]   ;;  %v6948_v8 = vld [vmem:[%s9201_s1 + $0x68] sm:$0xff]  }
   0x2   :  { %v6941_v1 = vld [vmem:[%s9201_s1 + $0xf8] sm:$0xff]   ;;  %6236 = vmatprep.subr.bf16.mxu0 %v6940_v0  ;;  %v6945_v5 = vld [vmem:[%s9201_s1 + $0xf0] sm:$0xff]   ;;  %v6949_v9 = vld [vmem:[%s9201_s1 + $0xe8] sm:$0xff]  }
   0x3   :  { %v6942_v2 = vld [vmem:[%s9201_s1 + $0x38] sm:$0xff]   ;;  %6258 = vmatprep.subr.bf16.mxu1 %v6941_v1  ;;  %v6946_v6 = vld [vmem:[%s9201_s1 + $0x30] sm:$0xff]   ;;  %v6950_v10 = vld [vmem:[%s9201_s1 + $0x28] sm:$0xff]  }
   0x4   :  { %v6943_v3 = vld [vmem:[%s9201_s1 + $0xb8] sm:$0xff]   ;;  %6237 = vmatpush3.bf16.msra.mxu0 %v6942_v2  ;;  %v6947_v7 = vld [vmem:[%s9201_s1 + $0xb0] sm:$0xff]   ;;  %v6951_v11 = vld [vmem:[%s9201_s1 + $0xa8] sm:$0xff]  }
   0x5   :  { %6259 = vmatpush3.bf16.msra.mxu1 %v6943_v3  ;;  %6238 = vmatprep.subr.bf16.mxu0 %v6944_v4  ;;  %v6952_v12 = vld [vmem:[%s9201_s1 + $0x60] sm:$0xff]   ;;  %v6956_v16 = vld [vmem:[%s9201_s1 + $0x58] sm:$0xff]   ;;  %v6960_v20 = vld [vmem:[%s9201_s1 + $0x50] sm:$0xff]  }
   0x6   :  { %6260 = vmatprep.subr.bf16.mxu1 %v6945_v5  ;;  %v6953_v13 = vld [vmem:[%s9201_s1 + $0xe0] sm:$0xff]   ;;  %v6957_v17 = vld [vmem:[%s9201_s1 + $0xd8] sm:$0xff]   ;;  %v6961_v21 = vld [vmem:[%s9201_s1 + $0xd0] sm:$0xff]  }
   0x7   :  { %v6954_v14 = vld [vmem:[%s9201_s1 + $0x20] sm:$0xff]   ;;  %v6958_v18 = vld [vmem:[%s9201_s1 + $0x18] sm:$0xff]   ;;  %v6962_v22 = vld [vmem:[%s9201_s1 + $0x10] sm:$0xff]  }
   0x8   :  { %6239 = vmatpush3.bf16.msra.mxu0 %v6946_v6  ;;  %v6955_v15 = vld [vmem:[%s9201_s1 + $0xa0] sm:$0xff]   ;;  %v6959_v19 = vld [vmem:[%s9201_s1 + $0x98] sm:$0xff]   ;;  %v6963_v23 = vld [vmem:[%s9201_s1 + $0x90] sm:$0xff]  }
   0x9   :  { %6261 = vmatpush3.bf16.msra.mxu1 %v6947_v7  ;;  %6240 = vmatprep.subr.bf16.mxu0 %v6948_v8  ;;  %v6964_v24 = vld [vmem:[%s9201_s1 + $0x48] sm:$0xff]   ;;  %v6968_v28 = vld [vmem:[%s9201_s1 + $0x40] sm:$0xff]   ;;  %v6976_v38 = vld [vmem:[%s9201_s1 + $0x178] sm:$0xff]  }
   0xa   :  { %6262 = vmatprep.subr.bf16.mxu1 %v6949_v9  ;;  %v6965_v25 = vld [vmem:[%s9201_s1 + $0xc8] sm:$0xff]   ;;  %v6969_v29 = vld [vmem:[%s9201_s1 + $0xc0] sm:$0xff]   ;;  %v6977_v39 = vld [vmem:[%s9201_s1 + $0x1f8] sm:$0xff]  }
   0xb   :  { %v6966_v26 = vld [vmem:[%s9201_s1 + $0x8] sm:$0xff]   ;;  %v6970_v30 = vld [vmem:[%s9201_s1] sm:$0xff]   ;;  %v6978_v40 = vld [vmem:[%s9201_s1 + $0x138] sm:$0xff]  }
   0xc   :  { %6241 = vmatpush3.bf16.msra.mxu0 %v6950_v10  ;;  %v6967_v27 = vld [vmem:[%s9201_s1 + $0x88] sm:$0xff]   ;;  %v6971_v31 = vld [vmem:[%s9201_s1 + $0x80] sm:$0xff]   ;;  %v6979_v41 = vld [vmem:[%s9201_s1 + $0x1b8] sm:$0xff]  }
   0xd   :  { %6263 = vmatpush3.bf16.msra.mxu1 %v6951_v11  ;;  %6242 = vmatprep.subr.bf16.mxu0 %v6952_v12  ;;  %v15_v32 = vld [vmem:[%s9202_s0] sm:$0xff]  ;;  %v16_v33 = vld [vmem:[%s9202_s0 + $0x8] sm:$0xff]  ;;  %v6980_v42 = vld [vmem:[%s9201_s1 + $0x170] sm:$0xff]  }
   0xe   :  { %6264 = vmatprep.subr.bf16.mxu1 %v6953_v13  ;;  %v5660_v34 = vcombine.low %v15_v32, %v15_v32  ;;  %v5661_v35 = vcombine.high %v15_v32, %v15_v32  ;;  %v5662_v36 = vcombine.low %v16_v33, %v16_v33  ;;  %v5663_v37 = vcombine.high %v16_v33, %v16_v33  ;;  %v6981_v43 = vld [vmem:[%s9201_s1 + $0x1f0] sm:$0xff]   ;;  %v6984_v46 = vld [vmem:[%s9201_s1 + $0x168] sm:$0xff]   ;;  %v6988_v50 = vld [vmem:[%s9201_s1 + $0x160] sm:$0xff]  }
   0xf   :  { %v6982_v44 = vld [vmem:[%s9201_s1 + $0x130] sm:$0xff]   ;;  %v6985_v47 = vld [vmem:[%s9201_s1 + $0x1e8] sm:$0xff]   ;;  %v6989_v51 = vld [vmem:[%s9201_s1 + $0x1e0] sm:$0xff]  }
  0x10   :  { %6243 = vmatpush3.bf16.msra.mxu0 %v6954_v14  ;;  %4406 = vmatprep.mubr.bf16.mxu0 %v5661_v35  ;;  %v6983_v45 = vld [vmem:[%s9201_s1 + $0x1b0] sm:$0xff]   ;;  %v6986_v48 = vld [vmem:[%s9201_s1 + $0x128] sm:$0xff]   ;;  %v6990_v52 = vld [vmem:[%s9201_s1 + $0x120] sm:$0xff]  }
  0x11   :  { %6265 = vmatpush3.bf16.msra.mxu1 %v6955_v15  ;;  %6244 = vmatprep.subr.bf16.mxu0 %v6956_v16  ;;  %v6987_v49 = vld [vmem:[%s9201_s1 + $0x1a8] sm:$0xff]   ;;  %v6991_v53 = vld [vmem:[%s9201_s1 + $0x1a0] sm:$0xff]   ;;  %v6992_v54 = vld [vmem:[%s9201_s1 + $0x158] sm:$0xff]  }
  0x12   :  { %6266 = vmatprep.subr.bf16.mxu1 %v6957_v17  ;;  %4446 = vmatprep.mubr.bf16.mxu1 %v5663_v37  ;;  %v6993_v55 = vld [vmem:[%s9201_s1 + $0x1d8] sm:$0xff]   ;;  %v6996_v58 = vld [vmem:[%s9201_s1 + $0x150] sm:$0xff]   ;;  %v7000_v62 = vld [vmem:[%s9201_s1 + $0x148] sm:$0xff]  }
  0x13   :  { %v6994_v56 = vld [vmem:[%s9201_s1 + $0x118] sm:$0xff]   ;;  %v6997_v59 = vld [vmem:[%s9201_s1 + $0x1d0] sm:$0xff]   ;;  %v7001_v63 = vld [vmem:[%s9201_s1 + $0x1c8] sm:$0xff]  }
  0x14   :  { %6245 = vmatpush3.bf16.msra.mxu0 %v6958_v18  ;;  %v6995_v57 = vld [vmem:[%s9201_s1 + $0x198] sm:$0xff]   ;;  %v6998_v60 = vld [vmem:[%s9201_s1 + $0x110] sm:$0xff]   ;;  %v7002_v0 = vld [vmem:[%s9201_s1 + $0x108] sm:$0xff]  }
  0x15   :  { %6267 = vmatpush3.bf16.msra.mxu1 %v6959_v19  ;;  %6246 = vmatprep.subr.bf16.mxu0 %v6960_v20  ;;  %v6999_v61 = vld [vmem:[%s9201_s1 + $0x190] sm:$0xff]   ;;  %v7003_v1 = vld [vmem:[%s9201_s1 + $0x188] sm:$0xff]   ;;  %v7004_v2 = vld [vmem:[%s9201_s1 + $0x140] sm:$0xff]  }
  0x16   :  { %6268 = vmatprep.subr.bf16.mxu1 %v6961_v21  ;;  %v7005_v3 = vld [vmem:[%s9201_s1 + $0x1c0] sm:$0xff]   ;;  %v17_v6 = vld [vmem:[%s9202_s0 + $0x10] sm:$0xff]  ;;  %v18_v9 = vld [vmem:[%s9202_s0 + $0x18] sm:$0xff] }
  0x17   :  { %v7006_v4 = vld [vmem:[%s9201_s1 + $0x100] sm:$0xff]   ;;  %v5664_v7 = vcombine.low %v17_v6, %v17_v6  ;;  %v5665_v8 = vcombine.high %v17_v6, %v17_v6  ;;  %v5666_v10 = vcombine.low %v18_v9, %v18_v9  ;;  %v5667_v11 = vcombine.high %v18_v9, %v18_v9  ;;  %v7012_v12 = vld [vmem:[%s9201_s1 + $0x278] sm:$0xff]   ;;  %v7016_v16 = vld [vmem:[%s9201_s1 + $0x270] sm:$0xff]  }
  0x18   :  { %6247 = vmatpush3.bf16.msra.mxu0 %v6962_v22  ;;  %v7007_v5 = vld [vmem:[%s9201_s1 + $0x180] sm:$0xff]   ;;  %v7013_v13 = vld [vmem:[%s9201_s1 + $0x2f8] sm:$0xff]   ;;  %v7017_v17 = vld [vmem:[%s9201_s1 + $0x2f0] sm:$0xff]  }
  0x19   :  { %6269 = vmatpush3.bf16.msra.mxu1 %v6963_v23  ;;  %6248 = vmatprep.subr.bf16.mxu0 %v6964_v24  ;;  %v7014_v14 = vld [vmem:[%s9201_s1 + $0x238] sm:$0xff]   ;;  %v7018_v18 = vld [vmem:[%s9201_s1 + $0x230] sm:$0xff]   ;;  %v7020_v20 = vld [vmem:[%s9201_s1 + $0x268] sm:$0xff]  }
  0x1a   :  { %6270 = vmatprep.subr.bf16.mxu1 %v6965_v25  ;;  %v7015_v15 = vld [vmem:[%s9201_s1 + $0x2b8] sm:$0xff]   ;;  %v7019_v19 = vld [vmem:[%s9201_s1 + $0x2b0] sm:$0xff]   ;;  %v7021_v21 = vld [vmem:[%s9201_s1 + $0x2e8] sm:$0xff]  }
  0x1b   :  { %v7022_v22 = vld [vmem:[%s9201_s1 + $0x228] sm:$0xff]   ;;  %v7024_v24 = vld [vmem:[%s9201_s1 + $0x260] sm:$0xff]   ;;  %v7032_v32 = vld [vmem:[%s9201_s1 + $0x250] sm:$0xff]  }
  0x1c   :  { %6249 = vmatpush3.bf16.msra.mxu0 %v6966_v26  ;;  %v7023_v23 = vld [vmem:[%s9201_s1 + $0x2a8] sm:$0xff]   ;;  %v7025_v25 = vld [vmem:[%s9201_s1 + $0x2e0] sm:$0xff]   ;;  %v7033_v33 = vld [vmem:[%s9201_s1 + $0x2d0] sm:$0xff]  }
  0x1d   :  { %6271 = vmatpush3.bf16.msra.mxu1 %v6967_v27  ;;  %6250 = vmatprep.subr.bf16.mxu0 %v6968_v28  ;;  %v7026_v26 = vld [vmem:[%s9201_s1 + $0x220] sm:$0xff]   ;;  %v7028_v28 = vld [vmem:[%s9201_s1 + $0x258] sm:$0xff]   ;;  %v7035_v35 = vld [vmem:[%s9201_s1 + $0x290] sm:$0xff]  }
  0x1e   :  { %6272 = vmatprep.subr.bf16.mxu1 %v6969_v29  ;;  %v7027_v27 = vld [vmem:[%s9201_s1 + $0x2a0] sm:$0xff]   ;;  %v7029_v29 = vld [vmem:[%s9201_s1 + $0x2d8] sm:$0xff]   ;;  %v7037_v37 = vld [vmem:[%s9201_s1 + $0x2c8] sm:$0xff]  }
  0x1f   :  { %v7068_v6 = vld [vmem:[%s9201_s1 + $0x350] sm:$0xff]  }
  0x20   :  { %6251 = vmatpush3.bf16.msra.mxu0 %v6970_v30  ;;  %v7030_v30 = vld [vmem:[%s9201_s1 + $0x218] sm:$0xff]   ;;  %v7071_v9 = vld [vmem:[%s9201_s1 + $0x390] sm:$0xff]  }
  0x21   :  { %6273 = vmatpush3.bf16.msra.mxu1 %v6971_v31  ;;  %6280 = vmatprep.subr.bf16.mxu0 %v6976_v38  ;;  %v7031_v31 = vld [vmem:[%s9201_s1 + $0x298] sm:$0xff]   ;;  %v7038_v38 = vld [vmem:[%s9201_s1 + $0x208] sm:$0xff]  }
  0x22   :  { %6302 = vmatprep.subr.bf16.mxu1 %v6977_v39  ;;  %v7039_v39 = vld [vmem:[%s9201_s1 + $0x288] sm:$0xff]  }
  0x23   :  { %4407 = vmatmul.mubr.bf16.vlgmr.msra.gmra.mxu0 %v5660_v34  ;;  %v7034_v34 = vld [vmem:[%s9201_s1 + $0x210] sm:$0xff]  }
  0x24   :  { %4447 = vmatmul.mubr.bf16.vlgmr.msra.gmra.mxu1 %v5662_v36  ;;  %6281 = vmatpush3.bf16.msra.mxu0 %v6978_v40  ;;  %v7036_v36 = vld [vmem:[%s9201_s1 + $0x248] sm:$0xff]   ;;  %v7040_v40 = vld [vmem:[%s9201_s1 + $0x240] sm:$0xff]  }
  0x25   :  { %6303 = vmatpush3.bf16.msra.mxu1 %v6979_v41  ;;  %6282 = vmatprep.subr.bf16.mxu0 %v6980_v42  ;;  %v7041_v41 = vld [vmem:[%s9201_s1 + $0x2c0] sm:$0xff]  }
  0x26   :  { %6304 = vmatprep.subr.bf16.mxu1 %v6981_v43  ;;  %4486 = vmatprep.mubr.bf16.mxu0 %v5665_v8  ;;  %v7042_v42 = vld [vmem:[%s9201_s1 + $0x200] sm:$0xff]   ;;  %v7070_v8 = vld [vmem:[%s9201_s1 + $0x310] sm:$0xff]  }
  0x27   :  { %4526 = vmatprep.mubr.bf16.mxu1 %v5667_v11  ;;  %v7043_v43 = vld [vmem:[%s9201_s1 + $0x280] sm:$0xff]   ;;  %v7073_v11 = vld [vmem:[%s9201_s1 + $0x3c8] sm:$0xff]  }
  0x28   :  { %6283 = vmatpush3.bf16.msra.mxu0 %v6982_v44  ;;  %v19_v44 = vld [vmem:[%s9202_s0 + $0x20] sm:$0xff] }
  0x29   :  { %6305 = vmatpush3.bf16.msra.mxu1 %v6983_v45  ;;  %6284 = vmatprep.subr.bf16.mxu0 %v6984_v46  ;;  %v20_v45 = vld [vmem:[%s9202_s0 + $0x28] sm:$0xff]  ;;  %v5668_v46 = vcombine.low %v19_v44, %v19_v44 }
  0x2a   :  { %6306 = vmatprep.subr.bf16.mxu1 %v6985_v47  ;;  %v5669_v47 = vcombine.high %v19_v44, %v19_v44  ;;  %v7104_v44 = vld [vmem:[%s9201_s1 + $0x450] sm:$0xff]  }
  0x2c   :  { %6285 = vmatpush3.bf16.msra.mxu0 %v6986_v48  ;;  %v5670_v48 = vcombine.low %v20_v45, %v20_v45 }
  0x2d   :  { %6307 = vmatpush3.bf16.msra.mxu1 %v6987_v49  ;;  %6286 = vmatprep.subr.bf16.mxu0 %v6988_v50  ;;  %v5671_v49 = vcombine.high %v20_v45, %v20_v45  ;;  %v7048_v50 = vld [vmem:[%s9201_s1 + $0x378] sm:$0xff]   ;;  %v7105_v45 = vld [vmem:[%s9201_s1 + $0x4d0] sm:$0xff]  }
  0x2e   :  { %6308 = vmatprep.subr.bf16.mxu1 %v6989_v51  ;;  %v7049_v51 = vld [vmem:[%s9201_s1 + $0x3f8] sm:$0xff]  }
  0x30   :  { %6287 = vmatpush3.bf16.msra.mxu0 %v6990_v52  ;;  %v7050_v52 = vld [vmem:[%s9201_s1 + $0x338] sm:$0xff]  }
  0x31   :  { %6309 = vmatpush3.bf16.msra.mxu1 %v6991_v53  ;;  %6288 = vmatprep.subr.bf16.mxu0 %v6992_v54  ;;  %v7051_v53 = vld [vmem:[%s9201_s1 + $0x3b8] sm:$0xff]   ;;  %v7052_v54 = vld [vmem:[%s9201_s1 + $0x370] sm:$0xff]  }
  0x32   :  { %6310 = vmatprep.subr.bf16.mxu1 %v6993_v55  ;;  %v7053_v55 = vld [vmem:[%s9201_s1 + $0x3f0] sm:$0xff]  }
  0x34   :  { %6289 = vmatpush3.bf16.msra.mxu0 %v6994_v56  ;;  %v7054_v56 = vld [vmem:[%s9201_s1 + $0x330] sm:$0xff]  }
  0x35   :  { %6311 = vmatpush3.bf16.msra.mxu1 %v6995_v57  ;;  %6290 = vmatprep.subr.bf16.mxu0 %v6996_v58  ;;  %v7055_v57 = vld [vmem:[%s9201_s1 + $0x3b0] sm:$0xff]   ;;  %v7056_v58 = vld [vmem:[%s9201_s1 + $0x368] sm:$0xff]  }
  0x36   :  { %6312 = vmatprep.subr.bf16.mxu1 %v6997_v59  ;;  %v7057_v59 = vld [vmem:[%s9201_s1 + $0x3e8] sm:$0xff]  }
  0x38   :  { %6291 = vmatpush3.bf16.msra.mxu0 %v6998_v60  ;;  %v7058_v60 = vld [vmem:[%s9201_s1 + $0x328] sm:$0xff]  }
  0x39   :  { %6313 = vmatpush3.bf16.msra.mxu1 %v6999_v61  ;;  %6292 = vmatprep.subr.bf16.mxu0 %v7000_v62  ;;  %v7059_v61 = vld [vmem:[%s9201_s1 + $0x3a8] sm:$0xff]   ;;  %v7060_v62 = vld [vmem:[%s9201_s1 + $0x360] sm:$0xff]  }
  0x3a   :  { %6314 = vmatprep.subr.bf16.mxu1 %v7001_v63  ;;  %v7061_v63 = vld [vmem:[%s9201_s1 + $0x3e0] sm:$0xff]  }
  0x3c   :  { %6293 = vmatpush3.bf16.msra.mxu0 %v7002_v0  ;;  %v7062_v0 = vld [vmem:[%s9201_s1 + $0x320] sm:$0xff]  }
  0x3d   :  { %6315 = vmatpush3.bf16.msra.mxu1 %v7003_v1  ;;  %6294 = vmatprep.subr.bf16.mxu0 %v7004_v2  ;;  %v7063_v1 = vld [vmem:[%s9201_s1 + $0x3a0] sm:$0xff]   ;;  %v7064_v2 = vld [vmem:[%s9201_s1 + $0x358] sm:$0xff]  }
  0x3e   :  { %6316 = vmatprep.subr.bf16.mxu1 %v7005_v3  ;;  %v7065_v3 = vld [vmem:[%s9201_s1 + $0x3d8] sm:$0xff]  }
  0x40   :  { %6295 = vmatpush3.bf16.msra.mxu0 %v7006_v4  ;;  %v7066_v4 = vld [vmem:[%s9201_s1 + $0x318] sm:$0xff]  }
  0x41   :  { %6317 = vmatpush3.bf16.msra.mxu1 %v7007_v5  ;;  %6324 = vmatprep.subr.bf16.mxu0 %v7012_v12  ;;  %v7067_v5 = vld [vmem:[%s9201_s1 + $0x398] sm:$0xff]   ;;  %v7074_v12 = vld [vmem:[%s9201_s1 + $0x308] sm:$0xff]  }
  0x42   :  { %6346 = vmatprep.subr.bf16.mxu1 %v7013_v13  ;;  %v7075_v13 = vld [vmem:[%s9201_s1 + $0x388] sm:$0xff]  }
  0x43   :  { %4487 = vmatmul.mubr.bf16.vlgmr.msra.gmra.mxu0 %v5664_v7  ;;  %v7069_v7 = vld [vmem:[%s9201_s1 + $0x3d0] sm:$0xff]  }
  0x44   :  { %4527 = vmatmul.mubr.bf16.vlgmr.msra.gmra.mxu1 %v5666_v10  ;;  %6325 = vmatpush3.bf16.msra.mxu0 %v7014_v14  ;;  %v7072_v10 = vld [vmem:[%s9201_s1 + $0x348] sm:$0xff]   ;;  %v7076_v14 = vld [vmem:[%s9201_s1 + $0x340] sm:$0xff]  }
  0x45   :  { %6347 = vmatpush3.bf16.msra.mxu1 %v7015_v15  ;;  %6326 = vmatprep.subr.bf16.mxu0 %v7016_v16  ;;  %v7077_v15 = vld [vmem:[%s9201_s1 + $0x3c0] sm:$0xff]  }
  0x46   :  { %6348 = vmatprep.subr.bf16.mxu1 %v7017_v17  ;;  %4566 = vmatprep.mubr.bf16.mxu0 %v5669_v47  ;;  %v7078_v16 = vld [vmem:[%s9201_s1 + $0x300] sm:$0xff]   ;;  %v7107_v47 = vld [vmem:[%s9201_s1 + $0x490] sm:$0xff]  }
  0x47   :  { %4606 = vmatprep.mubr.bf16.mxu1 %v5671_v49  ;;  %v7079_v17 = vld [vmem:[%s9201_s1 + $0x380] sm:$0xff]   ;;  %v7109_v49 = vld [vmem:[%s9201_s1 + $0x4c8] sm:$0xff]  }
  0x48   :  { %6327 = vmatpush3.bf16.msra.mxu0 %v7018_v18  ;;  %v21_v18 = vld [vmem:[%s9202_s0 + $0x30] sm:$0xff] }
  0x49   :  { %6349 = vmatpush3.bf16.msra.mxu1 %v7019_v19  ;;  %6328 = vmatprep.subr.bf16.mxu0 %v7020_v20  ;;  %v22_v19 = vld [vmem:[%s9202_s0 + $0x38] sm:$0xff]  ;;  %v5672_v20 = vcombine.low %v21_v18, %v21_v18 }
  0x4a   :  { %6350 = vmatprep.subr.bf16.mxu1 %v7021_v21  ;;  %v5673_v21 = vcombine.high %v21_v18, %v21_v18  ;;  %v7140_v18 = vld [vmem:[%s9201_s1 + $0x550] sm:$0xff]  }
  0x4c   :  { %6329 = vmatpush3.bf16.msra.mxu0 %v7022_v22  ;;  %v5674_v22 = vcombine.low %v22_v19, %v22_v19 }
  0x4d   :  { %6351 = vmatpush3.bf16.msra.mxu1 %v7023_v23  ;;  %6330 = vmatprep.subr.bf16.mxu0 %v7024_v24  ;;  %v7084_v23 = vld [vmem:[%s9201_s1 + $0x478] sm:$0xff]   ;;  %v5675_v24 = vcombine.high %v22_v19, %v22_v19  ;;  %v7141_v19 = vld [vmem:[%s9201_s1 + $0x5d0] sm:$0xff]  }
  0x4e   :  { %6352 = vmatprep.subr.bf16.mxu1 %v7025_v25  ;;  %v7085_v25 = vld [vmem:[%s9201_s1 + $0x4f8] sm:$0xff]  }
  0x50   :  { %6331 = vmatpush3.bf16.msra.mxu0 %v7026_v26  ;;  %v7086_v26 = vld [vmem:[%s9201_s1 + $0x438] sm:$0xff]  }
  0x51   :  { %6353 = vmatpush3.bf16.msra.mxu1 %v7027_v27  ;;  %6332 = vmatprep.subr.bf16.mxu0 %v7028_v28  ;;  %v7087_v27 = vld [vmem:[%s9201_s1 + $0x4b8] sm:$0xff]   ;;  %v7088_v28 = vld [vmem:[%s9201_s1 + $0x470] sm:$0xff]  }
  0x52   :  { %6354 = vmatprep.subr.bf16.mxu1 %v7029_v29  ;;  %v7089_v29 = vld [vmem:[%s9201_s1 + $0x4f0] sm:$0xff]  }
  0x54   :  { %6333 = vmatpush3.bf16.msra.mxu0 %v7030_v30  ;;  %v7090_v30 = vld [vmem:[%s9201_s1 + $0x430] sm:$0xff]  }
  0x55   :  { %6355 = vmatpush3.bf16.msra.mxu1 %v7031_v31  ;;  %6334 = vmatprep.subr.bf16.mxu0 %v7032_v32  ;;  %v7091_v31 = vld [vmem:[%s9201_s1 + $0x4b0] sm:$0xff]   ;;  %v7092_v32 = vld [vmem:[%s9201_s1 + $0x468] sm:$0xff]  }
  0x56   :  { %6356 = vmatprep.subr.bf16.mxu1 %v7033_v33  ;;  %v7093_v33 = vld [vmem:[%s9201_s1 + $0x4e8] sm:$0xff]  }
  0x58   :  { %6335 = vmatpush3.bf16.msra.mxu0 %v7034_v34  ;;  %v7094_v34 = vld [vmem:[%s9201_s1 + $0x428] sm:$0xff]  }
  0x59   :  { %6357 = vmatpush3.bf16.msra.mxu1 %v7035_v35  ;;  %6336 = vmatprep.subr.bf16.mxu0 %v7036_v36  ;;  %v7095_v35 = vld [vmem:[%s9201_s1 + $0x4a8] sm:$0xff]   ;;  %v7096_v36 = vld [vmem:[%s9201_s1 + $0x460] sm:$0xff]  }
  0x5a   :  { %6358 = vmatprep.subr.bf16.mxu1 %v7037_v37  ;;  %v7097_v37 = vld [vmem:[%s9201_s1 + $0x4e0] sm:$0xff]  }
  0x5c   :  { %6337 = vmatpush3.bf16.msra.mxu0 %v7038_v38  ;;  %v7098_v38 = vld [vmem:[%s9201_s1 + $0x420] sm:$0xff]  }
  0x5d   :  { %6359 = vmatpush3.bf16.msra.mxu1 %v7039_v39  ;;  %6338 = vmatprep.subr.bf16.mxu0 %v7040_v40  ;;  %v7099_v39 = vld [vmem:[%s9201_s1 + $0x4a0] sm:$0xff]   ;;  %v7100_v40 = vld [vmem:[%s9201_s1 + $0x458] sm:$0xff]  }
  0x5e   :  { %6360 = vmatprep.subr.bf16.mxu1 %v7041_v41  ;;  %v7101_v41 = vld [vmem:[%s9201_s1 + $0x4d8] sm:$0xff]  }
  0x60   :  { %6339 = vmatpush3.bf16.msra.mxu0 %v7042_v42  ;;  %v7102_v42 = vld [vmem:[%s9201_s1 + $0x418] sm:$0xff]  }
  0x61   :  { %6361 = vmatpush3.bf16.msra.mxu1 %v7043_v43  ;;  %6368 = vmatprep.subr.bf16.mxu0 %v7048_v50  ;;  %v7103_v43 = vld [vmem:[%s9201_s1 + $0x498] sm:$0xff]   ;;  %v7110_v50 = vld [vmem:[%s9201_s1 + $0x408] sm:$0xff]  }
  0x62   :  { %6390 = vmatprep.subr.bf16.mxu1 %v7049_v51  ;;  %v7111_v51 = vld [vmem:[%s9201_s1 + $0x488] sm:$0xff]  }
  0x63   :  { %4567 = vmatmul.mubr.bf16.vlgmr.msra.gmra.mxu0 %v5668_v46  ;;  %v7106_v46 = vld [vmem:[%s9201_s1 + $0x410] sm:$0xff]  }
  0x64   :  { %4607 = vmatmul.mubr.bf16.vlgmr.msra.gmra.mxu1 %v5670_v48  ;;  %6369 = vmatpush3.bf16.msra.mxu0 %v7050_v52  ;;  %v7108_v48 = vld [vmem:[%s9201_s1 + $0x448] sm:$0xff]   ;;  %v7112_v52 = vld [vmem:[%s9201_s1 + $0x440] sm:$0xff]  }
  0x65   :  { %6391 = vmatpush3.bf16.msra.mxu1 %v7051_v53  ;;  %6370 = vmatprep.subr.bf16.mxu0 %v7052_v54  ;;  %v7113_v53 = vld [vmem:[%s9201_s1 + $0x4c0] sm:$0xff]  }
  0x66   :  { %6392 = vmatprep.subr.bf16.mxu1 %v7053_v55  ;;  %4646 = vmatprep.mubr.bf16.mxu0 %v5673_v21  ;;  %v7114_v54 = vld [vmem:[%s9201_s1 + $0x400] sm:$0xff]   ;;  %v7143_v21 = vld [vmem:[%s9201_s1 + $0x590] sm:$0xff]  }
  0x67   :  { %4686 = vmatprep.mubr.bf16.mxu1 %v5675_v24  ;;  %v7115_v55 = vld [vmem:[%s9201_s1 + $0x480] sm:$0xff]   ;;  %v7146_v24 = vld [vmem:[%s9201_s1 + $0x508] sm:$0xff]  }
  0x68   :  { %6371 = vmatpush3.bf16.msra.mxu0 %v7054_v56  ;;  %v23_v56 = vld [vmem:[%s9202_s0 + $0x40] sm:$0xff] }
  0x69   :  { %6393 = vmatpush3.bf16.msra.mxu1 %v7055_v57  ;;  %6372 = vmatprep.subr.bf16.mxu0 %v7056_v58  ;;  %v5676_v57 = vcombine.low %v23_v56, %v23_v56  ;;  %v5677_v58 = vcombine.high %v23_v56, %v23_v56  ;;  %v7176_v56 = vld [vmem:[%s9201_s1 + $0x650] sm:$0xff]  }
  0x6a   :  { %6394 = vmatprep.subr.bf16.mxu1 %v7057_v59  ;;  %v24_v59 = vld [vmem:[%s9202_s0 + $0x48] sm:$0xff] }
  0x6c   :  { %6373 = vmatpush3.bf16.msra.mxu0 %v7058_v60  ;;  %v5678_v60 = vcombine.low %v24_v59, %v24_v59 }
  0x6d   :  { %6395 = vmatpush3.bf16.msra.mxu1 %v7059_v61  ;;  %6374 = vmatprep.subr.bf16.mxu0 %v7060_v62  ;;  %v5679_v61 = vcombine.high %v24_v59, %v24_v59  ;;  %v7120_v62 = vld [vmem:[%s9201_s1 + $0x578] sm:$0xff]   ;;  %v7179_v59 = vld [vmem:[%s9201_s1 + $0x690] sm:$0xff]  }
  0x6e   :  { %6396 = vmatprep.subr.bf16.mxu1 %v7061_v63  ;;  %v7121_v63 = vld [vmem:[%s9201_s1 + $0x5f8] sm:$0xff]  }
  0x70   :  { %6375 = vmatpush3.bf16.msra.mxu0 %v7062_v0  ;;  %v7122_v0 = vld [vmem:[%s9201_s1 + $0x538] sm:$0xff]  }
  0x71   :  { %6397 = vmatpush3.bf16.msra.mxu1 %v7063_v1  ;;  %6376 = vmatprep.subr.bf16.mxu0 %v7064_v2  ;;  %v7123_v1 = vld [vmem:[%s9201_s1 + $0x5b8] sm:$0xff]   ;;  %v7124_v2 = vld [vmem:[%s9201_s1 + $0x570] sm:$0xff]  }
  0x72   :  { %6398 = vmatprep.subr.bf16.mxu1 %v7065_v3  ;;  %v7125_v3 = vld [vmem:[%s9201_s1 + $0x5f0] sm:$0xff]  }
  0x74   :  { %6377 = vmatpush3.bf16.msra.mxu0 %v7066_v4  ;;  %v7126_v4 = vld [vmem:[%s9201_s1 + $0x530] sm:$0xff]  }
  0x75   :  { %6399 = vmatpush3.bf16.msra.mxu1 %v7067_v5  ;;  %6378 = vmatprep.subr.bf16.mxu0 %v7068_v6  ;;  %v7127_v5 = vld [vmem:[%s9201_s1 + $0x5b0] sm:$0xff]   ;;  %v7128_v6 = vld [vmem:[%s9201_s1 + $0x568] sm:$0xff]  }
  0x76   :  { %6400 = vmatprep.subr.bf16.mxu1 %v7069_v7  ;;  %v7129_v7 = vld [vmem:[%s9201_s1 + $0x5e8] sm:$0xff]  }
  0x78   :  { %6379 = vmatpush3.bf16.msra.mxu0 %v7070_v8  ;;  %v7130_v8 = vld [vmem:[%s9201_s1 + $0x528] sm:$0xff]  }
  0x79   :  { %6401 = vmatpush3.bf16.msra.mxu1 %v7071_v9  ;;  %6380 = vmatprep.subr.bf16.mxu0 %v7072_v10  ;;  %v7131_v9 = vld [vmem:[%s9201_s1 + $0x5a8] sm:$0xff]   ;;  %v7132_v10 = vld [vmem:[%s9201_s1 + $0x560] sm:$0xff]  }
  0x7a   :  { %6402 = vmatprep.subr.bf16.mxu1 %v7073_v11  ;;  %v7133_v11 = vld [vmem:[%s9201_s1 + $0x5e0] sm:$0xff]  }
  0x7c   :  { %6381 = vmatpush3.bf16.msra.mxu0 %v7074_v12  ;;  %v7134_v12 = vld [vmem:[%s9201_s1 + $0x520] sm:$0xff]  }
  0x7d   :  { %6403 = vmatpush3.bf16.msra.mxu1 %v7075_v13  ;;  %6382 = vmatprep.subr.bf16.mxu0 %v7076_v14  ;;  %v7135_v13 = vld [vmem:[%s9201_s1 + $0x5a0] sm:$0xff]   ;;  %v7136_v14 = vld [vmem:[%s9201_s1 + $0x558] sm:$0xff]  }
  0x7e   :  { %6404 = vmatprep.subr.bf16.mxu1 %v7077_v15  ;;  %v7137_v15 = vld [vmem:[%s9201_s1 + $0x5d8] sm:$0xff]  }
  0x80   :  { %6383 = vmatpush3.bf16.msra.mxu0 %v7078_v16  ;;  %v7138_v16 = vld [vmem:[%s9201_s1 + $0x518] sm:$0xff]  }
  0x81   :  { %6405 = vmatpush3.bf16.msra.mxu1 %v7079_v17  ;;  %6412 = vmatprep.subr.bf16.mxu0 %v7084_v23  ;;  %v7139_v17 = vld [vmem:[%s9201_s1 + $0x598] sm:$0xff]   ;;  %v7145_v23 = vld [vmem:[%s9201_s1 + $0x5c8] sm:$0xff]  }
  0x82   :  { %6434 = vmatprep.subr.bf16.mxu1 %v7085_v25  ;;  %v7147_v25 = vld [vmem:[%s9201_s1 + $0x588] sm:$0xff]  }
  0x83   :  { %4647 = vmatmul.mubr.bf16.vlgmr.msra.gmra.mxu0 %v5672_v20  ;;  %v7142_v20 = vld [vmem:[%s9201_s1 + $0x510] sm:$0xff]  }
  0x84   :  { %4687 = vmatmul.mubr.bf16.vlgmr.msra.gmra.mxu1 %v5674_v22  ;;  %6413 = vmatpush3.bf16.msra.mxu0 %v7086_v26  ;;  %v7144_v22 = vld [vmem:[%s9201_s1 + $0x548] sm:$0xff]   ;;  %v7148_v26 = vld [vmem:[%s9201_s1 + $0x540] sm:$0xff]  }
  0x85   :  { %6435 = vmatpush3.bf16.msra.mxu1 %v7087_v27  ;;  %6414 = vmatprep.subr.bf16.mxu0 %v7088_v28  ;;  %v7149_v27 = vld [vmem:[%s9201_s1 + $0x5c0] sm:$0xff]  }
  0x86   :  { %6436 = vmatprep.subr.bf16.mxu1 %v7089_v29  ;;  %4726 = vmatprep.mubr.bf16.mxu0 %v5677_v58  ;;  %v7150_v28 = vld [vmem:[%s9201_s1 + $0x500] sm:$0xff]   ;;  %v7178_v58 = vld [vmem:[%s9201_s1 + $0x610] sm:$0xff]  }
  0x87   :  { %4766 = vmatprep.mubr.bf16.mxu1 %v5679_v61  ;;  %v7151_v29 = vld [vmem:[%s9201_s1 + $0x580] sm:$0xff]   ;;  %v7181_v61 = vld [vmem:[%s9201_s1 + $0x6c8] sm:$0xff]  }
  0x88   :  { %6415 = vmatpush3.bf16.msra.mxu0 %v7090_v30  ;;  %v25_v30 = vld [vmem:[%s9202_s0 + $0x50] sm:$0xff] }
  0x89   :  { %6437 = vmatpush3.bf16.msra.mxu1 %v7091_v31  ;;  %6416 = vmatprep.subr.bf16.mxu0 %v7092_v32  ;;  %v26_v31 = vld [vmem:[%s9202_s0 + $0x58] sm:$0xff]  ;;  %v5680_v32 = vcombine.low %v25_v30, %v25_v30 }
  0x8a   :  { %6438 = vmatprep.subr.bf16.mxu1 %v7093_v33  ;;  %v5681_v33 = vcombine.high %v25_v30, %v25_v30  ;;  %v7199_v30 = vld [vmem:[%s9201_s1 + $0x7b0] sm:$0xff]  }
  0x8c   :  { %6417 = vmatpush3.bf16.msra.mxu0 %v7094_v34  ;;  %v5682_v34 = vcombine.low %v26_v31, %v26_v31 }
  0x8d   :  { %6439 = vmatpush3.bf16.msra.mxu1 %v7095_v35  ;;  %6418 = vmatprep.subr.bf16.mxu0 %v7096_v36  ;;  %v5683_v35 = vcombine.high %v26_v31, %v26_v31  ;;  %v7156_v36 = vld [vmem:[%s9201_s1 + $0x678] sm:$0xff]   ;;  %v7200_v31 = vld [vmem:[%s9201_s1 + $0x768] sm:$0xff]  }
  0x8e   :  { %6440 = vmatprep.subr.bf16.mxu1 %v7097_v37  ;;  %v7157_v37 = vld [vmem:[%s9201_s1 + $0x6f8] sm:$0xff]  }
  0x90   :  { %6419 = vmatpush3.bf16.msra.mxu0 %v7098_v38  ;;  %v7158_v38 = vld [vmem:[%s9201_s1 + $0x638] sm:$0xff]  }
  0x91   :  { %6441 = vmatpush3.bf16.msra.mxu1 %v7099_v39  ;;  %6420 = vmatprep.subr.bf16.mxu0 %v7100_v40  ;;  %v7159_v39 = vld [vmem:[%s9201_s1 + $0x6b8] sm:$0xff]   ;;  %v7160_v40 = vld [vmem:[%s9201_s1 + $0x670] sm:$0xff]  }
  0x92   :  { %6442 = vmatprep.subr.bf16.mxu1 %v7101_v41  ;;  %v7161_v41 = vld [vmem:[%s9201_s1 + $0x6f0] sm:$0xff]  }
  0x94   :  { %6421 = vmatpush3.bf16.msra.mxu0 %v7102_v42  ;;  %v7162_v42 = vld [vmem:[%s9201_s1 + $0x630] sm:$0xff]  }
  0x95   :  { %6443 = vmatpush3.bf16.msra.mxu1 %v7103_v43  ;;  %6422 = vmatprep.subr.bf16.mxu0 %v7104_v44  ;;  %v7163_v43 = vld [vmem:[%s9201_s1 + $0x6b0] sm:$0xff]   ;;  %v7164_v44 = vld [vmem:[%s9201_s1 + $0x668] sm:$0xff]  }
  0x96   :  { %6444 = vmatprep.subr.bf16.mxu1 %v7105_v45  ;;  %v7165_v45 = vld [vmem:[%s9201_s1 + $0x6e8] sm:$0xff]  }
  0x98   :  { %6423 = vmatpush3.bf16.msra.mxu0 %v7106_v46  ;;  %v7166_v46 = vld [vmem:[%s9201_s1 + $0x628] sm:$0xff]  }
  0x99   :  { %6445 = vmatpush3.bf16.msra.mxu1 %v7107_v47  ;;  %6424 = vmatprep.subr.bf16.mxu0 %v7108_v48  ;;  %v7167_v47 = vld [vmem:[%s9201_s1 + $0x6a8] sm:$0xff]   ;;  %v7168_v48 = vld [vmem:[%s9201_s1 + $0x660] sm:$0xff]  }
  0x9a   :  { %6446 = vmatprep.subr.bf16.mxu1 %v7109_v49  ;;  %v7169_v49 = vld [vmem:[%s9201_s1 + $0x6e0] sm:$0xff]  }
  0x9c   :  { %6425 = vmatpush3.bf16.msra.mxu0 %v7110_v50  ;;  %v7170_v50 = vld [vmem:[%s9201_s1 + $0x620] sm:$0xff]  }
  0x9d   :  { %6447 = vmatpush3.bf16.msra.mxu1 %v7111_v51  ;;  %6426 = vmatprep.subr.bf16.mxu0 %v7112_v52  ;;  %v7171_v51 = vld [vmem:[%s9201_s1 + $0x6a0] sm:$0xff]   ;;  %v7172_v52 = vld [vmem:[%s9201_s1 + $0x658] sm:$0xff]  }
  0x9e   :  { %6448 = vmatprep.subr.bf16.mxu1 %v7113_v53  ;;  %v7173_v53 = vld [vmem:[%s9201_s1 + $0x6d8] sm:$0xff]  }
  0xa0   :  { %6427 = vmatpush3.bf16.msra.mxu0 %v7114_v54  ;;  %v7174_v54 = vld [vmem:[%s9201_s1 + $0x618] sm:$0xff]  }
  0xa1   :  { %6449 = vmatpush3.bf16.msra.mxu1 %v7115_v55  ;;  %6456 = vmatprep.subr.bf16.mxu0 %v7120_v62  ;;  %v7175_v55 = vld [vmem:[%s9201_s1 + $0x698] sm:$0xff]   ;;  %v7182_v62 = vld [vmem:[%s9201_s1 + $0x608] sm:$0xff]  }
  0xa2   :  { %6478 = vmatprep.subr.bf16.mxu1 %v7121_v63  ;;  %v7183_v63 = vld [vmem:[%s9201_s1 + $0x688] sm:$0xff]  }
  0xa3   :  { %4727 = vmatmul.mubr.bf16.vlgmr.msra.gmra.mxu0 %v5676_v57  ;;  %v7177_v57 = vld [vmem:[%s9201_s1 + $0x6d0] sm:$0xff]  }
  0xa4   :  { %4767 = vmatmul.mubr.bf16.vlgmr.msra.gmra.mxu1 %v5678_v60  ;;  %6457 = vmatpush3.bf16.msra.mxu0 %v7122_v0  ;;  %v7180_v60 = vld [vmem:[%s9201_s1 + $0x648] sm:$0xff]   ;;  %v7184_v0 = vld [vmem:[%s9201_s1 + $0x640] sm:$0xff]  }
  0xa5   :  { %6479 = vmatpush3.bf16.msra.mxu1 %v7123_v1  ;;  %6458 = vmatprep.subr.bf16.mxu0 %v7124_v2  ;;  %v7185_v1 = vld [vmem:[%s9201_s1 + $0x6c0] sm:$0xff]  }
  0xa6   :  { %6480 = vmatprep.subr.bf16.mxu1 %v7125_v3  ;;  %4806 = vmatprep.mubr.bf16.mxu0 %v5681_v33  ;;  %v7186_v2 = vld [vmem:[%s9201_s1 + $0x600] sm:$0xff]   ;;  %v7202_v33 = vld [vmem:[%s9201_s1 + $0x728] sm:$0xff]  }
  0xa7   :  { %4846 = vmatprep.mubr.bf16.mxu1 %v5683_v35  ;;  %v7187_v3 = vld [vmem:[%s9201_s1 + $0x680] sm:$0xff]  }
  0xa8   :  { %6459 = vmatpush3.bf16.msra.mxu0 %v7126_v4  ;;  %v27_v4 = vld [vmem:[%s9202_s0 + $0x60] sm:$0xff] }
  0xa9   :  { %6481 = vmatpush3.bf16.msra.mxu1 %v7127_v5  ;;  %6460 = vmatprep.subr.bf16.mxu0 %v7128_v6  ;;  %v28_v5 = vld [vmem:[%s9202_s0 + $0x68] sm:$0xff]  ;;  %v7204_v35 = vld [vmem:[%s9201_s1 + $0x760] sm:$0xff]  }
  0xaa   :  { %6482 = vmatprep.subr.bf16.mxu1 %v7129_v7 }
  0xac   :  { %6461 = vmatpush3.bf16.msra.mxu0 %v7130_v8  ;;  %v5684_v8 = vcombine.low %v27_v4, %v27_v4 }
  0xad   :  { %6483 = vmatpush3.bf16.msra.mxu1 %v7131_v9  ;;  %6462 = vmatprep.subr.bf16.mxu0 %v7132_v10  ;;  %v5685_v9 = vcombine.high %v27_v4, %v27_v4  ;;  %v5686_v10 = vcombine.low %v28_v5, %v28_v5 }
  0xae   :  { %6484 = vmatprep.subr.bf16.mxu1 %v7133_v11  ;;  %v7192_v11 = vld [vmem:[%s9201_s1 + $0x778] sm:$0xff]  }
  0xb0   :  { %6463 = vmatpush3.bf16.msra.mxu0 %v7134_v12  ;;  %v5687_v12 = vcombine.high %v28_v5, %v28_v5 }
  0xb1   :  { %6485 = vmatpush3.bf16.msra.mxu1 %v7135_v13  ;;  %6464 = vmatprep.subr.bf16.mxu0 %v7136_v14  ;;  %v7193_v13 = vld [vmem:[%s9201_s1 + $0x7f8] sm:$0xff]  }
  0xb2   :  { %6486 = vmatprep.subr.bf16.mxu1 %v7137_v15 }
  0xb4   :  { %6465 = vmatpush3.bf16.msra.mxu0 %v7138_v16  ;;  %v7194_v16 = vld [vmem:[%s9201_s1 + $0x738] sm:$0xff]  }
  0xb5   :  { %6487 = vmatpush3.bf16.msra.mxu1 %v7139_v17  ;;  %6466 = vmatprep.subr.bf16.mxu0 %v7140_v18 }
  0xb6   :  { %6488 = vmatprep.subr.bf16.mxu1 %v7141_v19  ;;  %v7195_v19 = vld [vmem:[%s9201_s1 + $0x7b8] sm:$0xff]  }
  0xb8   :  { %6467 = vmatpush3.bf16.msra.mxu0 %v7142_v20  ;;  %v5659_v20 = vld [vmem:[%s9203_s2] ss:$0 sm:$0xff] }
  0xb9   :  { %6489 = vmatpush3.bf16.msra.mxu1 %v7143_v21  ;;  %6468 = vmatprep.subr.bf16.mxu0 %v7144_v22 }
  0xba   :  { %6490 = vmatprep.subr.bf16.mxu1 %v7145_v23 }
  0xbc   :  { %6469 = vmatpush3.bf16.msra.mxu0 %v7146_v24  ;;  %v7196_v24 = vld [vmem:[%s9201_s1 + $0x770] sm:$0xff]  }
  0xbd   :  { %6491 = vmatpush3.bf16.msra.mxu1 %v7147_v25  ;;  %6470 = vmatprep.subr.bf16.mxu0 %v7148_v26  ;;  %v7197_v25 = vld [vmem:[%s9201_s1 + $0x7f0] sm:$0xff]  }
  0xbe   :  { %6492 = vmatprep.subr.bf16.mxu1 %v7149_v27 }
  0xc0   :  { %6471 = vmatpush3.bf16.msra.mxu0 %v7150_v28 }
  0xc1   :  { %6493 = vmatpush3.bf16.msra.mxu1 %v7151_v29  ;;  %6500 = vmatprep.subr.bf16.mxu0 %v7156_v36  ;;  %v7198_v29 = vld [vmem:[%s9201_s1 + $0x730] sm:$0xff]   ;;  %v7205_v36 = vld [vmem:[%s9201_s1 + $0x7e0] sm:$0xff]  }
  0xc2   :  { %6522 = vmatprep.subr.bf16.mxu1 %v7157_v37  ;;  %v7206_v37 = vld [vmem:[%s9201_s1 + $0x720] sm:$0xff]  }
  0xc3   :  { %4807 = vmatmul.mubr.bf16.vlgmr.msra.gmra.mxu0 %v5680_v32  ;;  %v7201_v32 = vld [vmem:[%s9201_s1 + $0x7e8] sm:$0xff]  }
  0xc4   :  { %4847 = vmatmul.mubr.bf16.vlgmr.msra.gmra.mxu1 %v5682_v34  ;;  %6501 = vmatpush3.bf16.msra.mxu0 %v7158_v38  ;;  %v7203_v34 = vld [vmem:[%s9201_s1 + $0x7a8] sm:$0xff]   ;;  %v7207_v38 = vld [vmem:[%s9201_s1 + $0x7a0] sm:$0xff]  }
  0xc5   :  { %6523 = vmatpush3.bf16.msra.mxu1 %v7159_v39  ;;  %6502 = vmatprep.subr.bf16.mxu0 %v7160_v40  ;;  %v7208_v39 = vld [vmem:[%s9201_s1 + $0x758] sm:$0xff]  }
  0xc6   :  { %6524 = vmatprep.subr.bf16.mxu1 %v7161_v41  ;;  %4886 = vmatprep.mubr.bf16.mxu0 %v5685_v9  ;;  %v7209_v40 = vld [vmem:[%s9201_s1 + $0x7d8] sm:$0xff]  }
  0xc7   :  { %4926 = vmatprep.mubr.bf16.mxu1 %v5687_v12  ;;  %v7210_v41 = vld [vmem:[%s9201_s1 + $0x718] sm:$0xff]  }
  0xc8   :  { %6503 = vmatpush3.bf16.msra.mxu0 %v7162_v42  ;;  %v7211_v42 = vld [vmem:[%s9201_s1 + $0x798] sm:$0xff]  }
  0xc9   :  { %6525 = vmatpush3.bf16.msra.mxu1 %v7163_v43  ;;  %6504 = vmatprep.subr.bf16.mxu0 %v7164_v44  ;;  %v7212_v43 = vld [vmem:[%s9201_s1 + $0x750] sm:$0xff]  }
  0xca   :  { %6526 = vmatprep.subr.bf16.mxu1 %v7165_v45  ;;  %v7213_v44 = vld [vmem:[%s9201_s1 + $0x7d0] sm:$0xff]  }
  0xcb   :  { %v7214_v45 = vld [vmem:[%s9201_s1 + $0x710] sm:$0xff]  }
  0xcc   :  { %6505 = vmatpush3.bf16.msra.mxu0 %v7166_v46  ;;  %v7215_v46 = vld [vmem:[%s9201_s1 + $0x790] sm:$0xff]  }
  0xcd   :  { %6527 = vmatpush3.bf16.msra.mxu1 %v7167_v47  ;;  %6506 = vmatprep.subr.bf16.mxu0 %v7168_v48  ;;  %v7216_v47 = vld [vmem:[%s9201_s1 + $0x748] sm:$0xff]  }
  0xce   :  { %6528 = vmatprep.subr.bf16.mxu1 %v7169_v49  ;;  %v7217_v48 = vld [vmem:[%s9201_s1 + $0x7c8] sm:$0xff]  }
  0xcf   :  { %v7218_v49 = vld [vmem:[%s9201_s1 + $0x708] sm:$0xff]  }
  0xd0   :  { %6507 = vmatpush3.bf16.msra.mxu0 %v7170_v50  ;;  %v7219_v50 = vld [vmem:[%s9201_s1 + $0x788] sm:$0xff]  }
  0xd1   :  { %6529 = vmatpush3.bf16.msra.mxu1 %v7171_v51  ;;  %6508 = vmatprep.subr.bf16.mxu0 %v7172_v52  ;;  %v7220_v51 = vld [vmem:[%s9201_s1 + $0x740] sm:$0xff]  }
  0xd2   :  { %6530 = vmatprep.subr.bf16.mxu1 %v7173_v53  ;;  %v7221_v52 = vld [vmem:[%s9201_s1 + $0x7c0] sm:$0xff]  }
  0xd3   :  { %v7222_v53 = vld [vmem:[%s9201_s1 + $0x700] sm:$0xff]  }
  0xd4   :  { %6509 = vmatpush3.bf16.msra.mxu0 %v7174_v54  ;;  %v7223_v54 = vld [vmem:[%s9201_s1 + $0x780] sm:$0xff]  }
  0xd5   :  { %6531 = vmatpush3.bf16.msra.mxu1 %v7175_v55  ;;  %6510 = vmatprep.subr.bf16.mxu0 %v7176_v56  ;;  %v29_v55 = vld [vmem:[%s9202_s0 + $0x70] sm:$0xff]  ;;  %v30_v56 = vld [vmem:[%s9202_s0 + $0x78] sm:$0xff] }
  0xd6   :  { %6532 = vmatprep.subr.bf16.mxu1 %v7177_v57 }
  0xd8   :  { %6511 = vmatpush3.bf16.msra.mxu0 %v7178_v58 }
  0xd9   :  { %6533 = vmatpush3.bf16.msra.mxu1 %v7179_v59  ;;  %6512 = vmatprep.subr.bf16.mxu0 %v7180_v60  ;;  %v5688_v59 = vcombine.low %v29_v55, %v29_v55  ;;  %v5689_v60 = vcombine.high %v29_v55, %v29_v55 }
  0xda   :  { %6534 = vmatprep.subr.bf16.mxu1 %v7181_v61  ;;  %v5690_v61 = vcombine.low %v30_v56, %v30_v56 }
  0xdc   :  { %6513 = vmatpush3.bf16.msra.mxu0 %v7182_v62  ;;  %v7228_v62 = vld [vmem:[%s9201_s1 + $0x878] sm:$0xff]  }
  0xdd   :  { %6535 = vmatpush3.bf16.msra.mxu1 %v7183_v63  ;;  %6514 = vmatprep.subr.bf16.mxu0 %v7184_v0  ;;  %v5691_v63 = vcombine.high %v30_v56, %v30_v56  ;;  %v7229_v0 = vld [vmem:[%s9201_s1 + $0x8f8] sm:$0xff]  }
  0xde   :  { %6536 = vmatprep.subr.bf16.mxu1 %v7185_v1 }
  0xe0   :  { %6515 = vmatpush3.bf16.msra.mxu0 %v7186_v2 }
  0xe1   :  { %6537 = vmatpush3.bf16.msra.mxu1 %v7187_v3  ;;  %6544 = vmatprep.subr.bf16.mxu0 %v7192_v11  ;;  %v7230_v3 = vld [vmem:[%s9201_s1 + $0x838] sm:$0xff]   ;;  %v7233_v11 = vld [vmem:[%s9201_s1 + $0x8f0] sm:$0xff]  }
  0xe2   :  { %6566 = vmatprep.subr.bf16.mxu1 %v7193_v13 }
  0xe3   :  { %v6252_v6 = vpop.f32.mrf.mxu0  ;;  %4887 = vmatmul.mubr.bf16.vlgmr.msra.gmra.mxu0 %v5684_v8 }
  0xe4   :  { %v6274_v7 = vpop.f32.mrf.mxu1  ;;  %4927 = vmatmul.mubr.bf16.vlgmr.msra.gmra.mxu1 %v5686_v10  ;;  %6545 = vmatpush3.bf16.msra.mxu0 %v7194_v16  ;;  %v7232_v10 = vld [vmem:[%s9201_s1 + $0x870] sm:$0xff]  }
  0xe5   :  { %v6253_v14 = vpop.f32.mrf.mxu0  ;;  %6567 = vmatpush3.bf16.msra.mxu1 %v7195_v19  ;;  %6546 = vmatprep.subr.bf16.mxu0 %v7196_v24  ;;  %v7235_v16 = vld [vmem:[%s9201_s1 + $0x8b0] sm:$0xff]   ;;  %v7238_v19 = vld [vmem:[%s9201_s1 + $0x828] sm:$0xff]   ;;  %v7243_v24 = vld [vmem:[%s9201_s1 + $0x8a0] sm:$0xff]  }
  0xe6   :  { %v6275_v15 = vpop.f32.mrf.mxu1  ;;  %v6254_v17 = vadd.f32 %v6253_v14, %v6252_v6  ;;  %6568 = vmatprep.subr.bf16.mxu1 %v7197_v25  ;;  %4966 = vmatprep.mubr.bf16.mxu0 %v5689_v60  ;;  %v7231_v6 = vld [vmem:[%s9201_s1 + $0x8b8] sm:$0xff]   ;;  %v7268_v60 = vld [vmem:[%s9201_s1 + $0x970] sm:$0xff]  }
  0xe7   :  { %v6276_v18 = vadd.f32 %v6275_v15, %v6274_v7  ;;  %v6255_v21 = vpop.f32.mrf.mxu0  ;;  %5006 = vmatprep.mubr.bf16.mxu1 %v5691_v63  ;;  %v7234_v15 = vld [vmem:[%s9201_s1 + $0x830] sm:$0xff]   ;;  %v7244_v25 = vld [vmem:[%s9201_s1 + $0x858] sm:$0xff]  }
  0xe8   :  { %v6277_v22 = vpop.f32.mrf.mxu1  ;;  %v4409_v23 = vadd.f32 %v6254_v17, %v5659_v20  ;;  %6547 = vmatpush3.bf16.msra.mxu0 %v7198_v29  ;;  %v7236_v17 = vld [vmem:[%s9201_s1 + $0x868] sm:$0xff]   ;;  %v7240_v21 = vld [vmem:[%s9201_s1 + $0x860] sm:$0xff]   ;;  %v7248_v29 = vld [vmem:[%s9201_s1 + $0x850] sm:$0xff]  }
  0xe9   :  { %v6256_v26 = vpop.f32.mrf.mxu0  ;;  %6569 = vmatpush3.bf16.msra.mxu1 %v7199_v30  ;;  %6548 = vmatprep.subr.bf16.mxu0 %v7200_v31  ;;  %v7239_v20 = vld [vmem:[%s9201_s1 + $0x8a8] sm:$0xff]   ;;  %v7241_v22 = vld [vmem:[%s9201_s1 + $0x8e0] sm:$0xff]   ;;  %v7249_v30 = vld [vmem:[%s9201_s1 + $0x8d0] sm:$0xff]  }
  0xea   :  { %v6278_v27 = vpop.f32.mrf.mxu1  ;;  %v8271_v28 = vadd.f32 %v6276_v18, %v4409_v23  ;;  %6570 = vmatprep.subr.bf16.mxu1 %v7201_v32  ;;  %v7237_v18 = vld [vmem:[%s9201_s1 + $0x8e8] sm:$0xff]   ;;  %v7242_v23 = vld [vmem:[%s9201_s1 + $0x820] sm:$0xff]   ;;  %v7245_v26 = vld [vmem:[%s9201_s1 + $0x8d8] sm:$0xff]  }
  0xeb   :  { %v7246_v27 = vld [vmem:[%s9201_s1 + $0x818] sm:$0xff]   ;;  %v7250_v31 = vld [vmem:[%s9201_s1 + $0x810] sm:$0xff]  }
  0xec   :  { %6549 = vmatpush3.bf16.msra.mxu0 %v7202_v33  ;;  %v7251_v32 = vld [vmem:[%s9201_s1 + $0x890] sm:$0xff]   ;;  %v7252_v33 = vld [vmem:[%s9201_s1 + $0x848] sm:$0xff]  }
  0xed   :  { %6571 = vmatpush3.bf16.msra.mxu1 %v7203_v34  ;;  %6550 = vmatprep.subr.bf16.mxu0 %v7204_v35  ;;  %v7253_v34 = vld [vmem:[%s9201_s1 + $0x8c8] sm:$0xff]   ;;  %v7269_v63 = vld [vmem:[%s9201_s1 + $0x9f0] sm:$0xff]  }
  0xee   :  { %6572 = vmatprep.subr.bf16.mxu1 %v7205_v36  ;;  %v7254_v35 = vld [vmem:[%s9201_s1 + $0x808] sm:$0xff]  }
  0xef   :  { %v7255_v36 = vld [vmem:[%s9201_s1 + $0x888] sm:$0xff]  }
  0xf0   :  { %6551 = vmatpush3.bf16.msra.mxu0 %v7206_v37  ;;  %v7256_v37 = vld [vmem:[%s9201_s1 + $0x840] sm:$0xff]  }
  0xf1   :  { %6573 = vmatpush3.bf16.msra.mxu1 %v7207_v38  ;;  %6552 = vmatprep.subr.bf16.mxu0 %v7208_v39  ;;  %v7257_v38 = vld [vmem:[%s9201_s1 + $0x8c0] sm:$0xff]  }
  0xf2   :  { %6574 = vmatprep.subr.bf16.mxu1 %v7209_v40  ;;  %v7258_v39 = vld [vmem:[%s9201_s1 + $0x800] sm:$0xff]  }
  0xf3   :  { %v7259_v40 = vld [vmem:[%s9201_s1 + $0x880] sm:$0xff]  }
  0xf4   :  { %6553 = vmatpush3.bf16.msra.mxu0 %v7210_v41  ;;  %v31_v41 = vld [vmem:[%s9202_s0 + $0x80] sm:$0xff] }
  0xf5   :  { %6575 = vmatpush3.bf16.msra.mxu1 %v7211_v42  ;;  %6554 = vmatprep.subr.bf16.mxu0 %v7212_v43  ;;  %v5692_v43 = vcombine.low %v31_v41, %v31_v41 }
  0xf6   :  { %6576 = vmatprep.subr.bf16.mxu1 %v7213_v44  ;;  %v5693_v44 = vcombine.high %v31_v41, %v31_v41  ;;  %v7303_v41 = vld [vmem:[%s9201_s1 + $0xab8] sm:$0xff]  }
  0xf8   :  { %6555 = vmatpush3.bf16.msra.mxu0 %v7214_v45  ;;  %v32_v45 = vld [vmem:[%s9202_s0 + $0x88] sm:$0xff] }
  0xf9   :  { %6577 = vmatpush3.bf16.msra.mxu1 %v7215_v46  ;;  %6556 = vmatprep.subr.bf16.mxu0 %v7216_v47  ;;  %v5694_v47 = vcombine.low %v32_v45, %v32_v45 }
  0xfa   :  { %6578 = vmatprep.subr.bf16.mxu1 %v7217_v48  ;;  %v5695_v48 = vcombine.high %v32_v45, %v32_v45 }
  0xfc   :  { %6557 = vmatpush3.bf16.msra.mxu0 %v7218_v49  ;;  %v7264_v49 = vld [vmem:[%s9201_s1 + $0x978] sm:$0xff]  }
  0xfd   :  { %6579 = vmatpush3.bf16.msra.mxu1 %v7219_v50  ;;  %6558 = vmatprep.subr.bf16.mxu0 %v7220_v51  ;;  %v7265_v51 = vld [vmem:[%s9201_s1 + $0x9f8] sm:$0xff]  }
  0xfe   :  { %6580 = vmatprep.subr.bf16.mxu1 %v7221_v52 }
 0x100   :  { %6559 = vmatpush3.bf16.msra.mxu0 %v7222_v53 }
 0x101   :  { %6581 = vmatpush3.bf16.msra.mxu1 %v7223_v54  ;;  %6588 = vmatprep.subr.bf16.mxu0 %v7228_v62  ;;  %v7266_v54 = vld [vmem:[%s9201_s1 + $0x938] sm:$0xff]  }
 0x102   :  { %6610 = vmatprep.subr.bf16.mxu1 %v7229_v0 }
 0x103   :  { %v6296_v57 = vpop.f32.mrf.mxu0  ;;  %4967 = vmatmul.mubr.bf16.vlgmr.msra.gmra.mxu0 %v5688_v59 }
 0x104   :  { %v6318_v58 = vpop.f32.mrf.mxu1  ;;  %5007 = vmatmul.mubr.bf16.vlgmr.msra.gmra.mxu1 %v5690_v61  ;;  %6589 = vmatpush3.bf16.msra.mxu0 %v7230_v3  ;;  %v7272_v3 = vld [vmem:[%s9201_s1 + $0x968] sm:$0xff]  }
 0x105   :  { %v6297_v1 = vpop.f32.mrf.mxu0  ;;  %6611 = vmatpush3.bf16.msra.mxu1 %v7231_v6  ;;  %6590 = vmatprep.subr.bf16.mxu0 %v7232_v10  ;;  %v7275_v6 = vld [vmem:[%s9201_s1 + $0x9a8] sm:$0xff]   ;;  %v7279_v10 = vld [vmem:[%s9201_s1 + $0x9a0] sm:$0xff]  }
 0x106   :  { %v6319_v2 = vpop.f32.mrf.mxu1  ;;  %v6298_v4 = vadd.f32 %v6297_v1, %v6296_v57  ;;  %6612 = vmatprep.subr.bf16.mxu1 %v7233_v11  ;;  %5046 = vmatprep.mubr.bf16.mxu0 %v5693_v44  ;;  %v7267_v57 = vld [vmem:[%s9201_s1 + $0x9b8] sm:$0xff]   ;;  %v7270_v1 = vld [vmem:[%s9201_s1 + $0x930] sm:$0xff]  }
 0x107   :  { %v6320_v5 = vadd.f32 %v6319_v2, %v6318_v58  ;;  %v6299_v7 = vpop.f32.mrf.mxu0  ;;  %5086 = vmatprep.mubr.bf16.mxu1 %v5695_v48  ;;  %v7271_v2 = vld [vmem:[%s9201_s1 + $0x9b0] sm:$0xff]   ;;  %v7280_v11 = vld [vmem:[%s9201_s1 + $0x958] sm:$0xff]  }
 0x108   :  { %v6321_v8 = vpop.f32.mrf.mxu1  ;;  %v4489_v9 = vadd.f32 %v6298_v4, %v8271_v28  ;;  %6591 = vmatpush3.bf16.msra.mxu0 %v7234_v15  ;;  %v7247_v28 = vld [vmem:[%s9201_s1 + $0x898] sm:$0xff]   ;;  %v7273_v4 = vld [vmem:[%s9201_s1 + $0x9e8] sm:$0xff]   ;;  %v7276_v7 = vld [vmem:[%s9201_s1 + $0x960] sm:$0xff]  }
 0x109   :  { %v6300_v12 = vpop.f32.mrf.mxu0  ;;  %6613 = vmatpush3.bf16.msra.mxu1 %v7235_v16  ;;  %6592 = vmatprep.subr.bf16.mxu0 %v7236_v17  ;;  %v7277_v8 = vld [vmem:[%s9201_s1 + $0x9e0] sm:$0xff]   ;;  %v7284_v15 = vld [vmem:[%s9201_s1 + $0x950] sm:$0xff]  }
 0x10a   :  { %v6322_v13 = vpop.f32.mrf.mxu1  ;;  %v8376_v14 = vadd.f32 %v6320_v5, %v4489_v9  ;;  %6614 = vmatprep.subr.bf16.mxu1 %v7237_v18  ;;  %v7274_v5 = vld [vmem:[%s9201_s1 + $0x928] sm:$0xff]   ;;  %v7278_v9 = vld [vmem:[%s9201_s1 + $0x920] sm:$0xff]   ;;  %v7281_v12 = vld [vmem:[%s9201_s1 + $0x9d8] sm:$0xff]  }
 0x10b   :  { %v7282_v13 = vld [vmem:[%s9201_s1 + $0x918] sm:$0xff]   ;;  %v7285_v16 = vld [vmem:[%s9201_s1 + $0x9d0] sm:$0xff]  }
 0x10c   :  { %6593 = vmatpush3.bf16.msra.mxu0 %v7238_v19  ;;  %v7286_v17 = vld [vmem:[%s9201_s1 + $0x910] sm:$0xff]   ;;  %v7288_v19 = vld [vmem:[%s9201_s1 + $0x948] sm:$0xff]  }
 0x10d   :  { %6615 = vmatpush3.bf16.msra.mxu1 %v7239_v20  ;;  %6594 = vmatprep.subr.bf16.mxu0 %v7240_v21  ;;  %v7287_v18 = vld [vmem:[%s9201_s1 + $0x990] sm:$0xff]   ;;  %v7289_v20 = vld [vmem:[%s9201_s1 + $0x9c8] sm:$0xff]  }
 0x10e   :  { %6616 = vmatprep.subr.bf16.mxu1 %v7241_v22  ;;  %v7290_v21 = vld [vmem:[%s9201_s1 + $0x908] sm:$0xff]  }
 0x10f   :  { %v7291_v22 = vld [vmem:[%s9201_s1 + $0x988] sm:$0xff]  }
 0x110   :  { %6595 = vmatpush3.bf16.msra.mxu0 %v7242_v23  ;;  %v7292_v23 = vld [vmem:[%s9201_s1 + $0x940] sm:$0xff]  }
 0x111   :  { %6617 = vmatpush3.bf16.msra.mxu1 %v7243_v24  ;;  %6596 = vmatprep.subr.bf16.mxu0 %v7244_v25  ;;  %v7293_v24 = vld [vmem:[%s9201_s1 + $0x9c0] sm:$0xff]  }
 0x112   :  { %6618 = vmatprep.subr.bf16.mxu1 %v7245_v26  ;;  %v7294_v25 = vld [vmem:[%s9201_s1 + $0x900] sm:$0xff]  }
 0x113   :  { %v7295_v26 = vld [vmem:[%s9201_s1 + $0x980] sm:$0xff]  }
 0x114   :  { %6597 = vmatpush3.bf16.msra.mxu0 %v7246_v27  ;;  %v33_v27 = vld [vmem:[%s9202_s0 + $0x90] sm:$0xff] }
 0x115   :  { %6619 = vmatpush3.bf16.msra.mxu1 %v7247_v28  ;;  %6598 = vmatprep.subr.bf16.mxu0 %v7248_v29  ;;  %v34_v28 = vld [vmem:[%s9202_s0 + $0x98] sm:$0xff] }
 0x116   :  { %6620 = vmatprep.subr.bf16.mxu1 %v7249_v30  ;;  %v5696_v30 = vcombine.low %v33_v27, %v33_v27 }
 0x118   :  { %6599 = vmatpush3.bf16.msra.mxu0 %v7250_v31  ;;  %v5697_v31 = vcombine.high %v33_v27, %v33_v27 }
 0x119   :  { %6621 = vmatpush3.bf16.msra.mxu1 %v7251_v32  ;;  %6600 = vmatprep.subr.bf16.mxu0 %v7252_v33  ;;  %v5698_v32 = vcombine.low %v34_v28, %v34_v28  ;;  %v5699_v33 = vcombine.high %v34_v28, %v34_v28  ;;  %v7339_v28 = vld [vmem:[%s9201_s1 + $0xbb8] sm:$0xff]  }
 0x11a   :  { %6622 = vmatprep.subr.bf16.mxu1 %v7253_v34 }
 0x11c   :  { %6601 = vmatpush3.bf16.msra.mxu0 %v7254_v35  ;;  %v7300_v35 = vld [vmem:[%s9201_s1 + $0xa78] sm:$0xff]  }
 0x11d   :  { %6623 = vmatpush3.bf16.msra.mxu1 %v7255_v36  ;;  %6602 = vmatprep.subr.bf16.mxu0 %v7256_v37  ;;  %v7301_v36 = vld [vmem:[%s9201_s1 + $0xaf8] sm:$0xff]  }
 0x11e   :  { %6624 = vmatprep.subr.bf16.mxu1 %v7257_v38  ;;  %v7302_v38 = vld [vmem:[%s9201_s1 + $0xa38] sm:$0xff]  }
 0x120   :  { %6603 = vmatpush3.bf16.msra.mxu0 %v7258_v39 }
 0x121   :  { %6625 = vmatpush3.bf16.msra.mxu1 %v7259_v40  ;;  %6632 = vmatprep.subr.bf16.mxu0 %v7264_v49 }
 0x122   :  { %6654 = vmatprep.subr.bf16.mxu1 %v7265_v51 }
 0x123   :  { %v6340_v42 = vpop.f32.mrf.mxu0  ;;  %5047 = vmatmul.mubr.bf16.vlgmr.msra.gmra.mxu0 %v5692_v43 }
 0x124   :  { %v6362_v46 = vpop.f32.mrf.mxu1  ;;  %5087 = vmatmul.mubr.bf16.vlgmr.msra.gmra.mxu1 %v5694_v47  ;;  %6633 = vmatpush3.bf16.msra.mxu0 %v7266_v54  ;;  %v7305_v47 = vld [vmem:[%s9201_s1 + $0xaf0] sm:$0xff]   ;;  %v7309_v54 = vld [vmem:[%s9201_s1 + $0xae8] sm:$0xff]  }
 0x125   :  { %v6341_v50 = vpop.f32.mrf.mxu0  ;;  %6655 = vmatpush3.bf16.msra.mxu1 %v7267_v57  ;;  %6634 = vmatprep.subr.bf16.mxu0 %v7268_v60  ;;  %v7312_v57 = vld [vmem:[%s9201_s1 + $0xa60] sm:$0xff]  }
 0x126   :  { %v6342_v52 = vadd.f32 %v6341_v50, %v6340_v42  ;;  %v6363_v53 = vpop.f32.mrf.mxu1  ;;  %6656 = vmatprep.subr.bf16.mxu1 %v7269_v63  ;;  %5126 = vmatprep.mubr.bf16.mxu0 %v5697_v31  ;;  %v7306_v50 = vld [vmem:[%s9201_s1 + $0xa30] sm:$0xff]   ;;  %v7315_v60 = vld [vmem:[%s9201_s1 + $0xaa0] sm:$0xff]   ;;  %v7318_v63 = vld [vmem:[%s9201_s1 + $0xa18] sm:$0xff]  }
 0x127   :  { %v6364_v55 = vadd.f32 %v6363_v53, %v6362_v46  ;;  %v6343_v56 = vpop.f32.mrf.mxu0  ;;  %5166 = vmatprep.mubr.bf16.mxu1 %v5699_v33  ;;  %v7304_v46 = vld [vmem:[%s9201_s1 + $0xa70] sm:$0xff]   ;;  %v7308_v53 = vld [vmem:[%s9201_s1 + $0xa68] sm:$0xff]  }
 0x128   :  { %v4569_v58 = vadd.f32 %v6342_v52, %v8376_v14  ;;  %v6365_v59 = vpop.f32.mrf.mxu1  ;;  %6635 = vmatpush3.bf16.msra.mxu0 %v7270_v1  ;;  %v7283_v14 = vld [vmem:[%s9201_s1 + $0x998] sm:$0xff]   ;;  %v7307_v52 = vld [vmem:[%s9201_s1 + $0xab0] sm:$0xff]   ;;  %v7311_v56 = vld [vmem:[%s9201_s1 + $0xaa8] sm:$0xff]  }
 0x129   :  { %v6344_v61 = vpop.f32.mrf.mxu0  ;;  %6657 = vmatpush3.bf16.msra.mxu1 %v7271_v2  ;;  %6636 = vmatprep.subr.bf16.mxu0 %v7272_v3  ;;  %v7314_v59 = vld [vmem:[%s9201_s1 + $0xa20] sm:$0xff]   ;;  %v7320_v1 = vld [vmem:[%s9201_s1 + $0xa50] sm:$0xff]  }
 0x12a   :  { %v8478_v62 = vadd.f32 %v6364_v55, %v4569_v58  ;;  %v6366_v0 = vpop.f32.mrf.mxu1  ;;  %6658 = vmatprep.subr.bf16.mxu1 %v7273_v4  ;;  %v7310_v55 = vld [vmem:[%s9201_s1 + $0xa28] sm:$0xff]   ;;  %v7313_v58 = vld [vmem:[%s9201_s1 + $0xae0] sm:$0xff]   ;;  %v7316_v61 = vld [vmem:[%s9201_s1 + $0xa58] sm:$0xff]  }
 0x12b   :  { %v7319_v0 = vld [vmem:[%s9201_s1 + $0xa98] sm:$0xff]   ;;  %v7321_v2 = vld [vmem:[%s9201_s1 + $0xad0] sm:$0xff]  }
 0x12c   :  { %6637 = vmatpush3.bf16.msra.mxu0 %v7274_v5  ;;  %v7322_v3 = vld [vmem:[%s9201_s1 + $0xa10] sm:$0xff]   ;;  %v7324_v5 = vld [vmem:[%s9201_s1 + $0xa48] sm:$0xff]  }
 0x12d   :  { %6659 = vmatpush3.bf16.msra.mxu1 %v7275_v6  ;;  %6638 = vmatprep.subr.bf16.mxu0 %v7276_v7  ;;  %v7323_v4 = vld [vmem:[%s9201_s1 + $0xa90] sm:$0xff]   ;;  %v7325_v6 = vld [vmem:[%s9201_s1 + $0xac8] sm:$0xff]  }
 0x12e   :  { %6660 = vmatprep.subr.bf16.mxu1 %v7277_v8  ;;  %v7326_v7 = vld [vmem:[%s9201_s1 + $0xa08] sm:$0xff]   ;;  %v7341_v33 = vld [vmem:[%s9201_s1 + $0xbf0] sm:$0xff]  }
 0x12f   :  { %v7327_v8 = vld [vmem:[%s9201_s1 + $0xa88] sm:$0xff]  }
 0x130   :  { %6639 = vmatpush3.bf16.msra.mxu0 %v7278_v9  ;;  %v7328_v9 = vld [vmem:[%s9201_s1 + $0xa40] sm:$0xff]  }
 0x131   :  { %6661 = vmatpush3.bf16.msra.mxu1 %v7279_v10  ;;  %6640 = vmatprep.subr.bf16.mxu0 %v7280_v11  ;;  %v7329_v10 = vld [vmem:[%s9201_s1 + $0xac0] sm:$0xff]  }
 0x132   :  { %6662 = vmatprep.subr.bf16.mxu1 %v7281_v12  ;;  %v7330_v11 = vld [vmem:[%s9201_s1 + $0xa00] sm:$0xff]  }
 0x133   :  { %v7331_v12 = vld [vmem:[%s9201_s1 + $0xa80] sm:$0xff]  }
 0x134   :  { %6641 = vmatpush3.bf16.msra.mxu0 %v7282_v13  ;;  %v35_v13 = vld [vmem:[%s9202_s0 + $0xa0] sm:$0xff] }
 0x135   :  { %6663 = vmatpush3.bf16.msra.mxu1 %v7283_v14  ;;  %6642 = vmatprep.subr.bf16.mxu0 %v7284_v15  ;;  %v36_v14 = vld [vmem:[%s9202_s0 + $0xa8] sm:$0xff] }
 0x136   :  { %6664 = vmatprep.subr.bf16.mxu1 %v7285_v16 }
 0x138   :  { %6643 = vmatpush3.bf16.msra.mxu0 %v7286_v17  ;;  %v5700_v17 = vcombine.low %v35_v13, %v35_v13 }
 0x139   :  { %6665 = vmatpush3.bf16.msra.mxu1 %v7287_v18  ;;  %6644 = vmatprep.subr.bf16.mxu0 %v7288_v19  ;;  %v5701_v18 = vcombine.high %v35_v13, %v35_v13  ;;  %v5702_v19 = vcombine.low %v36_v14, %v36_v14 }
 0x13a   :  { %6666 = vmatprep.subr.bf16.mxu1 %v7289_v20  ;;  %v7336_v20 = vld [vmem:[%s9201_s1 + $0xb78] sm:$0xff]  }
 0x13c   :  { %6645 = vmatpush3.bf16.msra.mxu0 %v7290_v21  ;;  %v5703_v21 = vcombine.high %v36_v14, %v36_v14 }
 0x13d   :  { %6667 = vmatpush3.bf16.msra.mxu1 %v7291_v22  ;;  %6646 = vmatprep.subr.bf16.mxu0 %v7292_v23  ;;  %v7337_v22 = vld [vmem:[%s9201_s1 + $0xbf8] sm:$0xff]  }
 0x13e   :  { %6668 = vmatprep.subr.bf16.mxu1 %v7293_v24 }
 0x140   :  { %6647 = vmatpush3.bf16.msra.mxu0 %v7294_v25  ;;  %v7338_v25 = vld [vmem:[%s9201_s1 + $0xb38] sm:$0xff]  }
 0x141   :  { %6669 = vmatpush3.bf16.msra.mxu1 %v7295_v26  ;;  %6676 = vmatprep.subr.bf16.mxu0 %v7300_v35 }
 0x142   :  { %6698 = vmatprep.subr.bf16.mxu1 %v7301_v36 }
 0x143   :  { %v6384_v29 = vpop.f32.mrf.mxu0  ;;  %5127 = vmatmul.mubr.bf16.vlgmr.msra.gmra.mxu0 %v5696_v30 }
 0x144   :  { %v6406_v34 = vpop.f32.mrf.mxu1  ;;  %5167 = vmatmul.mubr.bf16.vlgmr.msra.gmra.mxu1 %v5698_v32  ;;  %6677 = vmatpush3.bf16.msra.mxu0 %v7302_v38  ;;  %v7340_v32 = vld [vmem:[%s9201_s1 + $0xb70] sm:$0xff]  }
 0x145   :  { %v6385_v37 = vpop.f32.mrf.mxu0  ;;  %6699 = vmatpush3.bf16.msra.mxu1 %v7303_v41  ;;  %6678 = vmatprep.subr.bf16.mxu0 %v7304_v46  ;;  %v7343_v38 = vld [vmem:[%s9201_s1 + $0xbb0] sm:$0xff]   ;;  %v7346_v41 = vld [vmem:[%s9201_s1 + $0xb28] sm:$0xff]   ;;  %v7351_v46 = vld [vmem:[%s9201_s1 + $0xba0] sm:$0xff]  }
 0x146   :  { %v6386_v39 = vadd.f32 %v6385_v37, %v6384_v29  ;;  %v6407_v40 = vpop.f32.mrf.mxu1  ;;  %6700 = vmatprep.subr.bf16.mxu1 %v7305_v47  ;;  %5206 = vmatprep.mubr.bf16.mxu0 %v5701_v18  ;;  %v7342_v37 = vld [vmem:[%s9201_s1 + $0xb30] sm:$0xff]   ;;  %v7352_v47 = vld [vmem:[%s9201_s1 + $0xb58] sm:$0xff]  }
 0x147   :  { %v6408_v42 = vadd.f32 %v6407_v40, %v6406_v34  ;;  %v6387_v43 = vpop.f32.mrf.mxu0  ;;  %5246 = vmatprep.mubr.bf16.mxu1 %v5703_v21  ;;  %v7345_v40 = vld [vmem:[%s9201_s1 + $0xbe8] sm:$0xff]   ;;  %v7376_v18 = vld [vmem:[%s9201_s1 + $0xc70] sm:$0xff]  }
 0x148   :  { %v4649_v44 = vadd.f32 %v6386_v39, %v8478_v62  ;;  %v6409_v45 = vpop.f32.mrf.mxu1  ;;  %6679 = vmatpush3.bf16.msra.mxu0 %v7306_v50  ;;  %v7317_v62 = vld [vmem:[%s9201_s1 + $0xad8] sm:$0xff]   ;;  %v7344_v39 = vld [vmem:[%s9201_s1 + $0xb68] sm:$0xff]   ;;  %v7348_v43 = vld [vmem:[%s9201_s1 + $0xb60] sm:$0xff]  }
 0x149   :  { %v6388_v48 = vpop.f32.mrf.mxu0  ;;  %6701 = vmatpush3.bf16.msra.mxu1 %v7307_v52  ;;  %6680 = vmatprep.subr.bf16.mxu0 %v7308_v53  ;;  %v7350_v45 = vld [vmem:[%s9201_s1 + $0xb20] sm:$0xff]   ;;  %v7355_v50 = vld [vmem:[%s9201_s1 + $0xb98] sm:$0xff]   ;;  %v7357_v52 = vld [vmem:[%s9201_s1 + $0xbd0] sm:$0xff]  }
 0x14a   :  { %v8586_v49 = vadd.f32 %v6408_v42, %v4649_v44  ;;  %v6410_v51 = vpop.f32.mrf.mxu1  ;;  %6702 = vmatprep.subr.bf16.mxu1 %v7309_v54  ;;  %v7347_v42 = vld [vmem:[%s9201_s1 + $0xba8] sm:$0xff]   ;;  %v7349_v44 = vld [vmem:[%s9201_s1 + $0xbe0] sm:$0xff]   ;;  %v7353_v48 = vld [vmem:[%s9201_s1 + $0xbd8] sm:$0xff]  }
 0x14b   :  { %v7356_v51 = vld [vmem:[%s9201_s1 + $0xb50] sm:$0xff]  }
 0x14c   :  { %6681 = vmatpush3.bf16.msra.mxu0 %v7310_v55  ;;  %v7358_v53 = vld [vmem:[%s9201_s1 + $0xb10] sm:$0xff]   ;;  %v7360_v55 = vld [vmem:[%s9201_s1 + $0xb48] sm:$0xff]  }
 0x14d   :  { %6703 = vmatpush3.bf16.msra.mxu1 %v7311_v56  ;;  %6682 = vmatprep.subr.bf16.mxu0 %v7312_v57  ;;  %v7359_v54 = vld [vmem:[%s9201_s1 + $0xb90] sm:$0xff]   ;;  %v7361_v56 = vld [vmem:[%s9201_s1 + $0xbc8] sm:$0xff]  }
 0x14e   :  { %6704 = vmatprep.subr.bf16.mxu1 %v7313_v58  ;;  %v7362_v57 = vld [vmem:[%s9201_s1 + $0xb08] sm:$0xff]   ;;  %v7377_v21 = vld [vmem:[%s9201_s1 + $0xcf0] sm:$0xff]  }
 0x14f   :  { %v7363_v58 = vld [vmem:[%s9201_s1 + $0xb88] sm:$0xff]  }
 0x150   :  { %6683 = vmatpush3.bf16.msra.mxu0 %v7314_v59  ;;  %v7364_v59 = vld [vmem:[%s9201_s1 + $0xb40] sm:$0xff]  }
 0x151   :  { %6705 = vmatpush3.bf16.msra.mxu1 %v7315_v60  ;;  %6684 = vmatprep.subr.bf16.mxu0 %v7316_v61  ;;  %v7365_v60 = vld [vmem:[%s9201_s1 + $0xbc0] sm:$0xff]  }
 0x152   :  { %6706 = vmatprep.subr.bf16.mxu1 %v7317_v62  ;;  %v7366_v61 = vld [vmem:[%s9201_s1 + $0xb00] sm:$0xff]  }
 0x153   :  { %v7367_v62 = vld [vmem:[%s9201_s1 + $0xb80] sm:$0xff]  }
 0x154   :  { %6685 = vmatpush3.bf16.msra.mxu0 %v7318_v63  ;;  %v37_v63 = vld [vmem:[%s9202_s0 + $0xb0] sm:$0xff] }
 0x155   :  { %6707 = vmatpush3.bf16.msra.mxu1 %v7319_v0  ;;  %6686 = vmatprep.subr.bf16.mxu0 %v7320_v1  ;;  %v5704_v1 = vcombine.low %v37_v63, %v37_v63 }
 0x156   :  { %6708 = vmatprep.subr.bf16.mxu1 %v7321_v2  ;;  %v5705_v2 = vcombine.high %v37_v63, %v37_v63  ;;  %v7411_v63 = vld [vmem:[%s9201_s1 + $0xdb8] sm:$0xff]  }
 0x158   :  { %6687 = vmatpush3.bf16.msra.mxu0 %v7322_v3  ;;  %v38_v3 = vld [vmem:[%s9202_s0 + $0xb8] sm:$0xff] }
 0x159   :  { %6709 = vmatpush3.bf16.msra.mxu1 %v7323_v4  ;;  %6688 = vmatprep.subr.bf16.mxu0 %v7324_v5  ;;  %v5706_v5 = vcombine.low %v38_v3, %v38_v3 }
 0x15a   :  { %6710 = vmatprep.subr.bf16.mxu1 %v7325_v6  ;;  %v5707_v6 = vcombine.high %v38_v3, %v38_v3 }
 0x15c   :  { %6689 = vmatpush3.bf16.msra.mxu0 %v7326_v7  ;;  %v7372_v7 = vld [vmem:[%s9201_s1 + $0xc78] sm:$0xff]  }
 0x15d   :  { %6711 = vmatpush3.bf16.msra.mxu1 %v7327_v8  ;;  %6690 = vmatprep.subr.bf16.mxu0 %v7328_v9  ;;  %v7373_v9 = vld [vmem:[%s9201_s1 + $0xcf8] sm:$0xff]  }
 0x15e   :  { %6712 = vmatprep.subr.bf16.mxu1 %v7329_v10 }
 0x160   :  { %6691 = vmatpush3.bf16.msra.mxu0 %v7330_v11 }
 0x161   :  { %6713 = vmatpush3.bf16.msra.mxu1 %v7331_v12  ;;  %6720 = vmatprep.subr.bf16.mxu0 %v7336_v20  ;;  %v7374_v12 = vld [vmem:[%s9201_s1 + $0xc38] sm:$0xff]  }
 0x162   :  { %6742 = vmatprep.subr.bf16.mxu1 %v7337_v22 }
 0x163   :  { %v6428_v15 = vpop.f32.mrf.mxu0  ;;  %5207 = vmatmul.mubr.bf16.vlgmr.msra.gmra.mxu0 %v5700_v17 }
 0x164   :  { %v6450_v16 = vpop.f32.mrf.mxu1  ;;  %5247 = vmatmul.mubr.bf16.vlgmr.msra.gmra.mxu1 %v5702_v19  ;;  %6721 = vmatpush3.bf16.msra.mxu0 %v7338_v25  ;;  %v7380_v25 = vld [vmem:[%s9201_s1 + $0xc68] sm:$0xff]  }
 0x165   :  { %v6429_v23 = vpop.f32.mrf.mxu0  ;;  %6743 = vmatpush3.bf16.msra.mxu1 %v7339_v28  ;;  %6722 = vmatprep.subr.bf16.mxu0 %v7340_v32  ;;  %v7383_v28 = vld [vmem:[%s9201_s1 + $0xca8] sm:$0xff]   ;;  %v7387_v32 = vld [vmem:[%s9201_s1 + $0xca0] sm:$0xff]  }
 0x166   :  { %v6451_v24 = vpop.f32.mrf.mxu1  ;;  %v6430_v26 = vadd.f32 %v6429_v23, %v6428_v15  ;;  %6744 = vmatprep.subr.bf16.mxu1 %v7341_v33  ;;  %5286 = vmatprep.mubr.bf16.mxu0 %v5705_v2  ;;  %v7375_v15 = vld [vmem:[%s9201_s1 + $0xcb8] sm:$0xff]   ;;  %v7378_v23 = vld [vmem:[%s9201_s1 + $0xc30] sm:$0xff]  }
 0x167   :  { %v6452_v27 = vadd.f32 %v6451_v24, %v6450_v16  ;;  %v6431_v29 = vpop.f32.mrf.mxu0  ;;  %5326 = vmatprep.mubr.bf16.mxu1 %v5707_v6  ;;  %v7379_v24 = vld [vmem:[%s9201_s1 + $0xcb0] sm:$0xff]   ;;  %v7388_v33 = vld [vmem:[%s9201_s1 + $0xc58] sm:$0xff]  }
 0x168   :  { %v6453_v30 = vpop.f32.mrf.mxu1  ;;  %v4729_v31 = vadd.f32 %v6430_v26, %v8586_v49  ;;  %6723 = vmatpush3.bf16.msra.mxu0 %v7342_v37  ;;  %v7354_v49 = vld [vmem:[%s9201_s1 + $0xb18] sm:$0xff]   ;;  %v7381_v26 = vld [vmem:[%s9201_s1 + $0xce8] sm:$0xff]   ;;  %v7384_v29 = vld [vmem:[%s9201_s1 + $0xc60] sm:$0xff]  }
 0x169   :  { %v6432_v34 = vpop.f32.mrf.mxu0  ;;  %6745 = vmatpush3.bf16.msra.mxu1 %v7343_v38  ;;  %6724 = vmatprep.subr.bf16.mxu0 %v7344_v39  ;;  %v7385_v30 = vld [vmem:[%s9201_s1 + $0xce0] sm:$0xff]   ;;  %v7392_v37 = vld [vmem:[%s9201_s1 + $0xc50] sm:$0xff]  }
 0x16a   :  { %v6454_v35 = vpop.f32.mrf.mxu1  ;;  %v8691_v36 = vadd.f32 %v6452_v27, %v4729_v31  ;;  %6746 = vmatprep.subr.bf16.mxu1 %v7345_v40  ;;  %v7382_v27 = vld [vmem:[%s9201_s1 + $0xc28] sm:$0xff]   ;;  %v7386_v31 = vld [vmem:[%s9201_s1 + $0xc20] sm:$0xff]   ;;  %v7389_v34 = vld [vmem:[%s9201_s1 + $0xcd8] sm:$0xff]  }
 0x16b   :  { %v7390_v35 = vld [vmem:[%s9201_s1 + $0xc18] sm:$0xff]   ;;  %v7393_v38 = vld [vmem:[%s9201_s1 + $0xcd0] sm:$0xff]  }
 0x16c   :  { %6725 = vmatpush3.bf16.msra.mxu0 %v7346_v41  ;;  %v7394_v39 = vld [vmem:[%s9201_s1 + $0xc10] sm:$0xff]   ;;  %v7396_v41 = vld [vmem:[%s9201_s1 + $0xc48] sm:$0xff]  }
 0x16d   :  { %6747 = vmatpush3.bf16.msra.mxu1 %v7347_v42  ;;  %6726 = vmatprep.subr.bf16.mxu0 %v7348_v43  ;;  %v7395_v40 = vld [vmem:[%s9201_s1 + $0xc90] sm:$0xff]   ;;  %v7397_v42 = vld [vmem:[%s9201_s1 + $0xcc8] sm:$0xff]  }
 0x16e   :  { %6748 = vmatprep.subr.bf16.mxu1 %v7349_v44  ;;  %v7398_v43 = vld [vmem:[%s9201_s1 + $0xc08] sm:$0xff]  }
 0x16f   :  { %v7399_v44 = vld [vmem:[%s9201_s1 + $0xc88] sm:$0xff]  }
 0x170   :  { %6727 = vmatpush3.bf16.msra.mxu0 %v7350_v45  ;;  %v7400_v45 = vld [vmem:[%s9201_s1 + $0xc40] sm:$0xff]  }
 0x171   :  { %6749 = vmatpush3.bf16.msra.mxu1 %v7351_v46  ;;  %6728 = vmatprep.subr.bf16.mxu0 %v7352_v47  ;;  %v7401_v46 = vld [vmem:[%s9201_s1 + $0xcc0] sm:$0xff]  }
 0x172   :  { %6750 = vmatprep.subr.bf16.mxu1 %v7353_v48  ;;  %v7402_v47 = vld [vmem:[%s9201_s1 + $0xc00] sm:$0xff]  }
 0x173   :  { %v7403_v48 = vld [vmem:[%s9201_s1 + $0xc80] sm:$0xff]  }
 0x174   :  { %6729 = vmatpush3.bf16.msra.mxu0 %v7354_v49  ;;  %v39_v49 = vld [vmem:[%s9202_s0 + $0xc0] sm:$0xff] }
 0x175   :  { %6751 = vmatpush3.bf16.msra.mxu1 %v7355_v50  ;;  %6730 = vmatprep.subr.bf16.mxu0 %v7356_v51  ;;  %v40_v50 = vld [vmem:[%s9202_s0 + $0xc8] sm:$0xff] }
 0x176   :  { %6752 = vmatprep.subr.bf16.mxu1 %v7357_v52  ;;  %v5708_v52 = vcombine.low %v39_v49, %v39_v49 }
 0x178   :  { %6731 = vmatpush3.bf16.msra.mxu0 %v7358_v53  ;;  %v5709_v53 = vcombine.high %v39_v49, %v39_v49  ;;  %v7447_v49 = vld [vmem:[%s9201_s1 + $0xeb8] sm:$0xff]  }
 0x179   :  { %6753 = vmatpush3.bf16.msra.mxu1 %v7359_v54  ;;  %6732 = vmatprep.subr.bf16.mxu0 %v7360_v55  ;;  %v5710_v54 = vcombine.low %v40_v50, %v40_v50  ;;  %v5711_v55 = vcombine.high %v40_v50, %v40_v50 }
 0x17a   :  { %6754 = vmatprep.subr.bf16.mxu1 %v7361_v56 }
 0x17c   :  { %6733 = vmatpush3.bf16.msra.mxu0 %v7362_v57  ;;  %v7408_v57 = vld [vmem:[%s9201_s1 + $0xd78] sm:$0xff]  }
 0x17d   :  { %6755 = vmatpush3.bf16.msra.mxu1 %v7363_v58  ;;  %6734 = vmatprep.subr.bf16.mxu0 %v7364_v59  ;;  %v7409_v58 = vld [vmem:[%s9201_s1 + $0xdf8] sm:$0xff]  }
 0x17e   :  { %6756 = vmatprep.subr.bf16.mxu1 %v7365_v60  ;;  %v7410_v60 = vld [vmem:[%s9201_s1 + $0xd38] sm:$0xff]  }
 0x180   :  { %6735 = vmatpush3.bf16.msra.mxu0 %v7366_v61 }
 0x181   :  { %6757 = vmatpush3.bf16.msra.mxu1 %v7367_v62  ;;  %6764 = vmatprep.subr.bf16.mxu0 %v7372_v7 }
 0x182   :  { %6786 = vmatprep.subr.bf16.mxu1 %v7373_v9 }
 0x183   :  { %v6472_v0 = vpop.f32.mrf.mxu0  ;;  %5287 = vmatmul.mubr.bf16.vlgmr.msra.gmra.mxu0 %v5704_v1 }
 0x184   :  { %v6494_v4 = vpop.f32.mrf.mxu1  ;;  %5327 = vmatmul.mubr.bf16.vlgmr.msra.gmra.mxu1 %v5706_v5  ;;  %6765 = vmatpush3.bf16.msra.mxu0 %v7374_v12  ;;  %v7413_v5 = vld [vmem:[%s9201_s1 + $0xdf0] sm:$0xff]   ;;  %v7417_v12 = vld [vmem:[%s9201_s1 + $0xde8] sm:$0xff]  }
 0x185   :  { %v6473_v8 = vpop.f32.mrf.mxu0  ;;  %6787 = vmatpush3.bf16.msra.mxu1 %v7375_v15  ;;  %6766 = vmatprep.subr.bf16.mxu0 %v7376_v18  ;;  %v7420_v15 = vld [vmem:[%s9201_s1 + $0xd60] sm:$0xff]  }
 0x186   :  { %v6474_v10 = vadd.f32 %v6473_v8, %v6472_v0  ;;  %v6495_v11 = vpop.f32.mrf.mxu1  ;;  %6788 = vmatprep.subr.bf16.mxu1 %v7377_v21  ;;  %5366 = vmatprep.mubr.bf16.mxu0 %v5709_v53  ;;  %v7414_v8 = vld [vmem:[%s9201_s1 + $0xd30] sm:$0xff]   ;;  %v7423_v18 = vld [vmem:[%s9201_s1 + $0xda0] sm:$0xff]   ;;  %v7426_v21 = vld [vmem:[%s9201_s1 + $0xd18] sm:$0xff]  }
 0x187   :  { %v6496_v13 = vadd.f32 %v6495_v11, %v6494_v4  ;;  %v6475_v14 = vpop.f32.mrf.mxu0  ;;  %5406 = vmatprep.mubr.bf16.mxu1 %v5711_v55  ;;  %v7412_v4 = vld [vmem:[%s9201_s1 + $0xd70] sm:$0xff]   ;;  %v7416_v11 = vld [vmem:[%s9201_s1 + $0xd68] sm:$0xff]  }
 0x188   :  { %v4809_v16 = vadd.f32 %v6474_v10, %v8691_v36  ;;  %v6497_v17 = vpop.f32.mrf.mxu1  ;;  %6767 = vmatpush3.bf16.msra.mxu0 %v7378_v23  ;;  %v7391_v36 = vld [vmem:[%s9201_s1 + $0xc98] sm:$0xff]   ;;  %v7415_v10 = vld [vmem:[%s9201_s1 + $0xdb0] sm:$0xff]   ;;  %v7419_v14 = vld [vmem:[%s9201_s1 + $0xda8] sm:$0xff]  }
 0x189   :  { %v6476_v19 = vpop.f32.mrf.mxu0  ;;  %6789 = vmatpush3.bf16.msra.mxu1 %v7379_v24  ;;  %6768 = vmatprep.subr.bf16.mxu0 %v7380_v25  ;;  %v7422_v17 = vld [vmem:[%s9201_s1 + $0xd20] sm:$0xff]   ;;  %v7428_v23 = vld [vmem:[%s9201_s1 + $0xd50] sm:$0xff]  }
 0x18a   :  { %v8793_v20 = vadd.f32 %v6496_v13, %v4809_v16  ;;  %v6498_v22 = vpop.f32.mrf.mxu1  ;;  %6790 = vmatprep.subr.bf16.mxu1 %v7381_v26  ;;  %v7418_v13 = vld [vmem:[%s9201_s1 + $0xd28] sm:$0xff]   ;;  %v7421_v16 = vld [vmem:[%s9201_s1 + $0xde0] sm:$0xff]   ;;  %v7424_v19 = vld [vmem:[%s9201_s1 + $0xd58] sm:$0xff]  }
 0x18b   :  { %v7427_v22 = vld [vmem:[%s9201_s1 + $0xd98] sm:$0xff]   ;;  %v7429_v24 = vld [vmem:[%s9201_s1 + $0xdd0] sm:$0xff]  }
 0x18c   :  { %6769 = vmatpush3.bf16.msra.mxu0 %v7382_v27  ;;  %v7430_v25 = vld [vmem:[%s9201_s1 + $0xd10] sm:$0xff]   ;;  %v7432_v27 = vld [vmem:[%s9201_s1 + $0xd48] sm:$0xff]  }
 0x18d   :  { %6791 = vmatpush3.bf16.msra.mxu1 %v7383_v28  ;;  %6770 = vmatprep.subr.bf16.mxu0 %v7384_v29  ;;  %v7431_v26 = vld [vmem:[%s9201_s1 + $0xd90] sm:$0xff]   ;;  %v7433_v28 = vld [vmem:[%s9201_s1 + $0xdc8] sm:$0xff]  }
 0x18e   :  { %6792 = vmatprep.subr.bf16.mxu1 %v7385_v30  ;;  %v7434_v29 = vld [vmem:[%s9201_s1 + $0xd08] sm:$0xff]   ;;  %v7449_v55 = vld [vmem:[%s9201_s1 + $0xef0] sm:$0xff]  }
 0x18f   :  { %v7435_v30 = vld [vmem:[%s9201_s1 + $0xd88] sm:$0xff]  }
 0x190   :  { %6771 = vmatpush3.bf16.msra.mxu0 %v7386_v31  ;;  %v7436_v31 = vld [vmem:[%s9201_s1 + $0xd40] sm:$0xff]  }
 0x191   :  { %6793 = vmatpush3.bf16.msra.mxu1 %v7387_v32  ;;  %6772 = vmatprep.subr.bf16.mxu0 %v7388_v33  ;;  %v7437_v32 = vld [vmem:[%s9201_s1 + $0xdc0] sm:$0xff]  }
 0x192   :  { %6794 = vmatprep.subr.bf16.mxu1 %v7389_v34  ;;  %v7438_v33 = vld [vmem:[%s9201_s1 + $0xd00] sm:$0xff]  }
 0x193   :  { %v7439_v34 = vld [vmem:[%s9201_s1 + $0xd80] sm:$0xff]  }
 0x194   :  { %6773 = vmatpush3.bf16.msra.mxu0 %v7390_v35  ;;  %v41_v35 = vld [vmem:[%s9202_s0 + $0xd0] sm:$0xff] }
 0x195   :  { %6795 = vmatpush3.bf16.msra.mxu1 %v7391_v36  ;;  %6774 = vmatprep.subr.bf16.mxu0 %v7392_v37  ;;  %v42_v36 = vld [vmem:[%s9202_s0 + $0xd8] sm:$0xff] }
 0x196   :  { %6796 = vmatprep.subr.bf16.mxu1 %v7393_v38  ;;  %v5712_v38 = vcombine.low %v41_v35, %v41_v35 }
 0x198   :  { %6775 = vmatpush3.bf16.msra.mxu0 %v7394_v39  ;;  %v5713_v39 = vcombine.high %v41_v35, %v41_v35 }
 0x199   :  { %6797 = vmatpush3.bf16.msra.mxu1 %v7395_v40  ;;  %6776 = vmatprep.subr.bf16.mxu0 %v7396_v41  ;;  %v5714_v40 = vcombine.low %v42_v36, %v42_v36 }
 0x19a   :  { %6798 = vmatprep.subr.bf16.mxu1 %v7397_v42  ;;  %v7444_v42 = vld [vmem:[%s9201_s1 + $0xe78] sm:$0xff]  }
 0x19c   :  { %6777 = vmatpush3.bf16.msra.mxu0 %v7398_v43  ;;  %v5715_v43 = vcombine.high %v42_v36, %v42_v36  ;;  %v7483_v36 = vld [vmem:[%s9201_s1 + $0xfb8] sm:$0xff]  }
 0x19d   :  { %6799 = vmatpush3.bf16.msra.mxu1 %v7399_v44  ;;  %6778 = vmatprep.subr.bf16.mxu0 %v7400_v45  ;;  %v7445_v44 = vld [vmem:[%s9201_s1 + $0xef8] sm:$0xff]  }
 0x19e   :  { %6800 = vmatprep.subr.bf16.mxu1 %v7401_v46  ;;  %v7446_v46 = vld [vmem:[%s9201_s1 + $0xe38] sm:$0xff]  }
 0x1a0   :  { %6779 = vmatpush3.bf16.msra.mxu0 %v7402_v47 }
 0x1a1   :  { %6801 = vmatpush3.bf16.msra.mxu1 %v7403_v48  ;;  %6808 = vmatprep.subr.bf16.mxu0 %v7408_v57 }
 0x1a2   :  { %6830 = vmatprep.subr.bf16.mxu1 %v7409_v58  ;;  %v7450_v58 = vld [vmem:[%s9201_s1 + $0xe30] sm:$0xff]  }
 0x1a3   :  { %v6516_v51 = vpop.f32.mrf.mxu0  ;;  %5367 = vmatmul.mubr.bf16.vlgmr.msra.gmra.mxu0 %v5708_v52 }
 0x1a4   :  { %v6538_v56 = vpop.f32.mrf.mxu1  ;;  %5407 = vmatmul.mubr.bf16.vlgmr.msra.gmra.mxu1 %v5710_v54  ;;  %6809 = vmatpush3.bf16.msra.mxu0 %v7410_v60  ;;  %v7448_v54 = vld [vmem:[%s9201_s1 + $0xe70] sm:$0xff]  }
 0x1a5   :  { %v6517_v59 = vpop.f32.mrf.mxu0  ;;  %6831 = vmatpush3.bf16.msra.mxu1 %v7411_v63  ;;  %6810 = vmatprep.subr.bf16.mxu0 %v7412_v4  ;;  %v7451_v60 = vld [vmem:[%s9201_s1 + $0xeb0] sm:$0xff]   ;;  %v7454_v63 = vld [vmem:[%s9201_s1 + $0xe28] sm:$0xff]   ;;  %v7459_v4 = vld [vmem:[%s9201_s1 + $0xea0] sm:$0xff]  }
 0x1a6   :  { %v6518_v61 = vadd.f32 %v6517_v59, %v6516_v51  ;;  %v6539_v62 = vpop.f32.mrf.mxu1  ;;  %6832 = vmatprep.subr.bf16.mxu1 %v7413_v5  ;;  %5446 = vmatprep.mubr.bf16.mxu0 %v5713_v39  ;;  %v7460_v5 = vld [vmem:[%s9201_s1 + $0xe58] sm:$0xff]  }
 0x1a7   :  { %v6540_v0 = vadd.f32 %v6539_v62, %v6538_v56  ;;  %v6519_v1 = vpop.f32.mrf.mxu0  ;;  %5486 = vmatprep.mubr.bf16.mxu1 %v5715_v43  ;;  %v7453_v62 = vld [vmem:[%s9201_s1 + $0xee8] sm:$0xff]  }
 0x1a8   :  { %v4889_v2 = vadd.f32 %v6518_v61, %v8793_v20  ;;  %v6541_v3 = vpop.f32.mrf.mxu1  ;;  %6811 = vmatpush3.bf16.msra.mxu0 %v7414_v8  ;;  %v7425_v20 = vld [vmem:[%s9201_s1 + $0xdd8] sm:$0xff]   ;;  %v7452_v61 = vld [vmem:[%s9201_s1 + $0xe68] sm:$0xff]   ;;  %v7456_v1 = vld [vmem:[%s9201_s1 + $0xe60] sm:$0xff]  }
 0x1a9   :  { %v6520_v6 = vpop.f32.mrf.mxu0  ;;  %6833 = vmatpush3.bf16.msra.mxu1 %v7415_v10  ;;  %6812 = vmatprep.subr.bf16.mxu0 %v7416_v11  ;;  %v7458_v3 = vld [vmem:[%s9201_s1 + $0xe20] sm:$0xff]   ;;  %v7463_v8 = vld [vmem:[%s9201_s1 + $0xe98] sm:$0xff]   ;;  %v7465_v10 = vld [vmem:[%s9201_s1 + $0xed0] sm:$0xff]  }
 0x1aa   :  { %v8901_v7 = vadd.f32 %v6540_v0, %v4889_v2  ;;  %v6542_v9 = vpop.f32.mrf.mxu1  ;;  %6834 = vmatprep.subr.bf16.mxu1 %v7417_v12  ;;  %v7455_v0 = vld [vmem:[%s9201_s1 + $0xea8] sm:$0xff]   ;;  %v7457_v2 = vld [vmem:[%s9201_s1 + $0xee0] sm:$0xff]   ;;  %v7461_v6 = vld [vmem:[%s9201_s1 + $0xed8] sm:$0xff]  }
 0x1ab   :  { %v7464_v9 = vld [vmem:[%s9201_s1 + $0xe50] sm:$0xff]  }
 0x1ac   :  { %6813 = vmatpush3.bf16.msra.mxu0 %v7418_v13  ;;  %v7466_v11 = vld [vmem:[%s9201_s1 + $0xe10] sm:$0xff]   ;;  %v7468_v13 = vld [vmem:[%s9201_s1 + $0xe48] sm:$0xff]  }
 0x1ad   :  { %6835 = vmatpush3.bf16.msra.mxu1 %v7419_v14  ;;  %6814 = vmatprep.subr.bf16.mxu0 %v7420_v15  ;;  %v7467_v12 = vld [vmem:[%s9201_s1 + $0xe90] sm:$0xff]   ;;  %v7469_v14 = vld [vmem:[%s9201_s1 + $0xec8] sm:$0xff]  }
 0x1ae   :  { %6836 = vmatprep.subr.bf16.mxu1 %v7421_v16  ;;  %v7470_v15 = vld [vmem:[%s9201_s1 + $0xe08] sm:$0xff]  }
 0x1af   :  { %v7471_v16 = vld [vmem:[%s9201_s1 + $0xe88] sm:$0xff]  }
 0x1b0   :  { %6815 = vmatpush3.bf16.msra.mxu0 %v7422_v17  ;;  %v7472_v17 = vld [vmem:[%s9201_s1 + $0xe40] sm:$0xff]  }
 0x1b1   :  { %6837 = vmatpush3.bf16.msra.mxu1 %v7423_v18  ;;  %6816 = vmatprep.subr.bf16.mxu0 %v7424_v19  ;;  %v7473_v18 = vld [vmem:[%s9201_s1 + $0xec0] sm:$0xff]  }
 0x1b2   :  { %6838 = vmatprep.subr.bf16.mxu1 %v7425_v20  ;;  %v7474_v19 = vld [vmem:[%s9201_s1 + $0xe00] sm:$0xff]  }
 0x1b3   :  { %v7475_v20 = vld [vmem:[%s9201_s1 + $0xe80] sm:$0xff]  }
 0x1b4   :  { %6817 = vmatpush3.bf16.msra.mxu0 %v7426_v21  ;;  %v43_v21 = vld [vmem:[%s9202_s0 + $0xe0] sm:$0xff] }
 0x1b5   :  { %6839 = vmatpush3.bf16.msra.mxu1 %v7427_v22  ;;  %6818 = vmatprep.subr.bf16.mxu0 %v7428_v23  ;;  %v5716_v22 = vcombine.low %v43_v21, %v43_v21  ;;  %v5717_v23 = vcombine.high %v43_v21, %v43_v21 }
 0x1b6   :  { %6840 = vmatprep.subr.bf16.mxu1 %v7429_v24  ;;  %v44_v24 = vld [vmem:[%s9202_s0 + $0xe8] sm:$0xff] }
 0x1b8   :  { %6819 = vmatpush3.bf16.msra.mxu0 %v7430_v25 }
 0x1b9   :  { %6841 = vmatpush3.bf16.msra.mxu1 %v7431_v26  ;;  %6820 = vmatprep.subr.bf16.mxu0 %v7432_v27  ;;  %v5718_v27 = vcombine.low %v44_v24, %v44_v24 }
 0x1ba   :  { %6842 = vmatprep.subr.bf16.mxu1 %v7433_v28  ;;  %v5719_v28 = vcombine.high %v44_v24, %v44_v24 }
 0x1bc   :  { %6821 = vmatpush3.bf16.msra.mxu0 %v7434_v29  ;;  %v7480_v29 = vld [vmem:[%s9201_s1 + $0xf78] sm:$0xff]  }
 0x1bd   :  { %6843 = vmatpush3.bf16.msra.mxu1 %v7435_v30  ;;  %6822 = vmatprep.subr.bf16.mxu0 %v7436_v31  ;;  %v7481_v30 = vld [vmem:[%s9201_s1 + $0xff8] sm:$0xff]  }
 0x1be   :  { %6844 = vmatprep.subr.bf16.mxu1 %v7437_v32 }
 0x1c0   :  { %6823 = vmatpush3.bf16.msra.mxu0 %v7438_v33  ;;  %v7482_v33 = vld [vmem:[%s9201_s1 + $0xf38] sm:$0xff]  }
 0x1c1   :  { %6845 = vmatpush3.bf16.msra.mxu1 %v7439_v34  ;;  %6852 = vmatprep.subr.bf16.mxu0 %v7444_v42 }
 0x1c2   :  { %6874 = vmatprep.subr.bf16.mxu1 %v7445_v44 }
 0x1c3   :  { %v6560_v37 = vpop.f32.mrf.mxu0  ;;  %5447 = vmatmul.mubr.bf16.vlgmr.msra.gmra.mxu0 %v5712_v38 }
 0x1c4   :  { %v6582_v41 = vpop.f32.mrf.mxu1  ;;  %5487 = vmatmul.mubr.bf16.vlgmr.msra.gmra.mxu1 %v5714_v40  ;;  %6853 = vmatpush3.bf16.msra.mxu0 %v7446_v46  ;;  %v7484_v40 = vld [vmem:[%s9201_s1 + $0xf70] sm:$0xff]  }
 0x1c5   :  { %v6561_v45 = vpop.f32.mrf.mxu0  ;;  %6875 = vmatpush3.bf16.msra.mxu1 %v7447_v49  ;;  %6854 = vmatprep.subr.bf16.mxu0 %v7448_v54  ;;  %v7487_v46 = vld [vmem:[%s9201_s1 + $0xfb0] sm:$0xff]   ;;  %v7490_v49 = vld [vmem:[%s9201_s1 + $0xf28] sm:$0xff]   ;;  %v7495_v54 = vld [vmem:[%s9201_s1 + $0xfa0] sm:$0xff]  }
 0x1c6   :  { %v6562_v47 = vadd.f32 %v6561_v45, %v6560_v37  ;;  %v6583_v48 = vpop.f32.mrf.mxu1  ;;  %6876 = vmatprep.subr.bf16.mxu1 %v7449_v55  ;;  %5526 = vmatprep.mubr.bf16.mxu0 %v5717_v23  ;;  %v7486_v45 = vld [vmem:[%s9201_s1 + $0xf30] sm:$0xff]   ;;  %v7496_v55 = vld [vmem:[%s9201_s1 + $0xf58] sm:$0xff]  }
 0x1c7   :  { %v6584_v50 = vadd.f32 %v6583_v48, %v6582_v41  ;;  %v6563_v51 = vpop.f32.mrf.mxu0  ;;  %5566 = vmatprep.mubr.bf16.mxu1 %v5719_v28  ;;  %v7485_v41 = vld [vmem:[%s9201_s1 + $0xff0] sm:$0xff]   ;;  %v7489_v48 = vld [vmem:[%s9201_s1 + $0xfe8] sm:$0xff]  }
 0x1c8   :  { %v4969_v52 = vadd.f32 %v6562_v47, %v8901_v7  ;;  %v6585_v53 = vpop.f32.mrf.mxu1  ;;  %6855 = vmatpush3.bf16.msra.mxu0 %v7450_v58  ;;  %v7462_v7 = vld [vmem:[%s9201_s1 + $0xe18] sm:$0xff]   ;;  %v7488_v47 = vld [vmem:[%s9201_s1 + $0xf68] sm:$0xff]   ;;  %v7492_v51 = vld [vmem:[%s9201_s1 + $0xf60] sm:$0xff]  }
 0x1c9   :  { %v6564_v56 = vpop.f32.mrf.mxu0  ;;  %6877 = vmatpush3.bf16.msra.mxu1 %v7451_v60  ;;  %6856 = vmatprep.subr.bf16.mxu0 %v7452_v61  ;;  %v7494_v53 = vld [vmem:[%s9201_s1 + $0xf20] sm:$0xff]   ;;  %v7499_v58 = vld [vmem:[%s9201_s1 + $0xf98] sm:$0xff]   ;;  %v7501_v60 = vld [vmem:[%s9201_s1 + $0xfd0] sm:$0xff]  }
 0x1ca   :  { %v9006_v57 = vadd.f32 %v6584_v50, %v4969_v52  ;;  %v6586_v59 = vpop.f32.mrf.mxu1  ;;  %6878 = vmatprep.subr.bf16.mxu1 %v7453_v62  ;;  %v7491_v50 = vld [vmem:[%s9201_s1 + $0xfa8] sm:$0xff]   ;;  %v7493_v52 = vld [vmem:[%s9201_s1 + $0xfe0] sm:$0xff]   ;;  %v7497_v56 = vld [vmem:[%s9201_s1 + $0xfd8] sm:$0xff]  }
 0x1cb   :  { %v7500_v59 = vld [vmem:[%s9201_s1 + $0xf50] sm:$0xff]  }
 0x1cc   :  { %6857 = vmatpush3.bf16.msra.mxu0 %v7454_v63  ;;  %v7502_v61 = vld [vmem:[%s9201_s1 + $0xf10] sm:$0xff]   ;;  %v7504_v63 = vld [vmem:[%s9201_s1 + $0xf48] sm:$0xff]  }
 0x1cd   :  { %6879 = vmatpush3.bf16.msra.mxu1 %v7455_v0  ;;  %6858 = vmatprep.subr.bf16.mxu0 %v7456_v1  ;;  %v7503_v62 = vld [vmem:[%s9201_s1 + $0xf90] sm:$0xff]   ;;  %v7505_v0 = vld [vmem:[%s9201_s1 + $0xfc8] sm:$0xff]  }
 0x1ce   :  { %6880 = vmatprep.subr.bf16.mxu1 %v7457_v2  ;;  %v7506_v1 = vld [vmem:[%s9201_s1 + $0xf08] sm:$0xff]  }
 0x1cf   :  { %v7507_v2 = vld [vmem:[%s9201_s1 + $0xf88] sm:$0xff]  }
 0x1d0   :  { %6859 = vmatpush3.bf16.msra.mxu0 %v7458_v3  ;;  %v7508_v3 = vld [vmem:[%s9201_s1 + $0xf40] sm:$0xff]  }
 0x1d1   :  { %6881 = vmatpush3.bf16.msra.mxu1 %v7459_v4  ;;  %6860 = vmatprep.subr.bf16.mxu0 %v7460_v5  ;;  %v7509_v4 = vld [vmem:[%s9201_s1 + $0xfc0] sm:$0xff]  }
 0x1d2   :  { %6882 = vmatprep.subr.bf16.mxu1 %v7461_v6  ;;  %v7510_v5 = vld [vmem:[%s9201_s1 + $0xf00] sm:$0xff]  }
 0x1d3   :  { %v7511_v6 = vld [vmem:[%s9201_s1 + $0xf80] sm:$0xff]  }
 0x1d4   :  { %6861 = vmatpush3.bf16.msra.mxu0 %v7462_v7  ;;  %v45_v7 = vld [vmem:[%s9202_s0 + $0xf0] sm:$0xff] }
 0x1d5   :  { %6883 = vmatpush3.bf16.msra.mxu1 %v7463_v8  ;;  %6862 = vmatprep.subr.bf16.mxu0 %v7464_v9  ;;  %v46_v8 = vld [vmem:[%s9202_s0 + $0xf8] sm:$0xff] }
 0x1d6   :  { %6884 = vmatprep.subr.bf16.mxu1 %v7465_v10  ;;  %v5720_v10 = vcombine.low %v45_v7, %v45_v7 }
 0x1d8   :  { %6863 = vmatpush3.bf16.msra.mxu0 %v7466_v11  ;;  %v5721_v11 = vcombine.high %v45_v7, %v45_v7 }
 0x1d9   :  { %6885 = vmatpush3.bf16.msra.mxu1 %v7467_v12  ;;  %6864 = vmatprep.subr.bf16.mxu0 %v7468_v13  ;;  %v5722_v12 = vcombine.low %v46_v8, %v46_v8  ;;  %v5723_v13 = vcombine.high %v46_v8, %v46_v8 }
 0x1da   :  { %6886 = vmatprep.subr.bf16.mxu1 %v7469_v14 }
 0x1dc   :  { %6865 = vmatpush3.bf16.msra.mxu0 %v7470_v15 }
 0x1dd   :  { %6887 = vmatpush3.bf16.msra.mxu1 %v7471_v16  ;;  %6866 = vmatprep.subr.bf16.mxu0 %v7472_v17 }
 0x1de   :  { %6888 = vmatprep.subr.bf16.mxu1 %v7473_v18 }
 0x1e0   :  { %6867 = vmatpush3.bf16.msra.mxu0 %v7474_v19 }
 0x1e1   :  { %6889 = vmatpush3.bf16.msra.mxu1 %v7475_v20  ;;  %6896 = vmatprep.subr.bf16.mxu0 %v7480_v29 }
 0x1e2   :  { %6918 = vmatprep.subr.bf16.mxu1 %v7481_v30 }
 0x1e3   :  { %v6604_v25 = vpop.f32.mrf.mxu0  ;;  %5527 = vmatmul.mubr.bf16.vlgmr.msra.gmra.mxu0 %v5716_v22 }
 0x1e4   :  { %v6626_v26 = vpop.f32.mrf.mxu1  ;;  %5567 = vmatmul.mubr.bf16.vlgmr.msra.gmra.mxu1 %v5718_v27  ;;  %6897 = vmatpush3.bf16.msra.mxu0 %v7482_v33 }
 0x1e5   :  { %v6605_v31 = vpop.f32.mrf.mxu0  ;;  %6919 = vmatpush3.bf16.msra.mxu1 %v7483_v36  ;;  %6898 = vmatprep.subr.bf16.mxu0 %v7484_v40 }
 0x1e6   :  { %v6627_v32 = vpop.f32.mrf.mxu1  ;;  %v6606_v34 = vadd.f32 %v6605_v31, %v6604_v25  ;;  %6920 = vmatprep.subr.bf16.mxu1 %v7485_v41  ;;  %5606 = vmatprep.mubr.bf16.mxu0 %v5721_v11 }
 0x1e7   :  { %v6628_v35 = vadd.f32 %v6627_v32, %v6626_v26  ;;  %v6607_v37 = vpop.f32.mrf.mxu0  ;;  %5646 = vmatprep.mubr.bf16.mxu1 %v5723_v13 }
 0x1e8   :  { %v6629_v38 = vpop.f32.mrf.mxu1  ;;  %v5049_v39 = vadd.f32 %v6606_v34, %v9006_v57  ;;  %6899 = vmatpush3.bf16.msra.mxu0 %v7486_v45  ;;  %v7498_v57 = vld [vmem:[%s9201_s1 + $0xf18] sm:$0xff]  }
 0x1e9   :  { %v6608_v42 = vpop.f32.mrf.mxu0  ;;  %6921 = vmatpush3.bf16.msra.mxu1 %v7487_v46  ;;  %6900 = vmatprep.subr.bf16.mxu0 %v7488_v47 }
 0x1ea   :  { %v6630_v43 = vpop.f32.mrf.mxu1  ;;  %v9111_v44 = vadd.f32 %v6628_v35, %v5049_v39  ;;  %6922 = vmatprep.subr.bf16.mxu1 %v7489_v48 }
 0x1ec   :  { %6901 = vmatpush3.bf16.msra.mxu0 %v7490_v49 }
 0x1ed   :  { %6923 = vmatpush3.bf16.msra.mxu1 %v7491_v50  ;;  %6902 = vmatprep.subr.bf16.mxu0 %v7492_v51 }
 0x1ee   :  { %6924 = vmatprep.subr.bf16.mxu1 %v7493_v52 }
 0x1f0   :  { %6903 = vmatpush3.bf16.msra.mxu0 %v7494_v53 }
 0x1f1   :  { %6925 = vmatpush3.bf16.msra.mxu1 %v7495_v54  ;;  %6904 = vmatprep.subr.bf16.mxu0 %v7496_v55 }
 0x1f2   :  { %6926 = vmatprep.subr.bf16.mxu1 %v7497_v56 }
 0x1f4   :  { %6905 = vmatpush3.bf16.msra.mxu0 %v7498_v57 }
 0x1f5   :  { %6927 = vmatpush3.bf16.msra.mxu1 %v7499_v58  ;;  %6906 = vmatprep.subr.bf16.mxu0 %v7500_v59 }
 0x1f6   :  { %6928 = vmatprep.subr.bf16.mxu1 %v7501_v60 }
 0x1f8   :  { %6907 = vmatpush3.bf16.msra.mxu0 %v7502_v61 }
 0x1f9   :  { %6929 = vmatpush3.bf16.msra.mxu1 %v7503_v62  ;;  %6908 = vmatprep.subr.bf16.mxu0 %v7504_v63 }
 0x1fa   :  { %6930 = vmatprep.subr.bf16.mxu1 %v7505_v0 }
 0x1fc   :  { %6909 = vmatpush3.bf16.msra.mxu0 %v7506_v1 }
 0x1fd   :  { %6931 = vmatpush3.bf16.msra.mxu1 %v7507_v2  ;;  %6910 = vmatprep.subr.bf16.mxu0 %v7508_v3 }
 0x1fe   :  { %6932 = vmatprep.subr.bf16.mxu1 %v7509_v4 }
 0x200   :  { %6911 = vmatpush3.bf16.msra.mxu0 %v7510_v5 }
 0x201   :  { %6933 = vmatpush3.bf16.msra.mxu1 %v7511_v6 }
 0x203   :  { %v6648_v9 = vpop.f32.mrf.mxu0  ;;  %5607 = vmatmul.mubr.bf16.vlgmr.msra.gmra.mxu0 %v5720_v10 }
 0x204   :  { %v6670_v14 = vpop.f32.mrf.mxu1  ;;  %5647 = vmatmul.mubr.bf16.vlgmr.msra.gmra.mxu1 %v5722_v12 }
 0x205   :  { %v6649_v15 = vpop.f32.mrf.mxu0 }
 0x206   :  { %v6650_v16 = vadd.f32 %v6649_v15, %v6648_v9  ;;  %v6671_v17 = vpop.f32.mrf.mxu1 }
 0x207   :  { %v6672_v18 = vadd.f32 %v6671_v17, %v6670_v14  ;;  %v6651_v19 = vpop.f32.mrf.mxu0 }
 0x208   :  { %v5129_v20 = vadd.f32 %v6650_v16, %v9111_v44  ;;  %v6673_v21 = vpop.f32.mrf.mxu1 }
 0x209   :  { %v6652_v22 = vpop.f32.mrf.mxu0 }
 0x20a   :  { %v5169_v23 = vadd.f32 %v6672_v18, %v5129_v20  ;;  %v6674_v24 = vpop.f32.mrf.mxu1 }
 0x223   :  { %v6692_v25 = vpop.f32.mrf.mxu0 }
 0x224   :  { %v6714_v26 = vpop.f32.mrf.mxu1 }
 0x225   :  { %v6693_v27 = vpop.f32.mrf.mxu0 }
 0x226   :  { %v6694_v28 = vadd.f32 %v6693_v27, %v6692_v25  ;;  %v6715_v29 = vpop.f32.mrf.mxu1 }
 0x227   :  { %v6716_v30 = vadd.f32 %v6715_v29, %v6714_v26  ;;  %v6695_v31 = vpop.f32.mrf.mxu0 }
 0x228   :  { %v5209_v32 = vadd.f32 %v6694_v28, %v5169_v23  ;;  %v6717_v33 = vpop.f32.mrf.mxu1 }
 0x229   :  { %v6696_v34 = vpop.f32.mrf.mxu0 }
 0x22a   :  { %v5249_v35 = vadd.f32 %v6716_v30, %v5209_v32  ;;  %v6718_v36 = vpop.f32.mrf.mxu1 }
 0x243   :  { %v6736_v37 = vpop.f32.mrf.mxu0 }
 0x244   :  { %v6758_v38 = vpop.f32.mrf.mxu1 }
 0x245   :  { %v6737_v39 = vpop.f32.mrf.mxu0 }
 0x246   :  { %v6759_v40 = vpop.f32.mrf.mxu1  ;;  %v6738_v41 = vadd.f32 %v6737_v39, %v6736_v37 }
 0x247   :  { %v6760_v42 = vadd.f32 %v6759_v40, %v6758_v38  ;;  %v6739_v43 = vpop.f32.mrf.mxu0 }
 0x248   :  { %v6761_v44 = vpop.f32.mrf.mxu1  ;;  %v5289_v45 = vadd.f32 %v6738_v41, %v5249_v35 }
 0x249   :  { %v6740_v46 = vpop.f32.mrf.mxu0 }
 0x24a   :  { %v6762_v47 = vpop.f32.mrf.mxu1  ;;  %v5329_v48 = vadd.f32 %v6760_v42, %v5289_v45 }
 0x263   :  { %v6780_v49 = vpop.f32.mrf.mxu0 }
 0x264   :  { %v6802_v50 = vpop.f32.mrf.mxu1 }
 0x265   :  { %v6781_v51 = vpop.f32.mrf.mxu0 }
 0x266   :  { %v6782_v52 = vadd.f32 %v6781_v51, %v6780_v49  ;;  %v6803_v53 = vpop.f32.mrf.mxu1 }
 0x267   :  { %v6804_v54 = vadd.f32 %v6803_v53, %v6802_v50  ;;  %v6783_v55 = vpop.f32.mrf.mxu0 }
 0x268   :  { %v5369_v56 = vadd.f32 %v6782_v52, %v5329_v48  ;;  %v6805_v57 = vpop.f32.mrf.mxu1 }
 0x269   :  { %v6784_v58 = vpop.f32.mrf.mxu0 }
 0x26a   :  { %v5409_v59 = vadd.f32 %v6804_v54, %v5369_v56  ;;  %v6806_v60 = vpop.f32.mrf.mxu1 }
 0x283   :  { %v6824_v61 = vpop.f32.mrf.mxu0 }
 0x284   :  { %v6846_v62 = vpop.f32.mrf.mxu1 }
 0x285   :  { %v6825_v63 = vpop.f32.mrf.mxu0 }
 0x286   :  { %v6847_v0 = vpop.f32.mrf.mxu1  ;;  %v6826_v13 = vadd.f32 %v6825_v63, %v6824_v61 }
 0x287   :  { %v6827_v1 = vpop.f32.mrf.mxu0  ;;  %v6848_v15 = vadd.f32 %v6847_v0, %v6846_v62 }
 0x288   :  { %v6849_v2 = vpop.f32.mrf.mxu1  ;;  %v5449_v14 = vadd.f32 %v6826_v13, %v5409_v59 }
 0x289   :  { %v6828_v3 = vpop.f32.mrf.mxu0 }
 0x28a   :  { %v6850_v4 = vpop.f32.mrf.mxu1  ;;  %v5489_v17 = vadd.f32 %v6848_v15, %v5449_v14 }
 0x2a3   :  { %v6868_v5 = vpop.f32.mrf.mxu0 }
 0x2a4   :  { %v6890_v6 = vpop.f32.mrf.mxu1 }
 0x2a5   :  { %v6869_v7 = vpop.f32.mrf.mxu0 }
 0x2a6   :  { %v6891_v8 = vpop.f32.mrf.mxu1  ;;  %v6870_v16 = vadd.f32 %v6869_v7, %v6868_v5 }
 0x2a7   :  { %v6871_v9 = vpop.f32.mrf.mxu0  ;;  %v6892_v19 = vadd.f32 %v6891_v8, %v6890_v6 }
 0x2a8   :  { %v6893_v10 = vpop.f32.mrf.mxu1  ;;  %v5529_v18 = vadd.f32 %v6870_v16, %v5489_v17 }
 0x2a9   :  { %v6872_v11 = vpop.f32.mrf.mxu0 }
 0x2aa   :  { %v6894_v12 = vpop.f32.mrf.mxu1  ;;  %v5569_v23 = vadd.f32 %v6892_v19, %v5529_v18 }
 0x2c3   :  { %v6912_v20 = vpop.f32.mrf.mxu0 }
 0x2c4   :  { %v6934_v21 = vpop.f32.mrf.mxu1 }
 0x2c5   :  { %v6913_v22 = vpop.f32.mrf.mxu0 }
 0x2c6   :  { %v6914_v24 = vadd.f32 %v6913_v22, %v6912_v20  ;;  %v6935_v25 = vpop.f32.mrf.mxu1 }
 0x2c7   :  { %v6915_v26 = vpop.f32.mrf.mxu0  ;;  %v6936_v28 = vadd.f32 %v6935_v25, %v6934_v21 }
 0x2c8   :  { %v5609_v27 = vadd.f32 %v6914_v24, %v5569_v23  ;;  %v6937_v29 = vpop.f32.mrf.mxu1 }
 0x2c9   :  { %v6916_v30 = vpop.f32.mrf.mxu0 }
 0x2ca   :  { %v5649_v31 = vadd.f32 %v6936_v28, %v5609_v27  ;;  %v6938_v32 = vpop.f32.mrf.mxu1 }
 0x2cc   :  { %5654 = vst [vmem:[%s9204_s3] sm:$0xff] %v5649_v31 }

</bundles_post_ra>
